<compile_context>
chip_gen: v7x
topology: tpu7x:2x2x1
jax: 0.10.0
libtpu: 0.0.40
codegen_flags: <defaults>
</compile_context>

<pallas_src>
import math
import numpy as np
import jax
import jax.numpy as jnp
from jax import lax
from jax.experimental import pallas as pl
from jax.experimental.pallas import tpu as pltpu

# ---- module configuration: GaussianBlurLayer(kernel_size=3, unflatten=True) ----
KERNEL_SIZE = 3                       # module "kernel_size" (== `size` in _gaussian_kernel)
SIGMA = 2.0
K = 2 * KERNEL_SIZE + 1               # actual window width (7)
PAD = int((KERNEL_SIZE - 1) / 2)      # NOTE: module pads with (kernel_size-1)//2 = 1, not (K-1)//2
H = W = 28                            # nn.Unflatten(1, (1, 28, 28)); C == 1 so get_gray branch never taken
HP, WP = H + 2 * PAD, W + 2 * PAD     # 30, 30
HO, WO = HP - K + 1, WP - K + 1       # 24, 24 (valid conv)

LANE = 128                            # TPU lane width
CH = 128                              # lane-chunk per inner iteration (keeps the 7-row window in vregs)
DEFAULT_BLOCK_N = 2048                # images per grid step (batch lives on the lane axis)


def _gaussian_1d(size: int = KERNEL_SIZE, sigma: float = SIGMA) -> np.ndarray:
    """Per-dimension factor used by _gaussian_kernel (verbatim (x-mean)/(2*sigma) form)."""
    k = 2 * size + 1
    coords = np.arange(k, dtype=np.float64)
    mean = (k - 1) / 2.0
    return (1.0 / (sigma * math.sqrt(2.0 * math.pi))) * np.exp(-((coords - mean) / (2.0 * sigma)) ** 2)


# Normalized 1-D taps; outer(_GN, _GN) == the module's 2-D kernel (kern = outer(g,g)/sum).
_G1 = _gaussian_1d()
_GN = tuple(float(v) for v in (_G1 / _G1.sum()))


def _reflect_idx(p: int, n: int) -> int:
    """Reflect-pad (PAD=1) map: padded index p in [0, n+2) -> original index in [0, n)."""
    if p == 0:
        return 1
    if p == n + 2 * PAD - 1:
        return n - 2
    return p - PAD


def _build_w_pass_matrix() -> np.ndarray:
    """(WO, W) banded matrix: 7 Gaussian taps along W with the W reflection folded in.

    out[:, j] = sum_kj g[kj] * x[:, reflect(j + kj)]  ==  (A @ x)[j]  for x of shape (W, lanes).
    """
    a = np.zeros((WO, W), dtype=np.float64)
    for j in range(WO):
        for kj in range(K):
            a[j, _reflect_idx(j + kj, W)] += _GN[kj]
    return a.astype(np.float32)


_A_MAT = _build_w_pass_matrix()


def blur_kernel(a_ref, x_ref, o_ref):
    """Separable 7x7 Gaussian blur for a block of TB images (batch on lanes).

    a_ref: (WO, W)      W-pass tap matrix (reflection folded into boundary columns)
    x_ref: (H,  W,  TB) unpadded images in VMEM
    o_ref: (HO, WO, TB) blurred output in VMEM
    """
    a = a_ref[...]                                   # (WO, W) = (24, 28), ~3 vregs
    tb = x_ref.shape[-1]
    g0, g1, g2, g3 = _GN[0], _GN[1], _GN[2], _GN[3]  # symmetric: g[k] == g[6-k]

    # Process 128 lanes (images) at a time so a rolling 7-row window of W-blurred rows
    # (7 x (24,128) = ~21 vregs) stays register-resident -> each input row is loaded ~once.
    for c in range(tb // CH):
        lo = c * CH

        def wblur(orig_row, lo=lo):
            # Load one input row chunk and blur it along W on the MXU (7 taps + reflection
            # are all inside the (24, 28) tap matrix).  f32 matmul at HIGHEST precision.
            row = x_ref[orig_row, :, lo:lo + CH]                       # (W, CH)
            return jnp.dot(a, row,
                           preferred_element_type=jnp.float32,
                           precision=lax.Precision.HIGHEST)            # (WO, CH)

        # Prime the window with padded rows 0..6 (H reflection via static index map).
        win = [wblur(_reflect_idx(p, H)) for p in range(K)]
        for i in range(HO):
            # Symmetric 7-tap Gaussian along H: 4 muls + 6 adds on (WO, CH) slabs.
            acc = (g0 * (win[0] + win[6])
                   + g1 * (win[1] + win[5])
                   + g2 * (win[2] + win[4])
                   + g3 * win[3])
            o_ref[i, :, lo:lo + CH] = acc.astype(o_ref.dtype)
            if i + 1 < HO:
                # Roll the window: drop padded row i, append padded row i+7.
                win = win[1:] + [wblur(_reflect_idx(i + K, H))]


def _cdiv(a: int, b: int) -> int:
    return -(-a // b)


def _pick_block(n: int, block_n: int) -> tuple[int, int]:
    """Pick (tb, n_pad): tb = images per grid step (multiple of 128), n_pad = grid * tb >= n."""
    n_groups = _cdiv(max(n, 1), LANE)          # batch size in 128-lane groups
    max_groups = max(1, _cdiv(block_n, LANE))
    grid = _cdiv(n_groups, max_groups)
    # Prefer >= 2 grid steps when the batch allows it: lets the "parallel" axis shard across
    # TensorCores (v7x megacore) and keeps the DMA pipeline busy.
    if grid == 1 and n_groups >= 2:
        grid = 2
    tb = _cdiv(n_groups, grid) * LANE
    return tb, grid * tb


def gaussian_blur_forward(x_flat: jax.Array, block_n: int = DEFAULT_BLOCK_N) -> jax.Array:
    """Equivalent of GaussianBlurLayer(kernel_size=3, unflatten=True).forward.

    x_flat:  (N, 784) float32
    returns: (N, HO*WO) = (N, 576) float32
    """
    n = x_flat.shape[0]
    x = x_flat.reshape(n, H, W)            # nn.Unflatten(1, (1, 28, 28)); C == 1 squeezed away
    # Lane-dense layout: batch on the last (lane) axis.  This transpose (and the inverse one
    # below) is pure layout plumbing; if the surrounding pipeline can keep activations in
    # (H, W, N) layout, drop both for an extra HBM-traffic win (largest on v5e).
    x = jnp.transpose(x, (1, 2, 0))        # (H, W, N)

    tb, n_pad = _pick_block(n, block_n)
    if n_pad != n:                         # ragged tail: pad batch, slice off afterwards
        x = jnp.pad(x, ((0, 0), (0, 0), (0, n_pad - n)))

    # Raise the scoped VMEM limit to match the block size (v5e default is only 16 MiB),
    # but cap at 48 MiB so the kernel also fits v7x's 64 MiB physical VMEM per TensorCore.
    in_block_bytes = H * W * tb * 4
    out_block_bytes = HO * WO * tb * 4
    vmem_limit = min(max(2 * (in_block_bytes + out_block_bytes) + (4 << 20), 32 << 20), 48 << 20)

    out = pl.pallas_call(
        blur_kernel,
        out_shape=jax.ShapeDtypeStruct((HO, WO, n_pad), x_flat.dtype),
        grid=(n_pad // tb,),
        in_specs=[pl.BlockSpec((WO, W), lambda b: (0, 0)),          # W-pass tap matrix (tiny)
                  pl.BlockSpec((H, W, tb), lambda b: (0, 0, b))],   # image block, batch on lanes
        out_specs=pl.BlockSpec((HO, WO, tb), lambda b: (0, 0, b)),
        compiler_params=pltpu.CompilerParams(
            dimension_semantics=("parallel",),
            vmem_limit_bytes=vmem_limit),
    )(jnp.asarray(_A_MAT), x)

    out = jnp.transpose(out[:, :, :n], (2, 0, 1))   # (N, HO, WO); torch.squeeze drops C==1
    return out.reshape(n, HO * WO)                  # nn.Flatten()


def _reference_numpy(x_flat: np.ndarray) -> np.ndarray:
    """float64 reference of the same forward pass (49-tap 2-D correlation, as in F.conv2d)."""
    x = np.asarray(x_flat, np.float64).reshape(-1, H, W)
    g = _gaussian_1d()
    kern = np.outer(g, g)
    kern = kern / kern.sum()
    xp = np.pad(x, ((0, 0), (PAD, PAD), (PAD, PAD)), mode="reflect")
    out = np.zeros((x.shape[0], HO, WO), np.float64)
    for ki in range(K):
        for kj in range(K):
            out += kern[ki, kj] * xp[:, ki:ki + HO, kj:kj + WO]
    return out.reshape(x.shape[0], HO * WO)


if __name__ == "__main__":
    key = jax.random.PRNGKey(0)
    N = 2
    x = jax.random.uniform(key, (N, H * W), dtype=jnp.float32)   # flattened 28x28 images

    y = jax.block_until_ready(gaussian_blur_forward(x))

    assert y.shape == (N, HO * WO), y.shape
    y_ref = _reference_numpy(np.asarray(x))
    assert np.allclose(np.asarray(y), y_ref, rtol=1e-4, atol=1e-5)

    print("KERNEL_OK")
</pallas_src>

<mosaic_0001>
module attributes {stable_mosaic.version = 11 : i64} {
  func.func @blur_kernel(%arg0: i32, %arg1: memref<24x28xf32, #tpu.memory_space<vmem>>, %arg2: memref<28x28x128xf32, #tpu.memory_space<vmem>>, %arg3: memref<24x24x128xf32, #tpu.memory_space<vmem>>) attributes {dimension_semantics = [#tpu.dimension_semantics<parallel>], iteration_bounds = array<i64: 1>, scalar_prefetch = 0 : i64, scratch_operands = 0 : i64, tpu.core_type = #tpu.core_type<tc>, window_params = [{pipeline_mode = #tpu.pipeline_mode<synchronous>, transform_indices = @transform_0, window_bounds = array<i64: 24, 28>}, {transform_indices = @transform_1, window_bounds = array<i64: 28, 28, 128>}, {transform_indices = @transform_2, window_bounds = array<i64: 24, 24, 128>}]} {
    %c0 = arith.constant 0 : index
    %c0_0 = arith.constant 0 : index
    %0 = vector.load %arg1[%c0, %c0_0] : memref<24x28xf32, #tpu.memory_space<vmem>>, vector<24x28xf32>
    %c1 = arith.constant 1 : index
    %c0_1 = arith.constant 0 : index
    %c0_2 = arith.constant 0 : index
    %1 = vector.load %arg2[%c1, %c0_1, %c0_2] : memref<28x28x128xf32, #tpu.memory_space<vmem>>, vector<1x28x128xf32>
    %2 = vector.shape_cast %1 : vector<1x28x128xf32> to vector<28x128xf32>
    %cst = arith.constant dense<0.000000e+00> : vector<24x128xf32>
    %3 = tpu.matmul %0, %2, %cst {dimension_numbers = #tpu.dot_dimension_numbers<[1], [0], [0], [1], [0, 0, 1, 1], [], []>, precision = #tpu.contract_precision<fp32>} : vector<24x28xf32>, vector<28x128xf32>, vector<24x128xf32> -> vector<24x128xf32>
    %c0_3 = arith.constant 0 : index
    %c0_4 = arith.constant 0 : index
    %c0_5 = arith.constant 0 : index
    %4 = vector.load %arg2[%c0_3, %c0_4, %c0_5] : memref<28x28x128xf32, #tpu.memory_space<vmem>>, vector<1x28x128xf32>
    %5 = vector.shape_cast %4 : vector<1x28x128xf32> to vector<28x128xf32>
    %cst_6 = arith.constant dense<0.000000e+00> : vector<24x128xf32>
    %6 = tpu.matmul %0, %5, %cst_6 {dimension_numbers = #tpu.dot_dimension_numbers<[1], [0], [0], [1], [0, 0, 1, 1], [], []>, precision = #tpu.contract_precision<fp32>} : vector<24x28xf32>, vector<28x128xf32>, vector<24x128xf32> -> vector<24x128xf32>
    %c1_7 = arith.constant 1 : index
    %c0_8 = arith.constant 0 : index
    %c0_9 = arith.constant 0 : index
    %7 = vector.load %arg2[%c1_7, %c0_8, %c0_9] : memref<28x28x128xf32, #tpu.memory_space<vmem>>, vector<1x28x128xf32>
    %8 = vector.shape_cast %7 : vector<1x28x128xf32> to vector<28x128xf32>
    %cst_10 = arith.constant dense<0.000000e+00> : vector<24x128xf32>
    %9 = tpu.matmul %0, %8, %cst_10 {dimension_numbers = #tpu.dot_dimension_numbers<[1], [0], [0], [1], [0, 0, 1, 1], [], []>, precision = #tpu.contract_precision<fp32>} : vector<24x28xf32>, vector<28x128xf32>, vector<24x128xf32> -> vector<24x128xf32>
    %c2 = arith.constant 2 : index
    %c0_11 = arith.constant 0 : index
    %c0_12 = arith.constant 0 : index
    %10 = vector.load %arg2[%c2, %c0_11, %c0_12] : memref<28x28x128xf32, #tpu.memory_space<vmem>>, vector<1x28x128xf32>
    %11 = vector.shape_cast %10 : vector<1x28x128xf32> to vector<28x128xf32>
    %cst_13 = arith.constant dense<0.000000e+00> : vector<24x128xf32>
    %12 = tpu.matmul %0, %11, %cst_13 {dimension_numbers = #tpu.dot_dimension_numbers<[1], [0], [0], [1], [0, 0, 1, 1], [], []>, precision = #tpu.contract_precision<fp32>} : vector<24x28xf32>, vector<28x128xf32>, vector<24x128xf32> -> vector<24x128xf32>
    %c3 = arith.constant 3 : index
    %c0_14 = arith.constant 0 : index
    %c0_15 = arith.constant 0 : index
    %13 = vector.load %arg2[%c3, %c0_14, %c0_15] : memref<28x28x128xf32, #tpu.memory_space<vmem>>, vector<1x28x128xf32>
    %14 = vector.shape_cast %13 : vector<1x28x128xf32> to vector<28x128xf32>
    %cst_16 = arith.constant dense<0.000000e+00> : vector<24x128xf32>
    %15 = tpu.matmul %0, %14, %cst_16 {dimension_numbers = #tpu.dot_dimension_numbers<[1], [0], [0], [1], [0, 0, 1, 1], [], []>, precision = #tpu.contract_precision<fp32>} : vector<24x28xf32>, vector<28x128xf32>, vector<24x128xf32> -> vector<24x128xf32>
    %c4 = arith.constant 4 : index
    %c0_17 = arith.constant 0 : index
    %c0_18 = arith.constant 0 : index
    %16 = vector.load %arg2[%c4, %c0_17, %c0_18] : memref<28x28x128xf32, #tpu.memory_space<vmem>>, vector<1x28x128xf32>
    %17 = vector.shape_cast %16 : vector<1x28x128xf32> to vector<28x128xf32>
    %cst_19 = arith.constant dense<0.000000e+00> : vector<24x128xf32>
    %18 = tpu.matmul %0, %17, %cst_19 {dimension_numbers = #tpu.dot_dimension_numbers<[1], [0], [0], [1], [0, 0, 1, 1], [], []>, precision = #tpu.contract_precision<fp32>} : vector<24x28xf32>, vector<28x128xf32>, vector<24x128xf32> -> vector<24x128xf32>
    %c5 = arith.constant 5 : index
    %c0_20 = arith.constant 0 : index
    %c0_21 = arith.constant 0 : index
    %19 = vector.load %arg2[%c5, %c0_20, %c0_21] : memref<28x28x128xf32, #tpu.memory_space<vmem>>, vector<1x28x128xf32>
    %20 = vector.shape_cast %19 : vector<1x28x128xf32> to vector<28x128xf32>
    %cst_22 = arith.constant dense<0.000000e+00> : vector<24x128xf32>
    %21 = tpu.matmul %0, %20, %cst_22 {dimension_numbers = #tpu.dot_dimension_numbers<[1], [0], [0], [1], [0, 0, 1, 1], [], []>, precision = #tpu.contract_precision<fp32>} : vector<24x28xf32>, vector<28x128xf32>, vector<24x128xf32> -> vector<24x128xf32>
    %22 = arith.addf %3, %21 : vector<24x128xf32>
    %cst_23 = arith.constant 0.102184989 : f32
    %23 = vector.broadcast %cst_23 : f32 to vector<24x128xf32>
    %24 = arith.mulf %23, %22 : vector<24x128xf32>
    %25 = arith.addf %6, %18 : vector<24x128xf32>
    %cst_24 = arith.constant 0.139670327 : f32
    %26 = vector.broadcast %cst_24 : f32 to vector<24x128xf32>
    %27 = arith.mulf %26, %25 : vector<24x128xf32>
    %28 = arith.addf %24, %27 : vector<24x128xf32>
    %29 = arith.addf %9, %15 : vector<24x128xf32>
    %cst_25 = arith.constant 0.16847457 : f32
    %30 = vector.broadcast %cst_25 : f32 to vector<24x128xf32>
    %31 = arith.mulf %30, %29 : vector<24x128xf32>
    %32 = arith.addf %28, %31 : vector<24x128xf32>
    %cst_26 = arith.constant 0.179340243 : f32
    %33 = vector.broadcast %cst_26 : f32 to vector<24x128xf32>
    %34 = arith.mulf %33, %12 : vector<24x128xf32>
    %35 = arith.addf %32, %34 : vector<24x128xf32>
    %c0_27 = arith.constant 0 : index
    %c0_28 = arith.constant 0 : index
    %c0_29 = arith.constant 0 : index
    %36 = vector.load %arg3[%c0_27, %c0_28, %c0_29] : memref<24x24x128xf32, #tpu.memory_space<vmem>>, vector<1x24x128xf32>
    %37 = vector.shape_cast %36 : vector<1x24x128xf32> to vector<24x128xf32>
    %38 = vector.shape_cast %35 : vector<24x128xf32> to vector<1x24x128xf32>
    tpu.vector_store %arg3[%c0_27, %c0_28, %c0_29], %38 {strides = array<i32>} : memref<24x24x128xf32, #tpu.memory_space<vmem>>, vector<1x24x128xf32>,
    %c6 = arith.constant 6 : index
    %c0_30 = arith.constant 0 : index
    %c0_31 = arith.constant 0 : index
    %39 = vector.load %arg2[%c6, %c0_30, %c0_31] : memref<28x28x128xf32, #tpu.memory_space<vmem>>, vector<1x28x128xf32>
    %40 = vector.shape_cast %39 : vector<1x28x128xf32> to vector<28x128xf32>
    %cst_32 = arith.constant dense<0.000000e+00> : vector<24x128xf32>
    %41 = tpu.matmul %0, %40, %cst_32 {dimension_numbers = #tpu.dot_dimension_numbers<[1], [0], [0], [1], [0, 0, 1, 1], [], []>, precision = #tpu.contract_precision<fp32>} : vector<24x28xf32>, vector<28x128xf32>, vector<24x128xf32> -> vector<24x128xf32>
    %42 = arith.addf %6, %41 : vector<24x128xf32>
    %cst_33 = arith.constant 0.102184989 : f32
    %43 = vector.broadcast %cst_33 : f32 to vector<24x128xf32>
    %44 = arith.mulf %43, %42 : vector<24x128xf32>
    %45 = arith.addf %9, %21 : vector<24x128xf32>
    %cst_34 = arith.constant 0.139670327 : f32
    %46 = vector.broadcast %cst_34 : f32 to vector<24x128xf32>
    %47 = arith.mulf %46, %45 : vector<24x128xf32>
    %48 = arith.addf %44, %47 : vector<24x128xf32>
    %49 = arith.addf %12, %18 : vector<24x128xf32>
    %cst_35 = arith.constant 0.16847457 : f32
    %50 = vector.broadcast %cst_35 : f32 to vector<24x128xf32>
    %51 = arith.mulf %50, %49 : vector<24x128xf32>
    %52 = arith.addf %48, %51 : vector<24x128xf32>
    %cst_36 = arith.constant 0.179340243 : f32
    %53 = vector.broadcast %cst_36 : f32 to vector<24x128xf32>
    %54 = arith.mulf %53, %15 : vector<24x128xf32>
    %55 = arith.addf %52, %54 : vector<24x128xf32>
    %c1_37 = arith.constant 1 : index
    %c0_38 = arith.constant 0 : index
    %c0_39 = arith.constant 0 : index
    %56 = vector.load %arg3[%c1_37, %c0_38, %c0_39] : memref<24x24x128xf32, #tpu.memory_space<vmem>>, vector<1x24x128xf32>
    %57 = vector.shape_cast %56 : vector<1x24x128xf32> to vector<24x128xf32>
    %58 = vector.shape_cast %55 : vector<24x128xf32> to vector<1x24x128xf32>
    tpu.vector_store %arg3[%c1_37, %c0_38, %c0_39], %58 {strides = array<i32>} : memref<24x24x128xf32, #tpu.memory_space<vmem>>, vector<1x24x128xf32>,
    %c7 = arith.constant 7 : index
    %c0_40 = arith.constant 0 : index
    %c0_41 = arith.constant 0 : index
    %59 = vector.load %arg2[%c7, %c0_40, %c0_41] : memref<28x28x128xf32, #tpu.memory_space<vmem>>, vector<1x28x128xf32>
    %60 = vector.shape_cast %59 : vector<1x28x128xf32> to vector<28x128xf32>
    %cst_42 = arith.constant dense<0.000000e+00> : vector<24x128xf32>
    %61 = tpu.matmul %0, %60, %cst_42 {dimension_numbers = #tpu.dot_dimension_numbers<[1], [0], [0], [1], [0, 0, 1, 1], [], []>, precision = #tpu.contract_precision<fp32>} : vector<24x28xf32>, vector<28x128xf32>, vector<24x128xf32> -> vector<24x128xf32>
    %62 = arith.addf %9, %61 : vector<24x128xf32>
    %cst_43 = arith.constant 0.102184989 : f32
    %63 = vector.broadcast %cst_43 : f32 to vector<24x128xf32>
    %64 = arith.mulf %63, %62 : vector<24x128xf32>
    %65 = arith.addf %12, %41 : vector<24x128xf32>
    %cst_44 = arith.constant 0.139670327 : f32
    %66 = vector.broadcast %cst_44 : f32 to vector<24x128xf32>
    %67 = arith.mulf %66, %65 : vector<24x128xf32>
    %68 = arith.addf %64, %67 : vector<24x128xf32>
    %69 = arith.addf %15, %21 : vector<24x128xf32>
    %cst_45 = arith.constant 0.16847457 : f32
    %70 = vector.broadcast %cst_45 : f32 to vector<24x128xf32>
    %71 = arith.mulf %70, %69 : vector<24x128xf32>
    %72 = arith.addf %68, %71 : vector<24x128xf32>
    %cst_46 = arith.constant 0.179340243 : f32
    %73 = vector.broadcast %cst_46 : f32 to vector<24x128xf32>
    %74 = arith.mulf %73, %18 : vector<24x128xf32>
    %75 = arith.addf %72, %74 : vector<24x128xf32>
    %c2_47 = arith.constant 2 : index
    %c0_48 = arith.constant 0 : index
    %c0_49 = arith.constant 0 : index
    %76 = vector.load %arg3[%c2_47, %c0_48, %c0_49] : memref<24x24x128xf32, #tpu.memory_space<vmem>>, vector<1x24x128xf32>
    %77 = vector.shape_cast %76 : vector<1x24x128xf32> to vector<24x128xf32>
    %78 = vector.shape_cast %75 : vector<24x128xf32> to vector<1x24x128xf32>
    tpu.vector_store %arg3[%c2_47, %c0_48, %c0_49], %78 {strides = array<i32>} : memref<24x24x128xf32, #tpu.memory_space<vmem>>, vector<1x24x128xf32>,
    %c8 = arith.constant 8 : index
    %c0_50 = arith.constant 0 : index
    %c0_51 = arith.constant 0 : index
    %79 = vector.load %arg2[%c8, %c0_50, %c0_51] : memref<28x28x128xf32, #tpu.memory_space<vmem>>, vector<1x28x128xf32>
    %80 = vector.shape_cast %79 : vector<1x28x128xf32> to vector<28x128xf32>
    %cst_52 = arith.constant dense<0.000000e+00> : vector<24x128xf32>
    %81 = tpu.matmul %0, %80, %cst_52 {dimension_numbers = #tpu.dot_dimension_numbers<[1], [0], [0], [1], [0, 0, 1, 1], [], []>, precision = #tpu.contract_precision<fp32>} : vector<24x28xf32>, vector<28x128xf32>, vector<24x128xf32> -> vector<24x128xf32>
    %82 = arith.addf %12, %81 : vector<24x128xf32>
    %cst_53 = arith.constant 0.102184989 : f32
    %83 = vector.broadcast %cst_53 : f32 to vector<24x128xf32>
    %84 = arith.mulf %83, %82 : vector<24x128xf32>
    %85 = arith.addf %15, %61 : vector<24x128xf32>
    %cst_54 = arith.constant 0.139670327 : f32
    %86 = vector.broadcast %cst_54 : f32 to vector<24x128xf32>
    %87 = arith.mulf %86, %85 : vector<24x128xf32>
    %88 = arith.addf %84, %87 : vector<24x128xf32>
    %89 = arith.addf %18, %41 : vector<24x128xf32>
    %cst_55 = arith.constant 0.16847457 : f32
    %90 = vector.broadcast %cst_55 : f32 to vector<24x128xf32>
    %91 = arith.mulf %90, %89 : vector<24x128xf32>
    %92 = arith.addf %88, %91 : vector<24x128xf32>
    %cst_56 = arith.constant 0.179340243 : f32
    %93 = vector.broadcast %cst_56 : f32 to vector<24x128xf32>
    %94 = arith.mulf %93, %21 : vector<24x128xf32>
    %95 = arith.addf %92, %94 : vector<24x128xf32>
    %c3_57 = arith.constant 3 : index
    %c0_58 = arith.constant 0 : index
    %c0_59 = arith.constant 0 : index
    %96 = vector.load %arg3[%c3_57, %c0_58, %c0_59] : memref<24x24x128xf32, #tpu.memory_space<vmem>>, vector<1x24x128xf32>
    %97 = vector.shape_cast %96 : vector<1x24x128xf32> to vector<24x128xf32>
    %98 = vector.shape_cast %95 : vector<24x128xf32> to vector<1x24x128xf32>
    tpu.vector_store %arg3[%c3_57, %c0_58, %c0_59], %98 {strides = array<i32>} : memref<24x24x128xf32, #tpu.memory_space<vmem>>, vector<1x24x128xf32>,
    %c9 = arith.constant 9 : index
    %c0_60 = arith.constant 0 : index
    %c0_61 = arith.constant 0 : index
    %99 = vector.load %arg2[%c9, %c0_60, %c0_61] : memref<28x28x128xf32, #tpu.memory_space<vmem>>, vector<1x28x128xf32>
    %100 = vector.shape_cast %99 : vector<1x28x128xf32> to vector<28x128xf32>
    %cst_62 = arith.constant dense<0.000000e+00> : vector<24x128xf32>
    %101 = tpu.matmul %0, %100, %cst_62 {dimension_numbers = #tpu.dot_dimension_numbers<[1], [0], [0], [1], [0, 0, 1, 1], [], []>, precision = #tpu.contract_precision<fp32>} : vector<24x28xf32>, vector<28x128xf32>, vector<24x128xf32> -> vector<24x128xf32>
    %102 = arith.addf %15, %101 : vector<24x128xf32>
    %cst_63 = arith.constant 0.102184989 : f32
    %103 = vector.broadcast %cst_63 : f32 to vector<24x128xf32>
    %104 = arith.mulf %103, %102 : vector<24x128xf32>
    %105 = arith.addf %18, %81 : vector<24x128xf32>
    %cst_64 = arith.constant 0.139670327 : f32
    %106 = vector.broadcast %cst_64 : f32 to vector<24x128xf32>
    %107 = arith.mulf %106, %105 : vector<24x128xf32>
    %108 = arith.addf %104, %107 : vector<24x128xf32>
    %109 = arith.addf %21, %61 : vector<24x128xf32>
    %cst_65 = arith.constant 0.16847457 : f32
    %110 = vector.broadcast %cst_65 : f32 to vector<24x128xf32>
    %111 = arith.mulf %110, %109 : vector<24x128xf32>
    %112 = arith.addf %108, %111 : vector<24x128xf32>
    %cst_66 = arith.constant 0.179340243 : f32
    %113 = vector.broadcast %cst_66 : f32 to vector<24x128xf32>
    %114 = arith.mulf %113, %41 : vector<24x128xf32>
    %115 = arith.addf %112, %114 : vector<24x128xf32>
    %c4_67 = arith.constant 4 : index
    %c0_68 = arith.constant 0 : index
    %c0_69 = arith.constant 0 : index
    %116 = vector.load %arg3[%c4_67, %c0_68, %c0_69] : memref<24x24x128xf32, #tpu.memory_space<vmem>>, vector<1x24x128xf32>
    %117 = vector.shape_cast %116 : vector<1x24x128xf32> to vector<24x128xf32>
    %118 = vector.shape_cast %115 : vector<24x128xf32> to vector<1x24x128xf32>
    tpu.vector_store %arg3[%c4_67, %c0_68, %c0_69], %118 {strides = array<i32>} : memref<24x24x128xf32, #tpu.memory_space<vmem>>, vector<1x24x128xf32>,
    %c10 = arith.constant 10 : index
    %c0_70 = arith.constant 0 : index
    %c0_71 = arith.constant 0 : index
    %119 = vector.load %arg2[%c10, %c0_70, %c0_71] : memref<28x28x128xf32, #tpu.memory_space<vmem>>, vector<1x28x128xf32>
    %120 = vector.shape_cast %119 : vector<1x28x128xf32> to vector<28x128xf32>
    %cst_72 = arith.constant dense<0.000000e+00> : vector<24x128xf32>
    %121 = tpu.matmul %0, %120, %cst_72 {dimension_numbers = #tpu.dot_dimension_numbers<[1], [0], [0], [1], [0, 0, 1, 1], [], []>, precision = #tpu.contract_precision<fp32>} : vector<24x28xf32>, vector<28x128xf32>, vector<24x128xf32> -> vector<24x128xf32>
    %122 = arith.addf %18, %121 : vector<24x128xf32>
    %cst_73 = arith.constant 0.102184989 : f32
    %123 = vector.broadcast %cst_73 : f32 to vector<24x128xf32>
    %124 = arith.mulf %123, %122 : vector<24x128xf32>
    %125 = arith.addf %21, %101 : vector<24x128xf32>
    %cst_74 = arith.constant 0.139670327 : f32
    %126 = vector.broadcast %cst_74 : f32 to vector<24x128xf32>
    %127 = arith.mulf %126, %125 : vector<24x128xf32>
    %128 = arith.addf %124, %127 : vector<24x128xf32>
    %129 = arith.addf %41, %81 : vector<24x128xf32>
    %cst_75 = arith.constant 0.16847457 : f32
    %130 = vector.broadcast %cst_75 : f32 to vector<24x128xf32>
    %131 = arith.mulf %130, %129 : vector<24x128xf32>
    %132 = arith.addf %128, %131 : vector<24x128xf32>
    %cst_76 = arith.constant 0.179340243 : f32
    %133 = vector.broadcast %cst_76 : f32 to vector<24x128xf32>
    %134 = arith.mulf %133, %61 : vector<24x128xf32>
    %135 = arith.addf %132, %134 : vector<24x128xf32>
    %c5_77 = arith.constant 5 : index
    %c0_78 = arith.constant 0 : index
    %c0_79 = arith.constant 0 : index
    %136 = vector.load %arg3[%c5_77, %c0_78, %c0_79] : memref<24x24x128xf32, #tpu.memory_space<vmem>>, vector<1x24x128xf32>
    %137 = vector.shape_cast %136 : vector<1x24x128xf32> to vector<24x128xf32>
    %138 = vector.shape_cast %135 : vector<24x128xf32> to vector<1x24x128xf32>
    tpu.vector_store %arg3[%c5_77, %c0_78, %c0_79], %138 {strides = array<i32>} : memref<24x24x128xf32, #tpu.memory_space<vmem>>, vector<1x24x128xf32>,
    %c11 = arith.constant 11 : index
    %c0_80 = arith.constant 0 : index
    %c0_81 = arith.constant 0 : index
    %139 = vector.load %arg2[%c11, %c0_80, %c0_81] : memref<28x28x128xf32, #tpu.memory_space<vmem>>, vector<1x28x128xf32>
    %140 = vector.shape_cast %139 : vector<1x28x128xf32> to vector<28x128xf32>
    %cst_82 = arith.constant dense<0.000000e+00> : vector<24x128xf32>
    %141 = tpu.matmul %0, %140, %cst_82 {dimension_numbers = #tpu.dot_dimension_numbers<[1], [0], [0], [1], [0, 0, 1, 1], [], []>, precision = #tpu.contract_precision<fp32>} : vector<24x28xf32>, vector<28x128xf32>, vector<24x128xf32> -> vector<24x128xf32>
    %142 = arith.addf %21, %141 : vector<24x128xf32>
    %cst_83 = arith.constant 0.102184989 : f32
    %143 = vector.broadcast %cst_83 : f32 to vector<24x128xf32>
    %144 = arith.mulf %143, %142 : vector<24x128xf32>
    %145 = arith.addf %41, %121 : vector<24x128xf32>
    %cst_84 = arith.constant 0.139670327 : f32
    %146 = vector.broadcast %cst_84 : f32 to vector<24x128xf32>
    %147 = arith.mulf %146, %145 : vector<24x128xf32>
    %148 = arith.addf %144, %147 : vector<24x128xf32>
    %149 = arith.addf %61, %101 : vector<24x128xf32>
    %cst_85 = arith.constant 0.16847457 : f32
    %150 = vector.broadcast %cst_85 : f32 to vector<24x128xf32>
    %151 = arith.mulf %150, %149 : vector<24x128xf32>
    %152 = arith.addf %148, %151 : vector<24x128xf32>
    %cst_86 = arith.constant 0.179340243 : f32
    %153 = vector.broadcast %cst_86 : f32 to vector<24x128xf32>
    %154 = arith.mulf %153, %81 : vector<24x128xf32>
    %155 = arith.addf %152, %154 : vector<24x128xf32>
    %c6_87 = arith.constant 6 : index
    %c0_88 = arith.constant 0 : index
    %c0_89 = arith.constant 0 : index
    %156 = vector.load %arg3[%c6_87, %c0_88, %c0_89] : memref<24x24x128xf32, #tpu.memory_space<vmem>>, vector<1x24x128xf32>
    %157 = vector.shape_cast %156 : vector<1x24x128xf32> to vector<24x128xf32>
    %158 = vector.shape_cast %155 : vector<24x128xf32> to vector<1x24x128xf32>
    tpu.vector_store %arg3[%c6_87, %c0_88, %c0_89], %158 {strides = array<i32>} : memref<24x24x128xf32, #tpu.memory_space<vmem>>, vector<1x24x128xf32>,
    %c12 = arith.constant 12 : index
    %c0_90 = arith.constant 0 : index
    %c0_91 = arith.constant 0 : index
    %159 = vector.load %arg2[%c12, %c0_90, %c0_91] : memref<28x28x128xf32, #tpu.memory_space<vmem>>, vector<1x28x128xf32>
    %160 = vector.shape_cast %159 : vector<1x28x128xf32> to vector<28x128xf32>
    %cst_92 = arith.constant dense<0.000000e+00> : vector<24x128xf32>
    %161 = tpu.matmul %0, %160, %cst_92 {dimension_numbers = #tpu.dot_dimension_numbers<[1], [0], [0], [1], [0, 0, 1, 1], [], []>, precision = #tpu.contract_precision<fp32>} : vector<24x28xf32>, vector<28x128xf32>, vector<24x128xf32> -> vector<24x128xf32>
    %162 = arith.addf %41, %161 : vector<24x128xf32>
    %cst_93 = arith.constant 0.102184989 : f32
    %163 = vector.broadcast %cst_93 : f32 to vector<24x128xf32>
    %164 = arith.mulf %163, %162 : vector<24x128xf32>
    %165 = arith.addf %61, %141 : vector<24x128xf32>
    %cst_94 = arith.constant 0.139670327 : f32
    %166 = vector.broadcast %cst_94 : f32 to vector<24x128xf32>
    %167 = arith.mulf %166, %165 : vector<24x128xf32>
    %168 = arith.addf %164, %167 : vector<24x128xf32>
    %169 = arith.addf %81, %121 : vector<24x128xf32>
    %cst_95 = arith.constant 0.16847457 : f32
    %170 = vector.broadcast %cst_95 : f32 to vector<24x128xf32>
    %171 = arith.mulf %170, %169 : vector<24x128xf32>
    %172 = arith.addf %168, %171 : vector<24x128xf32>
    %cst_96 = arith.constant 0.179340243 : f32
    %173 = vector.broadcast %cst_96 : f32 to vector<24x128xf32>
    %174 = arith.mulf %173, %101 : vector<24x128xf32>
    %175 = arith.addf %172, %174 : vector<24x128xf32>
    %c7_97 = arith.constant 7 : index
    %c0_98 = arith.constant 0 : index
    %c0_99 = arith.constant 0 : index
    %176 = vector.load %arg3[%c7_97, %c0_98, %c0_99] : memref<24x24x128xf32, #tpu.memory_space<vmem>>, vector<1x24x128xf32>
    %177 = vector.shape_cast %176 : vector<1x24x128xf32> to vector<24x128xf32>
    %178 = vector.shape_cast %175 : vector<24x128xf32> to vector<1x24x128xf32>
    tpu.vector_store %arg3[%c7_97, %c0_98, %c0_99], %178 {strides = array<i32>} : memref<24x24x128xf32, #tpu.memory_space<vmem>>, vector<1x24x128xf32>,
    %c13 = arith.constant 13 : index
    %c0_100 = arith.constant 0 : index
    %c0_101 = arith.constant 0 : index
    %179 = vector.load %arg2[%c13, %c0_100, %c0_101] : memref<28x28x128xf32, #tpu.memory_space<vmem>>, vector<1x28x128xf32>
    %180 = vector.shape_cast %179 : vector<1x28x128xf32> to vector<28x128xf32>
    %cst_102 = arith.constant dense<0.000000e+00> : vector<24x128xf32>
    %181 = tpu.matmul %0, %180, %cst_102 {dimension_numbers = #tpu.dot_dimension_numbers<[1], [0], [0], [1], [0, 0, 1, 1], [], []>, precision = #tpu.contract_precision<fp32>} : vector<24x28xf32>, vector<28x128xf32>, vector<24x128xf32> -> vector<24x128xf32>
    %182 = arith.addf %61, %181 : vector<24x128xf32>
    %cst_103 = arith.constant 0.102184989 : f32
    %183 = vector.broadcast %cst_103 : f32 to vector<24x128xf32>
    %184 = arith.mulf %183, %182 : vector<24x128xf32>
    %185 = arith.addf %81, %161 : vector<24x128xf32>
    %cst_104 = arith.constant 0.139670327 : f32
    %186 = vector.broadcast %cst_104 : f32 to vector<24x128xf32>
    %187 = arith.mulf %186, %185 : vector<24x128xf32>
    %188 = arith.addf %184, %187 : vector<24x128xf32>
    %189 = arith.addf %101, %141 : vector<24x128xf32>
    %cst_105 = arith.constant 0.16847457 : f32
    %190 = vector.broadcast %cst_105 : f32 to vector<24x128xf32>
    %191 = arith.mulf %190, %189 : vector<24x128xf32>
    %192 = arith.addf %188, %191 : vector<24x128xf32>
    %cst_106 = arith.constant 0.179340243 : f32
    %193 = vector.broadcast %cst_106 : f32 to vector<24x128xf32>
    %194 = arith.mulf %193, %121 : vector<24x128xf32>
    %195 = arith.addf %192, %194 : vector<24x128xf32>
    %c8_107 = arith.constant 8 : index
    %c0_108 = arith.constant 0 : index
    %c0_109 = arith.constant 0 : index
    %196 = vector.load %arg3[%c8_107, %c0_108, %c0_109] : memref<24x24x128xf32, #tpu.memory_space<vmem>>, vector<1x24x128xf32>
    %197 = vector.shape_cast %196 : vector<1x24x128xf32> to vector<24x128xf32>
    %198 = vector.shape_cast %195 : vector<24x128xf32> to vector<1x24x128xf32>
    tpu.vector_store %arg3[%c8_107, %c0_108, %c0_109], %198 {strides = array<i32>} : memref<24x24x128xf32, #tpu.memory_space<vmem>>, vector<1x24x128xf32>,
    %c14 = arith.constant 14 : index
    %c0_110 = arith.constant 0 : index
    %c0_111 = arith.constant 0 : index
    %199 = vector.load %arg2[%c14, %c0_110, %c0_111] : memref<28x28x128xf32, #tpu.memory_space<vmem>>, vector<1x28x128xf32>
    %200 = vector.shape_cast %199 : vector<1x28x128xf32> to vector<28x128xf32>
    %cst_112 = arith.constant dense<0.000000e+00> : vector<24x128xf32>
    %201 = tpu.matmul %0, %200, %cst_112 {dimension_numbers = #tpu.dot_dimension_numbers<[1], [0], [0], [1], [0, 0, 1, 1], [], []>, precision = #tpu.contract_precision<fp32>} : vector<24x28xf32>, vector<28x128xf32>, vector<24x128xf32> -> vector<24x128xf32>
    %202 = arith.addf %81, %201 : vector<24x128xf32>
    %cst_113 = arith.constant 0.102184989 : f32
    %203 = vector.broadcast %cst_113 : f32 to vector<24x128xf32>
    %204 = arith.mulf %203, %202 : vector<24x128xf32>
    %205 = arith.addf %101, %181 : vector<24x128xf32>
    %cst_114 = arith.constant 0.139670327 : f32
    %206 = vector.broadcast %cst_114 : f32 to vector<24x128xf32>
    %207 = arith.mulf %206, %205 : vector<24x128xf32>
    %208 = arith.addf %204, %207 : vector<24x128xf32>
    %209 = arith.addf %121, %161 : vector<24x128xf32>
    %cst_115 = arith.constant 0.16847457 : f32
    %210 = vector.broadcast %cst_115 : f32 to vector<24x128xf32>
    %211 = arith.mulf %210, %209 : vector<24x128xf32>
    %212 = arith.addf %208, %211 : vector<24x128xf32>
    %cst_116 = arith.constant 0.179340243 : f32
    %213 = vector.broadcast %cst_116 : f32 to vector<24x128xf32>
    %214 = arith.mulf %213, %141 : vector<24x128xf32>
    %215 = arith.addf %212, %214 : vector<24x128xf32>
    %c9_117 = arith.constant 9 : index
    %c0_118 = arith.constant 0 : index
    %c0_119 = arith.constant 0 : index
    %216 = vector.load %arg3[%c9_117, %c0_118, %c0_119] : memref<24x24x128xf32, #tpu.memory_space<vmem>>, vector<1x24x128xf32>
    %217 = vector.shape_cast %216 : vector<1x24x128xf32> to vector<24x128xf32>
    %218 = vector.shape_cast %215 : vector<24x128xf32> to vector<1x24x128xf32>
    tpu.vector_store %arg3[%c9_117, %c0_118, %c0_119], %218 {strides = array<i32>} : memref<24x24x128xf32, #tpu.memory_space<vmem>>, vector<1x24x128xf32>,
    %c15 = arith.constant 15 : index
    %c0_120 = arith.constant 0 : index
    %c0_121 = arith.constant 0 : index
    %219 = vector.load %arg2[%c15, %c0_120, %c0_121] : memref<28x28x128xf32, #tpu.memory_space<vmem>>, vector<1x28x128xf32>
    %220 = vector.shape_cast %219 : vector<1x28x128xf32> to vector<28x128xf32>
    %cst_122 = arith.constant dense<0.000000e+00> : vector<24x128xf32>
    %221 = tpu.matmul %0, %220, %cst_122 {dimension_numbers = #tpu.dot_dimension_numbers<[1], [0], [0], [1], [0, 0, 1, 1], [], []>, precision = #tpu.contract_precision<fp32>} : vector<24x28xf32>, vector<28x128xf32>, vector<24x128xf32> -> vector<24x128xf32>
    %222 = arith.addf %101, %221 : vector<24x128xf32>
    %cst_123 = arith.constant 0.102184989 : f32
    %223 = vector.broadcast %cst_123 : f32 to vector<24x128xf32>
    %224 = arith.mulf %223, %222 : vector<24x128xf32>
    %225 = arith.addf %121, %201 : vector<24x128xf32>
    %cst_124 = arith.constant 0.139670327 : f32
    %226 = vector.broadcast %cst_124 : f32 to vector<24x128xf32>
    %227 = arith.mulf %226, %225 : vector<24x128xf32>
    %228 = arith.addf %224, %227 : vector<24x128xf32>
    %229 = arith.addf %141, %181 : vector<24x128xf32>
    %cst_125 = arith.constant 0.16847457 : f32
    %230 = vector.broadcast %cst_125 : f32 to vector<24x128xf32>
    %231 = arith.mulf %230, %229 : vector<24x128xf32>
    %232 = arith.addf %228, %231 : vector<24x128xf32>
    %cst_126 = arith.constant 0.179340243 : f32
    %233 = vector.broadcast %cst_126 : f32 to vector<24x128xf32>
    %234 = arith.mulf %233, %161 : vector<24x128xf32>
    %235 = arith.addf %232, %234 : vector<24x128xf32>
    %c10_127 = arith.constant 10 : index
    %c0_128 = arith.constant 0 : index
    %c0_129 = arith.constant 0 : index
    %236 = vector.load %arg3[%c10_127, %c0_128, %c0_129] : memref<24x24x128xf32, #tpu.memory_space<vmem>>, vector<1x24x128xf32>
    %237 = vector.shape_cast %236 : vector<1x24x128xf32> to vector<24x128xf32>
    %238 = vector.shape_cast %235 : vector<24x128xf32> to vector<1x24x128xf32>
    tpu.vector_store %arg3[%c10_127, %c0_128, %c0_129], %238 {strides = array<i32>} : memref<24x24x128xf32, #tpu.memory_space<vmem>>, vector<1x24x128xf32>,
    %c16 = arith.constant 16 : index
    %c0_130 = arith.constant 0 : index
    %c0_131 = arith.constant 0 : index
    %239 = vector.load %arg2[%c16, %c0_130, %c0_131] : memref<28x28x128xf32, #tpu.memory_space<vmem>>, vector<1x28x128xf32>
    %240 = vector.shape_cast %239 : vector<1x28x128xf32> to vector<28x128xf32>
    %cst_132 = arith.constant dense<0.000000e+00> : vector<24x128xf32>
    %241 = tpu.matmul %0, %240, %cst_132 {dimension_numbers = #tpu.dot_dimension_numbers<[1], [0], [0], [1], [0, 0, 1, 1], [], []>, precision = #tpu.contract_precision<fp32>} : vector<24x28xf32>, vector<28x128xf32>, vector<24x128xf32> -> vector<24x128xf32>
    %242 = arith.addf %121, %241 : vector<24x128xf32>
    %cst_133 = arith.constant 0.102184989 : f32
    %243 = vector.broadcast %cst_133 : f32 to vector<24x128xf32>
    %244 = arith.mulf %243, %242 : vector<24x128xf32>
    %245 = arith.addf %141, %221 : vector<24x128xf32>
    %cst_134 = arith.constant 0.139670327 : f32
    %246 = vector.broadcast %cst_134 : f32 to vector<24x128xf32>
    %247 = arith.mulf %246, %245 : vector<24x128xf32>
    %248 = arith.addf %244, %247 : vector<24x128xf32>
    %249 = arith.addf %161, %201 : vector<24x128xf32>
    %cst_135 = arith.constant 0.16847457 : f32
    %250 = vector.broadcast %cst_135 : f32 to vector<24x128xf32>
    %251 = arith.mulf %250, %249 : vector<24x128xf32>
    %252 = arith.addf %248, %251 : vector<24x128xf32>
    %cst_136 = arith.constant 0.179340243 : f32
    %253 = vector.broadcast %cst_136 : f32 to vector<24x128xf32>
    %254 = arith.mulf %253, %181 : vector<24x128xf32>
    %255 = arith.addf %252, %254 : vector<24x128xf32>
    %c11_137 = arith.constant 11 : index
    %c0_138 = arith.constant 0 : index
    %c0_139 = arith.constant 0 : index
    %256 = vector.load %arg3[%c11_137, %c0_138, %c0_139] : memref<24x24x128xf32, #tpu.memory_space<vmem>>, vector<1x24x128xf32>
    %257 = vector.shape_cast %256 : vector<1x24x128xf32> to vector<24x128xf32>
    %258 = vector.shape_cast %255 : vector<24x128xf32> to vector<1x24x128xf32>
    tpu.vector_store %arg3[%c11_137, %c0_138, %c0_139], %258 {strides = array<i32>} : memref<24x24x128xf32, #tpu.memory_space<vmem>>, vector<1x24x128xf32>,
    %c17 = arith.constant 17 : index
    %c0_140 = arith.constant 0 : index
    %c0_141 = arith.constant 0 : index
    %259 = vector.load %arg2[%c17, %c0_140, %c0_141] : memref<28x28x128xf32, #tpu.memory_space<vmem>>, vector<1x28x128xf32>
    %260 = vector.shape_cast %259 : vector<1x28x128xf32> to vector<28x128xf32>
    %cst_142 = arith.constant dense<0.000000e+00> : vector<24x128xf32>
    %261 = tpu.matmul %0, %260, %cst_142 {dimension_numbers = #tpu.dot_dimension_numbers<[1], [0], [0], [1], [0, 0, 1, 1], [], []>, precision = #tpu.contract_precision<fp32>} : vector<24x28xf32>, vector<28x128xf32>, vector<24x128xf32> -> vector<24x128xf32>
    %262 = arith.addf %141, %261 : vector<24x128xf32>
    %cst_143 = arith.constant 0.102184989 : f32
    %263 = vector.broadcast %cst_143 : f32 to vector<24x128xf32>
    %264 = arith.mulf %263, %262 : vector<24x128xf32>
    %265 = arith.addf %161, %241 : vector<24x128xf32>
    %cst_144 = arith.constant 0.139670327 : f32
    %266 = vector.broadcast %cst_144 : f32 to vector<24x128xf32>
    %267 = arith.mulf %266, %265 : vector<24x128xf32>
    %268 = arith.addf %264, %267 : vector<24x128xf32>
    %269 = arith.addf %181, %221 : vector<24x128xf32>
    %cst_145 = arith.constant 0.16847457 : f32
    %270 = vector.broadcast %cst_145 : f32 to vector<24x128xf32>
    %271 = arith.mulf %270, %269 : vector<24x128xf32>
    %272 = arith.addf %268, %271 : vector<24x128xf32>
    %cst_146 = arith.constant 0.179340243 : f32
    %273 = vector.broadcast %cst_146 : f32 to vector<24x128xf32>
    %274 = arith.mulf %273, %201 : vector<24x128xf32>
    %275 = arith.addf %272, %274 : vector<24x128xf32>
    %c12_147 = arith.constant 12 : index
    %c0_148 = arith.constant 0 : index
    %c0_149 = arith.constant 0 : index
    %276 = vector.load %arg3[%c12_147, %c0_148, %c0_149] : memref<24x24x128xf32, #tpu.memory_space<vmem>>, vector<1x24x128xf32>
    %277 = vector.shape_cast %276 : vector<1x24x128xf32> to vector<24x128xf32>
    %278 = vector.shape_cast %275 : vector<24x128xf32> to vector<1x24x128xf32>
    tpu.vector_store %arg3[%c12_147, %c0_148, %c0_149], %278 {strides = array<i32>} : memref<24x24x128xf32, #tpu.memory_space<vmem>>, vector<1x24x128xf32>,
    %c18 = arith.constant 18 : index
    %c0_150 = arith.constant 0 : index
    %c0_151 = arith.constant 0 : index
    %279 = vector.load %arg2[%c18, %c0_150, %c0_151] : memref<28x28x128xf32, #tpu.memory_space<vmem>>, vector<1x28x128xf32>
    %280 = vector.shape_cast %279 : vector<1x28x128xf32> to vector<28x128xf32>
    %cst_152 = arith.constant dense<0.000000e+00> : vector<24x128xf32>
    %281 = tpu.matmul %0, %280, %cst_152 {dimension_numbers = #tpu.dot_dimension_numbers<[1], [0], [0], [1], [0, 0, 1, 1], [], []>, precision = #tpu.contract_precision<fp32>} : vector<24x28xf32>, vector<28x128xf32>, vector<24x128xf32> -> vector<24x128xf32>
    %282 = arith.addf %161, %281 : vector<24x128xf32>
    %cst_153 = arith.constant 0.102184989 : f32
    %283 = vector.broadcast %cst_153 : f32 to vector<24x128xf32>
    %284 = arith.mulf %283, %282 : vector<24x128xf32>
    %285 = arith.addf %181, %261 : vector<24x128xf32>
    %cst_154 = arith.constant 0.139670327 : f32
    %286 = vector.broadcast %cst_154 : f32 to vector<24x128xf32>
    %287 = arith.mulf %286, %285 : vector<24x128xf32>
    %288 = arith.addf %284, %287 : vector<24x128xf32>
    %289 = arith.addf %201, %241 : vector<24x128xf32>
    %cst_155 = arith.constant 0.16847457 : f32
    %290 = vector.broadcast %cst_155 : f32 to vector<24x128xf32>
    %291 = arith.mulf %290, %289 : vector<24x128xf32>
    %292 = arith.addf %288, %291 : vector<24x128xf32>
    %cst_156 = arith.constant 0.179340243 : f32
    %293 = vector.broadcast %cst_156 : f32 to vector<24x128xf32>
    %294 = arith.mulf %293, %221 : vector<24x128xf32>
    %295 = arith.addf %292, %294 : vector<24x128xf32>
    %c13_157 = arith.constant 13 : index
    %c0_158 = arith.constant 0 : index
    %c0_159 = arith.constant 0 : index
    %296 = vector.load %arg3[%c13_157, %c0_158, %c0_159] : memref<24x24x128xf32, #tpu.memory_space<vmem>>, vector<1x24x128xf32>
    %297 = vector.shape_cast %296 : vector<1x24x128xf32> to vector<24x128xf32>
    %298 = vector.shape_cast %295 : vector<24x128xf32> to vector<1x24x128xf32>
    tpu.vector_store %arg3[%c13_157, %c0_158, %c0_159], %298 {strides = array<i32>} : memref<24x24x128xf32, #tpu.memory_space<vmem>>, vector<1x24x128xf32>,
    %c19 = arith.constant 19 : index
    %c0_160 = arith.constant 0 : index
    %c0_161 = arith.constant 0 : index
    %299 = vector.load %arg2[%c19, %c0_160, %c0_161] : memref<28x28x128xf32, #tpu.memory_space<vmem>>, vector<1x28x128xf32>
    %300 = vector.shape_cast %299 : vector<1x28x128xf32> to vector<28x128xf32>
    %cst_162 = arith.constant dense<0.000000e+00> : vector<24x128xf32>
    %301 = tpu.matmul %0, %300, %cst_162 {dimension_numbers = #tpu.dot_dimension_numbers<[1], [0], [0], [1], [0, 0, 1, 1], [], []>, precision = #tpu.contract_precision<fp32>} : vector<24x28xf32>, vector<28x128xf32>, vector<24x128xf32> -> vector<24x128xf32>
    %302 = arith.addf %181, %301 : vector<24x128xf32>
    %cst_163 = arith.constant 0.102184989 : f32
    %303 = vector.broadcast %cst_163 : f32 to vector<24x128xf32>
    %304 = arith.mulf %303, %302 : vector<24x128xf32>
    %305 = arith.addf %201, %281 : vector<24x128xf32>
    %cst_164 = arith.constant 0.139670327 : f32
    %306 = vector.broadcast %cst_164 : f32 to vector<24x128xf32>
    %307 = arith.mulf %306, %305 : vector<24x128xf32>
    %308 = arith.addf %304, %307 : vector<24x128xf32>
    %309 = arith.addf %221, %261 : vector<24x128xf32>
    %cst_165 = arith.constant 0.16847457 : f32
    %310 = vector.broadcast %cst_165 : f32 to vector<24x128xf32>
    %311 = arith.mulf %310, %309 : vector<24x128xf32>
    %312 = arith.addf %308, %311 : vector<24x128xf32>
    %cst_166 = arith.constant 0.179340243 : f32
    %313 = vector.broadcast %cst_166 : f32 to vector<24x128xf32>
    %314 = arith.mulf %313, %241 : vector<24x128xf32>
    %315 = arith.addf %312, %314 : vector<24x128xf32>
    %c14_167 = arith.constant 14 : index
    %c0_168 = arith.constant 0 : index
    %c0_169 = arith.constant 0 : index
    %316 = vector.load %arg3[%c14_167, %c0_168, %c0_169] : memref<24x24x128xf32, #tpu.memory_space<vmem>>, vector<1x24x128xf32>
    %317 = vector.shape_cast %316 : vector<1x24x128xf32> to vector<24x128xf32>
    %318 = vector.shape_cast %315 : vector<24x128xf32> to vector<1x24x128xf32>
    tpu.vector_store %arg3[%c14_167, %c0_168, %c0_169], %318 {strides = array<i32>} : memref<24x24x128xf32, #tpu.memory_space<vmem>>, vector<1x24x128xf32>,
    %c20 = arith.constant 20 : index
    %c0_170 = arith.constant 0 : index
    %c0_171 = arith.constant 0 : index
    %319 = vector.load %arg2[%c20, %c0_170, %c0_171] : memref<28x28x128xf32, #tpu.memory_space<vmem>>, vector<1x28x128xf32>
    %320 = vector.shape_cast %319 : vector<1x28x128xf32> to vector<28x128xf32>
    %cst_172 = arith.constant dense<0.000000e+00> : vector<24x128xf32>
    %321 = tpu.matmul %0, %320, %cst_172 {dimension_numbers = #tpu.dot_dimension_numbers<[1], [0], [0], [1], [0, 0, 1, 1], [], []>, precision = #tpu.contract_precision<fp32>} : vector<24x28xf32>, vector<28x128xf32>, vector<24x128xf32> -> vector<24x128xf32>
    %322 = arith.addf %201, %321 : vector<24x128xf32>
    %cst_173 = arith.constant 0.102184989 : f32
    %323 = vector.broadcast %cst_173 : f32 to vector<24x128xf32>
    %324 = arith.mulf %323, %322 : vector<24x128xf32>
    %325 = arith.addf %221, %301 : vector<24x128xf32>
    %cst_174 = arith.constant 0.139670327 : f32
    %326 = vector.broadcast %cst_174 : f32 to vector<24x128xf32>
    %327 = arith.mulf %326, %325 : vector<24x128xf32>
    %328 = arith.addf %324, %327 : vector<24x128xf32>
    %329 = arith.addf %241, %281 : vector<24x128xf32>
    %cst_175 = arith.constant 0.16847457 : f32
    %330 = vector.broadcast %cst_175 : f32 to vector<24x128xf32>
    %331 = arith.mulf %330, %329 : vector<24x128xf32>
    %332 = arith.addf %328, %331 : vector<24x128xf32>
    %cst_176 = arith.constant 0.179340243 : f32
    %333 = vector.broadcast %cst_176 : f32 to vector<24x128xf32>
    %334 = arith.mulf %333, %261 : vector<24x128xf32>
    %335 = arith.addf %332, %334 : vector<24x128xf32>
    %c15_177 = arith.constant 15 : index
    %c0_178 = arith.constant 0 : index
    %c0_179 = arith.constant 0 : index
    %336 = vector.load %arg3[%c15_177, %c0_178, %c0_179] : memref<24x24x128xf32, #tpu.memory_space<vmem>>, vector<1x24x128xf32>
    %337 = vector.shape_cast %336 : vector<1x24x128xf32> to vector<24x128xf32>
    %338 = vector.shape_cast %335 : vector<24x128xf32> to vector<1x24x128xf32>
    tpu.vector_store %arg3[%c15_177, %c0_178, %c0_179], %338 {strides = array<i32>} : memref<24x24x128xf32, #tpu.memory_space<vmem>>, vector<1x24x128xf32>,
    %c21 = arith.constant 21 : index
    %c0_180 = arith.constant 0 : index
    %c0_181 = arith.constant 0 : index
    %339 = vector.load %arg2[%c21, %c0_180, %c0_181] : memref<28x28x128xf32, #tpu.memory_space<vmem>>, vector<1x28x128xf32>
    %340 = vector.shape_cast %339 : vector<1x28x128xf32> to vector<28x128xf32>
    %cst_182 = arith.constant dense<0.000000e+00> : vector<24x128xf32>
    %341 = tpu.matmul %0, %340, %cst_182 {dimension_numbers = #tpu.dot_dimension_numbers<[1], [0], [0], [1], [0, 0, 1, 1], [], []>, precision = #tpu.contract_precision<fp32>} : vector<24x28xf32>, vector<28x128xf32>, vector<24x128xf32> -> vector<24x128xf32>
    %342 = arith.addf %221, %341 : vector<24x128xf32>
    %cst_183 = arith.constant 0.102184989 : f32
    %343 = vector.broadcast %cst_183 : f32 to vector<24x128xf32>
    %344 = arith.mulf %343, %342 : vector<24x128xf32>
    %345 = arith.addf %241, %321 : vector<24x128xf32>
    %cst_184 = arith.constant 0.139670327 : f32
    %346 = vector.broadcast %cst_184 : f32 to vector<24x128xf32>
    %347 = arith.mulf %346, %345 : vector<24x128xf32>
    %348 = arith.addf %344, %347 : vector<24x128xf32>
    %349 = arith.addf %261, %301 : vector<24x128xf32>
    %cst_185 = arith.constant 0.16847457 : f32
    %350 = vector.broadcast %cst_185 : f32 to vector<24x128xf32>
    %351 = arith.mulf %350, %349 : vector<24x128xf32>
    %352 = arith.addf %348, %351 : vector<24x128xf32>
    %cst_186 = arith.constant 0.179340243 : f32
    %353 = vector.broadcast %cst_186 : f32 to vector<24x128xf32>
    %354 = arith.mulf %353, %281 : vector<24x128xf32>
    %355 = arith.addf %352, %354 : vector<24x128xf32>
    %c16_187 = arith.constant 16 : index
    %c0_188 = arith.constant 0 : index
    %c0_189 = arith.constant 0 : index
    %356 = vector.load %arg3[%c16_187, %c0_188, %c0_189] : memref<24x24x128xf32, #tpu.memory_space<vmem>>, vector<1x24x128xf32>
    %357 = vector.shape_cast %356 : vector<1x24x128xf32> to vector<24x128xf32>
    %358 = vector.shape_cast %355 : vector<24x128xf32> to vector<1x24x128xf32>
    tpu.vector_store %arg3[%c16_187, %c0_188, %c0_189], %358 {strides = array<i32>} : memref<24x24x128xf32, #tpu.memory_space<vmem>>, vector<1x24x128xf32>,
    %c22 = arith.constant 22 : index
    %c0_190 = arith.constant 0 : index
    %c0_191 = arith.constant 0 : index
    %359 = vector.load %arg2[%c22, %c0_190, %c0_191] : memref<28x28x128xf32, #tpu.memory_space<vmem>>, vector<1x28x128xf32>
    %360 = vector.shape_cast %359 : vector<1x28x128xf32> to vector<28x128xf32>
    %cst_192 = arith.constant dense<0.000000e+00> : vector<24x128xf32>
    %361 = tpu.matmul %0, %360, %cst_192 {dimension_numbers = #tpu.dot_dimension_numbers<[1], [0], [0], [1], [0, 0, 1, 1], [], []>, precision = #tpu.contract_precision<fp32>} : vector<24x28xf32>, vector<28x128xf32>, vector<24x128xf32> -> vector<24x128xf32>
    %362 = arith.addf %241, %361 : vector<24x128xf32>
    %cst_193 = arith.constant 0.102184989 : f32
    %363 = vector.broadcast %cst_193 : f32 to vector<24x128xf32>
    %364 = arith.mulf %363, %362 : vector<24x128xf32>
    %365 = arith.addf %261, %341 : vector<24x128xf32>
    %cst_194 = arith.constant 0.139670327 : f32
    %366 = vector.broadcast %cst_194 : f32 to vector<24x128xf32>
    %367 = arith.mulf %366, %365 : vector<24x128xf32>
    %368 = arith.addf %364, %367 : vector<24x128xf32>
    %369 = arith.addf %281, %321 : vector<24x128xf32>
    %cst_195 = arith.constant 0.16847457 : f32
    %370 = vector.broadcast %cst_195 : f32 to vector<24x128xf32>
    %371 = arith.mulf %370, %369 : vector<24x128xf32>
    %372 = arith.addf %368, %371 : vector<24x128xf32>
    %cst_196 = arith.constant 0.179340243 : f32
    %373 = vector.broadcast %cst_196 : f32 to vector<24x128xf32>
    %374 = arith.mulf %373, %301 : vector<24x128xf32>
    %375 = arith.addf %372, %374 : vector<24x128xf32>
    %c17_197 = arith.constant 17 : index
    %c0_198 = arith.constant 0 : index
    %c0_199 = arith.constant 0 : index
    %376 = vector.load %arg3[%c17_197, %c0_198, %c0_199] : memref<24x24x128xf32, #tpu.memory_space<vmem>>, vector<1x24x128xf32>
    %377 = vector.shape_cast %376 : vector<1x24x128xf32> to vector<24x128xf32>
    %378 = vector.shape_cast %375 : vector<24x128xf32> to vector<1x24x128xf32>
    tpu.vector_store %arg3[%c17_197, %c0_198, %c0_199], %378 {strides = array<i32>} : memref<24x24x128xf32, #tpu.memory_space<vmem>>, vector<1x24x128xf32>,
    %c23 = arith.constant 23 : index
    %c0_200 = arith.constant 0 : index
    %c0_201 = arith.constant 0 : index
    %379 = vector.load %arg2[%c23, %c0_200, %c0_201] : memref<28x28x128xf32, #tpu.memory_space<vmem>>, vector<1x28x128xf32>
    %380 = vector.shape_cast %379 : vector<1x28x128xf32> to vector<28x128xf32>
    %cst_202 = arith.constant dense<0.000000e+00> : vector<24x128xf32>
    %381 = tpu.matmul %0, %380, %cst_202 {dimension_numbers = #tpu.dot_dimension_numbers<[1], [0], [0], [1], [0, 0, 1, 1], [], []>, precision = #tpu.contract_precision<fp32>} : vector<24x28xf32>, vector<28x128xf32>, vector<24x128xf32> -> vector<24x128xf32>
    %382 = arith.addf %261, %381 : vector<24x128xf32>
    %cst_203 = arith.constant 0.102184989 : f32
    %383 = vector.broadcast %cst_203 : f32 to vector<24x128xf32>
    %384 = arith.mulf %383, %382 : vector<24x128xf32>
    %385 = arith.addf %281, %361 : vector<24x128xf32>
    %cst_204 = arith.constant 0.139670327 : f32
    %386 = vector.broadcast %cst_204 : f32 to vector<24x128xf32>
    %387 = arith.mulf %386, %385 : vector<24x128xf32>
    %388 = arith.addf %384, %387 : vector<24x128xf32>
    %389 = arith.addf %301, %341 : vector<24x128xf32>
    %cst_205 = arith.constant 0.16847457 : f32
    %390 = vector.broadcast %cst_205 : f32 to vector<24x128xf32>
    %391 = arith.mulf %390, %389 : vector<24x128xf32>
    %392 = arith.addf %388, %391 : vector<24x128xf32>
    %cst_206 = arith.constant 0.179340243 : f32
    %393 = vector.broadcast %cst_206 : f32 to vector<24x128xf32>
    %394 = arith.mulf %393, %321 : vector<24x128xf32>
    %395 = arith.addf %392, %394 : vector<24x128xf32>
    %c18_207 = arith.constant 18 : index
    %c0_208 = arith.constant 0 : index
    %c0_209 = arith.constant 0 : index
    %396 = vector.load %arg3[%c18_207, %c0_208, %c0_209] : memref<24x24x128xf32, #tpu.memory_space<vmem>>, vector<1x24x128xf32>
    %397 = vector.shape_cast %396 : vector<1x24x128xf32> to vector<24x128xf32>
    %398 = vector.shape_cast %395 : vector<24x128xf32> to vector<1x24x128xf32>
    tpu.vector_store %arg3[%c18_207, %c0_208, %c0_209], %398 {strides = array<i32>} : memref<24x24x128xf32, #tpu.memory_space<vmem>>, vector<1x24x128xf32>,
    %c24 = arith.constant 24 : index
    %c0_210 = arith.constant 0 : index
    %c0_211 = arith.constant 0 : index
    %399 = vector.load %arg2[%c24, %c0_210, %c0_211] : memref<28x28x128xf32, #tpu.memory_space<vmem>>, vector<1x28x128xf32>
    %400 = vector.shape_cast %399 : vector<1x28x128xf32> to vector<28x128xf32>
    %cst_212 = arith.constant dense<0.000000e+00> : vector<24x128xf32>
    %401 = tpu.matmul %0, %400, %cst_212 {dimension_numbers = #tpu.dot_dimension_numbers<[1], [0], [0], [1], [0, 0, 1, 1], [], []>, precision = #tpu.contract_precision<fp32>} : vector<24x28xf32>, vector<28x128xf32>, vector<24x128xf32> -> vector<24x128xf32>
    %402 = arith.addf %281, %401 : vector<24x128xf32>
    %cst_213 = arith.constant 0.102184989 : f32
    %403 = vector.broadcast %cst_213 : f32 to vector<24x128xf32>
    %404 = arith.mulf %403, %402 : vector<24x128xf32>
    %405 = arith.addf %301, %381 : vector<24x128xf32>
    %cst_214 = arith.constant 0.139670327 : f32
    %406 = vector.broadcast %cst_214 : f32 to vector<24x128xf32>
    %407 = arith.mulf %406, %405 : vector<24x128xf32>
    %408 = arith.addf %404, %407 : vector<24x128xf32>
    %409 = arith.addf %321, %361 : vector<24x128xf32>
    %cst_215 = arith.constant 0.16847457 : f32
    %410 = vector.broadcast %cst_215 : f32 to vector<24x128xf32>
    %411 = arith.mulf %410, %409 : vector<24x128xf32>
    %412 = arith.addf %408, %411 : vector<24x128xf32>
    %cst_216 = arith.constant 0.179340243 : f32
    %413 = vector.broadcast %cst_216 : f32 to vector<24x128xf32>
    %414 = arith.mulf %413, %341 : vector<24x128xf32>
    %415 = arith.addf %412, %414 : vector<24x128xf32>
    %c19_217 = arith.constant 19 : index
    %c0_218 = arith.constant 0 : index
    %c0_219 = arith.constant 0 : index
    %416 = vector.load %arg3[%c19_217, %c0_218, %c0_219] : memref<24x24x128xf32, #tpu.memory_space<vmem>>, vector<1x24x128xf32>
    %417 = vector.shape_cast %416 : vector<1x24x128xf32> to vector<24x128xf32>
    %418 = vector.shape_cast %415 : vector<24x128xf32> to vector<1x24x128xf32>
    tpu.vector_store %arg3[%c19_217, %c0_218, %c0_219], %418 {strides = array<i32>} : memref<24x24x128xf32, #tpu.memory_space<vmem>>, vector<1x24x128xf32>,
    %c25 = arith.constant 25 : index
    %c0_220 = arith.constant 0 : index
    %c0_221 = arith.constant 0 : index
    %419 = vector.load %arg2[%c25, %c0_220, %c0_221] : memref<28x28x128xf32, #tpu.memory_space<vmem>>, vector<1x28x128xf32>
    %420 = vector.shape_cast %419 : vector<1x28x128xf32> to vector<28x128xf32>
    %cst_222 = arith.constant dense<0.000000e+00> : vector<24x128xf32>
    %421 = tpu.matmul %0, %420, %cst_222 {dimension_numbers = #tpu.dot_dimension_numbers<[1], [0], [0], [1], [0, 0, 1, 1], [], []>, precision = #tpu.contract_precision<fp32>} : vector<24x28xf32>, vector<28x128xf32>, vector<24x128xf32> -> vector<24x128xf32>
    %422 = arith.addf %301, %421 : vector<24x128xf32>
    %cst_223 = arith.constant 0.102184989 : f32
    %423 = vector.broadcast %cst_223 : f32 to vector<24x128xf32>
    %424 = arith.mulf %423, %422 : vector<24x128xf32>
    %425 = arith.addf %321, %401 : vector<24x128xf32>
    %cst_224 = arith.constant 0.139670327 : f32
    %426 = vector.broadcast %cst_224 : f32 to vector<24x128xf32>
    %427 = arith.mulf %426, %425 : vector<24x128xf32>
    %428 = arith.addf %424, %427 : vector<24x128xf32>
    %429 = arith.addf %341, %381 : vector<24x128xf32>
    %cst_225 = arith.constant 0.16847457 : f32
    %430 = vector.broadcast %cst_225 : f32 to vector<24x128xf32>
    %431 = arith.mulf %430, %429 : vector<24x128xf32>
    %432 = arith.addf %428, %431 : vector<24x128xf32>
    %cst_226 = arith.constant 0.179340243 : f32
    %433 = vector.broadcast %cst_226 : f32 to vector<24x128xf32>
    %434 = arith.mulf %433, %361 : vector<24x128xf32>
    %435 = arith.addf %432, %434 : vector<24x128xf32>
    %c20_227 = arith.constant 20 : index
    %c0_228 = arith.constant 0 : index
    %c0_229 = arith.constant 0 : index
    %436 = vector.load %arg3[%c20_227, %c0_228, %c0_229] : memref<24x24x128xf32, #tpu.memory_space<vmem>>, vector<1x24x128xf32>
    %437 = vector.shape_cast %436 : vector<1x24x128xf32> to vector<24x128xf32>
    %438 = vector.shape_cast %435 : vector<24x128xf32> to vector<1x24x128xf32>
    tpu.vector_store %arg3[%c20_227, %c0_228, %c0_229], %438 {strides = array<i32>} : memref<24x24x128xf32, #tpu.memory_space<vmem>>, vector<1x24x128xf32>,
    %c26 = arith.constant 26 : index
    %c0_230 = arith.constant 0 : index
    %c0_231 = arith.constant 0 : index
    %439 = vector.load %arg2[%c26, %c0_230, %c0_231] : memref<28x28x128xf32, #tpu.memory_space<vmem>>, vector<1x28x128xf32>
    %440 = vector.shape_cast %439 : vector<1x28x128xf32> to vector<28x128xf32>
    %cst_232 = arith.constant dense<0.000000e+00> : vector<24x128xf32>
    %441 = tpu.matmul %0, %440, %cst_232 {dimension_numbers = #tpu.dot_dimension_numbers<[1], [0], [0], [1], [0, 0, 1, 1], [], []>, precision = #tpu.contract_precision<fp32>} : vector<24x28xf32>, vector<28x128xf32>, vector<24x128xf32> -> vector<24x128xf32>
    %442 = arith.addf %321, %441 : vector<24x128xf32>
    %cst_233 = arith.constant 0.102184989 : f32
    %443 = vector.broadcast %cst_233 : f32 to vector<24x128xf32>
    %444 = arith.mulf %443, %442 : vector<24x128xf32>
    %445 = arith.addf %341, %421 : vector<24x128xf32>
    %cst_234 = arith.constant 0.139670327 : f32
    %446 = vector.broadcast %cst_234 : f32 to vector<24x128xf32>
    %447 = arith.mulf %446, %445 : vector<24x128xf32>
    %448 = arith.addf %444, %447 : vector<24x128xf32>
    %449 = arith.addf %361, %401 : vector<24x128xf32>
    %cst_235 = arith.constant 0.16847457 : f32
    %450 = vector.broadcast %cst_235 : f32 to vector<24x128xf32>
    %451 = arith.mulf %450, %449 : vector<24x128xf32>
    %452 = arith.addf %448, %451 : vector<24x128xf32>
    %cst_236 = arith.constant 0.179340243 : f32
    %453 = vector.broadcast %cst_236 : f32 to vector<24x128xf32>
    %454 = arith.mulf %453, %381 : vector<24x128xf32>
    %455 = arith.addf %452, %454 : vector<24x128xf32>
    %c21_237 = arith.constant 21 : index
    %c0_238 = arith.constant 0 : index
    %c0_239 = arith.constant 0 : index
    %456 = vector.load %arg3[%c21_237, %c0_238, %c0_239] : memref<24x24x128xf32, #tpu.memory_space<vmem>>, vector<1x24x128xf32>
    %457 = vector.shape_cast %456 : vector<1x24x128xf32> to vector<24x128xf32>
    %458 = vector.shape_cast %455 : vector<24x128xf32> to vector<1x24x128xf32>
    tpu.vector_store %arg3[%c21_237, %c0_238, %c0_239], %458 {strides = array<i32>} : memref<24x24x128xf32, #tpu.memory_space<vmem>>, vector<1x24x128xf32>,
    %c27 = arith.constant 27 : index
    %c0_240 = arith.constant 0 : index
    %c0_241 = arith.constant 0 : index
    %459 = vector.load %arg2[%c27, %c0_240, %c0_241] : memref<28x28x128xf32, #tpu.memory_space<vmem>>, vector<1x28x128xf32>
    %460 = vector.shape_cast %459 : vector<1x28x128xf32> to vector<28x128xf32>
    %cst_242 = arith.constant dense<0.000000e+00> : vector<24x128xf32>
    %461 = tpu.matmul %0, %460, %cst_242 {dimension_numbers = #tpu.dot_dimension_numbers<[1], [0], [0], [1], [0, 0, 1, 1], [], []>, precision = #tpu.contract_precision<fp32>} : vector<24x28xf32>, vector<28x128xf32>, vector<24x128xf32> -> vector<24x128xf32>
    %462 = arith.addf %341, %461 : vector<24x128xf32>
    %cst_243 = arith.constant 0.102184989 : f32
    %463 = vector.broadcast %cst_243 : f32 to vector<24x128xf32>
    %464 = arith.mulf %463, %462 : vector<24x128xf32>
    %465 = arith.addf %361, %441 : vector<24x128xf32>
    %cst_244 = arith.constant 0.139670327 : f32
    %466 = vector.broadcast %cst_244 : f32 to vector<24x128xf32>
    %467 = arith.mulf %466, %465 : vector<24x128xf32>
    %468 = arith.addf %464, %467 : vector<24x128xf32>
    %469 = arith.addf %381, %421 : vector<24x128xf32>
    %cst_245 = arith.constant 0.16847457 : f32
    %470 = vector.broadcast %cst_245 : f32 to vector<24x128xf32>
    %471 = arith.mulf %470, %469 : vector<24x128xf32>
    %472 = arith.addf %468, %471 : vector<24x128xf32>
    %cst_246 = arith.constant 0.179340243 : f32
    %473 = vector.broadcast %cst_246 : f32 to vector<24x128xf32>
    %474 = arith.mulf %473, %401 : vector<24x128xf32>
    %475 = arith.addf %472, %474 : vector<24x128xf32>
    %c22_247 = arith.constant 22 : index
    %c0_248 = arith.constant 0 : index
    %c0_249 = arith.constant 0 : index
    %476 = vector.load %arg3[%c22_247, %c0_248, %c0_249] : memref<24x24x128xf32, #tpu.memory_space<vmem>>, vector<1x24x128xf32>
    %477 = vector.shape_cast %476 : vector<1x24x128xf32> to vector<24x128xf32>
    %478 = vector.shape_cast %475 : vector<24x128xf32> to vector<1x24x128xf32>
    tpu.vector_store %arg3[%c22_247, %c0_248, %c0_249], %478 {strides = array<i32>} : memref<24x24x128xf32, #tpu.memory_space<vmem>>, vector<1x24x128xf32>,
    %c26_250 = arith.constant 26 : index
    %c0_251 = arith.constant 0 : index
    %c0_252 = arith.constant 0 : index
    %479 = vector.load %arg2[%c26_250, %c0_251, %c0_252] : memref<28x28x128xf32, #tpu.memory_space<vmem>>, vector<1x28x128xf32>
    %480 = vector.shape_cast %479 : vector<1x28x128xf32> to vector<28x128xf32>
    %cst_253 = arith.constant dense<0.000000e+00> : vector<24x128xf32>
    %481 = tpu.matmul %0, %480, %cst_253 {dimension_numbers = #tpu.dot_dimension_numbers<[1], [0], [0], [1], [0, 0, 1, 1], [], []>, precision = #tpu.contract_precision<fp32>} : vector<24x28xf32>, vector<28x128xf32>, vector<24x128xf32> -> vector<24x128xf32>
    %482 = arith.addf %361, %481 : vector<24x128xf32>
    %cst_254 = arith.constant 0.102184989 : f32
    %483 = vector.broadcast %cst_254 : f32 to vector<24x128xf32>
    %484 = arith.mulf %483, %482 : vector<24x128xf32>
    %485 = arith.addf %381, %461 : vector<24x128xf32>
    %cst_255 = arith.constant 0.139670327 : f32
    %486 = vector.broadcast %cst_255 : f32 to vector<24x128xf32>
    %487 = arith.mulf %486, %485 : vector<24x128xf32>
    %488 = arith.addf %484, %487 : vector<24x128xf32>
    %489 = arith.addf %401, %441 : vector<24x128xf32>
    %cst_256 = arith.constant 0.16847457 : f32
    %490 = vector.broadcast %cst_256 : f32 to vector<24x128xf32>
    %491 = arith.mulf %490, %489 : vector<24x128xf32>
    %492 = arith.addf %488, %491 : vector<24x128xf32>
    %cst_257 = arith.constant 0.179340243 : f32
    %493 = vector.broadcast %cst_257 : f32 to vector<24x128xf32>
    %494 = arith.mulf %493, %421 : vector<24x128xf32>
    %495 = arith.addf %492, %494 : vector<24x128xf32>
    %c23_258 = arith.constant 23 : index
    %c0_259 = arith.constant 0 : index
    %c0_260 = arith.constant 0 : index
    %496 = vector.load %arg3[%c23_258, %c0_259, %c0_260] : memref<24x24x128xf32, #tpu.memory_space<vmem>>, vector<1x24x128xf32>
    %497 = vector.shape_cast %496 : vector<1x24x128xf32> to vector<24x128xf32>
    %498 = vector.shape_cast %495 : vector<24x128xf32> to vector<1x24x128xf32>
    tpu.vector_store %arg3[%c23_258, %c0_259, %c0_260], %498 {strides = array<i32>} : memref<24x24x128xf32, #tpu.memory_space<vmem>>, vector<1x24x128xf32>,
    return
  }
  func.func @transform_0(%arg0: i32) -> (i32, i32) {
    %c0_i32 = arith.constant 0 : i32
    %c0_i32_0 = arith.constant 0 : i32
    %c0_i32_1 = arith.constant 0 : i32
    return %c0_i32, %c0_i32_0 : i32, i32
  }
  func.func @transform_1(%arg0: i32) -> (i32, i32, i32) {
    %c0_i32 = arith.constant 0 : i32
    %c0_i32_0 = arith.constant 0 : i32
    %c0_i32_1 = arith.constant 0 : i32
    return %c0_i32, %c0_i32_0, %arg0 : i32, i32, i32
  }
  func.func @transform_2(%arg0: i32) -> (i32, i32, i32) {
    %c0_i32 = arith.constant 0 : i32
    %c0_i32_0 = arith.constant 0 : i32
    %c0_i32_1 = arith.constant 0 : i32
    return %c0_i32, %c0_i32_0, %arg0 : i32, i32, i32
  }
}

</mosaic_0001>

<bundles_post_ra>
// kernel: tpu_custom_call.1
= control target key start
LH: loop header
LB: loop body
LE: loop exit
PB: predicated region body
PF: predicated region fallthrough
CT: control target
= control target key end

     0   :  { %7 = vsyncpa [#allocation3], 0  ;;  %s29353_s0 = inlined_call_operand.hbm [shape: f32[24,28], index: 0, kind: input, shape index: {}]   ;;  %s29354_s1 = inlined_call_operand.hbm [shape: f32[28,28,128], index: 1, kind: input, shape index: {}]   ;;  %s29355_s2 = inlined_call_operand.hbm [shape: f32[24,24,128], index: 2, kind: output, shape index: {}]  }
   0x1   :  { %8 = vsyncpa [#allocation6], 0 }
   0x2   :  { %9 = vsyncpa [#allocation4], 0  ;;  %s24597_s9 = smov [#allocation2]   ;;  %s24525_s13 = scalar_lea.hbm %s29353_s0, 384 }
   0x3   :  { %s15_s10 = sshll.u32 %s24597_s9, 4  ;;  %p24526_p0 = scmp.ne.s32.totalorder %s29353_s0, %s24525_s13  ;;  %s16_s10 = int_to_ptr.vmem [resolvable:$true] %s15_s10 }
   0x4   :  { %p24529_p1 = scmp.lt.u32.totalorder %s24525_s13, %s29353_s0 }
   0x6   :  { %p24531_p2 = pnand %p24529_p1, %p24526_p0 }
   0x8   :  { %24534 = shalt.err (!%p24531_p2)
}
   0x9   :  { %s24535_s18 = scalar_lea.vmem %s16_s10, 384  ;;  %p24540_p4 = scmp.lt.s32.totalorder %s16_s10, %s16_s10 }
   0xa   :  { %p24536_p3 = scmp.ne.s32.totalorder %s16_s10, %s24535_s18  ;;  %p24541_p5 = scmp.lt.s32.totalorder %s24535_s18, %s24535_s18 }
   0xc   :  { %p24542_p6 = por %p24541_p5, %p24540_p4 }
   0xe   :  { %p24543_p7 = pnand %p24542_p6, %p24536_p3 }
  0x10   :  { %24546 = shalt.err (!%p24543_p7)
}
  0x11   :  { %s24598_s19 = smov 128   ;;  %s24599_s20 = smov 8  }
  0x12   :  { %21 = dma.hbm_to_vmem [thread:$0]  %s29353_s0, 384, %s16_s10, [#allocation3], %s24598_s19, %s24598_s19, %s24599_s20  }
  0x13   :  { %s24600_s23 = smov [#allocation5]   ;;  %s24547_s27 = scalar_lea.hbm %s29354_s1, 14336 }
  0x14   :  { %s27_s24 = sshll.u32 %s24600_s23, 4  ;;  %p24548_p8 = scmp.ne.s32.totalorder %s29354_s1, %s24547_s27  ;;  %s28_s24 = int_to_ptr.vmem [resolvable:$true] %s27_s24 }
  0x15   :  { %p24551_p9 = scmp.lt.u32.totalorder %s24547_s27, %s29354_s1 }
  0x17   :  { %p24553_p10 = pnand %p24551_p9, %p24548_p8 }
  0x19   :  { %24556 = shalt.err (!%p24553_p10)
}
  0x1a   :  { %s24557_s4 = scalar_lea.vmem %s28_s24, 14336  ;;  %p24562_p12 = scmp.lt.s32.totalorder %s28_s24, %s28_s24 }
  0x1b   :  { %p24558_p11 = scmp.ne.s32.totalorder %s28_s24, %s24557_s4  ;;  %p24563_p13 = scmp.lt.s32.totalorder %s24557_s4, %s24557_s4 }
  0x1d   :  { %p24564_p0 = por %p24563_p13, %p24562_p12 }
  0x1f   :  { %p24565_p1 = pnand %p24564_p0, %p24558_p11 }
  0x21   :  { %24568 = shalt.err (!%p24565_p1)
}
  0x22   :  { %33 = dma.hbm_to_vmem [thread:$0]  %s29354_s1, 14336, %s28_s24, [#allocation6], %s24598_s19, %s24598_s19, %s24599_s20  }
  0x23   :  { %24591 = dma.done.wait [#allocation3], 384  }
  0x24   :  { %24592 = vsyncadd [#allocation3], 4294966912 }
  0x25   :  { %24593 = dma.done.wait [#allocation6], 14336  }
  0x26   :  { %24594 = vsyncadd [#allocation6], 4294952960  ;;  %v29364_v0 = vmov 0.0|0.0   ;;  %vm24602_vm0 = vmmov 0   ;;  %v29362_v1 = vmov 0.0   ;;  %v48_v2 = vld [vmem:[#allocation5] sm:$0xff] }
  0x27   :  { %22564 = vmatprep.subr.bf16.mxu0 %v29364_v0  ;;  %22600 = vmatprep.subr.bf16.mxu1 %v29364_v0  ;;  %v49_v3 = vld [vmem:[#allocation5 + $0x8] sm:$0xff]  ;;  %v44_v4 = vld [vmem:[#allocation5 + $0x20] sm:$0xff]  ;;  %vm62_vm1 = vcmask 1043456   ;;  %vm52_vm2 = vcmask 228352   ;;  %v67_v5 = vand.u32 4294901760, %v48_v2  ;;  %v50_v9 = vld [vmem:[#allocation5 + $0x10] sm:$0xff] }
  0x28   :  { %19512 = vmatprep.mubr.msk.f32.mxu0 %vm24602_vm0, %v29362_v1  ;;  %19614 = vmatprep.mubr.msk.f32.mxu1 %vm24602_vm0, %v29362_v1  ;;  %v70_v6 = vand.u32 4294901760, %v49_v3  ;;  %v45_v7 = vld [vmem:[#allocation5 + $0x28] sm:$0xff]  ;;  %v641_v8 = vand.u32 4294901760, %v44_v4  ;;  %v46_v10 = vld [vmem:[#allocation5 + $0x30] sm:$0xff]  ;;  %v51_v12 = vld [vmem:[#allocation5 + $0x18] sm:$0xf] }
  0x29   :  { %v644_v11 = vand.u32 4294901760, %v45_v7  ;;  %v73_v13 = vand.u32 4294901760, %v50_v9  ;;  %v47_v14 = vld [vmem:[#allocation5 + $0x38] sm:$0xf]  ;;  %v24658_v16 = vsub.f32 %v48_v2, %v67_v5  ;;  %v64_v18 = vsel %vm62_vm1, %v51_v12, 0  ;;  %v40_v19 = vld [vmem:[#allocation2] sm:$0xff] }
  0x2a   :  { %v24656_v15 = vpack.c.bf16 %v70_v6, %v67_v5  ;;  %v24660_v17 = vsub.f32 %v49_v3, %v70_v6  ;;  %v76_v21 = vand.u32 4294901760, %v64_v18  ;;  %v638_v23 = vsel %vm62_vm1, %v47_v14, 0  ;;  %v41_v28 = vld [vmem:[#allocation2 + $0x8] sm:$0xff]  ;;  %v42_v49 = vld [vmem:[#allocation2 + $0x10] sm:$0xff]  ;;  %s24604_s1 = smov [#allocation7]  }
  0x2b   :  { %v24663_v20 = vpack.c.bf16 %v644_v11, %v641_v8  ;;  %v24665_v22 = vsub.f32 %v50_v9, %v73_v13  ;;  %v647_v24 = vand.u32 4294901760, %v46_v10  ;;  %v650_v25 = vand.u32 4294901760, %v638_v23  ;;  %s18231_s6 = sshll.u32 %s24604_s1, 4  ;;  %s18232_s6 = int_to_ptr.vmem [resolvable:$true] %s18231_s6 }
  0x2c   :  { %22566 = vmatpush3.bf16.msra.mxu0 %v24656_v15  ;;  %v54_v26 = vsel %vm52_vm2, %v40_v19, 0  ;;  %v24670_v27 = vsub.f32 %v44_v4, %v641_v8  ;;  %v24674_v29 = vpack.c.bf16 %v76_v21, %v73_v13  ;;  %v24676_v30 = vsub.f32 %v64_v18, %v76_v21  ;;  %s24569_s7 = scalar_lea.vmem %s18232_s6, 9216  ;;  %p24574_p3 = scmp.lt.s32.totalorder %s18232_s6, %s18232_s6 }
  0x2d   :  { %22602 = vmatpush3.bf16.msra.mxu1 %v24663_v20  ;;  %22567 = vmatprep.subr.bf16.mxu0 %v29364_v0  ;;  %v24678_v31 = vand.u32 4294901760, %v54_v26  ;;  %v24680_v32 = vsub.f32 %v45_v7, %v644_v11  ;;  %v24683_v33 = vpack.c.bf16 %v650_v25, %v647_v24  ;;  %v168_v35 = vand.u32 4294901760, %v24658_v16  ;;  %p24570_p2 = scmp.ne.s32.totalorder %s18232_s6, %s24569_s7  ;;  %p24575_p4 = scmp.lt.s32.totalorder %s24569_s7, %s24569_s7 }
  0x2e   :  { %22603 = vmatprep.subr.bf16.mxu1 %v29364_v0  ;;  %v742_v34 = vand.u32 4294901760, %v24670_v27  ;;  %v175_v36 = vand.u32 4294901760, %v24660_v17  ;;  %v57_v39 = vsel %vm52_vm2, %v41_v28, 0  ;;  %v24693_v40 = vsub.f32 %v46_v10, %v647_v24 }
  0x2f   :  { %v24689_v37 = vsub.f32 %v54_v26, %v24678_v31  ;;  %v749_v38 = vand.u32 4294901760, %v24680_v32  ;;  %v169_v42 = vsub.f32 %v24658_v16, %v168_v35  ;;  %v24705_v44 = vand.u32 4294901760, %v57_v39  ;;  %p24576_p5 = por %p24575_p4, %p24574_p3 }
  0x30   :  { %22569 = vmatpush3.bf16.msra.mxu0 %v24674_v29  ;;  %v743_v41 = vsub.f32 %v24670_v27, %v742_v34  ;;  %v176_v43 = vsub.f32 %v24660_v17, %v175_v36  ;;  %v756_v47 = vand.u32 4294901760, %v24693_v40  ;;  %v24716_v48 = vsub.f32 %v638_v23, %v650_v25 }
  0x31   :  { %22605 = vmatpush3.bf16.msra.mxu1 %v24683_v33  ;;  %v24709_v45 = vand.u32 4294901760, %v24689_v37  ;;  %v750_v46 = vsub.f32 %v24680_v32, %v749_v38  ;;  %22570 = vmatprep.subr.bf16.mxu0 %v29364_v0  ;;  %v170_v51 = vand.u32 4294901760, %v169_v42  ;;  %v24720_v53 = vsub.f32 %v57_v39, %v24705_v44  ;;  %p24577_p6 = pnand %p24576_p5, %p24570_p2 }
  0x32   :  { %22606 = vmatprep.subr.bf16.mxu1 %v29364_v0  ;;  %v744_v50 = vand.u32 4294901760, %v743_v41  ;;  %v177_v52 = vand.u32 4294901760, %v176_v43  ;;  %v757_v56 = vsub.f32 %v24693_v40, %v756_v47  ;;  %v763_v57 = vand.u32 4294901760, %v24716_v48 }
  0x33   :  { %29527 = vst [vmem:[#allocation11_spill] sm:$0xff] %v24709_v45  ;;  %29528 = vst [vmem:[#allocation12_spill] sm:$0xff] %v24720_v53  ;;  %v138_v54 = vsub.f32 %v24689_v37, %v24709_v45  ;;  %v751_v55 = vand.u32 4294901760, %v750_v46  ;;  %v24729_v59 = vand.u32 4294901760, %v24720_v53  ;;  %v60_v60 = vsel %vm52_vm2, %v42_v49, 0  ;;  %v1214_v49 = vld [vmem:[#allocation5 + $0x50] sm:$0xff] }
  0x34   :  { %v22571_v58 = vpack.c.bf16 %v177_v52, %v170_v51  ;;  %v182_v61 = vand.u32 4294901760, %v24665_v22  ;;  %v758_v2 = vand.u32 4294901760, %v757_v56  ;;  %v764_v3 = vsub.f32 %v24716_v48, %v763_v57 }
  0x35   :  { %29529 = vst [vmem:[#allocation13_spill] sm:$0xff] %v24729_v59  ;;  %v24733_v62 = vand.u32 4294901760, %v138_v54  ;;  %v24735_v63 = vpack.c.bf16 %v751_v55, %v744_v50  ;;  %v148_v4 = vsub.f32 %v24720_v53, %v24729_v59  ;;  %v24742_v5 = vand.u32 4294901760, %v60_v60 }
  0x36   :  { %v183_v6 = vsub.f32 %v24665_v22, %v182_v61  ;;  %v189_v7 = vand.u32 4294901760, %v24676_v30  ;;  %v765_v8 = vand.u32 4294901760, %v764_v3  ;;  %v24791_v24 = vpack.c.bf16 %v24680_v32, %v24670_v27  ;;  %v1792_v27 = vld [vmem:[#allocation5 + $0x68] sm:$0xff] }
  0x37   :  { %19513 = vmatmul.mubr.f32.vlgmr.msra.gmra.mrb[0].mxu0 %v24733_v62  ;;  %19615 = vmatmul.mubr.f32.vlgmr.msra.gmra.mrb[0].mxu1 %v24733_v62  ;;  %v24753_v9 = vand.u32 4294901760, %v148_v4  ;;  %v24756_v10 = vsub.f32 %v60_v60, %v24742_v5  ;;  %v22577_v25 = vpack.c.bf16 %v24660_v17, %v24658_v16  ;;  %v24804_v26 = vpack.c.bf16 %v24716_v48, %v24693_v40  ;;  %v1213_v32 = vld [vmem:[#allocation5 + $0x48] sm:$0xff] }
  0x38   :  { %22608 = vmatpush3.bf16.msra.mxu1 %v24735_v63  ;;  %19515 = vmatprep.mubr.msk.f32.mxu0 %vm24602_vm0, %v29362_v1  ;;  %v184_v11 = vand.u32 4294901760, %v183_v6  ;;  %v190_v12 = vsub.f32 %v24676_v30, %v189_v7  ;;  %v24763_v13 = vpack.c.bf16 %v765_v8, %v758_v2  ;;  %v22580_v28 = vpack.c.bf16 %v24676_v30, %v24665_v22  ;;  %v1791_v22 = vld [vmem:[#allocation5 + $0x60] sm:$0xff] }
  0x39   :  { %29530 = vst [vmem:[#allocation14_spill] sm:$0xff] %v24756_v10  ;;  %22572 = vmatpush3.bf16.msra.mxu0 %v22571_v58  ;;  %19617 = vmatprep.mubr.msk.f32.mxu1 %vm24602_vm0, %v29362_v1  ;;  %v24767_v14 = vand.u32 4294901760, %v24756_v10  ;;  %v24855_v39 = vpack.c.bf16 %v749_v38, %v742_v34  ;;  %v22589_v41 = vpack.c.bf16 %v175_v36, %v168_v35  ;;  %v1212_v30 = vld [vmem:[#allocation5 + $0x40] sm:$0xff]  ;;  %v1799_v34 = vand.u32 4294901760, %v1791_v22  ;;  %v1794_v35 = vld [vmem:[#allocation5 + $0x78] sm:$0xf] }
  0x3a   :  { %22609 = vmatprep.subr.bf16.mxu1 %v29364_v0  ;;  %22573 = vmatprep.subr.bf16.mxu0 %v29364_v0  ;;  %v191_v18 = vand.u32 4294901760, %v190_v12  ;;  %v24872_v16 = vpack.c.bf16 %v763_v57, %v756_v47  ;;  %v22592_v17 = vpack.c.bf16 %v189_v7, %v182_v61  ;;  %v1215_v36 = vld [vmem:[#allocation5 + $0x58] sm:$0xf]  ;;  %v1802_v38 = vand.u32 4294901760, %v1792_v27 }
  0x3b   :  { %29531 = vst [vmem:[#allocation15_spill] sm:$0xff] %v24767_v14  ;;  %19516 = vmatmul.mubr.f32.gmra.mrb[2].mxu0 %v24753_v9  ;;  %19618 = vmatmul.mubr.f32.gmra.mrb[2].mxu1 %v24753_v9  ;;  %v158_v19 = vsub.f32 %v24756_v10, %v24767_v14  ;;  %v1220_v40 = vand.u32 4294901760, %v1212_v30  ;;  %v24907_v42 = vsub.f32 %v1791_v22, %v1799_v34  ;;  %v1223_v43 = vand.u32 4294901760, %v1213_v32 }
  0x3c   :  { %19518 = vmatprep.mubr.msk.f32.mxu0 %vm24602_vm0, %v29362_v1  ;;  %19620 = vmatprep.mubr.msk.f32.mxu1 %vm24602_vm0, %v29362_v1  ;;  %v22574_v21 = vpack.c.bf16 %v191_v18, %v184_v11  ;;  %v24913_v46 = vsub.f32 %v1792_v27, %v1802_v38  ;;  %v1796_v48 = vsel %vm62_vm1, %v1794_v35, 0  ;;  %v1217_v50 = vsel %vm62_vm1, %v1215_v36, 0 }
  0x3d   :  { %22611 = vmatpush3.bf16.msra.mxu1 %v24763_v13  ;;  %v24779_v23 = vand.u32 4294901760, %v158_v19  ;;  %v24915_v47 = vsub.f32 %v1212_v30, %v1220_v40  ;;  %v24921_v51 = vsub.f32 %v1213_v32, %v1223_v43  ;;  %v24924_v52 = vpack.c.bf16 %v1802_v38, %v1799_v34 }
  0x3e   :  { %22575 = vmatpush3.bf16.msra.mxu0 %v22574_v21  ;;  %22612 = vmatprep.subr.bf16.mxu1 %v29364_v0  ;;  %v1808_v55 = vand.u32 4294901760, %v1796_v48  ;;  %v1226_v56 = vand.u32 4294901760, %v1214_v49  ;;  %v1229_v57 = vand.u32 4294901760, %v1217_v50  ;;  %v1900_v58 = vand.u32 4294901760, %v24907_v42 }
  0x3f   :  { %22576 = vmatprep.subr.bf16.mxu0 %v29364_v0  ;;  %19519 = vmatmul.mubr.f32.gmra.mrb[4].mxu0 %v24779_v23  ;;  %v1907_v61 = vand.u32 4294901760, %v24913_v46  ;;  %v1321_v2 = vand.u32 4294901760, %v24915_v47  ;;  %v1328_v7 = vand.u32 4294901760, %v24921_v51 }
  0x40   :  { %19621 = vmatmul.mubr.f32.gmra.mrb[4].mxu1 %v24779_v23  ;;  %19529 = vmatprep.mubr.msk.f32.mxu0 %vm24602_vm0, %v29362_v1  ;;  %v24940_v3 = vsub.f32 %v1796_v48, %v1808_v55  ;;  %v24942_v4 = vsub.f32 %v1214_v49, %v1226_v56  ;;  %v24944_v6 = vsub.f32 %v1217_v50, %v1229_v57 }
  0x41   :  { %19631 = vmatprep.mubr.msk.f32.mxu1 %vm24602_vm0, %v29362_v1  ;;  %v1901_v11 = vsub.f32 %v24907_v42, %v1900_v58  ;;  %v24957_v12 = vpack.c.bf16 %v1229_v57, %v1226_v56  ;;  %v1908_v18 = vsub.f32 %v24913_v46, %v1907_v61  ;;  %v1322_v19 = vsub.f32 %v24915_v47, %v1321_v2 }
  0x42   :  { %v22685_v56 = vpack.c.bf16 %v24913_v46, %v24907_v42  ;;  %v22649_v57 = vpack.c.bf16 %v24921_v51, %v24915_v47  ;;  %v2949_v47 = vld [vmem:[#allocation5 + $0xa0] sm:$0xff] }
  0x43   :  { %19530 = vmatmul.mubr.f32.vlgmr.msra.gmra.mrb[0].mxu0 %v24678_v31  ;;  %v1902_v22 = vand.u32 4294901760, %v1901_v11  ;;  %v1909_v27 = vand.u32 4294901760, %v1908_v18  ;;  %v1323_v30 = vand.u32 4294901760, %v1322_v19  ;;  %v22652_v18 = vpack.c.bf16 %v24944_v6, %v24942_v4 }
  0x44   :  { %19632 = vmatmul.mubr.f32.vlgmr.msra.gmra.mrb[0].mxu1 %v24678_v31  ;;  %19532 = vmatprep.mubr.msk.f32.mxu0 %vm24602_vm0, %v29362_v1  ;;  %v22697_v19 = vpack.c.bf16 %v1907_v61, %v1900_v58  ;;  %v2370_v58 = vld [vmem:[#allocation5 + $0x80] sm:$0xff]  ;;  %v2957_v61 = vand.u32 4294901760, %v2949_v47 }
  0x45   :  { %22614 = vmatpush3.bf16.msra.mxu1 %v24791_v24  ;;  %22578 = vmatpush3.bf16.msra.mxu0 %v22577_v25  ;;  %v1329_v25 = vsub.f32 %v24921_v51, %v1328_v7  ;;  %v2950_v51 = vld [vmem:[#allocation5 + $0xa8] sm:$0xff] }
  0x46   :  { %19634 = vmatprep.mubr.msk.f32.mxu1 %vm24602_vm0, %v29362_v1  ;;  %22615 = vmatprep.subr.bf16.mxu1 %v29364_v0 }
  0x47   :  { %22579 = vmatprep.subr.bf16.mxu0 %v29364_v0  ;;  %19533 = vmatmul.mubr.f32.gmra.mrb[2].mxu0 %v24705_v44  ;;  %v1330_v34 = vand.u32 4294901760, %v1329_v25  ;;  %v22661_v25 = vpack.c.bf16 %v1328_v7, %v1321_v2  ;;  %v2952_v2 = vld [vmem:[#allocation5 + $0xb8] sm:$0xf] }
  0x48   :  { %19635 = vmatmul.mubr.f32.gmra.mrb[2].mxu1 %v24705_v44  ;;  %19535 = vmatprep.mubr.msk.f32.mxu0 %vm24602_vm0, %v29362_v1 }
  0x49   :  { %19637 = vmatprep.mubr.msk.f32.mxu1 %vm24602_vm0, %v29362_v1  ;;  %22617 = vmatpush3.bf16.msra.mxu1 %v24804_v26 }
  0x4a   :  { %22581 = vmatpush3.bf16.msra.mxu0 %v22580_v28  ;;  %22618 = vmatprep.subr.bf16.mxu1 %v29364_v0  ;;  %v1921_v28 = vand.u32 4294901760, %v24940_v3 }
  0x4b   :  { %22582 = vmatprep.subr.bf16.mxu0 %v29364_v0  ;;  %19536 = vmatmul.mubr.f32.gmra.mrb[4].mxu0 %v24742_v5 }
  0x4c   :  { %19638 = vmatmul.mubr.f32.gmra.mrb[4].mxu1 %v24742_v5  ;;  %19546 = vmatprep.mubr.msk.f32.mxu0 %vm24602_vm0, %v29362_v1  ;;  %v1922_v35 = vsub.f32 %v24940_v3, %v1921_v28 }
  0x4d   :  { %19648 = vmatprep.mubr.msk.f32.mxu1 %vm24602_vm0, %v29362_v1 }
  0x4e   :  { %v1923_v48 = vand.u32 4294901760, %v1922_v35 }
  0x4f   :  { %19547 = vmatmul.mubr.f32.vlgmr.msra.gmra.mrb[0].mxu0 %v24689_v37 }
  0x50   :  { %19649 = vmatmul.mubr.f32.vlgmr.msra.gmra.mrb[0].mxu1 %v24689_v37  ;;  %19549 = vmatprep.mubr.msk.f32.mxu0 %vm24602_vm0, %v29362_v1 }
  0x51   :  { %22620 = vmatpush3.bf16.msra.mxu1 %v24663_v20  ;;  %22584 = vmatpush3.bf16.msra.mxu0 %v24656_v15 }
  0x52   :  { %19651 = vmatprep.mubr.msk.f32.mxu1 %vm24602_vm0, %v29362_v1  ;;  %22621 = vmatprep.subr.bf16.mxu1 %v29364_v0 }
  0x53   :  { %22585 = vmatprep.subr.bf16.mxu0 %v29364_v0  ;;  %19550 = vmatmul.mubr.f32.gmra.mrb[2].mxu0 %v24720_v53 }
  0x54   :  { %19652 = vmatmul.mubr.f32.gmra.mrb[2].mxu1 %v24720_v53  ;;  %19552 = vmatprep.mubr.msk.f32.mxu0 %vm24602_vm0, %v29362_v1 }
  0x55   :  { %19654 = vmatprep.mubr.msk.f32.mxu1 %vm24602_vm0, %v29362_v1  ;;  %22623 = vmatpush3.bf16.msra.mxu1 %v24683_v33 }
  0x56   :  { %22587 = vmatpush3.bf16.msra.mxu0 %v24674_v29  ;;  %22624 = vmatprep.subr.bf16.mxu1 %v29364_v0 }
  0x57   :  { %22588 = vmatprep.subr.bf16.mxu0 %v29364_v0  ;;  %19553 = vmatmul.mubr.f32.gmra.mrb[4].mxu0 %v24756_v10 }
  0x58   :  { %19655 = vmatmul.mubr.f32.gmra.mrb[4].mxu1 %v24756_v10  ;;  %19563 = vmatprep.mubr.msk.f32.mxu0 %vm24602_vm0, %v29362_v1 }
  0x59   :  { %19665 = vmatprep.mubr.msk.f32.mxu1 %vm24602_vm0, %v29362_v1 }
  0x5b   :  { %19564 = vmatmul.mubr.f32.vlgmr.msra.gmra.mrb[0].mxu0 %v24709_v45 }
  0x5c   :  { %19666 = vmatmul.mubr.f32.vlgmr.msra.gmra.mrb[0].mxu1 %v24709_v45  ;;  %19566 = vmatprep.mubr.msk.f32.mxu0 %vm24602_vm0, %v29362_v1 }
  0x5d   :  { %22626 = vmatpush3.bf16.msra.mxu1 %v24855_v39  ;;  %22590 = vmatpush3.bf16.msra.mxu0 %v22589_v41  ;;  %v1335_v41 = vand.u32 4294901760, %v24942_v4 }
  0x5e   :  { %19668 = vmatprep.mubr.msk.f32.mxu1 %vm24602_vm0, %v29362_v1  ;;  %22627 = vmatprep.subr.bf16.mxu1 %v29364_v0 }
  0x5f   :  { %22591 = vmatprep.subr.bf16.mxu0 %v29364_v0  ;;  %19567 = vmatmul.mubr.f32.gmra.mrb[2].mxu0 %v24729_v59  ;;  %v1336_v36 = vsub.f32 %v24942_v4, %v1335_v41  ;;  %v2960_v4 = vand.u32 4294901760, %v2950_v51 }
  0x60   :  { %19669 = vmatmul.mubr.f32.gmra.mrb[2].mxu1 %v24729_v59  ;;  %19569 = vmatprep.mubr.msk.f32.mxu0 %vm24602_vm0, %v29362_v1 }
  0x61   :  { %19671 = vmatprep.mubr.msk.f32.mxu1 %vm24602_vm0, %v29362_v1  ;;  %22629 = vmatpush3.bf16.msra.mxu1 %v24872_v16  ;;  %v1337_v49 = vand.u32 4294901760, %v1336_v36 }
  0x62   :  { %22593 = vmatpush3.bf16.msra.mxu0 %v22592_v17  ;;  %22630 = vmatprep.subr.bf16.mxu1 %v29364_v0  ;;  %v1342_v17 = vand.u32 4294901760, %v24944_v6 }
  0x63   :  { %22594 = vmatprep.subr.bf16.mxu0 %v29364_v0  ;;  %19570 = vmatmul.mubr.f32.gmra.mrb[4].mxu0 %v24767_v14 }
  0x64   :  { %19672 = vmatmul.mubr.f32.gmra.mrb[4].mxu1 %v24767_v14  ;;  %19580 = vmatprep.mubr.msk.f32.mxu0 %vm24602_vm0, %v29362_v1  ;;  %v1343_v38 = vsub.f32 %v24944_v6, %v1342_v17  ;;  %v22664_v46 = vpack.c.bf16 %v1342_v17, %v1335_v41  ;;  %v2378_v6 = vand.u32 4294901760, %v2370_v58  ;;  %v2954_v41 = vsel %vm62_vm1, %v2952_v2, 0  ;;  %v2372_v17 = vld [vmem:[#allocation5 + $0x90] sm:$0xff] }
  0x65   :  { %19682 = vmatprep.mubr.msk.f32.mxu1 %vm24602_vm0, %v29362_v1  ;;  %v2966_v35 = vand.u32 4294901760, %v2954_v41  ;;  %v2384_v36 = vand.u32 4294901760, %v2372_v17 }
  0x66   :  { %v1344_v50 = vand.u32 4294901760, %v1343_v38 }
  0x67   :  { %19581 = vmatmul.mubr.f32.vlgmr.msra.gmra.mrb[0].mxu0 %v24678_v31 }
  0x68   :  { %19683 = vmatmul.mubr.f32.vlgmr.msra.gmra.mrb[0].mxu1 %v24678_v31  ;;  %19583 = vmatprep.mubr.msk.f32.mxu0 %vm24602_vm0, %v29362_v1 }
  0x69   :  { %22632 = vmatpush3.bf16.msra.mxu1 %v24663_v20  ;;  %22596 = vmatpush3.bf16.msra.mxu0 %v24656_v15  ;;  %v1793_v15 = vld [vmem:[#allocation5 + $0x70] sm:$0xff] }
  0x6a   :  { %19685 = vmatprep.mubr.msk.f32.mxu1 %vm24602_vm0, %v29362_v1  ;;  %22633 = vmatprep.subr.bf16.mxu1 %v29364_v0  ;;  %v1805_v54 = vand.u32 4294901760, %v1793_v15 }
  0x6b   :  { %22597 = vmatprep.subr.bf16.mxu0 %v29364_v0  ;;  %19584 = vmatmul.mubr.f32.gmra.mrb[2].mxu0 %v24705_v44 }
  0x6c   :  { %19686 = vmatmul.mubr.f32.gmra.mrb[2].mxu1 %v24705_v44  ;;  %19586 = vmatprep.mubr.msk.f32.mxu0 %vm24602_vm0, %v29362_v1  ;;  %v24936_v60 = vsub.f32 %v1793_v15, %v1805_v54  ;;  %v24949_v8 = vpack.c.bf16 %v1808_v55, %v1805_v54  ;;  %v22643_v15 = vpack.c.bf16 %v1330_v34, %v1323_v30 }
  0x6d   :  { %19688 = vmatprep.mubr.msk.f32.mxu1 %vm24602_vm0, %v29362_v1  ;;  %22635 = vmatpush3.bf16.msra.mxu1 %v24683_v33  ;;  %v22646_v55 = vpack.c.bf16 %v1344_v50, %v1337_v49  ;;  %v25150_v30 = vpack.c.bf16 %v2960_v4, %v2957_v61 }
  0x6e   :  { %22599 = vmatpush3.bf16.msra.mxu0 %v24674_v29  ;;  %22672 = vmatprep.subr.bf16.mxu1 %v29364_v0  ;;  %v24934_v29 = vpack.c.bf16 %v1223_v43, %v1220_v40  ;;  %v1914_v21 = vand.u32 4294901760, %v24936_v60  ;;  %v22679_v40 = vpack.c.bf16 %v1909_v27, %v1902_v22  ;;  %v22688_v11 = vpack.c.bf16 %v24940_v3, %v24936_v60  ;;  %v2373_v3 = vld [vmem:[#allocation5 + $0x98] sm:$0xf] }
  0x6f   :  { %22636 = vmatprep.subr.bf16.mxu0 %v29364_v0  ;;  %19587 = vmatmul.mubr.f32.gmra.mrb[4].mxu0 %v24742_v5  ;;  %v2375_v22 = vsel %vm62_vm1, %v2373_v3, 0 }
  0x70   :  { %19689 = vmatmul.mubr.f32.gmra.mrb[4].mxu1 %v24742_v5  ;;  %19597 = vmatprep.mubr.msk.f32.mxu0 %vm24602_vm0, %v29362_v1  ;;  %v1915_v32 = vsub.f32 %v24936_v60, %v1914_v21  ;;  %v22700_v42 = vpack.c.bf16 %v1921_v28, %v1914_v21  ;;  %v2371_v60 = vld [vmem:[#allocation5 + $0x88] sm:$0xff]  ;;  %v25139_v21 = vsub.f32 %v2950_v51, %v2960_v4 }
  0x71   :  { %19699 = vmatprep.mubr.msk.f32.mxu1 %vm24602_vm0, %v29362_v1  ;;  %v2381_v7 = vand.u32 4294901760, %v2371_v60  ;;  %v25141_v28 = vsub.f32 %v2370_v58, %v2378_v6 }
  0x72   :  { %v1916_v43 = vand.u32 4294901760, %v1915_v32 }
  0x73   :  { %19598 = vmatmul.mubr.f32.vlgmr.msra.gmra.mrb[0].mxu0 %v24678_v31  ;;  %v25147_v27 = vsub.f32 %v2371_v60, %v2381_v7  ;;  %v25155_v34 = vpack.c.bf16 %v2381_v7, %v2378_v6 }
  0x74   :  { %19700 = vmatmul.mubr.f32.vlgmr.msra.gmra.mrb[0].mxu1 %v24678_v31  ;;  %19600 = vmatprep.mubr.msk.f32.mxu0 %vm24602_vm0, %v29362_v1  ;;  %v22682_v54 = vpack.c.bf16 %v1923_v48, %v1916_v43  ;;  %v2479_v43 = vand.u32 4294901760, %v25141_v28  ;;  %v25168_v48 = vsub.f32 %v2372_v17, %v2384_v36 }
  0x75   :  { %22674 = vmatpush3.bf16.msra.mxu1 %v24924_v52  ;;  %19702 = vmatprep.mubr.msk.f32.mxu1 %vm24602_vm0, %v29362_v1  ;;  %v2486_v50 = vand.u32 4294901760, %v25147_v27 }
  0x76   :  { %22638 = vmatpush3.bf16.msra.mxu0 %v24934_v29  ;;  %22675 = vmatprep.subr.bf16.mxu1 %v29364_v0 }
  0x77   :  { %22639 = vmatprep.subr.bf16.mxu0 %v29364_v0  ;;  %19601 = vmatmul.mubr.f32.gmra.mrb[2].mxu0 %v24705_v44 }
  0x78   :  { %19703 = vmatmul.mubr.f32.gmra.mrb[2].mxu1 %v24705_v44  ;;  %19603 = vmatprep.mubr.msk.f32.mxu0 %vm24602_vm0, %v29362_v1 }
  0x79   :  { %19705 = vmatprep.mubr.msk.f32.mxu1 %vm24602_vm0, %v29362_v1  ;;  %22677 = vmatpush3.bf16.msra.mxu1 %v24949_v8 }
  0x7a   :  { %22641 = vmatpush3.bf16.msra.mxu0 %v24957_v12  ;;  %22678 = vmatprep.subr.bf16.mxu1 %v29364_v0 }
  0x7b   :  { %22642 = vmatprep.subr.bf16.mxu0 %v29364_v0  ;;  %19604 = vmatmul.mubr.f32.gmra.mrb[4].mxu0 %v24742_v5 }
  0x7c   :  { %19706 = vmatmul.mubr.f32.gmra.mrb[4].mxu1 %v24742_v5  ;;  %19716 = vmatprep.mubr.msk.f32.mxu0 %vm24602_vm0, %v29362_v1 }
  0x7d   :  { %19818 = vmatprep.mubr.msk.f32.mxu1 %vm24602_vm0, %v29362_v1 }
  0x7f   :  { %19717 = vmatmul.mubr.f32.vlgmr.msra.gmra.mrb[6].mxu0 %v24733_v62 }
  0x80   :  { %19819 = vmatmul.mubr.f32.vlgmr.msra.gmra.mrb[6].mxu1 %v24733_v62  ;;  %19719 = vmatprep.mubr.msk.f32.mxu0 %vm24602_vm0, %v29362_v1 }
  0x81   :  { %22680 = vmatpush3.bf16.msra.mxu1 %v22679_v40  ;;  %22644 = vmatpush3.bf16.msra.mxu0 %v22643_v15  ;;  %v3065_v40 = vand.u32 4294901760, %v25139_v21  ;;  %v25166_v15 = vsub.f32 %v2954_v41, %v2966_v35 }
  0x82   :  { %19821 = vmatprep.mubr.msk.f32.mxu1 %vm24602_vm0, %v29362_v1  ;;  %22681 = vmatprep.subr.bf16.mxu1 %v29364_v0 }
  0x83   :  { %22645 = vmatprep.subr.bf16.mxu0 %v29364_v0  ;;  %19720 = vmatmul.mubr.f32.gmra.mrb[8].mxu0 %v24753_v9 }
  0x84   :  { %19822 = vmatmul.mubr.f32.gmra.mrb[8].mxu1 %v24753_v9  ;;  %19722 = vmatprep.mubr.msk.f32.mxu0 %vm24602_vm0, %v29362_v1 }
  0x85   :  { %19824 = vmatprep.mubr.msk.f32.mxu1 %vm24602_vm0, %v29362_v1  ;;  %22683 = vmatpush3.bf16.msra.mxu1 %v22682_v54 }
  0x86   :  { %22647 = vmatpush3.bf16.msra.mxu0 %v22646_v55  ;;  %22684 = vmatprep.subr.bf16.mxu1 %v29364_v0 }
  0x87   :  { %22648 = vmatprep.subr.bf16.mxu0 %v29364_v0  ;;  %19723 = vmatmul.mubr.f32.gmra.mrb[10].mxu0 %v24779_v23 }
  0x88   :  { %19825 = vmatmul.mubr.f32.gmra.mrb[10].mxu1 %v24779_v23  ;;  %19733 = vmatprep.mubr.msk.f32.mxu0 %vm24602_vm0, %v29362_v1 }
  0x89   :  { %19835 = vmatprep.mubr.msk.f32.mxu1 %vm24602_vm0, %v29362_v1 }
  0x8b   :  { %19734 = vmatmul.mubr.f32.vlgmr.msra.gmra.mrb[6].mxu0 %v24678_v31 }
  0x8c   :  { %19836 = vmatmul.mubr.f32.vlgmr.msra.gmra.mrb[6].mxu1 %v24678_v31  ;;  %19736 = vmatprep.mubr.msk.f32.mxu0 %vm24602_vm0, %v29362_v1 }
  0x8d   :  { %22686 = vmatpush3.bf16.msra.mxu1 %v22685_v56  ;;  %22650 = vmatpush3.bf16.msra.mxu0 %v22649_v57  ;;  %v3066_v57 = vsub.f32 %v25139_v21, %v3065_v40 }
  0x8e   :  { %19838 = vmatprep.mubr.msk.f32.mxu1 %vm24602_vm0, %v29362_v1  ;;  %22687 = vmatprep.subr.bf16.mxu1 %v29364_v0 }
  0x8f   :  { %22651 = vmatprep.subr.bf16.mxu0 %v29364_v0  ;;  %19737 = vmatmul.mubr.f32.gmra.mrb[8].mxu0 %v24705_v44  ;;  %v3067_v51 = vand.u32 4294901760, %v3066_v57 }
  0x90   :  { %19839 = vmatmul.mubr.f32.gmra.mrb[8].mxu1 %v24705_v44  ;;  %19739 = vmatprep.mubr.msk.f32.mxu0 %vm24602_vm0, %v29362_v1 }
  0x91   :  { %19841 = vmatprep.mubr.msk.f32.mxu1 %vm24602_vm0, %v29362_v1  ;;  %22689 = vmatpush3.bf16.msra.mxu1 %v22688_v11  ;;  %v2480_v11 = vsub.f32 %v25141_v28, %v2479_v43 }
  0x92   :  { %22653 = vmatpush3.bf16.msra.mxu0 %v22652_v18  ;;  %22690 = vmatprep.subr.bf16.mxu1 %v29364_v0 }
  0x93   :  { %22654 = vmatprep.subr.bf16.mxu0 %v29364_v0  ;;  %19740 = vmatmul.mubr.f32.gmra.mrb[10].mxu0 %v24742_v5  ;;  %v2481_v58 = vand.u32 4294901760, %v2480_v11 }
  0x94   :  { %19842 = vmatmul.mubr.f32.gmra.mrb[10].mxu1 %v24742_v5  ;;  %19750 = vmatprep.mubr.msk.f32.mxu0 %vm24602_vm0, %v29362_v1 }
  0x95   :  { %19852 = vmatprep.mubr.msk.f32.mxu1 %vm24602_vm0, %v29362_v1 }
  0x97   :  { %19751 = vmatmul.mubr.f32.vlgmr.msra.gmra.mrb[6].mxu0 %v24689_v37 }
  0x98   :  { %19853 = vmatmul.mubr.f32.vlgmr.msra.gmra.mrb[6].mxu1 %v24689_v37  ;;  %19753 = vmatprep.mubr.msk.f32.mxu0 %vm24602_vm0, %v29362_v1 }
  0x99   :  { %22692 = vmatpush3.bf16.msra.mxu1 %v24924_v52  ;;  %22656 = vmatpush3.bf16.msra.mxu0 %v24934_v29 }
  0x9a   :  { %19855 = vmatprep.mubr.msk.f32.mxu1 %vm24602_vm0, %v29362_v1  ;;  %22693 = vmatprep.subr.bf16.mxu1 %v29364_v0 }
  0x9b   :  { %22657 = vmatprep.subr.bf16.mxu0 %v29364_v0  ;;  %19754 = vmatmul.mubr.f32.gmra.mrb[8].mxu0 %v24720_v53 }
  0x9c   :  { %19856 = vmatmul.mubr.f32.gmra.mrb[8].mxu1 %v24720_v53  ;;  %19756 = vmatprep.mubr.msk.f32.mxu0 %vm24602_vm0, %v29362_v1 }
  0x9d   :  { %19858 = vmatprep.mubr.msk.f32.mxu1 %vm24602_vm0, %v29362_v1  ;;  %22695 = vmatpush3.bf16.msra.mxu1 %v24949_v8 }
  0x9e   :  { %22659 = vmatpush3.bf16.msra.mxu0 %v24957_v12  ;;  %22696 = vmatprep.subr.bf16.mxu1 %v29364_v0 }
  0x9f   :  { %22660 = vmatprep.subr.bf16.mxu0 %v29364_v0  ;;  %19757 = vmatmul.mubr.f32.gmra.mrb[10].mxu0 %v24756_v10 }
  0xa0   :  { %19859 = vmatmul.mubr.f32.gmra.mrb[10].mxu1 %v24756_v10  ;;  %19767 = vmatprep.mubr.msk.f32.mxu0 %vm24602_vm0, %v29362_v1 }
  0xa1   :  { %19869 = vmatprep.mubr.msk.f32.mxu1 %vm24602_vm0, %v29362_v1 }
  0xa3   :  { %19768 = vmatmul.mubr.f32.vlgmr.msra.gmra.mrb[6].mxu0 %v24709_v45 }
  0xa4   :  { %19870 = vmatmul.mubr.f32.vlgmr.msra.gmra.mrb[6].mxu1 %v24709_v45  ;;  %19770 = vmatprep.mubr.msk.f32.mxu0 %vm24602_vm0, %v29362_v1 }
  0xa5   :  { %22698 = vmatpush3.bf16.msra.mxu1 %v22697_v19  ;;  %22662 = vmatpush3.bf16.msra.mxu0 %v22661_v25  ;;  %v2487_v19 = vsub.f32 %v25147_v27, %v2486_v50  ;;  %v3079_v25 = vand.u32 4294901760, %v25166_v15 }
  0xa6   :  { %19872 = vmatprep.mubr.msk.f32.mxu1 %vm24602_vm0, %v29362_v1  ;;  %22699 = vmatprep.subr.bf16.mxu1 %v29364_v0 }
  0xa7   :  { %22663 = vmatprep.subr.bf16.mxu0 %v29364_v0  ;;  %19771 = vmatmul.mubr.f32.gmra.mrb[8].mxu0 %v24729_v59  ;;  %v3080_v2 = vsub.f32 %v25166_v15, %v3079_v25 }
  0xa8   :  { %19873 = vmatmul.mubr.f32.gmra.mrb[8].mxu1 %v24729_v59  ;;  %19773 = vmatprep.mubr.msk.f32.mxu0 %vm24602_vm0, %v29362_v1 }
  0xa9   :  { %19875 = vmatprep.mubr.msk.f32.mxu1 %vm24602_vm0, %v29362_v1  ;;  %22701 = vmatpush3.bf16.msra.mxu1 %v22700_v42  ;;  %v2493_v42 = vand.u32 4294901760, %v25168_v48  ;;  %v3081_v41 = vand.u32 4294901760, %v3080_v2 }
  0xaa   :  { %22665 = vmatpush3.bf16.msra.mxu0 %v22664_v46  ;;  %22702 = vmatprep.subr.bf16.mxu1 %v29364_v0 }
  0xab   :  { %22666 = vmatprep.subr.bf16.mxu0 %v29364_v0  ;;  %19774 = vmatmul.mubr.f32.gmra.mrb[10].mxu0 %v24767_v14  ;;  %v2494_v3 = vsub.f32 %v25168_v48, %v2493_v42 }
  0xac   :  { %19876 = vmatmul.mubr.f32.gmra.mrb[10].mxu1 %v24767_v14  ;;  %19784 = vmatprep.mubr.msk.f32.mxu0 %vm24602_vm0, %v29362_v1 }
  0xad   :  { %19886 = vmatprep.mubr.msk.f32.mxu1 %vm24602_vm0, %v29362_v1  ;;  %v2495_v17 = vand.u32 4294901760, %v2494_v3 }
  0xaf   :  { %19785 = vmatmul.mubr.f32.vlgmr.msra.gmra.mrb[6].mxu0 %v24678_v31 }
  0xb0   :  { %19887 = vmatmul.mubr.f32.vlgmr.msra.gmra.mrb[6].mxu1 %v24678_v31  ;;  %19787 = vmatprep.mubr.msk.f32.mxu0 %vm24602_vm0, %v29362_v1 }
  0xb1   :  { %22704 = vmatpush3.bf16.msra.mxu1 %v24924_v52  ;;  %22668 = vmatpush3.bf16.msra.mxu0 %v24934_v29  ;;  %v25133_v52 = vsub.f32 %v2949_v47, %v2957_v61  ;;  %v2951_v29 = vld [vmem:[#allocation5 + $0xb0] sm:$0xff]  ;;  %v2488_v61 = vand.u32 4294901760, %v2487_v19  ;;  %v22733_v19 = vpack.c.bf16 %v2486_v50, %v2479_v43 }
  0xb2   :  { %19889 = vmatprep.mubr.msk.f32.mxu1 %vm24602_vm0, %v29362_v1  ;;  %22705 = vmatprep.subr.bf16.mxu1 %v29364_v0  ;;  %v2963_v32 = vand.u32 4294901760, %v2951_v29  ;;  %v4131_v43 = vld [vmem:[#allocation5 + $0xd0] sm:$0xff] }
  0xb3   :  { %22669 = vmatprep.subr.bf16.mxu0 %v29364_v0  ;;  %19788 = vmatmul.mubr.f32.gmra.mrb[8].mxu0 %v24705_v44  ;;  %v3058_v38 = vand.u32 4294901760, %v25133_v52 }
  0xb4   :  { %19890 = vmatmul.mubr.f32.gmra.mrb[8].mxu1 %v24705_v44  ;;  %19790 = vmatprep.mubr.msk.f32.mxu0 %vm24602_vm0, %v29362_v1  ;;  %v25175_v54 = vpack.c.bf16 %v2966_v35, %v2963_v32 }
  0xb5   :  { %19892 = vmatprep.mubr.msk.f32.mxu1 %vm24602_vm0, %v29362_v1  ;;  %22707 = vmatpush3.bf16.msra.mxu1 %v24949_v8  ;;  %v2387_v8 = vand.u32 4294901760, %v2375_v22  ;;  %v3059_v56 = vsub.f32 %v25133_v52, %v3058_v38  ;;  %v22769_v11 = vpack.c.bf16 %v3065_v40, %v3058_v38 }
  0xb6   :  { %22671 = vmatpush3.bf16.msra.mxu0 %v24957_v12  ;;  %22744 = vmatprep.subr.bf16.mxu1 %v29364_v0  ;;  %v25161_v12 = vsub.f32 %v2951_v29, %v2963_v32  ;;  %v22715_v29 = vpack.c.bf16 %v2488_v61, %v2481_v58 }
  0xb7   :  { %22708 = vmatprep.subr.bf16.mxu0 %v29364_v0  ;;  %19791 = vmatmul.mubr.f32.gmra.mrb[10].mxu0 %v24742_v5  ;;  %v25170_v49 = vsub.f32 %v2375_v22, %v2387_v8  ;;  %v25177_v55 = vpack.c.bf16 %v2387_v8, %v2384_v36  ;;  %v3060_v47 = vand.u32 4294901760, %v3059_v56  ;;  %v22757_v36 = vpack.c.bf16 %v25139_v21, %v25133_v52 }
  0xb8   :  { %19893 = vmatmul.mubr.f32.gmra.mrb[10].mxu1 %v24742_v5  ;;  %19801 = vmatprep.mubr.msk.f32.mxu0 %vm24602_vm0, %v29362_v1  ;;  %v3072_v18 = vand.u32 4294901760, %v25161_v12  ;;  %v22721_v8 = vpack.c.bf16 %v25147_v27, %v25141_v28  ;;  %v22760_v56 = vpack.c.bf16 %v25166_v15, %v25161_v12  ;;  %v4129_v28 = vld [vmem:[#allocation5 + $0xc0] sm:$0xff]  ;;  %v4130_v27 = vld [vmem:[#allocation5 + $0xc8] sm:$0xff] }
  0xb9   :  { %19903 = vmatprep.mubr.msk.f32.mxu1 %vm24602_vm0, %v29362_v1  ;;  %v2500_v46 = vand.u32 4294901760, %v25170_v49  ;;  %v22751_v6 = vpack.c.bf16 %v3067_v51, %v3060_v47  ;;  %v22724_v57 = vpack.c.bf16 %v25170_v49, %v25168_v48  ;;  %v4137_v38 = vand.u32 4294901760, %v4129_v28 }
  0xba   :  { %v3073_v60 = vsub.f32 %v25161_v12, %v3072_v18  ;;  %v22772_v52 = vpack.c.bf16 %v3079_v25, %v3072_v18  ;;  %v4132_v12 = vld [vmem:[#allocation5 + $0xd8] sm:$0xf]  ;;  %v4140_v40 = vand.u32 4294901760, %v4130_v27  ;;  %v4143_v48 = vand.u32 4294901760, %v4131_v43 }
  0xbb   :  { %19802 = vmatmul.mubr.f32.vlgmr.msra.gmra.mrb[6].mxu0 %v24678_v31  ;;  %v2501_v4 = vsub.f32 %v25170_v49, %v2500_v46  ;;  %v22736_v21 = vpack.c.bf16 %v2500_v46, %v2493_v42  ;;  %v4134_v15 = vsel %vm62_vm1, %v4132_v12, 0 }
  0xbc   :  { %19904 = vmatmul.mubr.f32.vlgmr.msra.gmra.mrb[6].mxu1 %v24678_v31  ;;  %19804 = vmatprep.mubr.msk.f32.mxu0 %vm24602_vm0, %v29362_v1  ;;  %v3074_v7 = vand.u32 4294901760, %v3073_v60  ;;  %v4146_v49 = vand.u32 4294901760, %v4134_v15  ;;  %v25378_v50 = vpack.c.bf16 %v4140_v40, %v4137_v38  ;;  %v25382_v18 = vsub.f32 %v4131_v43, %v4143_v48 }
  0xbd   :  { %22746 = vmatpush3.bf16.msra.mxu1 %v25150_v30  ;;  %19906 = vmatprep.mubr.msk.f32.mxu1 %vm24602_vm0, %v29362_v1  ;;  %v2502_v22 = vand.u32 4294901760, %v2501_v4 }
  0xbe   :  { %22710 = vmatpush3.bf16.msra.mxu0 %v25155_v34  ;;  %22747 = vmatprep.subr.bf16.mxu1 %v29364_v0  ;;  %v22754_v32 = vpack.c.bf16 %v3081_v41, %v3074_v7  ;;  %v25384_v25 = vsub.f32 %v4134_v15, %v4146_v49  ;;  %v25400_v47 = vpack.c.bf16 %v4146_v49, %v4143_v48  ;;  %v4252_v51 = vand.u32 4294901760, %v25382_v18  ;;  %v5356_v41 = vld [vmem:[#allocation5 + $0x108] sm:$0xff] }
  0xbf   :  { %22711 = vmatprep.subr.bf16.mxu0 %v29364_v0  ;;  %19805 = vmatmul.mubr.f32.gmra.mrb[8].mxu0 %v24705_v44  ;;  %v22718_v35 = vpack.c.bf16 %v2502_v22, %v2495_v17  ;;  %v4743_v17 = vld [vmem:[#allocation5 + $0xe8] sm:$0xff] }
  0xc0   :  { %19907 = vmatmul.mubr.f32.gmra.mrb[8].mxu1 %v24705_v44  ;;  %19807 = vmatprep.mubr.msk.f32.mxu0 %vm24602_vm0, %v29362_v1  ;;  %v4259_v58 = vand.u32 4294901760, %v25384_v25  ;;  %v4253_v2 = vsub.f32 %v25382_v18, %v4252_v51 }
  0xc1   :  { %19909 = vmatprep.mubr.msk.f32.mxu1 %vm24602_vm0, %v29362_v1  ;;  %22749 = vmatpush3.bf16.msra.mxu1 %v25175_v54 }
  0xc2   :  { %22713 = vmatpush3.bf16.msra.mxu0 %v25177_v55  ;;  %22750 = vmatprep.subr.bf16.mxu1 %v29364_v0  ;;  %v4260_v3 = vsub.f32 %v25384_v25, %v4259_v58 }
  0xc3   :  { %22714 = vmatprep.subr.bf16.mxu0 %v29364_v0  ;;  %19808 = vmatmul.mubr.f32.gmra.mrb[10].mxu0 %v24742_v5 }
  0xc4   :  { %19910 = vmatmul.mubr.f32.gmra.mrb[10].mxu1 %v24742_v5  ;;  %19920 = vmatprep.mubr.msk.f32.mxu0 %vm24602_vm0, %v29362_v1  ;;  %v4261_v7 = vand.u32 4294901760, %v4260_v3 }
  0xc5   :  { %20022 = vmatprep.mubr.msk.f32.mxu1 %vm24602_vm0, %v29362_v1 }
  0xc7   :  { %19921 = vmatmul.mubr.f32.vlgmr.msra.gmra.mrb[12].mxu0 %v24733_v62 }
  0xc8   :  { %20023 = vmatmul.mubr.f32.vlgmr.msra.gmra.mrb[12].mxu1 %v24733_v62  ;;  %19923 = vmatprep.mubr.msk.f32.mxu0 %vm24602_vm0, %v29362_v1 }
  0xc9   :  { %22752 = vmatpush3.bf16.msra.mxu1 %v22751_v6  ;;  %22716 = vmatpush3.bf16.msra.mxu0 %v22715_v29  ;;  %v4254_v6 = vand.u32 4294901760, %v4253_v2 }
  0xca   :  { %20025 = vmatprep.mubr.msk.f32.mxu1 %vm24602_vm0, %v29362_v1  ;;  %22753 = vmatprep.subr.bf16.mxu1 %v29364_v0 }
  0xcb   :  { %22717 = vmatprep.subr.bf16.mxu0 %v29364_v0  ;;  %19924 = vmatmul.mubr.f32.gmra.mrb[14].mxu0 %v24753_v9  ;;  %v22826_v29 = vpack.c.bf16 %v4261_v7, %v4254_v6 }
  0xcc   :  { %20026 = vmatmul.mubr.f32.gmra.mrb[14].mxu1 %v24753_v9  ;;  %19926 = vmatprep.mubr.msk.f32.mxu0 %vm24602_vm0, %v29362_v1 }
  0xcd   :  { %20028 = vmatprep.mubr.msk.f32.mxu1 %vm24602_vm0, %v29362_v1  ;;  %22755 = vmatpush3.bf16.msra.mxu1 %v22754_v32  ;;  %v5366_v32 = vand.u32 4294901760, %v5356_v41 }
  0xce   :  { %22719 = vmatpush3.bf16.msra.mxu0 %v22718_v35  ;;  %22756 = vmatprep.subr.bf16.mxu1 %v29364_v0  ;;  %v5358_v35 = vld [vmem:[#allocation5 + $0x118] sm:$0xf] }
  0xcf   :  { %22720 = vmatprep.subr.bf16.mxu0 %v29364_v0  ;;  %19927 = vmatmul.mubr.f32.gmra.mrb[16].mxu0 %v24779_v23 }
  0xd0   :  { %20029 = vmatmul.mubr.f32.gmra.mrb[16].mxu1 %v24779_v23  ;;  %19937 = vmatprep.mubr.msk.f32.mxu0 %vm24602_vm0, %v29362_v1 }
  0xd1   :  { %20039 = vmatprep.mubr.msk.f32.mxu1 %vm24602_vm0, %v29362_v1 }
  0xd3   :  { %19938 = vmatmul.mubr.f32.vlgmr.msra.gmra.mrb[12].mxu0 %v24678_v31 }
  0xd4   :  { %20040 = vmatmul.mubr.f32.vlgmr.msra.gmra.mrb[12].mxu1 %v24678_v31  ;;  %19940 = vmatprep.mubr.msk.f32.mxu0 %vm24602_vm0, %v29362_v1 }
  0xd5   :  { %22758 = vmatpush3.bf16.msra.mxu1 %v22757_v36  ;;  %22722 = vmatpush3.bf16.msra.mxu0 %v22721_v8  ;;  %v4745_v36 = vld [vmem:[#allocation5 + $0xf8] sm:$0xf] }
  0xd6   :  { %20042 = vmatprep.mubr.msk.f32.mxu1 %vm24602_vm0, %v29362_v1  ;;  %22759 = vmatprep.subr.bf16.mxu1 %v29364_v0 }
  0xd7   :  { %22723 = vmatprep.subr.bf16.mxu0 %v29364_v0  ;;  %19941 = vmatmul.mubr.f32.gmra.mrb[14].mxu0 %v24705_v44 }
  0xd8   :  { %20043 = vmatmul.mubr.f32.gmra.mrb[14].mxu1 %v24705_v44  ;;  %19943 = vmatprep.mubr.msk.f32.mxu0 %vm24602_vm0, %v29362_v1 }
  0xd9   :  { %20045 = vmatprep.mubr.msk.f32.mxu1 %vm24602_vm0, %v29362_v1  ;;  %22761 = vmatpush3.bf16.msra.mxu1 %v22760_v56  ;;  %v4753_v56 = vand.u32 4294901760, %v4743_v17 }
  0xda   :  { %22725 = vmatpush3.bf16.msra.mxu0 %v22724_v57  ;;  %22762 = vmatprep.subr.bf16.mxu1 %v29364_v0 }
  0xdb   :  { %22726 = vmatprep.subr.bf16.mxu0 %v29364_v0  ;;  %19944 = vmatmul.mubr.f32.gmra.mrb[16].mxu0 %v24742_v5 }
  0xdc   :  { %20046 = vmatmul.mubr.f32.gmra.mrb[16].mxu1 %v24742_v5  ;;  %19954 = vmatprep.mubr.msk.f32.mxu0 %vm24602_vm0, %v29362_v1 }
  0xdd   :  { %20056 = vmatprep.mubr.msk.f32.mxu1 %vm24602_vm0, %v29362_v1 }
  0xdf   :  { %19955 = vmatmul.mubr.f32.vlgmr.msra.gmra.mrb[12].mxu0 %v24689_v37 }
  0xe0   :  { %20057 = vmatmul.mubr.f32.vlgmr.msra.gmra.mrb[12].mxu1 %v24689_v37  ;;  %19957 = vmatprep.mubr.msk.f32.mxu0 %vm24602_vm0, %v29362_v1 }
  0xe1   :  { %22764 = vmatpush3.bf16.msra.mxu1 %v25150_v30  ;;  %22728 = vmatpush3.bf16.msra.mxu0 %v25155_v34 }
  0xe2   :  { %20059 = vmatprep.mubr.msk.f32.mxu1 %vm24602_vm0, %v29362_v1  ;;  %22765 = vmatprep.subr.bf16.mxu1 %v29364_v0 }
  0xe3   :  { %22729 = vmatprep.subr.bf16.mxu0 %v29364_v0  ;;  %19958 = vmatmul.mubr.f32.gmra.mrb[14].mxu0 %v24720_v53 }
  0xe4   :  { %20060 = vmatmul.mubr.f32.gmra.mrb[14].mxu1 %v24720_v53  ;;  %19960 = vmatprep.mubr.msk.f32.mxu0 %vm24602_vm0, %v29362_v1 }
  0xe5   :  { %20062 = vmatprep.mubr.msk.f32.mxu1 %vm24602_vm0, %v29362_v1  ;;  %22767 = vmatpush3.bf16.msra.mxu1 %v25175_v54 }
  0xe6   :  { %22731 = vmatpush3.bf16.msra.mxu0 %v25177_v55  ;;  %22768 = vmatprep.subr.bf16.mxu1 %v29364_v0 }
  0xe7   :  { %22732 = vmatprep.subr.bf16.mxu0 %v29364_v0  ;;  %19961 = vmatmul.mubr.f32.gmra.mrb[16].mxu0 %v24756_v10 }
  0xe8   :  { %20063 = vmatmul.mubr.f32.gmra.mrb[16].mxu1 %v24756_v10  ;;  %19971 = vmatprep.mubr.msk.f32.mxu0 %vm24602_vm0, %v29362_v1 }
  0xe9   :  { %20073 = vmatprep.mubr.msk.f32.mxu1 %vm24602_vm0, %v29362_v1 }
  0xeb   :  { %19972 = vmatmul.mubr.f32.vlgmr.msra.gmra.mrb[12].mxu0 %v24709_v45 }
  0xec   :  { %20074 = vmatmul.mubr.f32.vlgmr.msra.gmra.mrb[12].mxu1 %v24709_v45  ;;  %19974 = vmatprep.mubr.msk.f32.mxu0 %vm24602_vm0, %v29362_v1 }
  0xed   :  { %22770 = vmatpush3.bf16.msra.mxu1 %v22769_v11  ;;  %22734 = vmatpush3.bf16.msra.mxu0 %v22733_v19  ;;  %v5357_v11 = vld [vmem:[#allocation5 + $0x110] sm:$0xff] }
  0xee   :  { %20076 = vmatprep.mubr.msk.f32.mxu1 %vm24602_vm0, %v29362_v1  ;;  %22771 = vmatprep.subr.bf16.mxu1 %v29364_v0 }
  0xef   :  { %22735 = vmatprep.subr.bf16.mxu0 %v29364_v0  ;;  %19975 = vmatmul.mubr.f32.gmra.mrb[14].mxu0 %v24729_v59 }
  0xf0   :  { %20077 = vmatmul.mubr.f32.gmra.mrb[14].mxu1 %v24729_v59  ;;  %19977 = vmatprep.mubr.msk.f32.mxu0 %vm24602_vm0, %v29362_v1 }
  0xf1   :  { %20079 = vmatprep.mubr.msk.f32.mxu1 %vm24602_vm0, %v29362_v1  ;;  %22773 = vmatpush3.bf16.msra.mxu1 %v22772_v52  ;;  %v25560_v52 = vsub.f32 %v4743_v17, %v4753_v56 }
  0xf2   :  { %22737 = vmatpush3.bf16.msra.mxu0 %v22736_v21  ;;  %22774 = vmatprep.subr.bf16.mxu1 %v29364_v0  ;;  %v5360_v21 = vsel %vm62_vm1, %v5358_v35, 0 }
  0xf3   :  { %22738 = vmatprep.subr.bf16.mxu0 %v29364_v0  ;;  %19978 = vmatmul.mubr.f32.gmra.mrb[16].mxu0 %v24767_v14  ;;  %v5372_v15 = vand.u32 4294901760, %v5360_v21 }
  0xf4   :  { %20080 = vmatmul.mubr.f32.gmra.mrb[16].mxu1 %v24767_v14  ;;  %19988 = vmatprep.mubr.msk.f32.mxu0 %vm24602_vm0, %v29362_v1 }
  0xf5   :  { %20090 = vmatprep.mubr.msk.f32.mxu1 %vm24602_vm0, %v29362_v1 }
  0xf7   :  { %19989 = vmatmul.mubr.f32.vlgmr.msra.gmra.mrb[12].mxu0 %v24678_v31 }
  0xf8   :  { %20091 = vmatmul.mubr.f32.vlgmr.msra.gmra.mrb[12].mxu1 %v24678_v31  ;;  %19991 = vmatprep.mubr.msk.f32.mxu0 %vm24602_vm0, %v29362_v1 }
  0xf9   :  { %22776 = vmatpush3.bf16.msra.mxu1 %v25150_v30  ;;  %22740 = vmatpush3.bf16.msra.mxu0 %v25155_v34  ;;  %v25363_v30 = vsub.f32 %v4129_v28, %v4137_v38  ;;  %v25365_v34 = vsub.f32 %v4130_v27, %v4140_v40  ;;  %v4744_v28 = vld [vmem:[#allocation5 + $0xf0] sm:$0xff]  ;;  %v4747_v27 = vsel %vm62_vm1, %v4745_v36, 0 }
  0xfa   :  { %20093 = vmatprep.mubr.msk.f32.mxu1 %vm24602_vm0, %v29362_v1  ;;  %22777 = vmatprep.subr.bf16.mxu1 %v29364_v0  ;;  %v4756_v48 = vand.u32 4294901760, %v4744_v28 }
  0xfb   :  { %22741 = vmatprep.subr.bf16.mxu0 %v29364_v0  ;;  %19992 = vmatmul.mubr.f32.gmra.mrb[14].mxu0 %v24705_v44 }
  0xfc   :  { %20094 = vmatmul.mubr.f32.gmra.mrb[14].mxu1 %v24705_v44  ;;  %19994 = vmatprep.mubr.msk.f32.mxu0 %vm24602_vm0, %v29362_v1 }
  0xfd   :  { %20096 = vmatprep.mubr.msk.f32.mxu1 %vm24602_vm0, %v29362_v1  ;;  %22779 = vmatpush3.bf16.msra.mxu1 %v25175_v54  ;;  %v4238_v54 = vand.u32 4294901760, %v25363_v30 }
  0xfe   :  { %22743 = vmatpush3.bf16.msra.mxu0 %v25177_v55  ;;  %22816 = vmatprep.subr.bf16.mxu1 %v29364_v0  ;;  %v4245_v55 = vand.u32 4294901760, %v25365_v34 }
  0xff   :  { %22780 = vmatprep.subr.bf16.mxu0 %v29364_v0  ;;  %19995 = vmatmul.mubr.f32.gmra.mrb[16].mxu0 %v24742_v5  ;;  %v4239_v42 = vsub.f32 %v25363_v30, %v4238_v54 }
 0x100   :  { %20097 = vmatmul.mubr.f32.gmra.mrb[16].mxu1 %v24742_v5  ;;  %20005 = vmatprep.mubr.msk.f32.mxu0 %vm24602_vm0, %v29362_v1  ;;  %v4246_v46 = vsub.f32 %v25365_v34, %v4245_v55 }
 0x101   :  { %20107 = vmatprep.mubr.msk.f32.mxu1 %vm24602_vm0, %v29362_v1  ;;  %v4240_v60 = vand.u32 4294901760, %v4239_v42  ;;  %v25588_v42 = vsub.f32 %v5360_v21, %v5372_v15 }
 0x102   :  { %v4247_v61 = vand.u32 4294901760, %v4246_v46  ;;  %v25590_v46 = vsub.f32 %v4744_v28, %v4756_v48 }
 0x103   :  { %20006 = vmatmul.mubr.f32.vlgmr.msra.gmra.mrb[12].mxu0 %v24678_v31 }
 0x104   :  { %20108 = vmatmul.mubr.f32.vlgmr.msra.gmra.mrb[12].mxu1 %v24678_v31  ;;  %20008 = vmatprep.mubr.msk.f32.mxu0 %vm24602_vm0, %v29362_v1  ;;  %v22823_v4 = vpack.c.bf16 %v4247_v61, %v4240_v60 }
 0x105   :  { %22818 = vmatpush3.bf16.msra.mxu1 %v25378_v50  ;;  %20110 = vmatprep.mubr.msk.f32.mxu1 %vm24602_vm0, %v29362_v1 }
 0x106   :  { %22782 = vmatpush3.bf16.msra.mxu0 %v24663_v20  ;;  %22819 = vmatprep.subr.bf16.mxu1 %v29364_v0 }
 0x107   :  { %22783 = vmatprep.subr.bf16.mxu0 %v29364_v0  ;;  %20009 = vmatmul.mubr.f32.gmra.mrb[14].mxu0 %v24705_v44 }
 0x108   :  { %20111 = vmatmul.mubr.f32.gmra.mrb[14].mxu1 %v24705_v44  ;;  %20011 = vmatprep.mubr.msk.f32.mxu0 %vm24602_vm0, %v29362_v1 }
 0x109   :  { %20113 = vmatprep.mubr.msk.f32.mxu1 %vm24602_vm0, %v29362_v1  ;;  %22821 = vmatpush3.bf16.msra.mxu1 %v25400_v47 }
 0x10a   :  { %22785 = vmatpush3.bf16.msra.mxu0 %v24683_v33  ;;  %22822 = vmatprep.subr.bf16.mxu1 %v29364_v0 }
 0x10b   :  { %22786 = vmatprep.subr.bf16.mxu0 %v29364_v0  ;;  %20012 = vmatmul.mubr.f32.gmra.mrb[16].mxu0 %v24742_v5 }
 0x10c   :  { %20114 = vmatmul.mubr.f32.gmra.mrb[16].mxu1 %v24742_v5  ;;  %20124 = vmatprep.mubr.msk.f32.mxu0 %vm24602_vm0, %v29362_v1 }
 0x10d   :  { %20226 = vmatprep.mubr.msk.f32.mxu1 %vm24602_vm0, %v29362_v1 }
 0x10f   :  { %20125 = vmatmul.mubr.f32.vlgmr.msra.gmra.mrb[18].mxu0 %v24733_v62 }
 0x110   :  { %20227 = vmatmul.mubr.f32.vlgmr.msra.gmra.mrb[18].mxu1 %v24733_v62  ;;  %20127 = vmatprep.mubr.msk.f32.mxu0 %vm24602_vm0, %v29362_v1 }
 0x111   :  { %22824 = vmatpush3.bf16.msra.mxu1 %v22823_v4  ;;  %22788 = vmatpush3.bf16.msra.mxu0 %v24735_v63  ;;  %v22829_v63 = vpack.c.bf16 %v25365_v34, %v25363_v30  ;;  %v5369_v30 = vand.u32 4294901760, %v5357_v11 }
 0x112   :  { %20229 = vmatprep.mubr.msk.f32.mxu1 %vm24602_vm0, %v29362_v1  ;;  %22825 = vmatprep.subr.bf16.mxu1 %v29364_v0 }
 0x113   :  { %22789 = vmatprep.subr.bf16.mxu0 %v29364_v0  ;;  %20128 = vmatmul.mubr.f32.gmra.mrb[20].mxu0 %v24753_v9  ;;  %v25600_v2 = vpack.c.bf16 %v5372_v15, %v5369_v30 }
 0x114   :  { %20230 = vmatmul.mubr.f32.gmra.mrb[20].mxu1 %v24753_v9  ;;  %20130 = vmatprep.mubr.msk.f32.mxu0 %vm24602_vm0, %v29362_v1 }
 0x115   :  { %20232 = vmatprep.mubr.msk.f32.mxu1 %vm24602_vm0, %v29362_v1  ;;  %22827 = vmatpush3.bf16.msra.mxu1 %v22826_v29 }
 0x116   :  { %22791 = vmatpush3.bf16.msra.mxu0 %v24763_v13  ;;  %22828 = vmatprep.subr.bf16.mxu1 %v29364_v0  ;;  %v22832_v13 = vpack.c.bf16 %v25384_v25, %v25382_v18  ;;  %v4858_v18 = vand.u32 4294901760, %v25560_v52 }
 0x117   :  { %22792 = vmatprep.subr.bf16.mxu0 %v29364_v0  ;;  %20131 = vmatmul.mubr.f32.gmra.mrb[22].mxu0 %v24779_v23 }
 0x118   :  { %20233 = vmatmul.mubr.f32.gmra.mrb[22].mxu1 %v24779_v23  ;;  %20141 = vmatprep.mubr.msk.f32.mxu0 %vm24602_vm0, %v29362_v1  ;;  %v4859_v7 = vsub.f32 %v25560_v52, %v4858_v18 }
 0x119   :  { %20243 = vmatprep.mubr.msk.f32.mxu1 %vm24602_vm0, %v29362_v1 }
 0x11a   :  { %v4860_v36 = vand.u32 4294901760, %v4859_v7 }
 0x11b   :  { %20142 = vmatmul.mubr.f32.vlgmr.msra.gmra.mrb[18].mxu0 %v24678_v31 }
 0x11c   :  { %20244 = vmatmul.mubr.f32.vlgmr.msra.gmra.mrb[18].mxu1 %v24678_v31  ;;  %20144 = vmatprep.mubr.msk.f32.mxu0 %vm24602_vm0, %v29362_v1 }
 0x11d   :  { %22830 = vmatpush3.bf16.msra.mxu1 %v22829_v63  ;;  %22794 = vmatpush3.bf16.msra.mxu0 %v24791_v24  ;;  %v22841_v24 = vpack.c.bf16 %v4245_v55, %v4238_v54 }
 0x11e   :  { %20246 = vmatprep.mubr.msk.f32.mxu1 %vm24602_vm0, %v29362_v1  ;;  %22831 = vmatprep.subr.bf16.mxu1 %v29364_v0 }
 0x11f   :  { %22795 = vmatprep.subr.bf16.mxu0 %v29364_v0  ;;  %20145 = vmatmul.mubr.f32.gmra.mrb[20].mxu0 %v24705_v44 }
 0x120   :  { %20247 = vmatmul.mubr.f32.gmra.mrb[20].mxu1 %v24705_v44  ;;  %20147 = vmatprep.mubr.msk.f32.mxu0 %vm24602_vm0, %v29362_v1 }
 0x121   :  { %20249 = vmatprep.mubr.msk.f32.mxu1 %vm24602_vm0, %v29362_v1  ;;  %22833 = vmatpush3.bf16.msra.mxu1 %v22832_v13  ;;  %v5485_v13 = vand.u32 4294901760, %v25588_v42 }
 0x122   :  { %22797 = vmatpush3.bf16.msra.mxu0 %v24804_v26  ;;  %22834 = vmatprep.subr.bf16.mxu1 %v29364_v0  ;;  %v22844_v26 = vpack.c.bf16 %v4259_v58, %v4252_v51 }
 0x123   :  { %22798 = vmatprep.subr.bf16.mxu0 %v29364_v0  ;;  %20148 = vmatmul.mubr.f32.gmra.mrb[22].mxu0 %v24742_v5 }
 0x124   :  { %20250 = vmatmul.mubr.f32.gmra.mrb[22].mxu1 %v24742_v5  ;;  %20158 = vmatprep.mubr.msk.f32.mxu0 %vm24602_vm0, %v29362_v1 }
 0x125   :  { %20260 = vmatprep.mubr.msk.f32.mxu1 %vm24602_vm0, %v29362_v1 }
 0x127   :  { %20159 = vmatmul.mubr.f32.vlgmr.msra.gmra.mrb[18].mxu0 %v24689_v37 }
 0x128   :  { %20261 = vmatmul.mubr.f32.vlgmr.msra.gmra.mrb[18].mxu1 %v24689_v37  ;;  %20161 = vmatprep.mubr.msk.f32.mxu0 %vm24602_vm0, %v29362_v1 }
 0x129   :  { %22836 = vmatpush3.bf16.msra.mxu1 %v25378_v50  ;;  %22800 = vmatpush3.bf16.msra.mxu0 %v24663_v20 }
 0x12a   :  { %20263 = vmatprep.mubr.msk.f32.mxu1 %vm24602_vm0, %v29362_v1  ;;  %22837 = vmatprep.subr.bf16.mxu1 %v29364_v0 }
 0x12b   :  { %22801 = vmatprep.subr.bf16.mxu0 %v29364_v0  ;;  %20162 = vmatmul.mubr.f32.gmra.mrb[20].mxu0 %v24720_v53 }
 0x12c   :  { %20264 = vmatmul.mubr.f32.gmra.mrb[20].mxu1 %v24720_v53  ;;  %20164 = vmatprep.mubr.msk.f32.mxu0 %vm24602_vm0, %v29362_v1 }
 0x12d   :  { %20266 = vmatprep.mubr.msk.f32.mxu1 %vm24602_vm0, %v29362_v1  ;;  %22839 = vmatpush3.bf16.msra.mxu1 %v25400_v47 }
 0x12e   :  { %22803 = vmatpush3.bf16.msra.mxu0 %v24683_v33  ;;  %22840 = vmatprep.subr.bf16.mxu1 %v29364_v0 }
 0x12f   :  { %22804 = vmatprep.subr.bf16.mxu0 %v29364_v0  ;;  %20165 = vmatmul.mubr.f32.gmra.mrb[22].mxu0 %v24756_v10 }
 0x130   :  { %20267 = vmatmul.mubr.f32.gmra.mrb[22].mxu1 %v24756_v10  ;;  %20175 = vmatprep.mubr.msk.f32.mxu0 %vm24602_vm0, %v29362_v1 }
 0x131   :  { %20277 = vmatprep.mubr.msk.f32.mxu1 %vm24602_vm0, %v29362_v1 }
 0x133   :  { %20176 = vmatmul.mubr.f32.vlgmr.msra.gmra.mrb[18].mxu0 %v24709_v45 }
 0x134   :  { %20278 = vmatmul.mubr.f32.vlgmr.msra.gmra.mrb[18].mxu1 %v24709_v45  ;;  %20178 = vmatprep.mubr.msk.f32.mxu0 %vm24602_vm0, %v29362_v1 }
 0x135   :  { %22842 = vmatpush3.bf16.msra.mxu1 %v22841_v24  ;;  %22806 = vmatpush3.bf16.msra.mxu0 %v24855_v39  ;;  %v5355_v39 = vld [vmem:[#allocation5 + $0x100] sm:$0xff]  ;;  %v4865_v24 = vand.u32 4294901760, %v25590_v46 }
 0x136   :  { %20280 = vmatprep.mubr.msk.f32.mxu1 %vm24602_vm0, %v29362_v1  ;;  %22843 = vmatprep.subr.bf16.mxu1 %v29364_v0  ;;  %v5363_v22 = vand.u32 4294901760, %v5355_v39 }
 0x137   :  { %22807 = vmatprep.subr.bf16.mxu0 %v29364_v0  ;;  %20179 = vmatmul.mubr.f32.gmra.mrb[20].mxu0 %v24729_v59 }
 0x138   :  { %20281 = vmatmul.mubr.f32.gmra.mrb[20].mxu1 %v24729_v59  ;;  %20181 = vmatprep.mubr.msk.f32.mxu0 %vm24602_vm0, %v29362_v1  ;;  %v25550_v57 = vsub.f32 %v5355_v39, %v5363_v22  ;;  %v25571_v40 = vpack.c.bf16 %v5366_v32, %v5363_v22 }
 0x139   :  { %20283 = vmatprep.mubr.msk.f32.mxu1 %vm24602_vm0, %v29362_v1  ;;  %22845 = vmatpush3.bf16.msra.mxu1 %v22844_v26 }
 0x13a   :  { %22809 = vmatpush3.bf16.msra.mxu0 %v24872_v16  ;;  %22846 = vmatprep.subr.bf16.mxu1 %v29364_v0  ;;  %v4742_v16 = vld [vmem:[#allocation5 + $0xe0] sm:$0xff]  ;;  %v5464_v49 = vand.u32 4294901760, %v25550_v57 }
 0x13b   :  { %22810 = vmatprep.subr.bf16.mxu0 %v29364_v0  ;;  %20182 = vmatmul.mubr.f32.gmra.mrb[22].mxu0 %v24767_v14  ;;  %v4750_v8 = vand.u32 4294901760, %v4742_v16 }
 0x13c   :  { %20284 = vmatmul.mubr.f32.gmra.mrb[22].mxu1 %v24767_v14  ;;  %20192 = vmatprep.mubr.msk.f32.mxu0 %vm24602_vm0, %v29362_v1  ;;  %v5465_v3 = vsub.f32 %v25550_v57, %v5464_v49 }
 0x13d   :  { %20294 = vmatprep.mubr.msk.f32.mxu1 %vm24602_vm0, %v29362_v1  ;;  %v25558_v19 = vsub.f32 %v4742_v16, %v4750_v8  ;;  %v25586_v25 = vpack.c.bf16 %v4753_v56, %v4750_v8  ;;  %v5486_v56 = vsub.f32 %v25588_v42, %v5485_v13 }
 0x13e   :  { %v5466_v22 = vand.u32 4294901760, %v5465_v3 }
 0x13f   :  { %20193 = vmatmul.mubr.f32.vlgmr.msra.gmra.mrb[18].mxu0 %v24678_v31  ;;  %v4851_v55 = vand.u32 4294901760, %v25558_v19 }
 0x140   :  { %20295 = vmatmul.mubr.f32.vlgmr.msra.gmra.mrb[18].mxu1 %v24678_v31  ;;  %20195 = vmatprep.mubr.msk.f32.mxu0 %vm24602_vm0, %v29362_v1 }
 0x141   :  { %22848 = vmatpush3.bf16.msra.mxu1 %v25378_v50  ;;  %22812 = vmatpush3.bf16.msra.mxu0 %v24663_v20  ;;  %v25552_v20 = vsub.f32 %v5356_v41, %v5366_v32  ;;  %v25581_v50 = vsub.f32 %v5357_v11, %v5369_v30  ;;  %v4852_v6 = vsub.f32 %v25558_v19, %v4851_v55 }
 0x142   :  { %20297 = vmatprep.mubr.msk.f32.mxu1 %vm24602_vm0, %v29362_v1  ;;  %22849 = vmatprep.subr.bf16.mxu1 %v29364_v0  ;;  %v4866_v11 = vsub.f32 %v25590_v46, %v4865_v24  ;;  %v22877_v7 = vpack.c.bf16 %v4858_v18, %v4851_v55  ;;  %v5971_v18 = vld [vmem:[#allocation5 + $0x138] sm:$0xf] }
 0x143   :  { %22813 = vmatprep.subr.bf16.mxu0 %v29364_v0  ;;  %20196 = vmatmul.mubr.f32.gmra.mrb[20].mxu0 %v24705_v44  ;;  %v5471_v54 = vand.u32 4294901760, %v25552_v20  ;;  %v5478_v29 = vand.u32 4294901760, %v25581_v50  ;;  %v4853_v35 = vand.u32 4294901760, %v4852_v6  ;;  %v22904_v3 = vpack.c.bf16 %v25588_v42, %v25581_v50 }
 0x144   :  { %20298 = vmatmul.mubr.f32.gmra.mrb[20].mxu1 %v24705_v44  ;;  %20198 = vmatprep.mubr.msk.f32.mxu0 %vm24602_vm0, %v29362_v1 }
 0x145   :  { %20300 = vmatprep.mubr.msk.f32.mxu1 %vm24602_vm0, %v29362_v1  ;;  %22851 = vmatpush3.bf16.msra.mxu1 %v25400_v47  ;;  %v5472_v4 = vsub.f32 %v25552_v20, %v5471_v54  ;;  %v5479_v8 = vsub.f32 %v25581_v50, %v5478_v29  ;;  %v22913_v6 = vpack.c.bf16 %v5471_v54, %v5464_v49  ;;  %v5968_v49 = vld [vmem:[#allocation5 + $0x120] sm:$0xff]  ;;  %v5969_v50 = vld [vmem:[#allocation5 + $0x128] sm:$0xff]  ;;  %v6584_v54 = vld [vmem:[#allocation5 + $0x158] sm:$0xf] }
 0x146   :  { %22815 = vmatpush3.bf16.msra.mxu0 %v24683_v33  ;;  %v25566_v12 = vpop.f32.mrb[0].mxu0  ;;  %22888 = vmatprep.subr.bf16.mxu1 %v29364_v0  ;;  %v4759_v33 = vand.u32 4294901760, %v4747_v27 }
 0x147   :  { %v25568_v38 = vpop.f32.mrb[0].mxu1  ;;  %22852 = vmatprep.subr.bf16.mxu0 %v29364_v0  ;;  %v19599_v34 = vpop.f32.mrb[1].mxu0  ;;  %20199 = vmatmul.mubr.f32.gmra.mrb[22].mxu0 %v24742_v5  ;;  %v5473_v32 = vand.u32 4294901760, %v5472_v4  ;;  %v5480_v30 = vand.u32 4294901760, %v5479_v8 }
 0x148   :  { %29532 = vst [vmem:[#allocation16_spill] sm:$0xff] %v25568_v38  ;;  %v19701_v43 = vpop.f32.mrb[1].mxu1  ;;  %20301 = vmatmul.mubr.f32.gmra.mrb[22].mxu1 %v24742_v5  ;;  %20209 = vmatprep.mubr.msk.f32.mxu0 %vm24602_vm0, %v29362_v1  ;;  %v25592_v47 = vsub.f32 %v4747_v27, %v4759_v33  ;;  %v25621_v63 = vpack.c.bf16 %v4759_v33, %v4756_v48  ;;  %v5487_v34 = vand.u32 4294901760, %v5486_v56 }
 0x149   :  { %20311 = vmatprep.mubr.msk.f32.mxu1 %vm24602_vm0, %v29362_v1  ;;  %v22895_v28 = vpack.c.bf16 %v5473_v32, %v5466_v22  ;;  %v22859_v27 = vpack.c.bf16 %v4860_v36, %v4853_v35  ;;  %v4867_v43 = vand.u32 4294901760, %v4866_v11 }
 0x14a   :  { %v25594_v51 = vpop.f32.mrb[2].mxu0  ;;  %v4872_v26 = vand.u32 4294901760, %v25592_v47  ;;  %v22898_v48 = vpack.c.bf16 %v5487_v34, %v5480_v30  ;;  %v22868_v4 = vpack.c.bf16 %v25592_v47, %v25590_v46  ;;  %v5976_v46 = vand.u32 4294901760, %v5968_v49 }
 0x14b   :  { %v25596_v58 = vpop.f32.mrb[2].mxu1  ;;  %v19602_v60 = vpop.f32.mrb[3].mxu0  ;;  %20210 = vmatmul.mubr.f32.vlgmr.msra.gmra.mrb[18].mxu0 %v24678_v31 }
 0x14c   :  { %29533 = vst [vmem:[#allocation17_spill] sm:$0xff] %v25596_v58  ;;  %v19704_v61 = vpop.f32.mrb[3].mxu1  ;;  %20312 = vmatmul.mubr.f32.vlgmr.msra.gmra.mrb[18].mxu1 %v24678_v31  ;;  %20212 = vmatprep.mubr.msk.f32.mxu0 %vm24602_vm0, %v29362_v1  ;;  %v4873_v21 = vsub.f32 %v25592_v47, %v4872_v26  ;;  %v22901_v60 = vpack.c.bf16 %v25552_v20, %v25550_v57  ;;  %v5979_v47 = vand.u32 4294901760, %v5969_v50 }
 0x14d   :  { %22890 = vmatpush3.bf16.msra.mxu1 %v25571_v40  ;;  %20314 = vmatprep.mubr.msk.f32.mxu1 %vm24602_vm0, %v29362_v1  ;;  %v22865_v61 = vpack.c.bf16 %v25560_v52, %v25558_v19  ;;  %v22916_v57 = vpack.c.bf16 %v5485_v13, %v5478_v29  ;;  %v22880_v20 = vpack.c.bf16 %v4872_v26, %v4865_v24  ;;  %v6581_v19 = vld [vmem:[#allocation5 + $0x140] sm:$0xff]  ;;  %v6582_v52 = vld [vmem:[#allocation5 + $0x148] sm:$0xff]  ;;  %v6583_v29 = vld [vmem:[#allocation5 + $0x150] sm:$0xff] }
 0x14e   :  { %22854 = vmatpush3.bf16.msra.mxu0 %v25586_v25  ;;  %v25626_v39 = vpop.f32.mrb[4].mxu0  ;;  %22891 = vmatprep.subr.bf16.mxu1 %v29364_v0  ;;  %v4874_v15 = vand.u32 4294901760, %v4873_v21  ;;  %v6589_v55 = vand.u32 4294901760, %v6581_v19  ;;  %v6592_v42 = vand.u32 4294901760, %v6582_v52  ;;  %v25797_v24 = vsub.f32 %v5968_v49, %v5976_v46 }
 0x14f   :  { %v25628_v41 = vpop.f32.mrb[4].mxu1  ;;  %22855 = vmatprep.subr.bf16.mxu0 %v29364_v0  ;;  %v19605_v16 = vpop.f32.mrb[5].mxu0  ;;  %20213 = vmatmul.mubr.f32.gmra.mrb[20].mxu0 %v24705_v44  ;;  %v25799_v26 = vsub.f32 %v5969_v50, %v5979_v47  ;;  %v6595_v36 = vand.u32 4294901760, %v6583_v29 }
 0x150   :  { %29534 = vst [vmem:[#allocation18_spill] sm:$0xff] %v25628_v41  ;;  %v19707_v17 = vpop.f32.mrb[5].mxu1  ;;  %20315 = vmatmul.mubr.f32.gmra.mrb[20].mxu1 %v24705_v44  ;;  %20215 = vmatprep.mubr.msk.f32.mxu0 %vm24602_vm0, %v29362_v1  ;;  %v22862_v33 = vpack.c.bf16 %v4874_v15, %v4867_v43  ;;  %v25795_v13 = vsub.f32 %v6582_v52, %v6592_v42  ;;  %v5970_v16 = vld [vmem:[#allocation5 + $0x130] sm:$0xff]  ;;  %v6077_v34 = vand.u32 4294901760, %v25797_v24 }
 0x151   :  { %20317 = vmatprep.mubr.msk.f32.mxu1 %vm24602_vm0, %v29362_v1  ;;  %22893 = vmatpush3.bf16.msra.mxu1 %v25600_v2  ;;  %v5973_v17 = vsel %vm62_vm1, %v5971_v18, 0  ;;  %v25809_v35 = vpack.c.bf16 %v6592_v42, %v6589_v55  ;;  %v6084_v43 = vand.u32 4294901760, %v25799_v26  ;;  %v25828_v15 = vpack.c.bf16 %v5979_v47, %v5976_v46 }
 0x152   :  { %22857 = vmatpush3.bf16.msra.mxu0 %v25621_v63  ;;  %22894 = vmatprep.subr.bf16.mxu1 %v29364_v0  ;;  %v6697_v30 = vand.u32 4294901760, %v25795_v13  ;;  %v6078_v52 = vsub.f32 %v25797_v24, %v6077_v34 }
 0x153   :  { %22858 = vmatprep.subr.bf16.mxu0 %v29364_v0  ;;  %20216 = vmatmul.mubr.f32.gmra.mrb[22].mxu0 %v24742_v5  ;;  %v6085_v49 = vsub.f32 %v25799_v26, %v6084_v43 }
 0x154   :  { %20318 = vmatmul.mubr.f32.gmra.mrb[22].mxu1 %v24742_v5  ;;  %20328 = vmatprep.mubr.msk.f32.mxu0 %vm24602_vm0, %v29362_v1 }
 0x155   :  { %20430 = vmatprep.mubr.msk.f32.mxu1 %vm24602_vm0, %v29362_v1 }
 0x157   :  { %20329 = vmatmul.mubr.f32.vlgmr.msra.gmra.mrb[24].mxu0 %v24733_v62 }
 0x158   :  { %20431 = vmatmul.mubr.f32.vlgmr.msra.gmra.mrb[24].mxu1 %v24733_v62  ;;  %20331 = vmatprep.mubr.msk.f32.mxu0 %vm24602_vm0, %v29362_v1 }
 0x159   :  { %22896 = vmatpush3.bf16.msra.mxu1 %v22895_v28  ;;  %22860 = vmatpush3.bf16.msra.mxu0 %v22859_v27  ;;  %v25823_v27 = vsub.f32 %v6583_v29, %v6595_v36 }
 0x15a   :  { %20433 = vmatprep.mubr.msk.f32.mxu1 %vm24602_vm0, %v29362_v1  ;;  %22897 = vmatprep.subr.bf16.mxu1 %v29364_v0 }
 0x15b   :  { %22861 = vmatprep.subr.bf16.mxu0 %v29364_v0  ;;  %20332 = vmatmul.mubr.f32.gmra.mrb[26].mxu0 %v24753_v9  ;;  %v6704_v50 = vand.u32 4294901760, %v25823_v27 }
 0x15c   :  { %20434 = vmatmul.mubr.f32.gmra.mrb[26].mxu1 %v24753_v9  ;;  %20334 = vmatprep.mubr.msk.f32.mxu0 %vm24602_vm0, %v29362_v1 }
 0x15d   :  { %20436 = vmatprep.mubr.msk.f32.mxu1 %vm24602_vm0, %v29362_v1  ;;  %22899 = vmatpush3.bf16.msra.mxu1 %v22898_v48 }
 0x15e   :  { %22863 = vmatpush3.bf16.msra.mxu0 %v22862_v33  ;;  %22900 = vmatprep.subr.bf16.mxu1 %v29364_v0 }
 0x15f   :  { %22864 = vmatprep.subr.bf16.mxu0 %v29364_v0  ;;  %20335 = vmatmul.mubr.f32.gmra.mrb[28].mxu0 %v24779_v23 }
 0x160   :  { %20437 = vmatmul.mubr.f32.gmra.mrb[28].mxu1 %v24779_v23  ;;  %20345 = vmatprep.mubr.msk.f32.mxu0 %vm24602_vm0, %v29362_v1 }
 0x161   :  { %20447 = vmatprep.mubr.msk.f32.mxu1 %vm24602_vm0, %v29362_v1 }
 0x163   :  { %20346 = vmatmul.mubr.f32.vlgmr.msra.gmra.mrb[24].mxu0 %v24678_v31 }
 0x164   :  { %20448 = vmatmul.mubr.f32.vlgmr.msra.gmra.mrb[24].mxu1 %v24678_v31  ;;  %20348 = vmatprep.mubr.msk.f32.mxu0 %vm24602_vm0, %v29362_v1 }
 0x165   :  { %22902 = vmatpush3.bf16.msra.mxu1 %v22901_v60  ;;  %22866 = vmatpush3.bf16.msra.mxu0 %v22865_v61 }
 0x166   :  { %20450 = vmatprep.mubr.msk.f32.mxu1 %vm24602_vm0, %v29362_v1  ;;  %22903 = vmatprep.subr.bf16.mxu1 %v29364_v0 }
 0x167   :  { %22867 = vmatprep.subr.bf16.mxu0 %v29364_v0  ;;  %20349 = vmatmul.mubr.f32.gmra.mrb[26].mxu0 %v24705_v44 }
 0x168   :  { %20451 = vmatmul.mubr.f32.gmra.mrb[26].mxu1 %v24705_v44  ;;  %20351 = vmatprep.mubr.msk.f32.mxu0 %vm24602_vm0, %v29362_v1 }
 0x169   :  { %20453 = vmatprep.mubr.msk.f32.mxu1 %vm24602_vm0, %v29362_v1  ;;  %22905 = vmatpush3.bf16.msra.mxu1 %v22904_v3 }
 0x16a   :  { %22869 = vmatpush3.bf16.msra.mxu0 %v22868_v4  ;;  %22906 = vmatprep.subr.bf16.mxu1 %v29364_v0 }
 0x16b   :  { %22870 = vmatprep.subr.bf16.mxu0 %v29364_v0  ;;  %20352 = vmatmul.mubr.f32.gmra.mrb[28].mxu0 %v24742_v5 }
 0x16c   :  { %20454 = vmatmul.mubr.f32.gmra.mrb[28].mxu1 %v24742_v5  ;;  %20362 = vmatprep.mubr.msk.f32.mxu0 %vm24602_vm0, %v29362_v1 }
 0x16d   :  { %20464 = vmatprep.mubr.msk.f32.mxu1 %vm24602_vm0, %v29362_v1 }
 0x16f   :  { %20363 = vmatmul.mubr.f32.vlgmr.msra.gmra.mrb[24].mxu0 %v24689_v37 }
 0x170   :  { %20465 = vmatmul.mubr.f32.vlgmr.msra.gmra.mrb[24].mxu1 %v24689_v37  ;;  %20365 = vmatprep.mubr.msk.f32.mxu0 %vm24602_vm0, %v29362_v1 }
 0x171   :  { %22908 = vmatpush3.bf16.msra.mxu1 %v25571_v40  ;;  %22872 = vmatpush3.bf16.msra.mxu0 %v25586_v25 }
 0x172   :  { %20467 = vmatprep.mubr.msk.f32.mxu1 %vm24602_vm0, %v29362_v1  ;;  %22909 = vmatprep.subr.bf16.mxu1 %v29364_v0 }
 0x173   :  { %22873 = vmatprep.subr.bf16.mxu0 %v29364_v0  ;;  %20366 = vmatmul.mubr.f32.gmra.mrb[26].mxu0 %v24720_v53 }
 0x174   :  { %20468 = vmatmul.mubr.f32.gmra.mrb[26].mxu1 %v24720_v53  ;;  %20368 = vmatprep.mubr.msk.f32.mxu0 %vm24602_vm0, %v29362_v1 }
 0x175   :  { %20470 = vmatprep.mubr.msk.f32.mxu1 %vm24602_vm0, %v29362_v1  ;;  %22911 = vmatpush3.bf16.msra.mxu1 %v25600_v2 }
 0x176   :  { %22875 = vmatpush3.bf16.msra.mxu0 %v25621_v63  ;;  %22912 = vmatprep.subr.bf16.mxu1 %v29364_v0 }
 0x177   :  { %22876 = vmatprep.subr.bf16.mxu0 %v29364_v0  ;;  %20369 = vmatmul.mubr.f32.gmra.mrb[28].mxu0 %v24756_v10 }
 0x178   :  { %20471 = vmatmul.mubr.f32.gmra.mrb[28].mxu1 %v24756_v10  ;;  %20379 = vmatprep.mubr.msk.f32.mxu0 %vm24602_vm0, %v29362_v1 }
 0x179   :  { %20481 = vmatprep.mubr.msk.f32.mxu1 %vm24602_vm0, %v29362_v1 }
 0x17b   :  { %20380 = vmatmul.mubr.f32.vlgmr.msra.gmra.mrb[24].mxu0 %v24709_v45 }
 0x17c   :  { %20482 = vmatmul.mubr.f32.vlgmr.msra.gmra.mrb[24].mxu1 %v24709_v45  ;;  %20382 = vmatprep.mubr.msk.f32.mxu0 %vm24602_vm0, %v29362_v1 }
 0x17d   :  { %22914 = vmatpush3.bf16.msra.mxu1 %v22913_v6  ;;  %22878 = vmatpush3.bf16.msra.mxu0 %v22877_v7 }
 0x17e   :  { %20484 = vmatprep.mubr.msk.f32.mxu1 %vm24602_vm0, %v29362_v1  ;;  %22915 = vmatprep.subr.bf16.mxu1 %v29364_v0 }
 0x17f   :  { %22879 = vmatprep.subr.bf16.mxu0 %v29364_v0  ;;  %20383 = vmatmul.mubr.f32.gmra.mrb[26].mxu0 %v24729_v59 }
 0x180   :  { %20485 = vmatmul.mubr.f32.gmra.mrb[26].mxu1 %v24729_v59  ;;  %20385 = vmatprep.mubr.msk.f32.mxu0 %vm24602_vm0, %v29362_v1 }
 0x181   :  { %20487 = vmatprep.mubr.msk.f32.mxu1 %vm24602_vm0, %v29362_v1  ;;  %22917 = vmatpush3.bf16.msra.mxu1 %v22916_v57 }
 0x182   :  { %22881 = vmatpush3.bf16.msra.mxu0 %v22880_v20  ;;  %22918 = vmatprep.subr.bf16.mxu1 %v29364_v0 }
 0x183   :  { %22882 = vmatprep.subr.bf16.mxu0 %v29364_v0  ;;  %20386 = vmatmul.mubr.f32.gmra.mrb[28].mxu0 %v24767_v14 }
 0x184   :  { %20488 = vmatmul.mubr.f32.gmra.mrb[28].mxu1 %v24767_v14  ;;  %20396 = vmatprep.mubr.msk.f32.mxu0 %vm24602_vm0, %v29362_v1 }
 0x185   :  { %20498 = vmatprep.mubr.msk.f32.mxu1 %vm24602_vm0, %v29362_v1 }
 0x187   :  { %20397 = vmatmul.mubr.f32.vlgmr.msra.gmra.mrb[24].mxu0 %v24678_v31 }
 0x188   :  { %20499 = vmatmul.mubr.f32.vlgmr.msra.gmra.mrb[24].mxu1 %v24678_v31  ;;  %20399 = vmatprep.mubr.msk.f32.mxu0 %vm24602_vm0, %v29362_v1 }
 0x189   :  { %22920 = vmatpush3.bf16.msra.mxu1 %v25571_v40  ;;  %22884 = vmatpush3.bf16.msra.mxu0 %v25586_v25  ;;  %v25788_v40 = vsub.f32 %v6581_v19, %v6589_v55  ;;  %v6586_v25 = vsel %vm62_vm1, %v6584_v54, 0  ;;  %v6698_v19 = vsub.f32 %v25795_v13, %v6697_v30 }
 0x18a   :  { %20501 = vmatprep.mubr.msk.f32.mxu1 %vm24602_vm0, %v29362_v1  ;;  %22921 = vmatprep.subr.bf16.mxu1 %v29364_v0  ;;  %v6598_v8 = vand.u32 4294901760, %v6586_v25 }
 0x18b   :  { %22885 = vmatprep.subr.bf16.mxu0 %v29364_v0  ;;  %20400 = vmatmul.mubr.f32.gmra.mrb[26].mxu0 %v24705_v44  ;;  %v6690_v21 = vand.u32 4294901760, %v25788_v40 }
 0x18c   :  { %20502 = vmatmul.mubr.f32.gmra.mrb[26].mxu1 %v24705_v44  ;;  %20402 = vmatprep.mubr.msk.f32.mxu0 %vm24602_vm0, %v29362_v1  ;;  %v25830_v48 = vsub.f32 %v6586_v25, %v6598_v8  ;;  %v25842_v7 = vpack.c.bf16 %v6598_v8, %v6595_v36  ;;  %v6699_v36 = vand.u32 4294901760, %v6698_v19  ;;  %v6079_v8 = vand.u32 4294901760, %v6078_v52 }
 0x18d   :  { %20504 = vmatprep.mubr.msk.f32.mxu1 %vm24602_vm0, %v29362_v1  ;;  %22923 = vmatpush3.bf16.msra.mxu1 %v25600_v2  ;;  %v5982_v2 = vand.u32 4294901760, %v5970_v16  ;;  %v6691_v57 = vsub.f32 %v25788_v40, %v6690_v21 }
 0x18e   :  { %22887 = vmatpush3.bf16.msra.mxu0 %v25621_v63  ;;  %v25804_v22 = vpop.f32.mrb[6].mxu0  ;;  %22960 = vmatprep.subr.bf16.mxu1 %v29364_v0  ;;  %v5985_v63 = vand.u32 4294901760, %v5973_v17  ;;  %v6711_v55 = vand.u32 4294901760, %v25830_v48 }
 0x18f   :  { %29535 = vst [vmem:[#allocation19_spill] sm:$0xff] %v25804_v22  ;;  %v25806_v32 = vpop.f32.mrb[6].mxu1  ;;  %22924 = vmatprep.subr.bf16.mxu0 %v29364_v0  ;;  %v19803_v56 = vpop.f32.mrb[7].mxu0  ;;  %20403 = vmatmul.mubr.f32.gmra.mrb[28].mxu0 %v24742_v5  ;;  %v25832_v33 = vsub.f32 %v5970_v16, %v5982_v2  ;;  %v6692_v16 = vand.u32 4294901760, %v6691_v57 }
 0x190   :  { %29536 = vst [vmem:[#allocation20_spill] sm:$0xff] %v25806_v32  ;;  %v19905_v11 = vpop.f32.mrb[7].mxu1  ;;  %20505 = vmatmul.mubr.f32.gmra.mrb[28].mxu1 %v24742_v5  ;;  %v25817_v28 = vadd.f32 %v25806_v32, %v25568_v38  ;;  %20413 = vmatprep.mubr.msk.f32.mxu0 %vm24602_vm0, %v29362_v1  ;;  %v25834_v60 = vsub.f32 %v5973_v17, %v5985_v63  ;;  %v6086_v56 = vand.u32 4294901760, %v6085_v49 }
 0x191   :  { %20515 = vmatprep.mubr.msk.f32.mxu1 %vm24602_vm0, %v29362_v1  ;;  %v25867_v54 = vpack.c.bf16 %v5985_v63, %v5982_v2  ;;  %v6091_v18 = vand.u32 4294901760, %v25832_v33  ;;  %v6705_v11 = vsub.f32 %v25823_v27, %v6704_v50  ;;  %v6712_v2 = vsub.f32 %v25830_v48, %v6711_v55 }
 0x192   :  { %v25836_v61 = vpop.f32.mrb[8].mxu0  ;;  %v29356_v42 = vand.u32 4294901760, %v25834_v60  ;;  %v22931_v57 = vpack.c.bf16 %v6086_v56, %v6079_v8  ;;  %v22940_v8 = vpack.c.bf16 %v25834_v60, %v25832_v33  ;;  %v22985_v56 = vpack.c.bf16 %v6697_v30, %v6690_v21  ;;  %v7808_v21 = vld [vmem:[#allocation5 + $0x188] sm:$0xff] }
 0x193   :  { %v25838_v3 = vpop.f32.mrb[8].mxu1  ;;  %v19806_v4 = vpop.f32.mrb[9].mxu0  ;;  %20414 = vmatmul.mubr.f32.vlgmr.msra.gmra.mrb[24].mxu0 %v24678_v31  ;;  %v6092_v63 = vsub.f32 %v25832_v33, %v6091_v18  ;;  %v6706_v19 = vand.u32 4294901760, %v6705_v11  ;;  %v6713_v52 = vand.u32 4294901760, %v6712_v2  ;;  %v22949_v11 = vpack.c.bf16 %v6084_v43, %v6077_v34  ;;  %v7195_v30 = vld [vmem:[#allocation5 + $0x168] sm:$0xff]  ;;  %v7196_v2 = vld [vmem:[#allocation5 + $0x170] sm:$0xff] }
 0x194   :  { %29537 = vst [vmem:[#allocation21_spill] sm:$0xff] %v25838_v3  ;;  %v19908_v6 = vpop.f32.mrb[9].mxu1  ;;  %20516 = vmatmul.mubr.f32.vlgmr.msra.gmra.mrb[24].mxu1 %v24678_v31  ;;  %v25849_v20 = vadd.f32 %v25838_v3, %v25596_v58  ;;  %20416 = vmatprep.mubr.msk.f32.mxu0 %vm24602_vm0, %v29362_v1  ;;  %v6099_v4 = vsub.f32 %v25834_v60, %v29356_v42  ;;  %v7818_v43 = vand.u32 4294901760, %v7808_v21  ;;  %v7197_v33 = vld [vmem:[#allocation5 + $0x178] sm:$0xf] }
 0x195   :  { %22962 = vmatpush3.bf16.msra.mxu1 %v25809_v35  ;;  %20518 = vmatprep.mubr.msk.f32.mxu1 %vm24602_vm0, %v29362_v1  ;;  %v22967_v6 = vpack.c.bf16 %v6699_v36, %v6692_v16  ;;  %v6093_v49 = vand.u32 4294901760, %v6092_v63  ;;  %v22973_v16 = vpack.c.bf16 %v25795_v13, %v25788_v40  ;;  %v22976_v36 = vpack.c.bf16 %v25830_v48, %v25823_v27  ;;  %v7194_v27 = vld [vmem:[#allocation5 + $0x160] sm:$0xff]  ;;  %v7810_v48 = vld [vmem:[#allocation5 + $0x198] sm:$0xf] }
 0x196   :  { %22926 = vmatpush3.bf16.msra.mxu0 %v25828_v15  ;;  %v25872_v46 = vpop.f32.mrb[10].mxu0  ;;  %22963 = vmatprep.subr.bf16.mxu1 %v29364_v0  ;;  %v22988_v40 = vpack.c.bf16 %v6711_v55, %v6704_v50  ;;  %v29540_v13 = vand.u32 4294901760, %v25834_v60  ;;  %v26038_v50 = vsub.f32 %v7808_v21, %v7818_v43  ;;  %v7205_v55 = vand.u32 4294901760, %v7195_v30 }
 0x197   :  { %v25874_v47 = vpop.f32.mrb[10].mxu1  ;;  %22927 = vmatprep.subr.bf16.mxu0 %v29364_v0  ;;  %v19809_v29 = vpop.f32.mrb[11].mxu0  ;;  %20417 = vmatmul.mubr.f32.gmra.mrb[26].mxu0 %v24705_v44 }
 0x198   :  { %29538 = vst [vmem:[#allocation22_spill] sm:$0xff] %v25874_v47  ;;  %v19911_v25 = vpop.f32.mrb[11].mxu1  ;;  %20519 = vmatmul.mubr.f32.gmra.mrb[26].mxu1 %v24705_v44  ;;  %v25882_v17 = vadd.f32 %v25874_v47, %v25628_v41  ;;  %20419 = vmatprep.mubr.msk.f32.mxu0 %vm24602_vm0, %v29362_v1  ;;  %v6100_v29 = vand.u32 4294901760, %v6099_v4  ;;  %v26049_v4 = vsub.f32 %v7195_v30, %v7205_v55 }
 0x199   :  { %20521 = vmatprep.mubr.msk.f32.mxu1 %vm24602_vm0, %v29362_v1  ;;  %22965 = vmatpush3.bf16.msra.mxu1 %v25842_v7  ;;  %v22970_v25 = vpack.c.bf16 %v6713_v52, %v6706_v19 }
 0x19a   :  { %29539 = vst [vmem:[#allocation23_spill] sm:$0xff] %v25882_v17  ;;  %22929 = vmatpush3.bf16.msra.mxu0 %v25867_v54  ;;  %22966 = vmatprep.subr.bf16.mxu1 %v29364_v0  ;;  %v22934_v42 = vpack.c.bf16 %v6100_v29, %v6093_v49 }
 0x19b   :  { %22930 = vmatprep.subr.bf16.mxu0 %v29364_v0  ;;  %20420 = vmatmul.mubr.f32.gmra.mrb[28].mxu0 %v24742_v5 }
 0x19c   :  { %20522 = vmatmul.mubr.f32.gmra.mrb[28].mxu1 %v24742_v5  ;;  %20532 = vmatprep.mubr.msk.f32.mxu0 %vm24602_vm0, %v29362_v1 }
 0x19d   :  { %20634 = vmatprep.mubr.msk.f32.mxu1 %vm24602_vm0, %v29362_v1 }
 0x19f   :  { %20533 = vmatmul.mubr.f32.vlgmr.msra.gmra.mrb[30].mxu0 %v24733_v62 }
 0x1a0   :  { %20635 = vmatmul.mubr.f32.vlgmr.msra.gmra.mrb[30].mxu1 %v24733_v62  ;;  %20535 = vmatprep.mubr.msk.f32.mxu0 %vm24602_vm0, %v29362_v1 }
 0x1a1   :  { %22968 = vmatpush3.bf16.msra.mxu1 %v22967_v6  ;;  %22932 = vmatpush3.bf16.msra.mxu0 %v22931_v57  ;;  %v7199_v6 = vsel %vm62_vm1, %v7197_v33, 0 }
 0x1a2   :  { %20637 = vmatprep.mubr.msk.f32.mxu1 %vm24602_vm0, %v29362_v1  ;;  %22969 = vmatprep.subr.bf16.mxu1 %v29364_v0 }
 0x1a3   :  { %22933 = vmatprep.subr.bf16.mxu0 %v29364_v0  ;;  %20536 = vmatmul.mubr.f32.gmra.mrb[32].mxu0 %v24753_v9 }
 0x1a4   :  { %20638 = vmatmul.mubr.f32.gmra.mrb[32].mxu1 %v24753_v9  ;;  %20538 = vmatprep.mubr.msk.f32.mxu0 %vm24602_vm0, %v29362_v1 }
 0x1a5   :  { %20640 = vmatprep.mubr.msk.f32.mxu1 %vm24602_vm0, %v29362_v1  ;;  %22971 = vmatpush3.bf16.msra.mxu1 %v22970_v25  ;;  %v7208_v25 = vand.u32 4294901760, %v7196_v2 }
 0x1a6   :  { %22935 = vmatpush3.bf16.msra.mxu0 %v22934_v42  ;;  %22972 = vmatprep.subr.bf16.mxu1 %v29364_v0  ;;  %v22937_v42 = vpack.c.bf16 %v25799_v26, %v25797_v24  ;;  %v22952_v24 = vpack.c.bf16 %v29540_v13, %v6091_v18  ;;  %v7807_v26 = vld [vmem:[#allocation5 + $0x180] sm:$0xff]  ;;  %v7809_v18 = vld [vmem:[#allocation5 + $0x190] sm:$0xff] }
 0x1a7   :  { %22936 = vmatprep.subr.bf16.mxu0 %v29364_v0  ;;  %20539 = vmatmul.mubr.f32.gmra.mrb[34].mxu0 %v24779_v23  ;;  %v7815_v34 = vand.u32 4294901760, %v7807_v26  ;;  %v7821_v19 = vand.u32 4294901760, %v7809_v18  ;;  %v26094_v30 = vsub.f32 %v7196_v2, %v7208_v25 }
 0x1a8   :  { %20641 = vmatmul.mubr.f32.gmra.mrb[34].mxu1 %v24779_v23  ;;  %20549 = vmatprep.mubr.msk.f32.mxu0 %vm24602_vm0, %v29362_v1 }
 0x1a9   :  { %20651 = vmatprep.mubr.msk.f32.mxu1 %vm24602_vm0, %v29362_v1  ;;  %v26036_v60 = vsub.f32 %v7807_v26, %v7815_v34  ;;  %v26054_v57 = vpack.c.bf16 %v7818_v43, %v7815_v34 }
 0x1ab   :  { %20550 = vmatmul.mubr.f32.vlgmr.msra.gmra.mrb[30].mxu0 %v24678_v31 }
 0x1ac   :  { %20652 = vmatmul.mubr.f32.vlgmr.msra.gmra.mrb[30].mxu1 %v24678_v31  ;;  %20552 = vmatprep.mubr.msk.f32.mxu0 %vm24602_vm0, %v29362_v1 }
 0x1ad   :  { %22974 = vmatpush3.bf16.msra.mxu1 %v22973_v16  ;;  %22938 = vmatpush3.bf16.msra.mxu0 %v22937_v42  ;;  %v29359_v16 = vand.u32 4294901760, %v26036_v60  ;;  %v29357_v42 = vand.u32 4294901760, %v26038_v50 }
 0x1ae   :  { %20654 = vmatprep.mubr.msk.f32.mxu1 %vm24602_vm0, %v29362_v1  ;;  %22975 = vmatprep.subr.bf16.mxu1 %v29364_v0 }
 0x1af   :  { %22939 = vmatprep.subr.bf16.mxu0 %v29364_v0  ;;  %20553 = vmatmul.mubr.f32.gmra.mrb[32].mxu0 %v24705_v44 }
 0x1b0   :  { %20655 = vmatmul.mubr.f32.gmra.mrb[32].mxu1 %v24705_v44  ;;  %20555 = vmatprep.mubr.msk.f32.mxu0 %vm24602_vm0, %v29362_v1 }
 0x1b1   :  { %20657 = vmatprep.mubr.msk.f32.mxu1 %vm24602_vm0, %v29362_v1  ;;  %22977 = vmatpush3.bf16.msra.mxu1 %v22976_v36 }
 0x1b2   :  { %22941 = vmatpush3.bf16.msra.mxu0 %v22940_v8  ;;  %22978 = vmatprep.subr.bf16.mxu1 %v29364_v0 }
 0x1b3   :  { %22942 = vmatprep.subr.bf16.mxu0 %v29364_v0  ;;  %20556 = vmatmul.mubr.f32.gmra.mrb[34].mxu0 %v24742_v5 }
 0x1b4   :  { %20658 = vmatmul.mubr.f32.gmra.mrb[34].mxu1 %v24742_v5  ;;  %20566 = vmatprep.mubr.msk.f32.mxu0 %vm24602_vm0, %v29362_v1 }
 0x1b5   :  { %20668 = vmatprep.mubr.msk.f32.mxu1 %vm24602_vm0, %v29362_v1 }
 0x1b7   :  { %20567 = vmatmul.mubr.f32.vlgmr.msra.gmra.mrb[30].mxu0 %v24689_v37 }
 0x1b8   :  { %20669 = vmatmul.mubr.f32.vlgmr.msra.gmra.mrb[30].mxu1 %v24689_v37  ;;  %20569 = vmatprep.mubr.msk.f32.mxu0 %vm24602_vm0, %v29362_v1 }
 0x1b9   :  { %22980 = vmatpush3.bf16.msra.mxu1 %v25809_v35  ;;  %22944 = vmatpush3.bf16.msra.mxu0 %v25828_v15 }
 0x1ba   :  { %20671 = vmatprep.mubr.msk.f32.mxu1 %vm24602_vm0, %v29362_v1  ;;  %22981 = vmatprep.subr.bf16.mxu1 %v29364_v0 }
 0x1bb   :  { %22945 = vmatprep.subr.bf16.mxu0 %v29364_v0  ;;  %20570 = vmatmul.mubr.f32.gmra.mrb[32].mxu0 %v24720_v53 }
 0x1bc   :  { %20672 = vmatmul.mubr.f32.gmra.mrb[32].mxu1 %v24720_v53  ;;  %20572 = vmatprep.mubr.msk.f32.mxu0 %vm24602_vm0, %v29362_v1 }
 0x1bd   :  { %20674 = vmatprep.mubr.msk.f32.mxu1 %vm24602_vm0, %v29362_v1  ;;  %22983 = vmatpush3.bf16.msra.mxu1 %v25842_v7 }
 0x1be   :  { %22947 = vmatpush3.bf16.msra.mxu0 %v25867_v54  ;;  %22984 = vmatprep.subr.bf16.mxu1 %v29364_v0 }
 0x1bf   :  { %22948 = vmatprep.subr.bf16.mxu0 %v29364_v0  ;;  %20573 = vmatmul.mubr.f32.gmra.mrb[34].mxu0 %v24756_v10 }
 0x1c0   :  { %20675 = vmatmul.mubr.f32.gmra.mrb[34].mxu1 %v24756_v10  ;;  %20583 = vmatprep.mubr.msk.f32.mxu0 %vm24602_vm0, %v29362_v1 }
 0x1c1   :  { %20685 = vmatprep.mubr.msk.f32.mxu1 %vm24602_vm0, %v29362_v1 }
 0x1c3   :  { %20584 = vmatmul.mubr.f32.vlgmr.msra.gmra.mrb[30].mxu0 %v24709_v45 }
 0x1c4   :  { %20686 = vmatmul.mubr.f32.vlgmr.msra.gmra.mrb[30].mxu1 %v24709_v45  ;;  %20586 = vmatprep.mubr.msk.f32.mxu0 %vm24602_vm0, %v29362_v1 }
 0x1c5   :  { %22986 = vmatpush3.bf16.msra.mxu1 %v22985_v56  ;;  %22950 = vmatpush3.bf16.msra.mxu0 %v22949_v11  ;;  %v7211_v11 = vand.u32 4294901760, %v7199_v6 }
 0x1c6   :  { %20688 = vmatprep.mubr.msk.f32.mxu1 %vm24602_vm0, %v29362_v1  ;;  %22987 = vmatprep.subr.bf16.mxu1 %v29364_v0 }
 0x1c7   :  { %22951 = vmatprep.subr.bf16.mxu0 %v29364_v0  ;;  %20587 = vmatmul.mubr.f32.gmra.mrb[32].mxu0 %v24729_v59  ;;  %v26096_v34 = vsub.f32 %v7199_v6, %v7211_v11 }
 0x1c8   :  { %20689 = vmatmul.mubr.f32.gmra.mrb[32].mxu1 %v24729_v59  ;;  %20589 = vmatprep.mubr.msk.f32.mxu0 %vm24602_vm0, %v29362_v1 }
 0x1c9   :  { %20691 = vmatprep.mubr.msk.f32.mxu1 %vm24602_vm0, %v29362_v1  ;;  %22989 = vmatpush3.bf16.msra.mxu1 %v22988_v40  ;;  %v26082_v40 = vsub.f32 %v7809_v18, %v7821_v19  ;;  %v7917_v18 = vsub.f32 %v26036_v60, %v29359_v16 }
 0x1ca   :  { %22953 = vmatpush3.bf16.msra.mxu0 %v22952_v24  ;;  %22990 = vmatprep.subr.bf16.mxu1 %v29364_v0  ;;  %v29360_v24 = vand.u32 4294901760, %v26049_v4 }
 0x1cb   :  { %22954 = vmatprep.subr.bf16.mxu0 %v29364_v0  ;;  %20590 = vmatmul.mubr.f32.gmra.mrb[34].mxu0 %v24767_v14 }
 0x1cc   :  { %20692 = vmatmul.mubr.f32.gmra.mrb[34].mxu1 %v24767_v14  ;;  %20600 = vmatprep.mubr.msk.f32.mxu0 %vm24602_vm0, %v29362_v1 }
 0x1cd   :  { %20702 = vmatprep.mubr.msk.f32.mxu1 %vm24602_vm0, %v29362_v1 }
 0x1cf   :  { %20601 = vmatmul.mubr.f32.vlgmr.msra.gmra.mrb[30].mxu0 %v24678_v31 }
 0x1d0   :  { %20703 = vmatmul.mubr.f32.vlgmr.msra.gmra.mrb[30].mxu1 %v24678_v31  ;;  %20603 = vmatprep.mubr.msk.f32.mxu0 %vm24602_vm0, %v29362_v1 }
 0x1d1   :  { %22992 = vmatpush3.bf16.msra.mxu1 %v25809_v35  ;;  %22956 = vmatpush3.bf16.msra.mxu0 %v25828_v15  ;;  %v7202_v35 = vand.u32 4294901760, %v7194_v27  ;;  %v7812_v15 = vsel %vm62_vm1, %v7810_v48, 0 }
 0x1d2   :  { %20705 = vmatprep.mubr.msk.f32.mxu1 %vm24602_vm0, %v29362_v1  ;;  %22993 = vmatprep.subr.bf16.mxu1 %v29364_v0  ;;  %v7824_v29 = vand.u32 4294901760, %v7812_v15 }
 0x1d3   :  { %22957 = vmatprep.subr.bf16.mxu0 %v29364_v0  ;;  %20604 = vmatmul.mubr.f32.gmra.mrb[32].mxu0 %v24705_v44  ;;  %v26047_v63 = vsub.f32 %v7194_v27, %v7202_v35  ;;  %v26090_v21 = vpack.c.bf16 %v7205_v55, %v7202_v35  ;;  %v7924_v35 = vsub.f32 %v26038_v50, %v29357_v42 }
 0x1d4   :  { %20706 = vmatmul.mubr.f32.gmra.mrb[32].mxu1 %v24705_v44  ;;  %20606 = vmatprep.mubr.msk.f32.mxu0 %vm24602_vm0, %v29362_v1  ;;  %v26092_v27 = vsub.f32 %v7812_v15, %v7824_v29  ;;  %v26102_v33 = vpack.c.bf16 %v7824_v29, %v7821_v19 }
 0x1d5   :  { %20708 = vmatprep.mubr.msk.f32.mxu1 %vm24602_vm0, %v29362_v1  ;;  %22995 = vmatpush3.bf16.msra.mxu1 %v25842_v7  ;;  %v29358_v13 = vand.u32 4294901760, %v26047_v63 }
 0x1d6   :  { %22959 = vmatpush3.bf16.msra.mxu0 %v25867_v54  ;;  %v26056_v52 = vpop.f32.mrb[12].mxu0  ;;  %23032 = vmatprep.subr.bf16.mxu1 %v29364_v0 }
 0x1d7   :  { %29541 = vst [vmem:[#allocation24_spill] sm:$0xff] %v26056_v52  ;;  %v26058_v49 = vpop.f32.mrb[12].mxu1  ;;  %22996 = vmatprep.subr.bf16.mxu0 %v29364_v0  ;;  %v26066_v7 = vadd.f32 %v26056_v52, %v25804_v22  ;;  %v20007_v8 = vpop.f32.mrb[13].mxu0  ;;  %20607 = vmatmul.mubr.f32.gmra.mrb[34].mxu0 %v24742_v5  ;;  %v26088_v26 = vadd.f32 %v26056_v52, %v25566_v12 }
 0x1d8   :  { %29542 = vst [vmem:[#allocation25_spill] sm:$0xff] %v26058_v49  ;;  %v26070_v54 = vadd.f32 %v26058_v49, %v25568_v38  ;;  %v26074_v36 = vadd.f32 %v26058_v49, %v25806_v32  ;;  %v20109_v56 = vpop.f32.mrb[13].mxu1  ;;  %20709 = vmatmul.mubr.f32.gmra.mrb[34].mxu1 %v24742_v5  ;;  %20617 = vmatprep.mubr.msk.f32.mxu0 %vm24602_vm0, %v29362_v1  ;;  %v29551_v38 = vand.u32 4294901760, %v26082_v40 }
 0x1d9   :  { %20719 = vmatprep.mubr.msk.f32.mxu1 %vm24602_vm0, %v29362_v1  ;;  %v7304_v29 = vsub.f32 %v26047_v63, %v29358_v13  ;;  %v7311_v8 = vsub.f32 %v26049_v4, %v29360_v24 }
 0x1da   :  { %29543 = vst [vmem:[#allocation26_spill] sm:$0xff] %v26074_v36  ;;  %v26098_v43 = vpop.f32.mrb[14].mxu0  ;;  %v29556_v36 = vmov 0.0|0.0  }
 0x1db   :  { %29544 = vst [vmem:[#allocation27_spill] sm:$0xff] %v26098_v43  ;;  %v26100_v48 = vpop.f32.mrb[14].mxu1  ;;  %v26112_v55 = vadd.f32 %v26098_v43, %v25836_v61  ;;  %v20010_v6 = vpop.f32.mrb[15].mxu0  ;;  %20618 = vmatmul.mubr.f32.vlgmr.msra.gmra.mrb[30].mxu0 %v24678_v31  ;;  %v7305_v42 = vand.u32 4294901760, %v7304_v29 }
 0x1dc   :  { %29545 = vst [vmem:[#allocation28_spill] sm:$0xff] %v26100_v48  ;;  %v26116_v15 = vadd.f32 %v26100_v48, %v25596_v58  ;;  %v26120_v2 = vadd.f32 %v26100_v48, %v25838_v3  ;;  %v20112_v19 = vpop.f32.mrb[15].mxu1  ;;  %20720 = vmatmul.mubr.f32.vlgmr.msra.gmra.mrb[30].mxu1 %v24678_v31  ;;  %20620 = vmatprep.mubr.msk.f32.mxu0 %vm24602_vm0, %v29362_v1  ;;  %v7918_v58 = vand.u32 4294901760, %v7917_v18  ;;  %v29550_v18 = vmov 0.0  }
 0x1dd   :  { %23034 = vmatpush3.bf16.msra.mxu1 %v26054_v57  ;;  %v26136_v6 = vadd.f32 %v26098_v43, %v25594_v51  ;;  %20722 = vmatprep.mubr.msk.f32.mxu1 %vm24602_vm0, %v29362_v1  ;;  %v26141_v19 = vpack.c.bf16 %v7211_v11, %v7208_v25 }
 0x1de   :  { %29546 = vst [vmem:[#allocation29_spill] sm:$0xff] %v26120_v2  ;;  %22998 = vmatpush3.bf16.msra.mxu0 %v26090_v21  ;;  %v26146_v24 = vpop.f32.mrb[16].mxu0  ;;  %23035 = vmatprep.subr.bf16.mxu1 %v29364_v0  ;;  %v7931_v2 = vsub.f32 %v26082_v40, %v29551_v38 }
 0x1df   :  { %v26148_v56 = vpop.f32.mrb[16].mxu1  ;;  %22999 = vmatprep.subr.bf16.mxu0 %v29364_v0  ;;  %v26154_v1 = vadd.f32 %v26146_v24, %v25872_v46  ;;  %v20013_v16 = vpop.f32.mrb[17].mxu0  ;;  %20621 = vmatmul.mubr.f32.gmra.mrb[32].mxu0 %v24705_v44  ;;  %v7925_v0 = vand.u32 4294901760, %v7924_v35 }
 0x1e0   :  { %v26158_v25 = vadd.f32 %v26148_v56, %v25628_v41  ;;  %v26162_v11 = vadd.f32 %v26148_v56, %v25874_v47  ;;  %v20115_v13 = vpop.f32.mrb[17].mxu1  ;;  %20723 = vmatmul.mubr.f32.gmra.mrb[32].mxu1 %v24705_v44  ;;  %20623 = vmatprep.mubr.msk.f32.mxu0 %vm24602_vm0, %v29550_v18  ;;  %v7312_v41 = vand.u32 4294901760, %v7311_v8  ;;  %v26175_v16 = vadd.f32 %v26146_v24, %v25626_v39 }
 0x1e1   :  { %29547 = vst [vmem:[#allocation30_spill] sm:$0xff] %v26154_v1  ;;  %20725 = vmatprep.mubr.msk.f32.mxu1 %vm24602_vm0, %v29550_v18  ;;  %23037 = vmatpush3.bf16.msra.mxu1 %v26102_v33  ;;  %v29553_v13 = vand.u32 4294901760, %v26092_v27  ;;  %v29555_v8 = vand.u32 4294901760, %v26096_v34  ;;  %v7932_v17 = vand.u32 4294901760, %v7931_v2  ;;  %v29559_v2 = vand.u32 4294901760, %v26047_v63 }
 0x1e2   :  { %29548 = vst [vmem:[#allocation31_spill] sm:$0xff] %v26158_v25  ;;  %29549 = vst [vmem:[#allocation32_spill] sm:$0xff] %v26162_v11  ;;  %23001 = vmatpush3.bf16.msra.mxu0 %v26141_v19  ;;  %v29554_v11 = vand.u32 4294901760, %v26094_v30  ;;  %23038 = vmatprep.subr.bf16.mxu1 %v29556_v36 }
 0x1e3   :  { %29552 = vst [vmem:[#allocation33_spill] sm:$0xff] %v26175_v16  ;;  %v7938_v35 = vsub.f32 %v26092_v27, %v29553_v13  ;;  %v7325_v38 = vsub.f32 %v26096_v34, %v29555_v8  ;;  %23002 = vmatprep.subr.bf16.mxu0 %v29556_v36  ;;  %20624 = vmatmul.mubr.f32.gmra.mrb[34].mxu0 %v24742_v5 }
 0x1e4   :  { %v7318_v29 = vsub.f32 %v26094_v30, %v29554_v11  ;;  %20726 = vmatmul.mubr.f32.gmra.mrb[34].mxu1 %v24742_v5  ;;  %20736 = vmatprep.mubr.msk.f32.mxu0 %vm24602_vm0, %v29550_v18  ;;  %v23039_v13 = vpack.c.bf16 %v7925_v0, %v7918_v58  ;;  %v23003_v11 = vpack.c.bf16 %v7312_v41, %v7305_v42 }
 0x1e5   :  { %20838 = vmatprep.mubr.msk.f32.mxu1 %vm24602_vm0, %v29550_v18  ;;  %v7939_v1 = vand.u32 4294901760, %v7938_v35  ;;  %v7326_v8 = vand.u32 4294901760, %v7325_v38  ;;  %v23045_v0 = vpack.c.bf16 %v26038_v50, %v26036_v60  ;;  %v23048_v58 = vpack.c.bf16 %v26092_v27, %v26082_v40  ;;  %v9033_v38 = vld [vmem:[#allocation5 + $0x1c0] sm:$0xff] }
 0x1e6   :  { %v7319_v47 = vand.u32 4294901760, %v7318_v29  ;;  %v23012_v41 = vpack.c.bf16 %v26096_v34, %v26094_v30  ;;  %v29564_v35 = vand.u32 4294901760, %v26096_v34 }
 0x1e7   :  { %20737 = vmatmul.mubr.f32.vlgmr.msra.gmra.mrb[36].mxu0 %v24733_v62  ;;  %v23042_v16 = vpack.c.bf16 %v7939_v1, %v7932_v17  ;;  %v23009_v1 = vpack.c.bf16 %v26049_v4, %v26047_v63  ;;  %v29558_v17 = vand.u32 4294901760, %v26038_v50  ;;  %v29562_v50 = vand.u32 4294901760, %v26092_v27  ;;  %v8420_v27 = vld [vmem:[#allocation5 + $0x1a0] sm:$0xff] }
 0x1e8   :  { %20839 = vmatmul.mubr.f32.vlgmr.msra.gmra.mrb[36].mxu1 %v24733_v62  ;;  %20739 = vmatprep.mubr.msk.f32.mxu0 %vm24602_vm0, %v29550_v18  ;;  %v23006_v25 = vpack.c.bf16 %v7326_v8, %v7319_v47  ;;  %v29557_v47 = vand.u32 4294901760, %v26036_v60  ;;  %v29561_v60 = vand.u32 4294901760, %v26082_v40  ;;  %v9041_v40 = vand.u32 4294901760, %v9033_v38  ;;  %v9036_v8 = vld [vmem:[#allocation5 + $0x1d8] sm:$0xf] }
 0x1e9   :  { %23040 = vmatpush3.bf16.msra.mxu1 %v23039_v13  ;;  %23004 = vmatpush3.bf16.msra.mxu0 %v23003_v11  ;;  %v9034_v13 = vld [vmem:[#allocation5 + $0x1c8] sm:$0xff] }
 0x1ea   :  { %20841 = vmatprep.mubr.msk.f32.mxu1 %vm24602_vm0, %v29550_v18  ;;  %23041 = vmatprep.subr.bf16.mxu1 %v29556_v36  ;;  %v23057_v42 = vpack.c.bf16 %v29558_v17, %v29557_v47  ;;  %v23060_v63 = vpack.c.bf16 %v29562_v50, %v29561_v60  ;;  %v9044_v34 = vand.u32 4294901760, %v9034_v13  ;;  %v26306_v11 = vsub.f32 %v9033_v38, %v9041_v40  ;;  %v9035_v47 = vld [vmem:[#allocation5 + $0x1d0] sm:$0xff] }
 0x1eb   :  { %23005 = vmatprep.subr.bf16.mxu0 %v29556_v36  ;;  %20740 = vmatmul.mubr.f32.gmra.mrb[38].mxu0 %v24753_v9  ;;  %v9038_v17 = vsel %vm62_vm1, %v9036_v8, 0  ;;  %v26325_v60 = vmul.f32 0.17934024, %v25804_v22  ;;  %v9047_v50 = vand.u32 4294901760, %v9035_v47  ;;  %v26341_v38 = vmul.f32 0.16847457, %v25817_v28 }
 0x1ec   :  { %20842 = vmatmul.mubr.f32.gmra.mrb[38].mxu1 %v24753_v9  ;;  %20742 = vmatprep.mubr.msk.f32.mxu0 %vm24602_vm0, %v29550_v18  ;;  %v26358_v8 = vmul.f32 0.17934024, %v25836_v61 }
 0x1ed   :  { %20844 = vmatprep.mubr.msk.f32.mxu1 %vm24602_vm0, %v29550_v18  ;;  %23043 = vmatpush3.bf16.msra.mxu1 %v23042_v16 }
 0x1ee   :  { %23007 = vmatpush3.bf16.msra.mxu0 %v23006_v25  ;;  %23044 = vmatprep.subr.bf16.mxu1 %v29556_v36  ;;  %v29560_v25 = vand.u32 4294901760, %v26049_v4  ;;  %v29563_v4 = vand.u32 4294901760, %v26094_v30  ;;  %v8421_v30 = vld [vmem:[#allocation5 + $0x1a8] sm:$0xff] }
 0x1ef   :  { %23008 = vmatprep.subr.bf16.mxu0 %v29556_v36  ;;  %20743 = vmatmul.mubr.f32.gmra.mrb[40].mxu0 %v24779_v23 }
 0x1f0   :  { %20845 = vmatmul.mubr.f32.gmra.mrb[40].mxu1 %v24779_v23  ;;  %20753 = vmatprep.mubr.msk.f32.mxu0 %vm24602_vm0, %v29550_v18  ;;  %v23021_v16 = vpack.c.bf16 %v29560_v25, %v29559_v2  ;;  %v23024_v29 = vpack.c.bf16 %v29564_v35, %v29563_v4  ;;  %v26321_v25 = vld [vmem:[#allocation5 + $0x1b0] sm:$0xff] }
 0x1f1   :  { %20855 = vmatprep.mubr.msk.f32.mxu1 %vm24602_vm0, %v29550_v18 }
 0x1f3   :  { %20754 = vmatmul.mubr.f32.vlgmr.msra.gmra.mrb[36].mxu0 %v24678_v31 }
 0x1f4   :  { %20856 = vmatmul.mubr.f32.vlgmr.msra.gmra.mrb[36].mxu1 %v24678_v31  ;;  %20756 = vmatprep.mubr.msk.f32.mxu0 %vm24602_vm0, %v29550_v18 }
 0x1f5   :  { %23046 = vmatpush3.bf16.msra.mxu1 %v23045_v0  ;;  %23010 = vmatpush3.bf16.msra.mxu0 %v23009_v1  ;;  %v8428_v0 = vand.u32 4294901760, %v8420_v27  ;;  %v26314_v1 = vsub.f32 %v9034_v13, %v9044_v34 }
 0x1f6   :  { %20858 = vmatprep.mubr.msk.f32.mxu1 %vm24602_vm0, %v29550_v18  ;;  %23047 = vmatprep.subr.bf16.mxu1 %v29556_v36 }
 0x1f7   :  { %23011 = vmatprep.subr.bf16.mxu0 %v29556_v36  ;;  %20757 = vmatmul.mubr.f32.gmra.mrb[38].mxu0 %v24705_v44  ;;  %v29375_v35 = vand.u32 4294901760, %v26314_v1 }
 0x1f8   :  { %20859 = vmatmul.mubr.f32.gmra.mrb[38].mxu1 %v24705_v44  ;;  %20759 = vmatprep.mubr.msk.f32.mxu0 %vm24602_vm0, %v29550_v18 }
 0x1f9   :  { %20861 = vmatprep.mubr.msk.f32.mxu1 %vm24602_vm0, %v29550_v18  ;;  %23049 = vmatpush3.bf16.msra.mxu1 %v23048_v58  ;;  %v8431_v58 = vand.u32 4294901760, %v8421_v30 }
 0x1fa   :  { %23013 = vmatpush3.bf16.msra.mxu0 %v23012_v41  ;;  %23050 = vmatprep.subr.bf16.mxu1 %v29556_v36  ;;  %v26316_v41 = vsub.f32 %v8420_v27, %v8428_v0  ;;  %v26347_v27 = vsub.f32 %v9035_v47, %v9047_v50  ;;  %v26365_v47 = vpack.c.bf16 %v9044_v34, %v9041_v40  ;;  %v3512_v34 = vadd.f32 nan, %v26058_v49 }
 0x1fb   :  { %23014 = vmatprep.subr.bf16.mxu0 %v29556_v36  ;;  %20760 = vmatmul.mubr.f32.gmra.mrb[40].mxu0 %v24742_v5  ;;  %v26319_v2 = vsub.f32 %v8421_v30, %v8431_v58  ;;  %v26374_v28 = vpack.c.bf16 %v8431_v58, %v8428_v0  ;;  %v26382_v40 = vsub.f32 %v26314_v1, %v29375_v35 }
 0x1fc   :  { %20862 = vmatmul.mubr.f32.gmra.mrb[40].mxu1 %v24742_v5  ;;  %20770 = vmatprep.mubr.msk.f32.mxu0 %vm24602_vm0, %v29550_v18  ;;  %v29565_v0 = vand.u32 4294901760, %v26316_v41 }
 0x1fd   :  { %20872 = vmatprep.mubr.msk.f32.mxu1 %vm24602_vm0, %v29550_v18 }
 0x1fe   :  { %v26394_v58 = vsub.f32 %v26316_v41, %v29565_v0 }
 0x1ff   :  { %20771 = vmatmul.mubr.f32.vlgmr.msra.gmra.mrb[36].mxu0 %v24689_v37 }
 0x200   :  { %20873 = vmatmul.mubr.f32.vlgmr.msra.gmra.mrb[36].mxu1 %v24689_v37  ;;  %20773 = vmatprep.mubr.msk.f32.mxu0 %vm24602_vm0, %v29550_v18 }
 0x201   :  { %23052 = vmatpush3.bf16.msra.mxu1 %v26054_v57  ;;  %23016 = vmatpush3.bf16.msra.mxu0 %v26090_v21 }
 0x202   :  { %20875 = vmatprep.mubr.msk.f32.mxu1 %vm24602_vm0, %v29550_v18  ;;  %23053 = vmatprep.subr.bf16.mxu1 %v29556_v36 }
 0x203   :  { %23017 = vmatprep.subr.bf16.mxu0 %v29556_v36  ;;  %20774 = vmatmul.mubr.f32.gmra.mrb[38].mxu0 %v24720_v53 }
 0x204   :  { %20876 = vmatmul.mubr.f32.gmra.mrb[38].mxu1 %v24720_v53  ;;  %20776 = vmatprep.mubr.msk.f32.mxu0 %vm24602_vm0, %v29550_v18 }
 0x205   :  { %20878 = vmatprep.mubr.msk.f32.mxu1 %vm24602_vm0, %v29550_v18  ;;  %23055 = vmatpush3.bf16.msra.mxu1 %v26102_v33 }
 0x206   :  { %23019 = vmatpush3.bf16.msra.mxu0 %v26141_v19  ;;  %23056 = vmatprep.subr.bf16.mxu1 %v29556_v36 }
 0x207   :  { %23020 = vmatprep.subr.bf16.mxu0 %v29556_v36  ;;  %20777 = vmatmul.mubr.f32.gmra.mrb[40].mxu0 %v24756_v10 }
 0x208   :  { %20879 = vmatmul.mubr.f32.gmra.mrb[40].mxu1 %v24756_v10  ;;  %20787 = vmatprep.mubr.msk.f32.mxu0 %vm24602_vm0, %v29550_v18 }
 0x209   :  { %20889 = vmatprep.mubr.msk.f32.mxu1 %vm24602_vm0, %v29550_v18 }
 0x20b   :  { %20788 = vmatmul.mubr.f32.vlgmr.msra.gmra.mrb[36].mxu0 %v24709_v45 }
 0x20c   :  { %20890 = vmatmul.mubr.f32.vlgmr.msra.gmra.mrb[36].mxu1 %v24709_v45  ;;  %20790 = vmatprep.mubr.msk.f32.mxu0 %vm24602_vm0, %v29550_v18 }
 0x20d   :  { %23058 = vmatpush3.bf16.msra.mxu1 %v23057_v42  ;;  %23022 = vmatpush3.bf16.msra.mxu0 %v23021_v16  ;;  %v8423_v42 = vld [vmem:[#allocation5 + $0x1b8] sm:$0xf]  ;;  %v29370_v16 = vand.u32 4294901760, %v26306_v11 }
 0x20e   :  { %20892 = vmatprep.mubr.msk.f32.mxu1 %vm24602_vm0, %v29550_v18  ;;  %23059 = vmatprep.subr.bf16.mxu1 %v29556_v36  ;;  %v8425_v4 = vsel %vm62_vm1, %v8423_v42, 0  ;;  %v26361_v42 = vmul.f32 0.17934024, %v25838_v3 }
 0x20f   :  { %23023 = vmatprep.subr.bf16.mxu0 %v29556_v36  ;;  %20791 = vmatmul.mubr.f32.gmra.mrb[38].mxu0 %v24729_v59 }
 0x210   :  { %20893 = vmatmul.mubr.f32.gmra.mrb[38].mxu1 %v24729_v59  ;;  %20793 = vmatprep.mubr.msk.f32.mxu0 %vm24602_vm0, %v29550_v18 }
 0x211   :  { %20895 = vmatprep.mubr.msk.f32.mxu1 %vm24602_vm0, %v29550_v18  ;;  %23061 = vmatpush3.bf16.msra.mxu1 %v23060_v63  ;;  %v9050_v63 = vand.u32 4294901760, %v9038_v17 }
 0x212   :  { %23025 = vmatpush3.bf16.msra.mxu0 %v23024_v29  ;;  %23062 = vmatprep.subr.bf16.mxu1 %v29556_v36  ;;  %v26335_v29 = vmul.f32 0.17934024, %v25806_v32 }
 0x213   :  { %23026 = vmatprep.subr.bf16.mxu0 %v29556_v36  ;;  %20794 = vmatmul.mubr.f32.gmra.mrb[40].mxu0 %v24767_v14  ;;  %v26349_v30 = vsub.f32 %v9038_v17, %v9050_v63  ;;  %v8437_v17 = vand.u32 4294901760, %v8425_v4  ;;  %v26387_v3 = vpack.c.bf16 %v9050_v63, %v9047_v50 }
 0x214   :  { %20896 = vmatmul.mubr.f32.gmra.mrb[40].mxu1 %v24767_v14  ;;  %20804 = vmatprep.mubr.msk.f32.mxu0 %vm24602_vm0, %v29550_v18 }
 0x215   :  { %20906 = vmatprep.mubr.msk.f32.mxu1 %vm24602_vm0, %v29550_v18 }
 0x217   :  { %20805 = vmatmul.mubr.f32.vlgmr.msra.gmra.mrb[36].mxu0 %v24678_v31 }
 0x218   :  { %20907 = vmatmul.mubr.f32.vlgmr.msra.gmra.mrb[36].mxu1 %v24678_v31  ;;  %20807 = vmatprep.mubr.msk.f32.mxu0 %vm24602_vm0, %v29550_v18 }
 0x219   :  { %23064 = vmatpush3.bf16.msra.mxu1 %v26054_v57  ;;  %23028 = vmatpush3.bf16.msra.mxu0 %v26090_v21  ;;  %v8434_v57 = vand.u32 4294901760, %v26321_v25  ;;  %v26354_v21 = vsub.f32 %v26306_v11, %v29370_v16  ;;  %v26372_v16 = vmul.f32 0.16847457, %v25849_v20  ;;  %v26389_v20 = vsub.f32 %v8425_v4, %v8437_v17 }
 0x21a   :  { %20909 = vmatprep.mubr.msk.f32.mxu1 %vm24602_vm0, %v29550_v18  ;;  %23065 = vmatprep.subr.bf16.mxu1 %v29556_v36  ;;  %v4104_v4 = vmul.f32 0.13967033, %v26088_v26 }
 0x21b   :  { %23029 = vmatprep.subr.bf16.mxu0 %v29556_v36  ;;  %20808 = vmatmul.mubr.f32.gmra.mrb[38].mxu0 %v24705_v44  ;;  %v26377_v13 = vsub.f32 %v26321_v25, %v8434_v57 }
 0x21c   :  { %20910 = vmatmul.mubr.f32.gmra.mrb[38].mxu1 %v24705_v44  ;;  %20810 = vmatprep.mubr.msk.f32.mxu0 %vm24602_vm0, %v29550_v18 }
 0x21d   :  { %20912 = vmatprep.mubr.msk.f32.mxu1 %vm24602_vm0, %v29550_v18  ;;  %23067 = vmatpush3.bf16.msra.mxu1 %v26102_v33 }
 0x21e   :  { %23031 = vmatpush3.bf16.msra.mxu0 %v26141_v19  ;;  %v4082_v25 = vpop.f32.mrb[18].mxu0  ;;  %23104 = vmatprep.subr.bf16.mxu1 %v29556_v36  ;;  %v29567_v19 = vand.u32 4294901760, %v26319_v2 }
 0x21f   :  { %v26396_v32 = vpop.f32.mrb[18].mxu1  ;;  %23068 = vmatprep.subr.bf16.mxu0 %v29556_v36  ;;  %v23644_v0 = vadd.f32 %v4082_v25, %v3512_v34  ;;  %v20211_v14 = vpop.f32.mrb[19].mxu0  ;;  %20811 = vmatmul.mubr.f32.gmra.mrb[40].mxu0 %v24742_v5 }
 0x220   :  { %29566 = vst [vmem:[#allocation34_spill] sm:$0xff] %v26396_v32  ;;  %v26404_v50 = vsub.f32 %v26319_v2, %v29567_v19  ;;  %v4707_v35 = vadd.f32 %v26396_v32, %v25566_v12  ;;  %v26412_v49 = vadd.f32 %v26396_v32, %v25804_v22  ;;  %v26416_v33 = vadd.f32 %v26396_v32, %v26056_v52  ;;  %v20313_v59 = vpop.f32.mrb[19].mxu1 }
 0x221   :  { %v4716_v19 = vmul.f32 0.13967033, %v26070_v54  ;;  %20913 = vmatmul.mubr.f32.gmra.mrb[40].mxu1 %v24742_v5  ;;  %20821 = vmatprep.mubr.msk.f32.mxu0 %vm24602_vm0, %v29550_v18  ;;  %v4098_v25 = vmul.f32 0.10218499, %v23644_v0  ;;  %v3518_v14 = vadd.f32 nan, %v26100_v48 }
 0x222   :  { %29568 = vst [vmem:[#allocation35_spill] sm:$0xff] %v26412_v49  ;;  %29569 = vst [vmem:[#allocation36_spill] sm:$0xff] %v26416_v33  ;;  %v4710_v63 = vmul.f32 0.10218499, %v4707_v35  ;;  %20923 = vmatprep.mubr.msk.f32.mxu1 %vm24602_vm0, %v29550_v18  ;;  %v4725_v54 = vmul.f32 0.16847457, %v26066_v7  ;;  %v26433_v49 = vpack.c.bf16 %v8437_v17, %v8434_v57 }
 0x223   :  { %v4088_v26 = vpop.f32.mrb[20].mxu0  ;;  %v26431_v33 = vpop.f32.mrb[20].mxu1  ;;  %v4107_v0 = vadd.f32 %v4104_v4, %v4098_v25  ;;  %20822 = vmatmul.mubr.f32.vlgmr.msra.gmra.mrb[36].mxu0 %v24678_v31  ;;  %v4717_v7 = vmul.f32 0.13967033, %v26116_v15  ;;  %v4105_v59 = vmul.f32 0.13967033, %v26136_v6 }
 0x224   :  { %29570 = vst [vmem:[#allocation37_spill] sm:$0xff] %v26431_v33  ;;  %v4719_v35 = vadd.f32 %v4716_v19, %v4710_v63  ;;  %v23645_v32 = vadd.f32 %v4088_v26, %v3518_v14  ;;  %v4708_v22 = vadd.f32 %v26431_v33, %v25594_v51  ;;  %v20214_v48 = vpop.f32.mrb[21].mxu0  ;;  %v20316_v52 = vpop.f32.mrb[21].mxu1  ;;  %v26444_v57 = vadd.f32 %v26431_v33, %v25836_v61 }
 0x225   :  { %v26448_v17 = vadd.f32 %v26431_v33, %v26098_v43  ;;  %20924 = vmatmul.mubr.f32.vlgmr.msra.gmra.mrb[36].mxu1 %v24678_v31  ;;  %20824 = vmatprep.mubr.msk.f32.mxu0 %vm24602_vm0, %v29550_v18  ;;  %v4116_v51 = vadd.f32 %v26341_v38, %v4107_v0  ;;  %v4726_v6 = vmul.f32 0.16847457, %v26112_v55  ;;  %v3524_v63 = vadd.f32 nan, %v26148_v56 }
 0x226   :  { %v4728_v52 = vadd.f32 %v4725_v54, %v4719_v35  ;;  %v4099_v48 = vmul.f32 0.10218499, %v23645_v32  ;;  %v4711_v15 = vmul.f32 0.10218499, %v4708_v22  ;;  %23106 = vmatpush3.bf16.msra.mxu1 %v26365_v47  ;;  %20926 = vmatprep.mubr.msk.f32.mxu1 %vm24602_vm0, %v29550_v18  ;;  %v4094_v4 = vpop.f32.mrb[22].mxu0  ;;  %v29571_v38 = vand.u32 4294901760, %v26347_v27 }
 0x227   :  { %v26459_v19 = vpop.f32.mrb[22].mxu1  ;;  %23070 = vmatpush3.bf16.msra.mxu0 %v26374_v28  ;;  %23107 = vmatprep.subr.bf16.mxu1 %v29556_v36  ;;  %v29572_v32 = vand.u32 4294901760, %v26349_v30  ;;  %v4122_v14 = vadd.f32 %v26325_v60, %v4116_v51  ;;  %v20217_v0 = vpop.f32.mrb[23].mxu0  ;;  %v23646_v34 = vadd.f32 %v4094_v4, %v3524_v63  ;;  %v29573_v60 = vld [vmem:[#allocation31_spill] sm:$0xff]  ;;  %v4121_v4 = vmul.f32 0.17934024, %v25872_v46 }
 0x228   :  { %v9157_v22 = vsub.f32 %v26347_v27, %v29571_v38  ;;  %v4734_v55 = vadd.f32 %v26335_v29, %v4728_v52  ;;  %v4108_v54 = vadd.f32 %v4105_v59, %v4099_v48  ;;  %v4720_v26 = vadd.f32 %v4717_v7, %v4711_v15  ;;  %v20319_v35 = vpop.f32.mrb[23].mxu1  ;;  %20825 = vmatmul.mubr.f32.gmra.mrb[38].mxu0 %v24705_v44  ;;  %v29575_v48 = vld [vmem:[#allocation33_spill] sm:$0xff] }
 0x229   :  { %v9164_v25 = vsub.f32 %v26349_v30, %v29572_v32  ;;  %v4709_v12 = vadd.f32 %v26459_v19, %v25626_v39  ;;  %v26476_v38 = vadd.f32 %v26459_v19, %v25872_v46  ;;  %v26480_v32 = vadd.f32 %v26459_v19, %v26146_v24  ;;  %20927 = vmatmul.mubr.f32.gmra.mrb[38].mxu1 %v24705_v44  ;;  %v29579_v35 = vld [vmem:[#allocation23_spill] sm:$0xff] }
 0x22a   :  { %v4718_v29 = vmul.f32 0.13967033, %v29573_v60  ;;  %4125 = vst [vmem:[#allocation7] sm:$0xff] %v4122_v14  ;;  %4738 = vst [vmem:[#allocation7 + $0x18] sm:$0xff] %v4734_v55  ;;  %v4117_v59 = vadd.f32 %v26372_v16, %v4108_v54  ;;  %v4729_v7 = vadd.f32 %v4726_v6, %v4720_v26  ;;  %20827 = vmatprep.mubr.msk.f32.mxu0 %vm24602_vm0, %v29550_v18  ;;  %20929 = vmatprep.mubr.msk.f32.mxu1 %vm24602_vm0, %v29550_v18  ;;  %v29577_v14 = vld [vmem:[#allocation22_spill] sm:$0xff] }
 0x22b   :  { %v29574_v39 = vand.u32 4294901760, %v26377_v13  ;;  %v4100_v52 = vmul.f32 0.10218499, %v23646_v34  ;;  %v4106_v15 = vmul.f32 0.13967033, %v29575_v48  ;;  %23109 = vmatpush3.bf16.msra.mxu1 %v26387_v3  ;;  %23071 = vmatprep.subr.bf16.mxu0 %v29556_v36  ;;  %v29576_v16 = vand.u32 4294901760, %v26389_v20 }
 0x22c   :  { %v4712_v63 = vmul.f32 0.10218499, %v4709_v12  ;;  %v4733_v55 = vmul.f32 0.17934024, %v29577_v14  ;;  %v4123_v54 = vadd.f32 %v26358_v8, %v4117_v59  ;;  %v4735_v26 = vadd.f32 %v26361_v42, %v4729_v7  ;;  %20828 = vmatmul.mubr.f32.gmra.mrb[40].mxu0 %v24742_v5  ;;  %23110 = vmatprep.subr.bf16.mxu1 %v29556_v36  ;;  %v29578_v12 = vld [vmem:[#allocation30_spill] sm:$0xff] }
 0x22d   :  { %v8544_v51 = vsub.f32 %v26377_v13, %v29574_v39  ;;  %v8551_v6 = vsub.f32 %v26389_v20, %v29576_v16  ;;  %v4727_v34 = vmul.f32 0.16847457, %v29578_v12  ;;  %v4109_v0 = vadd.f32 %v4106_v15, %v4100_v52  ;;  %20930 = vmatmul.mubr.f32.gmra.mrb[40].mxu1 %v24742_v5  ;;  %23073 = vmatpush3.bf16.msra.mxu0 %v26433_v49 }
 0x22e   :  { %v4115_v60 = vmul.f32 0.16847457, %v29579_v35  ;;  %v4721_v39 = vadd.f32 %v4718_v29, %v4712_v63  ;;  %4126 = vst [vmem:[#allocation7 + $0x8] sm:$0xff] %v4123_v54  ;;  %4739 = vst [vmem:[#allocation7 + $0x20] sm:$0xff] %v4735_v26  ;;  %20940 = vmatprep.mubr.msk.f32.mxu0 %vm24602_vm0, %v29550_v18  ;;  %21042 = vmatprep.mubr.msk.f32.mxu1 %vm24602_vm0, %v29550_v18  ;;  %v29580_v8 = vand.u32 4294901760, %v26354_v21  ;;  %v29581_v42 = vand.u32 4294901760, %v26382_v40 }
 0x22f   :  { %v29582_v7 = vand.u32 4294901760, %v26394_v58  ;;  %v29583_v29 = vand.u32 4294901760, %v26404_v50  ;;  %v9158_v48 = vand.u32 4294901760, %v9157_v22  ;;  %v9165_v15 = vand.u32 4294901760, %v9164_v25  ;;  %23074 = vmatprep.subr.bf16.mxu0 %v29556_v36 }
 0x230   :  { %v23111_v59 = vpack.c.bf16 %v29581_v42, %v29580_v8  ;;  %v4118_v63 = vadd.f32 %v4115_v60, %v4109_v0  ;;  %v4730_v16 = vadd.f32 %v4727_v34, %v4721_v39  ;;  %v8545_v54 = vand.u32 4294901760, %v8544_v51  ;;  %20941 = vmatmul.mubr.f32.vlgmr.msra.gmra.mrb[42].mxu0 %v24733_v62  ;;  %v26615_v39 = vld [vmem:[#allocation5 + $0x200] sm:$0xff]  ;;  %v10260_v42 = vld [vmem:[#allocation5 + $0x208] sm:$0xff] }
 0x231   :  { %v23075_v52 = vpack.c.bf16 %v29583_v29, %v29582_v7  ;;  %v8552_v26 = vand.u32 4294901760, %v8551_v6  ;;  %21043 = vmatmul.mubr.f32.vlgmr.msra.gmra.mrb[42].mxu1 %v24733_v62  ;;  %20943 = vmatprep.mubr.msk.f32.mxu0 %vm24602_vm0, %v29550_v18  ;;  %v23114_v40 = vpack.c.bf16 %v9165_v15, %v9158_v48  ;;  %v23117_v50 = vpack.c.bf16 %v26314_v1, %v26306_v11  ;;  %v10262_v29 = vld [vmem:[#allocation5 + $0x218] sm:$0xf] }
 0x232   :  { %v4124_v12 = vadd.f32 %v4121_v4, %v4118_v63  ;;  %v4736_v21 = vadd.f32 %v4733_v55, %v4730_v16  ;;  %23112 = vmatpush3.bf16.msra.mxu1 %v23111_v59  ;;  %21045 = vmatprep.mubr.msk.f32.mxu1 %vm24602_vm0, %v29550_v18  ;;  %v23081_v22 = vpack.c.bf16 %v26319_v2, %v26316_v41  ;;  %v29584_v6 = vand.u32 4294901760, %v26306_v11  ;;  %v29592_v59 = vld [vmem:[#allocation13_spill] sm:$0xff]  ;;  %v9649_v15 = vld [vmem:[#allocation5 + $0x1f8] sm:$0xf]  ;;  %v9647_v63 = vld [vmem:[#allocation5 + $0x1e8] sm:$0xff] }
 0x233   :  { %23076 = vmatpush3.bf16.msra.mxu0 %v23075_v52  ;;  %23113 = vmatprep.subr.bf16.mxu1 %v29556_v36  ;;  %v23078_v58 = vpack.c.bf16 %v8552_v26, %v8545_v54  ;;  %v23120_v25 = vpack.c.bf16 %v26349_v30, %v26347_v27  ;;  %v23084_v51 = vpack.c.bf16 %v26389_v20, %v26377_v13  ;;  %v29585_v4 = vand.u32 4294901760, %v26314_v1  ;;  %v29593_v52 = vld [vmem:[#allocation15_spill] sm:$0xff]  ;;  %v10261_v54 = vld [vmem:[#allocation5 + $0x210] sm:$0xff] }
 0x234   :  { %4127 = vst [vmem:[#allocation7 + $0x10] sm:$0xff] %v4124_v12  ;;  %4740 = vst [vmem:[#allocation7 + $0x28] sm:$0xff] %v4736_v21  ;;  %20944 = vmatmul.mubr.f32.gmra.mrb[44].mxu0 %v24753_v9  ;;  %23077 = vmatprep.subr.bf16.mxu0 %v29556_v36  ;;  %v29586_v34 = vand.u32 4294901760, %v26316_v41  ;;  %v29587_v0 = vand.u32 4294901760, %v26319_v2  ;;  %v29588_v60 = vand.u32 4294901760, %v26347_v27  ;;  %v29589_v11 = vand.u32 4294901760, %v26349_v30 }
 0x235   :  { %21046 = vmatmul.mubr.f32.gmra.mrb[44].mxu1 %v24753_v9  ;;  %20946 = vmatprep.mubr.msk.f32.mxu0 %vm24602_vm0, %v29550_v18  ;;  %v23129_v55 = vpack.c.bf16 %v29585_v4, %v29584_v6  ;;  %v29590_v41 = vand.u32 4294901760, %v26377_v13  ;;  %v29591_v2 = vand.u32 4294901760, %v26389_v20  ;;  %v9646_v27 = vld [vmem:[#allocation5 + $0x1e0] sm:$0xff]  ;;  %v10267_v30 = vand.u32 4294901760, %v26615_v39  ;;  %v9648_v12 = vld [vmem:[#allocation5 + $0x1f0] sm:$0xff] }
 0x236   :  { %21048 = vmatprep.mubr.msk.f32.mxu1 %vm24602_vm0, %v29550_v18  ;;  %23115 = vmatpush3.bf16.msra.mxu1 %v23114_v40  ;;  %v23093_v35 = vpack.c.bf16 %v29587_v0, %v29586_v34  ;;  %v23132_v1 = vpack.c.bf16 %v29589_v11, %v29588_v60  ;;  %v10270_v13 = vand.u32 4294901760, %v10260_v42  ;;  %v9654_v7 = vand.u32 4294901760, %v9646_v27  ;;  %v29595_v34 = vld [vmem:[#allocation25_spill] sm:$0xff] }
 0x237   :  { %23079 = vmatpush3.bf16.msra.mxu0 %v23078_v58  ;;  %23116 = vmatprep.subr.bf16.mxu1 %v29556_v36  ;;  %v23096_v8 = vpack.c.bf16 %v29591_v2, %v29590_v41  ;;  %v26634_v20 = vsub.f32 %v26615_v39, %v10267_v30  ;;  %v10264_v26 = vsel %vm62_vm1, %v10262_v29, 0  ;;  %v9651_v21 = vsel %vm62_vm1, %v9649_v15, 0 }
 0x238   :  { %20947 = vmatmul.mubr.f32.gmra.mrb[46].mxu0 %v24779_v23  ;;  %23080 = vmatprep.subr.bf16.mxu0 %v29556_v36  ;;  %v26638_v48 = vsub.f32 %v10260_v42, %v10270_v13  ;;  %v26643_v16 = vsub.f32 %v9646_v27, %v9654_v7  ;;  %v9657_v58 = vand.u32 4294901760, %v9647_v63  ;;  %v10276_v6 = vand.u32 4294901760, %v10264_v26  ;;  %v29598_v27 = vld [vmem:[#allocation28_spill] sm:$0xff] }
 0x239   :  { %21049 = vmatmul.mubr.f32.gmra.mrb[46].mxu1 %v24779_v23  ;;  %20957 = vmatprep.mubr.msk.f32.mxu0 %vm24602_vm0, %v29550_v18  ;;  %v29391_v40 = vand.u32 4294901760, %v26634_v20  ;;  %v9660_v4 = vand.u32 4294901760, %v9648_v12  ;;  %v26660_v0 = vmul.f32 0.17934024, %v29595_v34  ;;  %v9663_v11 = vand.u32 4294901760, %v9651_v21 }
 0x23a   :  { %21059 = vmatprep.mubr.msk.f32.mxu1 %vm24602_vm0, %v29550_v18  ;;  %v26674_v41 = vsub.f32 %v10264_v26, %v10276_v6  ;;  %v26688_v29 = vmul.f32 0.17934024, %v29598_v27  ;;  %v26703_v26 = vpack.c.bf16 %v9657_v58, %v9654_v7 }
 0x23b   :  { %v26676_v2 = vsub.f32 %v9648_v12, %v9660_v4 }
 0x23c   :  { %20958 = vmatmul.mubr.f32.vlgmr.msra.gmra.mrb[42].mxu0 %v24678_v31 }
 0x23d   :  { %21060 = vmatmul.mubr.f32.vlgmr.msra.gmra.mrb[42].mxu1 %v24678_v31  ;;  %20960 = vmatprep.mubr.msk.f32.mxu0 %vm24602_vm0, %v29550_v18 }
 0x23e   :  { %23118 = vmatpush3.bf16.msra.mxu1 %v23117_v50  ;;  %23082 = vmatpush3.bf16.msra.mxu0 %v23081_v22  ;;  %v10273_v50 = vand.u32 4294901760, %v10261_v54  ;;  %v29389_v22 = vand.u32 4294901760, %v26638_v48 }
 0x23f   :  { %21062 = vmatprep.mubr.msk.f32.mxu1 %vm24602_vm0, %v29550_v18  ;;  %23119 = vmatprep.subr.bf16.mxu1 %v29556_v36 }
 0x240   :  { %20961 = vmatmul.mubr.f32.gmra.mrb[44].mxu0 %v24705_v44  ;;  %23083 = vmatprep.subr.bf16.mxu0 %v29556_v36  ;;  %v26666_v60 = vsub.f32 %v10261_v54, %v10273_v50  ;;  %v10376_v15 = vsub.f32 %v26638_v48, %v29389_v22  ;;  %v26701_v54 = vpack.c.bf16 %v10270_v13, %v10267_v30 }
 0x241   :  { %21063 = vmatmul.mubr.f32.gmra.mrb[44].mxu1 %v24705_v44  ;;  %20963 = vmatprep.mubr.msk.f32.mxu0 %vm24602_vm0, %v29550_v18  ;;  %v26717_v22 = vsub.f32 %v9651_v21, %v9663_v11 }
 0x242   :  { %21065 = vmatprep.mubr.msk.f32.mxu1 %vm24602_vm0, %v29550_v18  ;;  %23121 = vmatpush3.bf16.msra.mxu1 %v23120_v25  ;;  %v29594_v25 = vld [vmem:[#allocation24_spill] sm:$0xff] }
 0x243   :  { %23085 = vmatpush3.bf16.msra.mxu0 %v23084_v51  ;;  %23122 = vmatprep.subr.bf16.mxu1 %v29556_v36  ;;  %v26653_v51 = vmul.f32 0.17934024, %v29594_v25 }
 0x244   :  { %20964 = vmatmul.mubr.f32.gmra.mrb[46].mxu0 %v24742_v5  ;;  %23086 = vmatprep.subr.bf16.mxu0 %v29556_v36 }
 0x245   :  { %21066 = vmatmul.mubr.f32.gmra.mrb[46].mxu1 %v24742_v5  ;;  %20974 = vmatprep.mubr.msk.f32.mxu0 %vm24602_vm0, %v29550_v18 }
 0x246   :  { %21076 = vmatprep.mubr.msk.f32.mxu1 %vm24602_vm0, %v29550_v18 }
 0x248   :  { %20975 = vmatmul.mubr.f32.vlgmr.msra.gmra.mrb[42].mxu0 %v24689_v37 }
 0x249   :  { %21077 = vmatmul.mubr.f32.vlgmr.msra.gmra.mrb[42].mxu1 %v24689_v37  ;;  %20977 = vmatprep.mubr.msk.f32.mxu0 %vm24602_vm0, %v29550_v18 }
 0x24a   :  { %23124 = vmatpush3.bf16.msra.mxu1 %v26365_v47  ;;  %23088 = vmatpush3.bf16.msra.mxu0 %v26374_v28 }
 0x24b   :  { %21079 = vmatprep.mubr.msk.f32.mxu1 %vm24602_vm0, %v29550_v18  ;;  %23125 = vmatprep.subr.bf16.mxu1 %v29556_v36 }
 0x24c   :  { %20978 = vmatmul.mubr.f32.gmra.mrb[44].mxu0 %v24720_v53  ;;  %23089 = vmatprep.subr.bf16.mxu0 %v29556_v36 }
 0x24d   :  { %21080 = vmatmul.mubr.f32.gmra.mrb[44].mxu1 %v24720_v53  ;;  %20980 = vmatprep.mubr.msk.f32.mxu0 %vm24602_vm0, %v29550_v18 }
 0x24e   :  { %21082 = vmatprep.mubr.msk.f32.mxu1 %vm24602_vm0, %v29550_v18  ;;  %23127 = vmatpush3.bf16.msra.mxu1 %v26387_v3 }
 0x24f   :  { %23091 = vmatpush3.bf16.msra.mxu0 %v26433_v49  ;;  %23128 = vmatprep.subr.bf16.mxu1 %v29556_v36 }
 0x250   :  { %20981 = vmatmul.mubr.f32.gmra.mrb[46].mxu0 %v24756_v10  ;;  %23092 = vmatprep.subr.bf16.mxu0 %v29556_v36 }
 0x251   :  { %21083 = vmatmul.mubr.f32.gmra.mrb[46].mxu1 %v24756_v10  ;;  %20991 = vmatprep.mubr.msk.f32.mxu0 %vm24602_vm0, %v29550_v18  ;;  %v29617_v10 = vld [vmem:[#allocation21_spill] sm:$0xff] }
 0x252   :  { %21093 = vmatprep.mubr.msk.f32.mxu1 %vm24602_vm0, %v29550_v18 }
 0x254   :  { %20992 = vmatmul.mubr.f32.vlgmr.msra.gmra.mrb[42].mxu0 %v24709_v45 }
 0x255   :  { %21094 = vmatmul.mubr.f32.vlgmr.msra.gmra.mrb[42].mxu1 %v24709_v45  ;;  %20994 = vmatprep.mubr.msk.f32.mxu0 %vm24602_vm0, %v29550_v18  ;;  %v29616_v45 = vld [vmem:[#allocation17_spill] sm:$0xff] }
 0x256   :  { %23130 = vmatpush3.bf16.msra.mxu1 %v23129_v55  ;;  %23094 = vmatpush3.bf16.msra.mxu0 %v23093_v35  ;;  %v29390_v55 = vand.u32 4294901760, %v26643_v16  ;;  %v26664_v35 = vsub.f32 %v9647_v63, %v9657_v58  ;;  %v26696_v63 = vmul.f32 0.17934024, %v26146_v24 }
 0x257   :  { %21096 = vmatprep.mubr.msk.f32.mxu1 %vm24602_vm0, %v29550_v18  ;;  %23131 = vmatprep.subr.bf16.mxu1 %v29556_v36 }
 0x258   :  { %20995 = vmatmul.mubr.f32.gmra.mrb[44].mxu0 %v29592_v59  ;;  %23095 = vmatprep.subr.bf16.mxu0 %v29556_v36  ;;  %v26708_v12 = vsub.f32 %v26643_v16, %v29390_v55  ;;  %v29606_v55 = vld [vmem:[#allocation34_spill] sm:$0xff] }
 0x259   :  { %21097 = vmatmul.mubr.f32.gmra.mrb[44].mxu1 %v29592_v59  ;;  %20997 = vmatprep.mubr.msk.f32.mxu0 %vm24602_vm0, %v29550_v18 }
 0x25a   :  { %21099 = vmatprep.mubr.msk.f32.mxu1 %vm24602_vm0, %v29550_v18  ;;  %23133 = vmatpush3.bf16.msra.mxu1 %v23132_v1  ;;  %v29596_v1 = vld [vmem:[#allocation26_spill] sm:$0xff] }
 0x25b   :  { %23097 = vmatpush3.bf16.msra.mxu0 %v23096_v8  ;;  %23134 = vmatprep.subr.bf16.mxu1 %v29556_v36  ;;  %v26669_v39 = vmul.f32 0.16847457, %v29596_v1  ;;  %v29597_v8 = vld [vmem:[#allocation29_spill] sm:$0xff]  ;;  %v26713_v1 = vpack.c.bf16 %v10276_v6, %v10273_v50  ;;  %v29601_v6 = vld [vmem:[#allocation16_spill] sm:$0xff] }
 0x25c   :  { %20998 = vmatmul.mubr.f32.gmra.mrb[46].mxu0 %v29593_v52  ;;  %23098 = vmatprep.subr.bf16.mxu0 %v29556_v36  ;;  %v26685_v42 = vmul.f32 0.16847457, %v29597_v8  ;;  %v26715_v8 = vpack.c.bf16 %v9663_v11, %v9660_v4  ;;  %v29602_v4 = vld [vmem:[#allocation20_spill] sm:$0xff] }
 0x25d   :  { %21100 = vmatmul.mubr.f32.gmra.mrb[46].mxu1 %v29593_v52  ;;  %21008 = vmatprep.mubr.msk.f32.mxu0 %vm24602_vm0, %v29550_v18 }
 0x25e   :  { %21110 = vmatprep.mubr.msk.f32.mxu1 %vm24602_vm0, %v29550_v18 }
 0x260   :  { %21009 = vmatmul.mubr.f32.vlgmr.msra.gmra.mrb[42].mxu0 %v24678_v31 }
 0x261   :  { %21111 = vmatmul.mubr.f32.vlgmr.msra.gmra.mrb[42].mxu1 %v24678_v31  ;;  %21011 = vmatprep.mubr.msk.f32.mxu0 %vm24602_vm0, %v29550_v18 }
 0x262   :  { %23136 = vmatpush3.bf16.msra.mxu1 %v26365_v47  ;;  %23100 = vmatpush3.bf16.msra.mxu0 %v26374_v28  ;;  %v10369_v28 = vsub.f32 %v26634_v20, %v29391_v40  ;;  %v26682_v47 = vmul.f32 0.17934024, %v26098_v43 }
 0x263   :  { %21113 = vmatprep.mubr.msk.f32.mxu1 %vm24602_vm0, %v29550_v18  ;;  %23137 = vmatprep.subr.bf16.mxu1 %v29556_v36 }
 0x264   :  { %21012 = vmatmul.mubr.f32.gmra.mrb[44].mxu0 %v24705_v44  ;;  %23101 = vmatprep.subr.bf16.mxu0 %v29556_v36  ;;  %v10370_v58 = vand.u32 4294901760, %v10369_v28  ;;  %v10377_v28 = vand.u32 4294901760, %v10376_v15 }
 0x265   :  { %21114 = vmatmul.mubr.f32.gmra.mrb[44].mxu1 %v24705_v44  ;;  %21014 = vmatprep.mubr.msk.f32.mxu0 %vm24602_vm0, %v29550_v18 }
 0x266   :  { %21116 = vmatprep.mubr.msk.f32.mxu1 %vm24602_vm0, %v29550_v18  ;;  %23139 = vmatpush3.bf16.msra.mxu1 %v26387_v3  ;;  %v26720_v13 = vpop.f32.mrb[24].mxu0  ;;  %v29604_v3 = vld [vmem:[#allocation19_spill] sm:$0xff] }
 0x267   :  { %29599 = vst [vmem:[#allocation31_spill] sm:$0xff] %v26720_v13  ;;  %v26722_v7 = vpop.f32.mrb[24].mxu1  ;;  %23103 = vmatpush3.bf16.msra.mxu0 %v26433_v49  ;;  %23176 = vmatprep.subr.bf16.mxu1 %v29556_v36  ;;  %v5320_v21 = vadd.f32 %v26720_v13, %v29601_v6  ;;  %v5939_v11 = vadd.f32 %v26720_v13, %v29602_v4  ;;  %v20415_v49 = vpop.f32.mrb[25].mxu0 }
 0x268   :  { %29600 = vst [vmem:[#allocation33_spill] sm:$0xff] %v26722_v7  ;;  %v26735_v40 = vadd.f32 %v26720_v13, %v29595_v34  ;;  %v20517_v30 = vpop.f32.mrb[25].mxu1  ;;  %21015 = vmatmul.mubr.f32.gmra.mrb[46].mxu0 %v24742_v5  ;;  %23140 = vmatprep.subr.bf16.mxu0 %v29556_v36  ;;  %v5933_v50 = vadd.f32 %v26722_v7, %v29604_v3  ;;  %v29608_v49 = vld [vmem:[#allocation35_spill] sm:$0xff]  ;;  %v29609_v3 = vand.u32 4294901760, %v26664_v35 }
 0x269   :  { %v26743_v6 = vadd.f32 %v26722_v7, %v29594_v25  ;;  %v26747_v4 = vadd.f32 %v26722_v7, %v29606_v55  ;;  %21117 = vmatmul.mubr.f32.gmra.mrb[46].mxu1 %v24742_v5  ;;  %21025 = vmatprep.mubr.msk.f32.mxu0 %vm24602_vm0, %v29550_v18  ;;  %v5329_v15 = vmul.f32 0.13967033, %v29608_v49  ;;  %v5942_v13 = vmul.f32 0.13967033, %v5939_v11  ;;  %v29612_v11 = vld [vmem:[#allocation36_spill] sm:$0xff] }
 0x26a   :  { %29603 = vst [vmem:[#allocation22_spill] sm:$0xff] %v26735_v40  ;;  %v5323_v40 = vmul.f32 0.10218499, %v5320_v21  ;;  %21127 = vmatprep.mubr.msk.f32.mxu1 %vm24602_vm0, %v29550_v18  ;;  %v29610_v7 = vand.u32 4294901760, %v26666_v60  ;;  %v29611_v30 = vand.u32 4294901760, %v26674_v41  ;;  %v26773_v52 = vpop.f32.mrb[26].mxu0 }
 0x26b   :  { %29605 = vst [vmem:[#allocation30_spill] sm:$0xff] %v26743_v6  ;;  %29607 = vst [vmem:[#allocation23_spill] sm:$0xff] %v26747_v4  ;;  %v26759_v6 = vsub.f32 %v26664_v35, %v29609_v3  ;;  %v5936_v4 = vmul.f32 0.10218499, %v5933_v50  ;;  %v5951_v34 = vmul.f32 0.16847457, %v29612_v11  ;;  %v26778_v50 = vpack.c.bf16 %v10377_v28, %v10370_v58 }
 0x26c   :  { %v26764_v25 = vsub.f32 %v26666_v60, %v29610_v7  ;;  %v26769_v49 = vsub.f32 %v26674_v41, %v29611_v30  ;;  %v5332_v55 = vadd.f32 %v5329_v15, %v5323_v40  ;;  %29613 = vst [vmem:[#allocation26_spill] sm:$0xff] %v26773_v52  ;;  %v26775_v3 = vpop.f32.mrb[26].mxu1  ;;  %21026 = vmatmul.mubr.f32.vlgmr.msra.gmra.mrb[42].mxu0 %v24678_v31  ;;  %v29615_v7 = vand.u32 4294901760, %v26676_v2  ;;  %v20418_v11 = vpop.f32.mrb[27].mxu0 }
 0x26d   :  { %29614 = vst [vmem:[#allocation29_spill] sm:$0xff] %v26775_v3  ;;  %v5945_v30 = vadd.f32 %v5942_v13, %v5936_v4  ;;  %v5321_v21 = vadd.f32 %v26773_v52, %v29616_v45  ;;  %v5940_v40 = vadd.f32 %v26773_v52, %v29617_v10  ;;  %v26791_v15 = vadd.f32 %v26773_v52, %v29598_v27  ;;  %v20520_v53 = vpop.f32.mrb[27].mxu1 }
 0x26e   :  { %v26783_v59 = vsub.f32 %v26676_v2, %v29615_v7  ;;  %21128 = vmatmul.mubr.f32.vlgmr.msra.gmra.mrb[42].mxu1 %v24678_v31  ;;  %v5341_v58 = vadd.f32 %v26669_v39, %v5332_v55  ;;  %v5934_v28 = vadd.f32 %v26775_v3, %v25836_v61  ;;  %v26799_v13 = vadd.f32 %v26775_v3, %v26098_v43 }
 0x26f   :  { %29618 = vst [vmem:[#allocation16_spill] sm:$0xff] %v26791_v15  ;;  %23178 = vmatpush3.bf16.msra.mxu1 %v26701_v54  ;;  %21028 = vmatprep.mubr.msk.f32.mxu0 %vm24602_vm0, %v29550_v18  ;;  %v9764_v45 = vand.u32 4294901760, %v26759_v6  ;;  %v5330_v53 = vmul.f32 0.13967033, %v26444_v57  ;;  %v5954_v4 = vadd.f32 %v5951_v34, %v5945_v30  ;;  %v5324_v7 = vmul.f32 0.10218499, %v5321_v21 }
 0x270   :  { %29619 = vst [vmem:[#allocation19_spill] sm:$0xff] %v26799_v13  ;;  %v5943_v11 = vmul.f32 0.13967033, %v5940_v40  ;;  %21130 = vmatprep.mubr.msk.f32.mxu1 %vm24602_vm0, %v29550_v18  ;;  %23142 = vmatpush3.bf16.msra.mxu0 %v26703_v26  ;;  %v5347_v61 = vadd.f32 %v26653_v51, %v5341_v58  ;;  %v5937_v55 = vmul.f32 0.10218499, %v5934_v28  ;;  %v26812_v39 = vadd.f32 %v26775_v3, %v26431_v33  ;;  %v26814_v15 = vpop.f32.mrb[28].mxu0 }
 0x271   :  { %v26816_v6 = vpop.f32.mrb[28].mxu1  ;;  %21029 = vmatmul.mubr.f32.gmra.mrb[44].mxu0 %v24705_v44  ;;  %23179 = vmatprep.subr.bf16.mxu1 %v29556_v36  ;;  %v29621_v57 = vand.u32 4294901760, %v26717_v22  ;;  %v29622_v21 = vld [vmem:[#allocation32_spill] sm:$0xff]  ;;  %v5960_v51 = vadd.f32 %v26660_v0, %v5954_v4  ;;  %v5333_v40 = vadd.f32 %v5330_v53, %v5324_v7  ;;  %v29623_v58 = vld [vmem:[#allocation18_spill] sm:$0xff]  ;;  %v5952_v13 = vmul.f32 0.16847457, %v26448_v17 }
 0x272   :  { %29620 = vst [vmem:[#allocation35_spill] sm:$0xff] %v26812_v39  ;;  %v5340_v30 = vmul.f32 0.16847457, %v29622_v21  ;;  %v5322_v28 = vadd.f32 %v26814_v15, %v29623_v58  ;;  %v20421_v39 = vpop.f32.mrb[29].mxu0  ;;  %v20523_v3 = vpop.f32.mrb[29].mxu1  ;;  %21131 = vmatmul.mubr.f32.gmra.mrb[44].mxu1 %v24705_v44  ;;  %21031 = vmatprep.mubr.msk.f32.mxu0 %vm24602_vm0, %v29550_v18  ;;  %5351 = vst [vmem:[#allocation7 + $0x30] sm:$0xff] %v5347_v61  ;;  %v5946_v43 = vadd.f32 %v5943_v11, %v5937_v55 }
 0x273   :  { %v9777_v34 = vsub.f32 %v26717_v22, %v29621_v57  ;;  %v5941_v57 = vadd.f32 %v26814_v15, %v29577_v14  ;;  %v26835_v0 = vadd.f32 %v26814_v15, %v26148_v56  ;;  %21133 = vmatprep.mubr.msk.f32.mxu1 %vm24602_vm0, %v29550_v18  ;;  %23181 = vmatpush3.bf16.msra.mxu1 %v26713_v1  ;;  %v5331_v3 = vmul.f32 0.13967033, %v26476_v38 }
 0x274   :  { %5964 = vst [vmem:[#allocation7 + $0x48] sm:$0xff] %v5960_v51  ;;  %v5342_v53 = vadd.f32 %v26685_v42, %v5333_v40  ;;  %v5325_v17 = vmul.f32 0.10218499, %v5322_v28  ;;  %v5935_v4 = vadd.f32 %v26816_v6, %v25872_v46  ;;  %23143 = vmatprep.subr.bf16.mxu0 %v29556_v36  ;;  %23182 = vmatprep.subr.bf16.mxu1 %v29556_v36  ;;  %v29624_v38 = vand.u32 4294901760, %v26708_v12 }
 0x275   :  { %v5955_v7 = vadd.f32 %v5952_v13, %v5946_v43  ;;  %v5944_v11 = vmul.f32 0.13967033, %v5941_v57  ;;  %v26848_v61 = vadd.f32 %v26816_v6, %v26146_v24  ;;  %21032 = vmatmul.mubr.f32.gmra.mrb[46].mxu0 %v24742_v5  ;;  %v26856_v46 = vadd.f32 %v26816_v6, %v26459_v19  ;;  %v29625_v57 = vld [vmem:[#allocation12_spill] sm:$0xff] }
 0x276   :  { %v23147_v55 = vpack.c.bf16 %v9764_v45, %v29624_v38  ;;  %v5348_v42 = vadd.f32 %v26682_v47, %v5342_v53  ;;  %v5334_v39 = vadd.f32 %v5331_v3, %v5325_v17  ;;  %v5938_v21 = vmul.f32 0.10218499, %v5935_v4  ;;  %21134 = vmatmul.mubr.f32.gmra.mrb[46].mxu1 %v24742_v5  ;;  %23145 = vmatpush3.bf16.msra.mxu0 %v26715_v8  ;;  %v29626_v3 = vld [vmem:[#allocation14_spill] sm:$0xff] }
 0x277   :  { %v5961_v43 = vadd.f32 %v26688_v29, %v5955_v7  ;;  %21144 = vmatprep.mubr.msk.f32.mxu0 %vm24602_vm0, %v29550_v18  ;;  %21246 = vmatprep.mubr.msk.f32.mxu1 %vm24602_vm0, %v29550_v18  ;;  %v10384_v47 = vand.u32 4294901760, %v26764_v25  ;;  %v10391_v12 = vand.u32 4294901760, %v26769_v49  ;;  %v9771_v13 = vand.u32 4294901760, %v26783_v59 }
 0x278   :  { %v5953_v45 = vmul.f32 0.16847457, %v26480_v32  ;;  %5352 = vst [vmem:[#allocation7 + $0x38] sm:$0xff] %v5348_v42  ;;  %v5343_v51 = vadd.f32 %v5340_v30, %v5334_v39  ;;  %v5947_v40 = vadd.f32 %v5944_v11, %v5938_v21  ;;  %23146 = vmatprep.subr.bf16.mxu0 %v29556_v36  ;;  %v9778_v29 = vand.u32 4294901760, %v9777_v34  ;;  %v26963_v42 = vld [vmem:[#allocation5 + $0x240] sm:$0xff] }
 0x279   :  { %5965 = vst [vmem:[#allocation7 + $0x50] sm:$0xff] %v5961_v43  ;;  %21145 = vmatmul.mubr.f32.vlgmr.msra.gmra.mrb[48].mxu0 %v24733_v62  ;;  %v5959_v58 = vmul.f32 0.17934024, %v26148_v56  ;;  %v23186_v32 = vpack.c.bf16 %v10391_v12, %v10384_v47  ;;  %v23192_v34 = vpack.c.bf16 %v26674_v41, %v26666_v60  ;;  %v23156_v30 = vpack.c.bf16 %v26717_v22, %v26676_v2  ;;  %v10873_v12 = vld [vmem:[#allocation5 + $0x228] sm:$0xff] }
 0x27a   :  { %v5349_v28 = vadd.f32 %v26696_v63, %v5343_v51  ;;  %v5956_v25 = vadd.f32 %v5953_v45, %v5947_v40  ;;  %21247 = vmatmul.mubr.f32.vlgmr.msra.gmra.mrb[48].mxu1 %v24733_v62  ;;  %21147 = vmatprep.mubr.msk.f32.mxu0 %vm24602_vm0, %v29550_v18  ;;  %v23150_v49 = vpack.c.bf16 %v9778_v29, %v9771_v13  ;;  %v29627_v53 = vand.u32 4294901760, %v26634_v20  ;;  %v29636_v13 = vld [vmem:[#allocation13_spill] sm:$0xff]  ;;  %v11488_v40 = vld [vmem:[#allocation5 + $0x258] sm:$0xf] }
 0x27b   :  { %23184 = vmatpush3.bf16.msra.mxu1 %v26778_v50  ;;  %23148 = vmatpush3.bf16.msra.mxu0 %v23147_v55  ;;  %v23189_v63 = vpack.c.bf16 %v26638_v48, %v26634_v20  ;;  %v23153_v50 = vpack.c.bf16 %v26664_v35, %v26643_v16  ;;  %v29628_v17 = vand.u32 4294901760, %v26638_v48  ;;  %v29629_v7 = vand.u32 4294901760, %v26643_v16  ;;  %v29631_v55 = vld [vmem:[#allocation11_spill] sm:$0xff]  ;;  %v26969_v16 = vld [vmem:[#allocation5 + $0x248] sm:$0xff]  ;;  %v11487_v51 = vld [vmem:[#allocation5 + $0x250] sm:$0xff] }
 0x27c   :  { %5353 = vst [vmem:[#allocation7 + $0x40] sm:$0xff] %v5349_v28  ;;  %v5962_v59 = vadd.f32 %v5959_v58, %v5956_v25  ;;  %21249 = vmatprep.mubr.msk.f32.mxu1 %vm24602_vm0, %v29550_v18  ;;  %23185 = vmatprep.subr.bf16.mxu1 %v29556_v36  ;;  %v29630_v11 = vand.u32 4294901760, %v26664_v35  ;;  %v29632_v20 = vand.u32 4294901760, %v26666_v60  ;;  %v29633_v48 = vand.u32 4294901760, %v26674_v41  ;;  %v26971_v35 = vld [vmem:[#allocation5 + $0x220] sm:$0xff] }
 0x27d   :  { %21148 = vmatmul.mubr.f32.gmra.mrb[50].mxu0 %v24753_v9  ;;  %23149 = vmatprep.subr.bf16.mxu0 %v29556_v36  ;;  %v23201_v4 = vpack.c.bf16 %v29628_v17, %v29627_v53  ;;  %v29634_v21 = vand.u32 4294901760, %v26676_v2  ;;  %v29635_v43 = vand.u32 4294901760, %v26717_v22  ;;  %v11493_v60 = vand.u32 4294901760, %v26963_v42  ;;  %v10875_v28 = vld [vmem:[#allocation5 + $0x238] sm:$0xf]  ;;  %v29637_v25 = vld [vmem:[#allocation15_spill] sm:$0xff] }
 0x27e   :  { %5966 = vst [vmem:[#allocation7 + $0x58] sm:$0xff] %v5962_v59  ;;  %21250 = vmatmul.mubr.f32.gmra.mrb[50].mxu1 %v24753_v9  ;;  %21150 = vmatprep.mubr.msk.f32.mxu0 %vm24602_vm0, %v29550_v18  ;;  %v23165_v38 = vpack.c.bf16 %v29630_v11, %v29629_v7  ;;  %v23204_v39 = vpack.c.bf16 %v29633_v48, %v29632_v20  ;;  %v11496_v41 = vand.u32 4294901760, %v26969_v16  ;;  %v10880_v45 = vand.u32 4294901760, %v26971_v35 }
 0x27f   :  { %21252 = vmatprep.mubr.msk.f32.mxu1 %vm24602_vm0, %v29550_v18  ;;  %23187 = vmatpush3.bf16.msra.mxu1 %v23186_v32  ;;  %v23168_v47 = vpack.c.bf16 %v29635_v43, %v29634_v21  ;;  %v26991_v22 = vsub.f32 %v26963_v42, %v11493_v60  ;;  %v10883_v2 = vand.u32 4294901760, %v10873_v12  ;;  %v11490_v59 = vsel %vm62_vm1, %v11488_v40, 0 }
 0x280   :  { %23151 = vmatpush3.bf16.msra.mxu0 %v23150_v49  ;;  %23188 = vmatprep.subr.bf16.mxu1 %v29556_v36  ;;  %v26995_v29 = vsub.f32 %v26969_v16, %v11496_v41  ;;  %v26998_v58 = vsub.f32 %v26971_v35, %v10880_v45  ;;  %v11499_v49 = vand.u32 4294901760, %v11487_v51  ;;  %v29638_v35 = vld [vmem:[#allocation34_spill] sm:$0xff] }
 0x281   :  { %21151 = vmatmul.mubr.f32.gmra.mrb[52].mxu0 %v24779_v23  ;;  %23152 = vmatprep.subr.bf16.mxu0 %v29556_v36  ;;  %v27002_v32 = vsub.f32 %v10873_v12, %v10883_v2  ;;  %v27043_v21 = vmul.f32 0.17934024, %v29638_v35  ;;  %v27056_v12 = vpack.c.bf16 %v11496_v41, %v11493_v60 }
 0x282   :  { %21253 = vmatmul.mubr.f32.gmra.mrb[52].mxu1 %v24779_v23  ;;  %21161 = vmatprep.mubr.msk.f32.mxu0 %vm24602_vm0, %v29550_v18  ;;  %v29412_v53 = vand.u32 4294901760, %v26995_v29  ;;  %v29410_v17 = vand.u32 4294901760, %v26998_v58 }
 0x283   :  { %21263 = vmatprep.mubr.msk.f32.mxu1 %vm24602_vm0, %v29550_v18  ;;  %v29409_v11 = vand.u32 4294901760, %v27002_v32 }
 0x285   :  { %21162 = vmatmul.mubr.f32.vlgmr.msra.gmra.mrb[48].mxu0 %v24678_v31  ;;  %v10989_v43 = vsub.f32 %v27002_v32, %v29409_v11 }
 0x286   :  { %21264 = vmatmul.mubr.f32.vlgmr.msra.gmra.mrb[48].mxu1 %v24678_v31  ;;  %21164 = vmatprep.mubr.msk.f32.mxu0 %vm24602_vm0, %v29550_v18 }
 0x287   :  { %23190 = vmatpush3.bf16.msra.mxu1 %v23189_v63  ;;  %23154 = vmatpush3.bf16.msra.mxu0 %v23153_v50  ;;  %v10874_v63 = vld [vmem:[#allocation5 + $0x230] sm:$0xff]  ;;  %v10877_v50 = vsel %vm62_vm1, %v10875_v28, 0 }
 0x288   :  { %21266 = vmatprep.mubr.msk.f32.mxu1 %vm24602_vm0, %v29550_v18  ;;  %23191 = vmatprep.subr.bf16.mxu1 %v29556_v36  ;;  %v10886_v7 = vand.u32 4294901760, %v10874_v63 }
 0x289   :  { %21165 = vmatmul.mubr.f32.gmra.mrb[50].mxu0 %v24705_v44  ;;  %23155 = vmatprep.subr.bf16.mxu0 %v29556_v36 }
 0x28a   :  { %21267 = vmatmul.mubr.f32.gmra.mrb[50].mxu1 %v24705_v44  ;;  %21167 = vmatprep.mubr.msk.f32.mxu0 %vm24602_vm0, %v29550_v18  ;;  %v27025_v20 = vsub.f32 %v10874_v63, %v10886_v7 }
 0x28b   :  { %21269 = vmatprep.mubr.msk.f32.mxu1 %vm24602_vm0, %v29550_v18  ;;  %23193 = vmatpush3.bf16.msra.mxu1 %v23192_v34  ;;  %v29413_v34 = vand.u32 4294901760, %v26991_v22 }
 0x28c   :  { %23157 = vmatpush3.bf16.msra.mxu0 %v23156_v30  ;;  %23194 = vmatprep.subr.bf16.mxu1 %v29556_v36  ;;  %v27012_v30 = vsub.f32 %v11487_v51, %v11499_v49  ;;  %v27058_v51 = vpack.c.bf16 %v10883_v2, %v10880_v45  ;;  %v29647_v2 = vld [vmem:[#allocation33_spill] sm:$0xff] }
 0x28d   :  { %21168 = vmatmul.mubr.f32.gmra.mrb[52].mxu0 %v24742_v5  ;;  %23158 = vmatprep.subr.bf16.mxu0 %v29556_v36  ;;  %v11595_v48 = vsub.f32 %v26991_v22, %v29413_v34 }
 0x28e   :  { %21270 = vmatmul.mubr.f32.gmra.mrb[52].mxu1 %v24742_v5  ;;  %21178 = vmatprep.mubr.msk.f32.mxu0 %vm24602_vm0, %v29550_v18  ;;  %v29411_v16 = vand.u32 4294901760, %v27012_v30 }
 0x28f   :  { %21280 = vmatprep.mubr.msk.f32.mxu1 %vm24602_vm0, %v29550_v18 }
 0x291   :  { %21179 = vmatmul.mubr.f32.vlgmr.msra.gmra.mrb[48].mxu0 %v24689_v37 }
 0x292   :  { %21281 = vmatmul.mubr.f32.vlgmr.msra.gmra.mrb[48].mxu1 %v24689_v37  ;;  %21181 = vmatprep.mubr.msk.f32.mxu0 %vm24602_vm0, %v29550_v18 }
 0x293   :  { %23196 = vmatpush3.bf16.msra.mxu1 %v26701_v54  ;;  %23160 = vmatpush3.bf16.msra.mxu0 %v26703_v26 }
 0x294   :  { %21283 = vmatprep.mubr.msk.f32.mxu1 %vm24602_vm0, %v29550_v18  ;;  %23197 = vmatprep.subr.bf16.mxu1 %v29556_v36 }
 0x295   :  { %21182 = vmatmul.mubr.f32.gmra.mrb[50].mxu0 %v29625_v57  ;;  %23161 = vmatprep.subr.bf16.mxu0 %v29556_v36 }
 0x296   :  { %21284 = vmatmul.mubr.f32.gmra.mrb[50].mxu1 %v29625_v57  ;;  %21184 = vmatprep.mubr.msk.f32.mxu0 %vm24602_vm0, %v29550_v18 }
 0x297   :  { %21286 = vmatprep.mubr.msk.f32.mxu1 %vm24602_vm0, %v29550_v18  ;;  %23199 = vmatpush3.bf16.msra.mxu1 %v26713_v1 }
 0x298   :  { %23163 = vmatpush3.bf16.msra.mxu0 %v26715_v8  ;;  %23200 = vmatprep.subr.bf16.mxu1 %v29556_v36 }
 0x299   :  { %21185 = vmatmul.mubr.f32.gmra.mrb[52].mxu0 %v29626_v3  ;;  %23164 = vmatprep.subr.bf16.mxu0 %v29556_v36 }
 0x29a   :  { %21287 = vmatmul.mubr.f32.gmra.mrb[52].mxu1 %v29626_v3  ;;  %21195 = vmatprep.mubr.msk.f32.mxu0 %vm24602_vm0, %v29550_v18 }
 0x29b   :  { %21297 = vmatprep.mubr.msk.f32.mxu1 %vm24602_vm0, %v29550_v18 }
 0x29d   :  { %21196 = vmatmul.mubr.f32.vlgmr.msra.gmra.mrb[48].mxu0 %v29631_v55 }
 0x29e   :  { %21298 = vmatmul.mubr.f32.vlgmr.msra.gmra.mrb[48].mxu1 %v29631_v55  ;;  %21198 = vmatprep.mubr.msk.f32.mxu0 %vm24602_vm0, %v29550_v18 }
 0x29f   :  { %23202 = vmatpush3.bf16.msra.mxu1 %v23201_v4  ;;  %23166 = vmatpush3.bf16.msra.mxu0 %v23165_v38  ;;  %v11502_v4 = vand.u32 4294901760, %v11490_v59  ;;  %v10889_v38 = vand.u32 4294901760, %v10877_v50 }
 0x2a0   :  { %21300 = vmatprep.mubr.msk.f32.mxu1 %vm24602_vm0, %v29550_v18  ;;  %23203 = vmatprep.subr.bf16.mxu1 %v29556_v36 }
 0x2a1   :  { %21199 = vmatmul.mubr.f32.gmra.mrb[50].mxu0 %v29636_v13  ;;  %23167 = vmatprep.subr.bf16.mxu0 %v29556_v36  ;;  %v27023_v42 = vsub.f32 %v11490_v59, %v11502_v4  ;;  %v27060_v40 = vpack.c.bf16 %v11502_v4, %v11499_v49  ;;  %v27065_v28 = vpack.c.bf16 %v10889_v38, %v10886_v7  ;;  %v11596_v59 = vand.u32 4294901760, %v11595_v48  ;;  %v29641_v49 = vld [vmem:[#allocation20_spill] sm:$0xff]  ;;  %v29642_v7 = vld [vmem:[#allocation25_spill] sm:$0xff]  ;;  %v29643_v48 = vld [vmem:[#allocation31_spill] sm:$0xff] }
 0x2a2   :  { %21301 = vmatmul.mubr.f32.gmra.mrb[50].mxu1 %v29636_v13  ;;  %21201 = vmatprep.mubr.msk.f32.mxu0 %vm24602_vm0, %v29550_v18 }
 0x2a3   :  { %21303 = vmatprep.mubr.msk.f32.mxu1 %vm24602_vm0, %v29550_v18  ;;  %23205 = vmatpush3.bf16.msra.mxu1 %v23204_v39  ;;  %v27033_v39 = vsub.f32 %v10877_v50, %v10889_v38 }
 0x2a4   :  { %23169 = vmatpush3.bf16.msra.mxu0 %v23168_v47  ;;  %23206 = vmatprep.subr.bf16.mxu1 %v29556_v36  ;;  %v27051_v47 = vmul.f32 0.17934024, %v26431_v33 }
 0x2a5   :  { %21202 = vmatmul.mubr.f32.gmra.mrb[52].mxu0 %v29637_v25  ;;  %23170 = vmatprep.subr.bf16.mxu0 %v29556_v36 }
 0x2a6   :  { %21304 = vmatmul.mubr.f32.gmra.mrb[52].mxu1 %v29637_v25  ;;  %21212 = vmatprep.mubr.msk.f32.mxu0 %vm24602_vm0, %v29550_v18 }
 0x2a7   :  { %21314 = vmatprep.mubr.msk.f32.mxu1 %vm24602_vm0, %v29550_v18 }
 0x2a9   :  { %21213 = vmatmul.mubr.f32.vlgmr.msra.gmra.mrb[48].mxu0 %v24678_v31 }
 0x2aa   :  { %21315 = vmatmul.mubr.f32.vlgmr.msra.gmra.mrb[48].mxu1 %v24678_v31  ;;  %21215 = vmatprep.mubr.msk.f32.mxu0 %vm24602_vm0, %v29550_v18 }
 0x2ab   :  { %23208 = vmatpush3.bf16.msra.mxu1 %v26701_v54  ;;  %23172 = vmatpush3.bf16.msra.mxu0 %v26703_v26  ;;  %v11602_v54 = vsub.f32 %v26995_v29, %v29412_v53  ;;  %v10982_v26 = vsub.f32 %v26998_v58, %v29410_v17  ;;  %v29645_v53 = vld [vmem:[#allocation24_spill] sm:$0xff] }
 0x2ac   :  { %21317 = vmatprep.mubr.msk.f32.mxu1 %vm24602_vm0, %v29550_v18  ;;  %23209 = vmatprep.subr.bf16.mxu1 %v29556_v36 }
 0x2ad   :  { %21216 = vmatmul.mubr.f32.gmra.mrb[50].mxu0 %v24705_v44  ;;  %23173 = vmatprep.subr.bf16.mxu0 %v29556_v36  ;;  %v11603_v41 = vand.u32 4294901760, %v11602_v54  ;;  %v10983_v45 = vand.u32 4294901760, %v10982_v26  ;;  %v10990_v26 = vand.u32 4294901760, %v10989_v43 }
 0x2ae   :  { %21318 = vmatmul.mubr.f32.gmra.mrb[50].mxu1 %v24705_v44  ;;  %21218 = vmatprep.mubr.msk.f32.mxu0 %vm24602_vm0, %v29550_v18  ;;  %v27069_v11 = vpop.f32.mrb[30].mxu0 }
 0x2af   :  { %21320 = vmatprep.mubr.msk.f32.mxu1 %vm24602_vm0, %v29550_v18  ;;  %23211 = vmatpush3.bf16.msra.mxu1 %v26713_v1  ;;  %29639 = vst [vmem:[#allocation36_spill] sm:$0xff] %v27069_v11  ;;  %v27071_v60 = vpop.f32.mrb[30].mxu1  ;;  %v27078_v1 = vsub.f32 %v27012_v30, %v29411_v16  ;;  %v6546_v4 = vadd.f32 %v27069_v11, %v29641_v49  ;;  %v20619_v17 = vpop.f32.mrb[31].mxu0  ;;  %v27092_v16 = vmul.f32 0.17934024, %v26459_v19 }
 0x2b0   :  { %29640 = vst [vmem:[#allocation17_spill] sm:$0xff] %v27071_v60  ;;  %23175 = vmatpush3.bf16.msra.mxu0 %v26715_v8  ;;  %23248 = vmatprep.subr.bf16.mxu1 %v29556_v36  ;;  %v7165_v38 = vadd.f32 %v27069_v11, %v29642_v7  ;;  %v27087_v8 = vadd.f32 %v27069_v11, %v29643_v48  ;;  %v20721_v54 = vpop.f32.mrb[31].mxu1  ;;  %v29649_v17 = vld [vmem:[#allocation30_spill] sm:$0xff]  ;;  %v29654_v7 = vld [vmem:[#allocation23_spill] sm:$0xff] }
 0x2b1   :  { %21219 = vmatmul.mubr.f32.gmra.mrb[52].mxu0 %v24742_v5  ;;  %23212 = vmatprep.subr.bf16.mxu0 %v29556_v36  ;;  %v7159_v49 = vadd.f32 %v27071_v60, %v29645_v53  ;;  %v27098_v34 = vadd.f32 %v27071_v60, %v29638_v35  ;;  %v27102_v50 = vadd.f32 %v27071_v60, %v29647_v2  ;;  %v6555_v43 = vmul.f32 0.13967033, %v29649_v17 }
 0x2b2   :  { %29644 = vst [vmem:[#allocation21_spill] sm:$0xff] %v27087_v8  ;;  %21321 = vmatmul.mubr.f32.gmra.mrb[52].mxu1 %v24742_v5  ;;  %21229 = vmatprep.mubr.msk.f32.mxu0 %vm24602_vm0, %v29550_v18  ;;  %v6549_v54 = vmul.f32 0.10218499, %v6546_v4  ;;  %v7168_v63 = vmul.f32 0.13967033, %v7165_v38  ;;  %v29650_v53 = vand.u32 4294901760, %v27023_v42  ;;  %v27115_v60 = vpack.c.bf16 %v11603_v41, %v11596_v59 }
 0x2b3   :  { %29646 = vst [vmem:[#allocation32_spill] sm:$0xff] %v27098_v34  ;;  %29648 = vst [vmem:[#allocation18_spill] sm:$0xff] %v27102_v50  ;;  %21331 = vmatprep.mubr.msk.f32.mxu1 %vm24602_vm0, %v29550_v18  ;;  %v7162_v34 = vmul.f32 0.10218499, %v7159_v49  ;;  %v29651_v50 = vand.u32 4294901760, %v27025_v20  ;;  %v29652_v17 = vand.u32 4294901760, %v27033_v39  ;;  %v27134_v59 = vpack.c.bf16 %v10990_v26, %v10983_v45 }
 0x2b4   :  { %v27113_v8 = vsub.f32 %v27023_v42, %v29650_v53  ;;  %v29653_v38 = vld [vmem:[#allocation22_spill] sm:$0xff]  ;;  %v7177_v2 = vmul.f32 0.16847457, %v29654_v7  ;;  %v6558_v25 = vadd.f32 %v6555_v43, %v6549_v54  ;;  %v27129_v53 = vpop.f32.mrb[32].mxu0  ;;  %v27131_v49 = vpop.f32.mrb[32].mxu1  ;;  %v29658_v45 = vld [vmem:[#allocation27_spill] sm:$0xff] }
 0x2b5   :  { %v27120_v35 = vsub.f32 %v27025_v20, %v29651_v50  ;;  %v27125_v4 = vsub.f32 %v27033_v39, %v29652_v17  ;;  %v6564_v11 = vmul.f32 0.16847457, %v29653_v38  ;;  %29655 = vst [vmem:[#allocation12_spill] sm:$0xff] %v27129_v53  ;;  %29656 = vst [vmem:[#allocation14_spill] sm:$0xff] %v27131_v49  ;;  %21230 = vmatmul.mubr.f32.vlgmr.msra.gmra.mrb[48].mxu0 %v24678_v31  ;;  %v20622_v7 = vpop.f32.mrb[33].mxu0  ;;  %v20724_v43 = vpop.f32.mrb[33].mxu1 }
 0x2b6   :  { %v7171_v50 = vadd.f32 %v7168_v63, %v7162_v34  ;;  %v6547_v41 = vadd.f32 %v27129_v53, %v29617_v10  ;;  %v7166_v17 = vadd.f32 %v27129_v53, %v29598_v27  ;;  %v27142_v38 = vadd.f32 %v27129_v53, %v26773_v52  ;;  %21332 = vmatmul.mubr.f32.vlgmr.msra.gmra.mrb[48].mxu1 %v24678_v31  ;;  %v29660_v63 = vld [vmem:[#allocation19_spill] sm:$0xff]  ;;  %v27165_v53 = vpop.f32.mrb[34].mxu0 }
 0x2b7   :  { %v7183_v54 = vmul.f32 0.17934024, %v29643_v48  ;;  %v6567_v13 = vadd.f32 %v6564_v11, %v6558_v25  ;;  %v7160_v34 = vadd.f32 %v27131_v49, %v29658_v45  ;;  %v27150_v10 = vadd.f32 %v27131_v49, %v26431_v33  ;;  %23250 = vmatpush3.bf16.msra.mxu1 %v27056_v12  ;;  %21232 = vmatprep.mubr.msk.f32.mxu0 %vm24602_vm0, %v29550_v18 }
 0x2b8   :  { %29657 = vst [vmem:[#allocation11_spill] sm:$0xff] %v27142_v38  ;;  %v6556_v26 = vmul.f32 0.13967033, %v29660_v63  ;;  %v7180_v7 = vadd.f32 %v7177_v2, %v7171_v50  ;;  %v6550_v43 = vmul.f32 0.10218499, %v6547_v41  ;;  %21334 = vmatprep.mubr.msk.f32.mxu1 %vm24602_vm0, %v29550_v18  ;;  %23214 = vmatpush3.bf16.msra.mxu0 %v27058_v51  ;;  %v27167_v63 = vpop.f32.mrb[34].mxu1  ;;  %v7167_v27 = vadd.f32 %v27165_v53, %v26148_v56 }
 0x2b9   :  { %29659 = vst [vmem:[#allocation20_spill] sm:$0xff] %v27150_v10  ;;  %v7169_v38 = vmul.f32 0.13967033, %v7166_v17  ;;  %v7184_v25 = vmul.f32 0.17934024, %v26773_v52  ;;  %v6573_v11 = vadd.f32 %v27043_v21, %v6567_v13  ;;  %v29661_v10 = vld [vmem:[#allocation29_spill] sm:$0xff]  ;;  %21233 = vmatmul.mubr.f32.gmra.mrb[50].mxu0 %v24705_v44  ;;  %23251 = vmatprep.subr.bf16.mxu1 %v29556_v36  ;;  %v6548_v13 = vadd.f32 %v27165_v53, %v29577_v14 }
 0x2ba   :  { %v7163_v45 = vmul.f32 0.10218499, %v7160_v34  ;;  %v27163_v33 = vadd.f32 %v27131_v49, %v29661_v10  ;;  %v29663_v2 = vld [vmem:[#allocation16_spill] sm:$0xff]  ;;  %v7186_v41 = vadd.f32 %v7183_v54, %v7180_v7  ;;  %v6559_v17 = vadd.f32 %v6556_v26, %v6550_v43  ;;  %v20625_v21 = vpop.f32.mrb[35].mxu0  ;;  %v20727_v34 = vpop.f32.mrb[35].mxu1  ;;  %21335 = vmatmul.mubr.f32.gmra.mrb[50].mxu1 %v24705_v44  ;;  %21235 = vmatprep.mubr.msk.f32.mxu0 %vm24602_vm0, %v29550_v18 }
 0x2bb   :  { %v6565_v50 = vmul.f32 0.16847457, %v29663_v2  ;;  %6577 = vst [vmem:[#allocation7 + $0x60] sm:$0xff] %v6573_v11  ;;  %v27182_v54 = vadd.f32 %v27165_v53, %v26814_v15  ;;  %21337 = vmatprep.mubr.msk.f32.mxu1 %vm24602_vm0, %v29550_v18  ;;  %23253 = vmatpush3.bf16.msra.mxu1 %v27060_v40  ;;  %v6557_v14 = vmul.f32 0.13967033, %v26848_v61  ;;  %v29665_v34 = vand.u32 4294901760, %v26991_v22 }
 0x2bc   :  { %29662 = vst [vmem:[#allocation24_spill] sm:$0xff] %v27163_v33  ;;  %v29664_v33 = vld [vmem:[#allocation35_spill] sm:$0xff]  ;;  %v7172_v52 = vadd.f32 %v7169_v38, %v7163_v45  ;;  %7190 = vst [vmem:[#allocation7 + $0x78] sm:$0xff] %v7186_v41  ;;  %v6551_v7 = vmul.f32 0.10218499, %v6548_v13  ;;  %23215 = vmatprep.subr.bf16.mxu0 %v29556_v36  ;;  %23254 = vmatprep.subr.bf16.mxu1 %v29556_v36  ;;  %v27195_v45 = vadd.f32 %v27167_v63, %v26459_v19 }
 0x2bd   :  { %v7178_v49 = vmul.f32 0.16847457, %v29664_v33  ;;  %v6568_v26 = vadd.f32 %v6565_v50, %v6559_v17  ;;  %v7161_v33 = vadd.f32 %v27167_v63, %v26146_v24  ;;  %v6566_v38 = vmul.f32 0.16847457, %v26835_v0  ;;  %21236 = vmatmul.mubr.f32.gmra.mrb[52].mxu0 %v24742_v5 }
 0x2be   :  { %v7170_v11 = vmul.f32 0.13967033, %v7167_v27  ;;  %v6560_v2 = vadd.f32 %v6557_v14, %v6551_v7  ;;  %v27201_v24 = vadd.f32 %v27167_v63, %v26816_v6  ;;  %21338 = vmatmul.mubr.f32.gmra.mrb[52].mxu1 %v24742_v5  ;;  %23217 = vmatpush3.bf16.msra.mxu0 %v27065_v28  ;;  %v11610_v27 = vand.u32 4294901760, %v27078_v1 }
 0x2bf   :  { %v7181_v43 = vadd.f32 %v7178_v49, %v7172_v52  ;;  %v6574_v61 = vadd.f32 %v27051_v47, %v6568_v26  ;;  %v7164_v50 = vmul.f32 0.10218499, %v7161_v33  ;;  %21348 = vmatprep.mubr.msk.f32.mxu0 %vm24602_vm0, %v29550_v18  ;;  %21450 = vmatprep.mubr.msk.f32.mxu1 %vm24602_vm0, %v29550_v18  ;;  %v11617_v0 = vand.u32 4294901760, %v27113_v8 }
 0x2c0   :  { %v10997_v47 = vand.u32 4294901760, %v27120_v35  ;;  %v7179_v49 = vmul.f32 0.16847457, %v26856_v46  ;;  %v6569_v41 = vadd.f32 %v6566_v38, %v6560_v2  ;;  %23218 = vmatprep.subr.bf16.mxu0 %v29556_v36  ;;  %v7185_v13 = vmul.f32 0.17934024, %v26814_v15 }
 0x2c1   :  { %v7187_v52 = vadd.f32 %v7184_v25, %v7181_v43  ;;  %6578 = vst [vmem:[#allocation7 + $0x68] sm:$0xff] %v6574_v61  ;;  %v7173_v17 = vadd.f32 %v7170_v11, %v7164_v50  ;;  %v11004_v25 = vand.u32 4294901760, %v27125_v4  ;;  %21349 = vmatmul.mubr.f32.vlgmr.msra.gmra.mrb[54].mxu0 %v24733_v62  ;;  %v23258_v46 = vpack.c.bf16 %v11617_v0, %v11610_v27  ;;  %v27309_v43 = vld [vmem:[#allocation5 + $0x280] sm:$0xff]  ;;  %v29673_v27 = vld [vmem:[#allocation13_spill] sm:$0xff] }
 0x2c2   :  { %v6575_v1 = vadd.f32 %v27092_v16, %v6569_v41  ;;  %21451 = vmatmul.mubr.f32.vlgmr.msra.gmra.mrb[54].mxu1 %v24733_v62  ;;  %21351 = vmatprep.mubr.msk.f32.mxu0 %vm24602_vm0, %v29550_v18  ;;  %v23261_v16 = vpack.c.bf16 %v26995_v29, %v26991_v22  ;;  %v23264_v4 = vpack.c.bf16 %v27023_v42, %v27012_v30  ;;  %v29666_v14 = vand.u32 4294901760, %v26995_v29 }
 0x2c3   :  { %7191 = vst [vmem:[#allocation7 + $0x80] sm:$0xff] %v7187_v52  ;;  %v7182_v21 = vadd.f32 %v7179_v49, %v7173_v17  ;;  %23256 = vmatpush3.bf16.msra.mxu1 %v27115_v60  ;;  %23220 = vmatpush3.bf16.msra.mxu0 %v27134_v59  ;;  %v23222_v8 = vpack.c.bf16 %v11004_v25, %v10997_v47  ;;  %v29667_v7 = vand.u32 4294901760, %v26998_v58  ;;  %v29668_v33 = vand.u32 4294901760, %v27002_v32  ;;  %v12099_v52 = vld [vmem:[#allocation5 + $0x268] sm:$0xff]  ;;  %v12713_v47 = vld [vmem:[#allocation5 + $0x290] sm:$0xff] }
 0x2c4   :  { %6579 = vst [vmem:[#allocation7 + $0x70] sm:$0xff] %v6575_v1  ;;  %21453 = vmatprep.mubr.msk.f32.mxu1 %vm24602_vm0, %v29550_v18  ;;  %23257 = vmatprep.subr.bf16.mxu1 %v29556_v36  ;;  %v23225_v60 = vpack.c.bf16 %v27002_v32, %v26998_v58  ;;  %v23228_v59 = vpack.c.bf16 %v27033_v39, %v27025_v20  ;;  %v29669_v22 = vand.u32 4294901760, %v27012_v30  ;;  %v29670_v29 = vand.u32 4294901760, %v27023_v42  ;;  %v27315_v58 = vld [vmem:[#allocation5 + $0x288] sm:$0xff]  ;;  %v27317_v32 = vld [vmem:[#allocation5 + $0x260] sm:$0xff] }
 0x2c5   :  { %v7188_v35 = vadd.f32 %v7185_v13, %v7182_v21  ;;  %21352 = vmatmul.mubr.f32.gmra.mrb[56].mxu0 %v24753_v9  ;;  %23221 = vmatprep.subr.bf16.mxu0 %v29556_v36  ;;  %v23273_v26 = vpack.c.bf16 %v29666_v14, %v29665_v34  ;;  %v23237_v38 = vpack.c.bf16 %v29668_v33, %v29667_v7  ;;  %v29671_v61 = vand.u32 4294901760, %v27025_v20  ;;  %v12714_v49 = vld [vmem:[#allocation5 + $0x298] sm:$0xf]  ;;  %v29674_v13 = vld [vmem:[#allocation15_spill] sm:$0xff] }
 0x2c6   :  { %21454 = vmatmul.mubr.f32.gmra.mrb[56].mxu1 %v24753_v9  ;;  %21354 = vmatprep.mubr.msk.f32.mxu0 %vm24602_vm0, %v29550_v18  ;;  %v23276_v11 = vpack.c.bf16 %v29670_v29, %v29669_v22  ;;  %v29672_v2 = vand.u32 4294901760, %v27033_v39  ;;  %v12719_v30 = vand.u32 4294901760, %v27309_v43  ;;  %v12722_v42 = vand.u32 4294901760, %v27315_v58  ;;  %v12101_v25 = vld [vmem:[#allocation5 + $0x278] sm:$0xf] }
 0x2c7   :  { %7192 = vst [vmem:[#allocation7 + $0x88] sm:$0xff] %v7188_v35  ;;  %21456 = vmatprep.mubr.msk.f32.mxu1 %vm24602_vm0, %v29550_v18  ;;  %23259 = vmatpush3.bf16.msra.mxu1 %v23258_v46  ;;  %v12106_v0 = vand.u32 4294901760, %v27317_v32  ;;  %v12109_v39 = vand.u32 4294901760, %v12099_v52  ;;  %v12716_v21 = vsel %vm62_vm1, %v12714_v49, 0  ;;  %v12725_v46 = vand.u32 4294901760, %v12713_v47  ;;  %v12100_v35 = vld [vmem:[#allocation5 + $0x270] sm:$0xff] }
 0x2c8   :  { %23223 = vmatpush3.bf16.msra.mxu0 %v23222_v8  ;;  %23260 = vmatprep.subr.bf16.mxu1 %v29556_v36  ;;  %v23240_v50 = vpack.c.bf16 %v29672_v2, %v29671_v61  ;;  %v27337_v20 = vsub.f32 %v27309_v43, %v12719_v30  ;;  %v27341_v41 = vsub.f32 %v27315_v58, %v12722_v42  ;;  %v12103_v8 = vsel %vm62_vm1, %v12101_v25, 0 }
 0x2c9   :  { %21355 = vmatmul.mubr.f32.gmra.mrb[58].mxu0 %v24779_v23  ;;  %23224 = vmatprep.subr.bf16.mxu0 %v29556_v36  ;;  %v27344_v17 = vsub.f32 %v27317_v32, %v12106_v0  ;;  %v27348_v1 = vsub.f32 %v12099_v52, %v12109_v39  ;;  %v12728_v34 = vand.u32 4294901760, %v12716_v21  ;;  %v12112_v14 = vand.u32 4294901760, %v12100_v35 }
 0x2ca   :  { %21457 = vmatmul.mubr.f32.gmra.mrb[58].mxu1 %v24779_v23  ;;  %21365 = vmatprep.mubr.msk.f32.mxu0 %vm24602_vm0, %v29550_v18  ;;  %v12115_v7 = vand.u32 4294901760, %v12103_v8  ;;  %v27397_v61 = vmul.f32 0.17934024, %v29661_v10  ;;  %v27402_v2 = vpack.c.bf16 %v12722_v42, %v12719_v30 }
 0x2cb   :  { %21467 = vmatprep.mubr.msk.f32.mxu1 %vm24602_vm0, %v29550_v18  ;;  %v27369_v33 = vsub.f32 %v12716_v21, %v12728_v34  ;;  %v27406_v52 = vpack.c.bf16 %v12728_v34, %v12725_v46  ;;  %v29678_v34 = vld [vmem:[#allocation36_spill] sm:$0xff] }
 0x2cc   :  { %v27379_v22 = vsub.f32 %v12103_v8, %v12115_v7 }
 0x2cd   :  { %21366 = vmatmul.mubr.f32.vlgmr.msra.gmra.mrb[54].mxu0 %v24678_v31  ;;  %v29439_v25 = vand.u32 4294901760, %v27369_v33 }
 0x2ce   :  { %21468 = vmatmul.mubr.f32.vlgmr.msra.gmra.mrb[54].mxu1 %v24678_v31  ;;  %21368 = vmatprep.mubr.msk.f32.mxu0 %vm24602_vm0, %v29550_v18 }
 0x2cf   :  { %23262 = vmatpush3.bf16.msra.mxu1 %v23261_v16  ;;  %23226 = vmatpush3.bf16.msra.mxu0 %v23225_v60  ;;  %v29433_v16 = vand.u32 4294901760, %v27337_v20  ;;  %v27358_v60 = vsub.f32 %v12713_v47, %v12725_v46  ;;  %v27411_v47 = vpack.c.bf16 %v12115_v7, %v12112_v14 }
 0x2d0   :  { %21470 = vmatprep.mubr.msk.f32.mxu1 %vm24602_vm0, %v29550_v18  ;;  %23263 = vmatprep.subr.bf16.mxu1 %v29556_v36 }
 0x2d1   :  { %21369 = vmatmul.mubr.f32.gmra.mrb[56].mxu0 %v24705_v44  ;;  %23227 = vmatprep.subr.bf16.mxu0 %v29556_v36  ;;  %v12821_v43 = vsub.f32 %v27337_v20, %v29433_v16  ;;  %v29429_v29 = vand.u32 4294901760, %v27358_v60 }
 0x2d2   :  { %21471 = vmatmul.mubr.f32.gmra.mrb[56].mxu1 %v24705_v44  ;;  %21371 = vmatprep.mubr.msk.f32.mxu0 %vm24602_vm0, %v29550_v18 }
 0x2d3   :  { %21473 = vmatprep.mubr.msk.f32.mxu1 %vm24602_vm0, %v29550_v18  ;;  %23265 = vmatpush3.bf16.msra.mxu1 %v23264_v4  ;;  %v29432_v4 = vand.u32 4294901760, %v27341_v41  ;;  %v12822_v49 = vand.u32 4294901760, %v12821_v43 }
 0x2d4   :  { %23229 = vmatpush3.bf16.msra.mxu0 %v23228_v59  ;;  %23266 = vmatprep.subr.bf16.mxu1 %v29556_v36  ;;  %v29431_v59 = vand.u32 4294901760, %v27344_v17 }
 0x2d5   :  { %21372 = vmatmul.mubr.f32.gmra.mrb[58].mxu0 %v24742_v5  ;;  %23230 = vmatprep.subr.bf16.mxu0 %v29556_v36 }
 0x2d6   :  { %21474 = vmatmul.mubr.f32.gmra.mrb[58].mxu1 %v24742_v5  ;;  %21382 = vmatprep.mubr.msk.f32.mxu0 %vm24602_vm0, %v29550_v18 }
 0x2d7   :  { %21484 = vmatprep.mubr.msk.f32.mxu1 %vm24602_vm0, %v29550_v18 }
 0x2d9   :  { %21383 = vmatmul.mubr.f32.vlgmr.msra.gmra.mrb[54].mxu0 %v24689_v37 }
 0x2da   :  { %21485 = vmatmul.mubr.f32.vlgmr.msra.gmra.mrb[54].mxu1 %v24689_v37  ;;  %21385 = vmatprep.mubr.msk.f32.mxu0 %vm24602_vm0, %v29550_v18 }
 0x2db   :  { %23268 = vmatpush3.bf16.msra.mxu1 %v27056_v12  ;;  %23232 = vmatpush3.bf16.msra.mxu0 %v27058_v51 }
 0x2dc   :  { %21487 = vmatprep.mubr.msk.f32.mxu1 %vm24602_vm0, %v29550_v18  ;;  %23269 = vmatprep.subr.bf16.mxu1 %v29556_v36 }
 0x2dd   :  { %21386 = vmatmul.mubr.f32.gmra.mrb[56].mxu0 %v29625_v57  ;;  %23233 = vmatprep.subr.bf16.mxu0 %v29556_v36 }
 0x2de   :  { %21488 = vmatmul.mubr.f32.gmra.mrb[56].mxu1 %v29625_v57  ;;  %21388 = vmatprep.mubr.msk.f32.mxu0 %vm24602_vm0, %v29550_v18 }
 0x2df   :  { %21490 = vmatprep.mubr.msk.f32.mxu1 %vm24602_vm0, %v29550_v18  ;;  %23271 = vmatpush3.bf16.msra.mxu1 %v27060_v40 }
 0x2e0   :  { %23235 = vmatpush3.bf16.msra.mxu0 %v27065_v28  ;;  %23272 = vmatprep.subr.bf16.mxu1 %v29556_v36 }
 0x2e1   :  { %21389 = vmatmul.mubr.f32.gmra.mrb[58].mxu0 %v29626_v3  ;;  %23236 = vmatprep.subr.bf16.mxu0 %v29556_v36 }
 0x2e2   :  { %21491 = vmatmul.mubr.f32.gmra.mrb[58].mxu1 %v29626_v3  ;;  %21399 = vmatprep.mubr.msk.f32.mxu0 %vm24602_vm0, %v29550_v18 }
 0x2e3   :  { %21501 = vmatprep.mubr.msk.f32.mxu1 %vm24602_vm0, %v29550_v18 }
 0x2e5   :  { %21400 = vmatmul.mubr.f32.vlgmr.msra.gmra.mrb[54].mxu0 %v29631_v55 }
 0x2e6   :  { %21502 = vmatmul.mubr.f32.vlgmr.msra.gmra.mrb[54].mxu1 %v29631_v55  ;;  %21402 = vmatprep.mubr.msk.f32.mxu0 %vm24602_vm0, %v29550_v18 }
 0x2e7   :  { %23274 = vmatpush3.bf16.msra.mxu1 %v23273_v26  ;;  %23238 = vmatpush3.bf16.msra.mxu0 %v23237_v38  ;;  %v29430_v26 = vand.u32 4294901760, %v27348_v1  ;;  %v27371_v38 = vsub.f32 %v12100_v35, %v12112_v14 }
 0x2e8   :  { %21504 = vmatprep.mubr.msk.f32.mxu1 %vm24602_vm0, %v29550_v18  ;;  %23275 = vmatprep.subr.bf16.mxu1 %v29556_v36 }
 0x2e9   :  { %21403 = vmatmul.mubr.f32.gmra.mrb[56].mxu0 %v29673_v27  ;;  %23239 = vmatprep.subr.bf16.mxu0 %v29556_v36  ;;  %v12215_v32 = vsub.f32 %v27348_v1, %v29430_v26  ;;  %v29683_v26 = vld [vmem:[#allocation17_spill] sm:$0xff] }
 0x2ea   :  { %21505 = vmatmul.mubr.f32.gmra.mrb[56].mxu1 %v29673_v27  ;;  %21405 = vmatprep.mubr.msk.f32.mxu0 %vm24602_vm0, %v29550_v18 }
 0x2eb   :  { %21507 = vmatprep.mubr.msk.f32.mxu1 %vm24602_vm0, %v29550_v18  ;;  %23277 = vmatpush3.bf16.msra.mxu1 %v23276_v11  ;;  %v29675_v11 = vld [vmem:[#allocation33_spill] sm:$0xff]  ;;  %v12216_v43 = vand.u32 4294901760, %v12215_v32  ;;  %v29685_v32 = vld [vmem:[#allocation32_spill] sm:$0xff] }
 0x2ec   :  { %23241 = vmatpush3.bf16.msra.mxu0 %v23240_v50  ;;  %23278 = vmatprep.subr.bf16.mxu1 %v29556_v36  ;;  %v27389_v58 = vmul.f32 0.17934024, %v29675_v11  ;;  %v27404_v50 = vpack.c.bf16 %v12109_v39, %v12106_v0  ;;  %v27422_v0 = vsub.f32 %v27358_v60, %v29429_v29  ;;  %v29677_v39 = vld [vmem:[#allocation25_spill] sm:$0xff] }
 0x2ed   :  { %21406 = vmatmul.mubr.f32.gmra.mrb[58].mxu0 %v29674_v13  ;;  %23242 = vmatprep.subr.bf16.mxu0 %v29556_v36 }
 0x2ee   :  { %21508 = vmatmul.mubr.f32.gmra.mrb[58].mxu1 %v29674_v13  ;;  %21416 = vmatprep.mubr.msk.f32.mxu0 %vm24602_vm0, %v29550_v18  ;;  %v29694_v13 = vld [vmem:[#allocation12_spill] sm:$0xff] }
 0x2ef   :  { %21518 = vmatprep.mubr.msk.f32.mxu1 %vm24602_vm0, %v29550_v18 }
 0x2f1   :  { %21417 = vmatmul.mubr.f32.vlgmr.msra.gmra.mrb[54].mxu0 %v24678_v31 }
 0x2f2   :  { %21519 = vmatmul.mubr.f32.vlgmr.msra.gmra.mrb[54].mxu1 %v24678_v31  ;;  %21419 = vmatprep.mubr.msk.f32.mxu0 %vm24602_vm0, %v29550_v18 }
 0x2f3   :  { %23280 = vmatpush3.bf16.msra.mxu1 %v27056_v12  ;;  %23244 = vmatpush3.bf16.msra.mxu0 %v27058_v51  ;;  %v12828_v12 = vsub.f32 %v27341_v41, %v29432_v4  ;;  %v12208_v51 = vsub.f32 %v27344_v17, %v29431_v59  ;;  %v7781_v4 = vmul.f32 0.13967033, %v29685_v32  ;;  %v29687_v32 = vand.u32 4294901760, %v27379_v22 }
 0x2f4   :  { %21521 = vmatprep.mubr.msk.f32.mxu1 %vm24602_vm0, %v29550_v18  ;;  %23281 = vmatprep.subr.bf16.mxu1 %v29556_v36 }
 0x2f5   :  { %21420 = vmatmul.mubr.f32.gmra.mrb[56].mxu0 %v24705_v44  ;;  %23245 = vmatprep.subr.bf16.mxu0 %v29556_v36  ;;  %v12829_v30 = vand.u32 4294901760, %v12828_v12  ;;  %v12209_v42 = vand.u32 4294901760, %v12208_v51  ;;  %v27438_v12 = vmul.f32 0.17934024, %v26816_v6  ;;  %v29681_v51 = vld [vmem:[#allocation34_spill] sm:$0xff] }
 0x2f6   :  { %21522 = vmatmul.mubr.f32.gmra.mrb[56].mxu1 %v24705_v44  ;;  %21422 = vmatprep.mubr.msk.f32.mxu0 %vm24602_vm0, %v29550_v18  ;;  %v27415_v35 = vpop.f32.mrb[36].mxu0 }
 0x2f7   :  { %21524 = vmatprep.mubr.msk.f32.mxu1 %vm24602_vm0, %v29550_v18  ;;  %23283 = vmatpush3.bf16.msra.mxu1 %v27060_v40  ;;  %29676 = vst [vmem:[#allocation30_spill] sm:$0xff] %v27415_v35  ;;  %v7772_v46 = vadd.f32 %v27415_v35, %v29677_v39  ;;  %v8391_v8 = vadd.f32 %v27415_v35, %v29643_v48  ;;  %v20823_v7 = vpop.f32.mrb[37].mxu0 }
 0x2f8   :  { %23247 = vmatpush3.bf16.msra.mxu0 %v27065_v28  ;;  %23320 = vmatprep.subr.bf16.mxu1 %v29556_v36  ;;  %v27431_v28 = vadd.f32 %v27415_v35, %v29678_v34  ;;  %v27433_v14 = vpop.f32.mrb[36].mxu1 }
 0x2f9   :  { %29680 = vst [vmem:[#allocation23_spill] sm:$0xff] %v27433_v14  ;;  %21423 = vmatmul.mubr.f32.gmra.mrb[58].mxu0 %v24742_v5  ;;  %23284 = vmatprep.subr.bf16.mxu0 %v29556_v36  ;;  %v8385_v39 = vadd.f32 %v27433_v14, %v29681_v51  ;;  %v27444_v29 = vadd.f32 %v27433_v14, %v29675_v11  ;;  %v20925_v7 = vpop.f32.mrb[37].mxu1  ;;  %v7775_v16 = vmul.f32 0.10218499, %v7772_v46  ;;  %v8394_v40 = vmul.f32 0.13967033, %v8391_v8 }
 0x2fa   :  { %29679 = vst [vmem:[#allocation22_spill] sm:$0xff] %v27431_v28  ;;  %v27448_v59 = vadd.f32 %v27433_v14, %v29683_v26  ;;  %21525 = vmatmul.mubr.f32.gmra.mrb[58].mxu1 %v24742_v5  ;;  %21433 = vmatprep.mubr.msk.f32.mxu0 %vm24602_vm0, %v29550_v18  ;;  %v27459_v51 = vsub.f32 %v27369_v33, %v29439_v25  ;;  %v29686_v7 = vand.u32 4294901760, %v27371_v38  ;;  %v29688_v8 = vld [vmem:[#allocation21_spill] sm:$0xff]  ;;  %v29689_v14 = vld [vmem:[#allocation18_spill] sm:$0xff] }
 0x2fb   :  { %29682 = vst [vmem:[#allocation27_spill] sm:$0xff] %v27444_v29  ;;  %21535 = vmatprep.mubr.msk.f32.mxu1 %vm24602_vm0, %v29550_v18  ;;  %v8388_v21 = vmul.f32 0.10218499, %v8385_v39  ;;  %v27471_v46 = vsub.f32 %v27379_v22, %v29687_v32  ;;  %v7790_v29 = vmul.f32 0.16847457, %v29688_v8  ;;  %v7784_v35 = vadd.f32 %v7781_v4, %v7775_v16  ;;  %v27475_v25 = vpop.f32.mrb[38].mxu0 }
 0x2fc   :  { %29684 = vst [vmem:[#allocation19_spill] sm:$0xff] %v27448_v59  ;;  %v27461_v59 = vpack.c.bf16 %v12829_v30, %v12822_v49  ;;  %v27466_v28 = vsub.f32 %v27371_v38, %v29686_v7  ;;  %v8403_v11 = vmul.f32 0.16847457, %v29689_v14  ;;  %29690 = vst [vmem:[#allocation16_spill] sm:$0xff] %v27475_v25  ;;  %v27477_v39 = vpop.f32.mrb[38].mxu1  ;;  %v27480_v49 = vpack.c.bf16 %v12216_v43, %v12209_v42  ;;  %v29692_v7 = vld [vmem:[#allocation28_spill] sm:$0xff] }
 0x2fd   :  { %29691 = vst [vmem:[#allocation35_spill] sm:$0xff] %v27477_v39  ;;  %21434 = vmatmul.mubr.f32.vlgmr.msra.gmra.mrb[54].mxu0 %v24678_v31  ;;  %v8397_v30 = vadd.f32 %v8394_v40, %v8388_v21  ;;  %v7773_v48 = vadd.f32 %v27475_v25, %v29692_v7  ;;  %v29693_v26 = vld [vmem:[#allocation26_spill] sm:$0xff]  ;;  %v27488_v8 = vadd.f32 %v27475_v25, %v29694_v13  ;;  %v20826_v16 = vpop.f32.mrb[39].mxu0  ;;  %v20928_v4 = vpop.f32.mrb[39].mxu1  ;;  %v8409_v14 = vmul.f32 0.17934024, %v29678_v34 }
 0x2fe   :  { %v8392_v32 = vadd.f32 %v27475_v25, %v29693_v26  ;;  %21536 = vmatmul.mubr.f32.vlgmr.msra.gmra.mrb[54].mxu1 %v24678_v31  ;;  %v7793_v27 = vadd.f32 %v7790_v29, %v7784_v35  ;;  %v29696_v42 = vld [vmem:[#allocation37_spill] sm:$0xff]  ;;  %v27496_v40 = vadd.f32 %v27477_v39, %v29661_v10  ;;  %21436 = vmatprep.mubr.msk.f32.mxu0 %vm24602_vm0, %v29550_v18  ;;  %v29698_v43 = vld [vmem:[#allocation20_spill] sm:$0xff]  ;;  %v8410_v29 = vmul.f32 0.17934024, %v29694_v13 }
 0x2ff   :  { %29695 = vst [vmem:[#allocation25_spill] sm:$0xff] %v27488_v8  ;;  %v8386_v21 = vadd.f32 %v27477_v39, %v29696_v42  ;;  %23322 = vmatpush3.bf16.msra.mxu1 %v27402_v2  ;;  %v7782_v7 = vmul.f32 0.13967033, %v29698_v43  ;;  %v8406_v16 = vadd.f32 %v8403_v11, %v8397_v30  ;;  %v7776_v4 = vmul.f32 0.10218499, %v7773_v48  ;;  %21538 = vmatprep.mubr.msk.f32.mxu1 %vm24602_vm0, %v29550_v18  ;;  %v27511_v25 = vpop.f32.mrb[40].mxu0 }
 0x300   :  { %29697 = vst [vmem:[#allocation34_spill] sm:$0xff] %v27496_v40  ;;  %v8395_v8 = vmul.f32 0.13967033, %v8392_v32  ;;  %23286 = vmatpush3.bf16.msra.mxu0 %v27404_v50  ;;  %v7799_v35 = vadd.f32 %v27389_v58, %v7793_v27  ;;  %v29699_v40 = vld [vmem:[#allocation14_spill] sm:$0xff]  ;;  %v27513_v43 = vpop.f32.mrb[40].mxu1  ;;  %23323 = vmatprep.subr.bf16.mxu1 %v29556_v36  ;;  %v29701_v48 = vld [vmem:[#allocation11_spill] sm:$0xff]  ;;  %v7774_v27 = vadd.f32 %v27511_v25, %v26148_v56 }
 0x301   :  { %v8389_v42 = vmul.f32 0.10218499, %v8386_v21  ;;  %v27509_v10 = vadd.f32 %v27477_v39, %v29699_v40  ;;  %21437 = vmatmul.mubr.f32.gmra.mrb[56].mxu0 %v24705_v44  ;;  %v7791_v11 = vmul.f32 0.16847457, %v29701_v48  ;;  %v8412_v30 = vadd.f32 %v8409_v14, %v8406_v16  ;;  %v20829_v58 = vpop.f32.mrb[41].mxu0  ;;  %v20931_v21 = vpop.f32.mrb[41].mxu1  ;;  %23287 = vmatprep.subr.bf16.mxu0 %v29556_v36 }
 0x302   :  { %v7785_v32 = vadd.f32 %v7782_v7, %v7776_v4  ;;  %21539 = vmatmul.mubr.f32.gmra.mrb[56].mxu1 %v24705_v44  ;;  %21439 = vmatprep.mubr.msk.f32.mxu0 %vm24602_vm0, %v29550_v18  ;;  %7803 = vst [vmem:[#allocation7 + $0x90] sm:$0xff] %v7799_v35  ;;  %v8393_v26 = vadd.f32 %v27511_v25, %v26814_v15  ;;  %v7783_v56 = vmul.f32 0.13967033, %v27195_v45  ;;  %v7777_v16 = vmul.f32 0.10218499, %v7774_v27 }
 0x303   :  { %29700 = vst [vmem:[#allocation32_spill] sm:$0xff] %v27509_v10  ;;  %v29702_v10 = vld [vmem:[#allocation24_spill] sm:$0xff]  ;;  %v8398_v13 = vadd.f32 %v8395_v8, %v8389_v42  ;;  %v27528_v14 = vadd.f32 %v27511_v25, %v27165_v53  ;;  %21541 = vmatprep.mubr.msk.f32.mxu1 %vm24602_vm0, %v29550_v18  ;;  %23325 = vmatpush3.bf16.msra.mxu1 %v27406_v52  ;;  %8416 = vst [vmem:[#allocation7 + $0xa8] sm:$0xff] %v8412_v30  ;;  %v7792_v8 = vmul.f32 0.16847457, %v27182_v54 }
 0x304   :  { %v8404_v39 = vmul.f32 0.16847457, %v29702_v10  ;;  %v7794_v7 = vadd.f32 %v7791_v11, %v7785_v32  ;;  %v8387_v10 = vadd.f32 %v27513_v43, %v26459_v19  ;;  %23326 = vmatprep.subr.bf16.mxu1 %v29556_v36  ;;  %v8396_v35 = vmul.f32 0.13967033, %v8393_v26  ;;  %23289 = vmatpush3.bf16.msra.mxu0 %v27411_v47 }
 0x305   :  { %v27541_v42 = vadd.f32 %v27513_v43, %v26816_v6  ;;  %21440 = vmatmul.mubr.f32.gmra.mrb[58].mxu0 %v24742_v5  ;;  %v7786_v48 = vadd.f32 %v7783_v56, %v7777_v16  ;;  %v27547_v19 = vadd.f32 %v27513_v43, %v27167_v63  ;;  %v12843_v26 = vand.u32 4294901760, %v27459_v51  ;;  %23290 = vmatprep.subr.bf16.mxu0 %v29556_v36 }
 0x306   :  { %v8407_v4 = vadd.f32 %v8404_v39, %v8398_v13  ;;  %v7800_v45 = vadd.f32 %v27397_v61, %v7794_v7  ;;  %v8390_v11 = vmul.f32 0.10218499, %v8387_v10  ;;  %21542 = vmatmul.mubr.f32.gmra.mrb[58].mxu1 %v24742_v5  ;;  %21552 = vmatprep.mubr.msk.f32.mxu0 %vm24602_vm0, %v29550_v18  ;;  %v12836_v13 = vand.u32 4294901760, %v27422_v0 }
 0x307   :  { %21654 = vmatprep.mubr.msk.f32.mxu1 %vm24602_vm0, %v29550_v18  ;;  %v12223_v61 = vand.u32 4294901760, %v27466_v28  ;;  %v8405_v39 = vmul.f32 0.16847457, %v27201_v24  ;;  %v7795_v30 = vadd.f32 %v7792_v8, %v7786_v48  ;;  %v8411_v27 = vmul.f32 0.17934024, %v27165_v53 }
 0x308   :  { %v8413_v54 = vadd.f32 %v8410_v29, %v8407_v4  ;;  %7804 = vst [vmem:[#allocation7 + $0x98] sm:$0xff] %v7800_v45  ;;  %v8399_v32 = vadd.f32 %v8396_v35, %v8390_v11  ;;  %v12230_v29 = vand.u32 4294901760, %v27471_v46  ;;  %v23330_v24 = vpack.c.bf16 %v12843_v26, %v12836_v13  ;;  %v27655_v4 = vld [vmem:[#allocation5 + $0x2c0] sm:$0xff]  ;;  %v29711_v13 = vld [vmem:[#allocation13_spill] sm:$0xff] }
 0x309   :  { %21553 = vmatmul.mubr.f32.vlgmr.msra.gmra.mrb[60].mxu0 %v24733_v62  ;;  %v7801_v0 = vadd.f32 %v27438_v12, %v7795_v30  ;;  %v23297_v12 = vpack.c.bf16 %v27348_v1, %v27344_v17  ;;  %v23336_v46 = vpack.c.bf16 %v27369_v33, %v27358_v60  ;;  %v29703_v21 = vand.u32 4294901760, %v27337_v20 }
 0x30a   :  { %8417 = vst [vmem:[#allocation7 + $0xb0] sm:$0xff] %v8413_v54  ;;  %v8408_v58 = vadd.f32 %v8405_v39, %v8399_v32  ;;  %21655 = vmatmul.mubr.f32.vlgmr.msra.gmra.mrb[60].mxu1 %v24733_v62  ;;  %21555 = vmatprep.mubr.msk.f32.mxu0 %vm24602_vm0, %v29550_v18  ;;  %v23294_v51 = vpack.c.bf16 %v12230_v29, %v12223_v61  ;;  %v29704_v56 = vand.u32 4294901760, %v27341_v41  ;;  %v29705_v16 = vand.u32 4294901760, %v27344_v17  ;;  %v27661_v17 = vld [vmem:[#allocation5 + $0x2c8] sm:$0xff]  ;;  %v13939_v61 = vld [vmem:[#allocation5 + $0x2d0] sm:$0xff] }
 0x30b   :  { %23328 = vmatpush3.bf16.msra.mxu1 %v27461_v59  ;;  %23292 = vmatpush3.bf16.msra.mxu0 %v27480_v49  ;;  %7805 = vst [vmem:[#allocation7 + $0xa0] sm:$0xff] %v7801_v0  ;;  %v23333_v59 = vpack.c.bf16 %v27341_v41, %v27337_v20  ;;  %v23300_v49 = vpack.c.bf16 %v27379_v22, %v27371_v38  ;;  %v29706_v10 = vand.u32 4294901760, %v27348_v1  ;;  %v29707_v20 = vand.u32 4294901760, %v27358_v60  ;;  %v27663_v1 = vld [vmem:[#allocation5 + $0x2a0] sm:$0xff]  ;;  %v13325_v54 = vld [vmem:[#allocation5 + $0x2a8] sm:$0xff] }
 0x30c   :  { %v8414_v28 = vadd.f32 %v8411_v27, %v8408_v58  ;;  %21657 = vmatprep.mubr.msk.f32.mxu1 %vm24602_vm0, %v29550_v18  ;;  %23329 = vmatprep.subr.bf16.mxu1 %v29556_v36  ;;  %v23345_v7 = vpack.c.bf16 %v29704_v56, %v29703_v21  ;;  %v29708_v41 = vand.u32 4294901760, %v27369_v33  ;;  %v29709_v45 = vand.u32 4294901760, %v27371_v38  ;;  %v13940_v39 = vld [vmem:[#allocation5 + $0x2d8] sm:$0xf]  ;;  %v29712_v27 = vld [vmem:[#allocation15_spill] sm:$0xff] }
 0x30d   :  { %21556 = vmatmul.mubr.f32.gmra.mrb[62].mxu0 %v24753_v9  ;;  %23293 = vmatprep.subr.bf16.mxu0 %v29556_v36  ;;  %v23309_v8 = vpack.c.bf16 %v29706_v10, %v29705_v16  ;;  %v29710_v48 = vand.u32 4294901760, %v27379_v22  ;;  %v13945_v60 = vand.u32 4294901760, %v27655_v4  ;;  %v13948_v33 = vand.u32 4294901760, %v27661_v17  ;;  %v13327_v29 = vld [vmem:[#allocation5 + $0x2b8] sm:$0xf] }
 0x30e   :  { %8418 = vst [vmem:[#allocation7 + $0xb8] sm:$0xff] %v8414_v28  ;;  %21658 = vmatmul.mubr.f32.gmra.mrb[62].mxu1 %v24753_v9  ;;  %21558 = vmatprep.mubr.msk.f32.mxu0 %vm24602_vm0, %v29550_v18  ;;  %v23348_v35 = vpack.c.bf16 %v29708_v41, %v29707_v20  ;;  %v13332_v26 = vand.u32 4294901760, %v27663_v1  ;;  %v13335_v22 = vand.u32 4294901760, %v13325_v54  ;;  %v13942_v58 = vsel %vm62_vm1, %v13940_v39, 0  ;;  %v13326_v28 = vld [vmem:[#allocation5 + $0x2b0] sm:$0xff] }
 0x30f   :  { %21660 = vmatprep.mubr.msk.f32.mxu1 %vm24602_vm0, %v29550_v18  ;;  %23331 = vmatpush3.bf16.msra.mxu1 %v23330_v24  ;;  %v23312_v11 = vpack.c.bf16 %v29710_v48, %v29709_v45  ;;  %v27683_v38 = vsub.f32 %v27655_v4, %v13945_v60  ;;  %v27687_v30 = vsub.f32 %v27661_v17, %v13948_v33  ;;  %v13951_v24 = vand.u32 4294901760, %v13939_v61 }
 0x310   :  { %23295 = vmatpush3.bf16.msra.mxu0 %v23294_v51  ;;  %23332 = vmatprep.subr.bf16.mxu1 %v29556_v36  ;;  %v27690_v32 = vsub.f32 %v27663_v1, %v13332_v26  ;;  %v27694_v0 = vsub.f32 %v13325_v54, %v13335_v22  ;;  %v13329_v51 = vsel %vm62_vm1, %v13327_v29, 0  ;;  %v13954_v21 = vand.u32 4294901760, %v13942_v58 }
 0x311   :  { %21559 = vmatmul.mubr.f32.gmra.mrb[64].mxu0 %v24779_v23  ;;  %23296 = vmatprep.subr.bf16.mxu0 %v29556_v36  ;;  %v13338_v56 = vand.u32 4294901760, %v13326_v28  ;;  %v13341_v16 = vand.u32 4294901760, %v13329_v51  ;;  %v27743_v45 = vmul.f32 0.17934024, %v29699_v40  ;;  %v27748_v48 = vpack.c.bf16 %v13948_v33, %v13945_v60 }
 0x312   :  { %21661 = vmatmul.mubr.f32.gmra.mrb[64].mxu1 %v24779_v23  ;;  %21569 = vmatprep.mubr.msk.f32.mxu0 %vm24602_vm0, %v29550_v18  ;;  %v27715_v10 = vsub.f32 %v13942_v58, %v13954_v21  ;;  %v27752_v54 = vpack.c.bf16 %v13954_v21, %v13951_v24  ;;  %v29716_v21 = vld [vmem:[#allocation30_spill] sm:$0xff] }
 0x313   :  { %21671 = vmatprep.mubr.msk.f32.mxu1 %vm24602_vm0, %v29550_v18  ;;  %v27725_v20 = vsub.f32 %v13329_v51, %v13341_v16 }
 0x314   :  { %v29459_v29 = vand.u32 4294901760, %v27715_v10 }
 0x315   :  { %21570 = vmatmul.mubr.f32.vlgmr.msra.gmra.mrb[60].mxu0 %v24678_v31 }
 0x316   :  { %21672 = vmatmul.mubr.f32.vlgmr.msra.gmra.mrb[60].mxu1 %v24678_v31  ;;  %21572 = vmatprep.mubr.msk.f32.mxu0 %vm24602_vm0, %v29550_v18 }
 0x317   :  { %23334 = vmatpush3.bf16.msra.mxu1 %v23333_v59  ;;  %23298 = vmatpush3.bf16.msra.mxu0 %v23297_v12  ;;  %v29453_v59 = vand.u32 4294901760, %v27683_v38  ;;  %v27704_v12 = vsub.f32 %v13939_v61, %v13951_v24  ;;  %v27757_v61 = vpack.c.bf16 %v13341_v16, %v13338_v56 }
 0x318   :  { %21674 = vmatprep.mubr.msk.f32.mxu1 %vm24602_vm0, %v29550_v18  ;;  %23335 = vmatprep.subr.bf16.mxu1 %v29556_v36 }
 0x319   :  { %21573 = vmatmul.mubr.f32.gmra.mrb[62].mxu0 %v24705_v44  ;;  %23299 = vmatprep.subr.bf16.mxu0 %v29556_v36  ;;  %v14047_v4 = vsub.f32 %v27683_v38, %v29453_v59  ;;  %v29449_v41 = vand.u32 4294901760, %v27704_v12 }
 0x31a   :  { %21675 = vmatmul.mubr.f32.gmra.mrb[62].mxu1 %v24705_v44  ;;  %21575 = vmatprep.mubr.msk.f32.mxu0 %vm24602_vm0, %v29550_v18 }
 0x31b   :  { %21677 = vmatprep.mubr.msk.f32.mxu1 %vm24602_vm0, %v29550_v18  ;;  %23337 = vmatpush3.bf16.msra.mxu1 %v23336_v46  ;;  %v29452_v46 = vand.u32 4294901760, %v27687_v30  ;;  %v14048_v39 = vand.u32 4294901760, %v14047_v4 }
 0x31c   :  { %23301 = vmatpush3.bf16.msra.mxu0 %v23300_v49  ;;  %23338 = vmatprep.subr.bf16.mxu1 %v29556_v36  ;;  %v29451_v49 = vand.u32 4294901760, %v27690_v32 }
 0x31d   :  { %21576 = vmatmul.mubr.f32.gmra.mrb[64].mxu0 %v24742_v5  ;;  %23302 = vmatprep.subr.bf16.mxu0 %v29556_v36 }
 0x31e   :  { %21678 = vmatmul.mubr.f32.gmra.mrb[64].mxu1 %v24742_v5  ;;  %21586 = vmatprep.mubr.msk.f32.mxu0 %vm24602_vm0, %v29550_v18 }
 0x31f   :  { %21688 = vmatprep.mubr.msk.f32.mxu1 %vm24602_vm0, %v29550_v18 }
 0x321   :  { %21587 = vmatmul.mubr.f32.vlgmr.msra.gmra.mrb[60].mxu0 %v24689_v37 }
 0x322   :  { %21689 = vmatmul.mubr.f32.vlgmr.msra.gmra.mrb[60].mxu1 %v24689_v37  ;;  %21589 = vmatprep.mubr.msk.f32.mxu0 %vm24602_vm0, %v29550_v18 }
 0x323   :  { %23340 = vmatpush3.bf16.msra.mxu1 %v27402_v2  ;;  %23304 = vmatpush3.bf16.msra.mxu0 %v27404_v50 }
 0x324   :  { %21691 = vmatprep.mubr.msk.f32.mxu1 %vm24602_vm0, %v29550_v18  ;;  %23341 = vmatprep.subr.bf16.mxu1 %v29556_v36 }
 0x325   :  { %21590 = vmatmul.mubr.f32.gmra.mrb[62].mxu0 %v29625_v57  ;;  %23305 = vmatprep.subr.bf16.mxu0 %v29556_v36 }
 0x326   :  { %21692 = vmatmul.mubr.f32.gmra.mrb[62].mxu1 %v29625_v57  ;;  %21592 = vmatprep.mubr.msk.f32.mxu0 %vm24602_vm0, %v29550_v18 }
 0x327   :  { %21694 = vmatprep.mubr.msk.f32.mxu1 %vm24602_vm0, %v29550_v18  ;;  %23343 = vmatpush3.bf16.msra.mxu1 %v27406_v52 }
 0x328   :  { %23307 = vmatpush3.bf16.msra.mxu0 %v27411_v47  ;;  %23344 = vmatprep.subr.bf16.mxu1 %v29556_v36 }
 0x329   :  { %21593 = vmatmul.mubr.f32.gmra.mrb[64].mxu0 %v29626_v3  ;;  %23308 = vmatprep.subr.bf16.mxu0 %v29556_v36 }
 0x32a   :  { %21695 = vmatmul.mubr.f32.gmra.mrb[64].mxu1 %v29626_v3  ;;  %21603 = vmatprep.mubr.msk.f32.mxu0 %vm24602_vm0, %v29550_v18 }
 0x32b   :  { %21705 = vmatprep.mubr.msk.f32.mxu1 %vm24602_vm0, %v29550_v18 }
 0x32d   :  { %21604 = vmatmul.mubr.f32.vlgmr.msra.gmra.mrb[60].mxu0 %v29631_v55 }
 0x32e   :  { %21706 = vmatmul.mubr.f32.vlgmr.msra.gmra.mrb[60].mxu1 %v29631_v55  ;;  %21606 = vmatprep.mubr.msk.f32.mxu0 %vm24602_vm0, %v29550_v18 }
 0x32f   :  { %23346 = vmatpush3.bf16.msra.mxu1 %v23345_v7  ;;  %23310 = vmatpush3.bf16.msra.mxu0 %v23309_v8  ;;  %v29450_v7 = vand.u32 4294901760, %v27694_v0  ;;  %v27717_v8 = vsub.f32 %v13326_v28, %v13338_v56 }
 0x330   :  { %21708 = vmatprep.mubr.msk.f32.mxu1 %vm24602_vm0, %v29550_v18  ;;  %23347 = vmatprep.subr.bf16.mxu1 %v29556_v36 }
 0x331   :  { %21607 = vmatmul.mubr.f32.gmra.mrb[62].mxu0 %v29711_v13  ;;  %23311 = vmatprep.subr.bf16.mxu0 %v29556_v36  ;;  %v13441_v1 = vsub.f32 %v27694_v0, %v29450_v7  ;;  %v29721_v7 = vld [vmem:[#allocation23_spill] sm:$0xff] }
 0x332   :  { %21709 = vmatmul.mubr.f32.gmra.mrb[62].mxu1 %v29711_v13  ;;  %21609 = vmatprep.mubr.msk.f32.mxu0 %vm24602_vm0, %v29550_v18 }
 0x333   :  { %21711 = vmatprep.mubr.msk.f32.mxu1 %vm24602_vm0, %v29550_v18  ;;  %23349 = vmatpush3.bf16.msra.mxu1 %v23348_v35  ;;  %v29713_v35 = vld [vmem:[#allocation17_spill] sm:$0xff]  ;;  %v13442_v4 = vand.u32 4294901760, %v13441_v1  ;;  %v29723_v1 = vld [vmem:[#allocation27_spill] sm:$0xff] }
 0x334   :  { %23313 = vmatpush3.bf16.msra.mxu0 %v23312_v11  ;;  %23350 = vmatprep.subr.bf16.mxu1 %v29556_v36  ;;  %v27735_v17 = vmul.f32 0.17934024, %v29713_v35  ;;  %v27750_v11 = vpack.c.bf16 %v13335_v22, %v13332_v26  ;;  %v27768_v26 = vsub.f32 %v27704_v12, %v29449_v41  ;;  %v29715_v22 = vld [vmem:[#allocation31_spill] sm:$0xff] }
 0x335   :  { %21610 = vmatmul.mubr.f32.gmra.mrb[64].mxu0 %v29712_v27  ;;  %23314 = vmatprep.subr.bf16.mxu0 %v29556_v36 }
 0x336   :  { %21712 = vmatmul.mubr.f32.gmra.mrb[64].mxu1 %v29712_v27  ;;  %21620 = vmatprep.mubr.msk.f32.mxu0 %vm24602_vm0, %v29550_v18  ;;  %v29732_v27 = vld [vmem:[#allocation16_spill] sm:$0xff] }
 0x337   :  { %21722 = vmatprep.mubr.msk.f32.mxu1 %vm24602_vm0, %v29550_v18 }
 0x339   :  { %21621 = vmatmul.mubr.f32.vlgmr.msra.gmra.mrb[60].mxu0 %v24678_v31 }
 0x33a   :  { %21723 = vmatmul.mubr.f32.vlgmr.msra.gmra.mrb[60].mxu1 %v24678_v31  ;;  %21623 = vmatprep.mubr.msk.f32.mxu0 %vm24602_vm0, %v29550_v18 }
 0x33b   :  { %23352 = vmatpush3.bf16.msra.mxu1 %v27402_v2  ;;  %23316 = vmatpush3.bf16.msra.mxu0 %v27404_v50  ;;  %v14054_v2 = vsub.f32 %v27687_v30, %v29452_v46  ;;  %v13434_v50 = vsub.f32 %v27690_v32, %v29451_v49  ;;  %v9007_v46 = vmul.f32 0.13967033, %v29723_v1  ;;  %v29725_v1 = vand.u32 4294901760, %v27725_v20 }
 0x33c   :  { %21725 = vmatprep.mubr.msk.f32.mxu1 %vm24602_vm0, %v29550_v18  ;;  %23353 = vmatprep.subr.bf16.mxu1 %v29556_v36 }
 0x33d   :  { %21624 = vmatmul.mubr.f32.gmra.mrb[62].mxu0 %v24705_v44  ;;  %23317 = vmatprep.subr.bf16.mxu0 %v29556_v36  ;;  %v14055_v60 = vand.u32 4294901760, %v14054_v2  ;;  %v13435_v33 = vand.u32 4294901760, %v13434_v50  ;;  %v27784_v2 = vmul.f32 0.17934024, %v27167_v63  ;;  %v29719_v50 = vld [vmem:[#allocation33_spill] sm:$0xff] }
 0x33e   :  { %21726 = vmatmul.mubr.f32.gmra.mrb[62].mxu1 %v24705_v44  ;;  %21626 = vmatprep.mubr.msk.f32.mxu0 %vm24602_vm0, %v29550_v18 }
 0x33f   :  { %21728 = vmatprep.mubr.msk.f32.mxu1 %vm24602_vm0, %v29550_v18  ;;  %23355 = vmatpush3.bf16.msra.mxu1 %v27406_v52  ;;  %v27761_v28 = vpop.f32.mrb[42].mxu0 }
 0x340   :  { %29714 = vst [vmem:[#allocation21_spill] sm:$0xff] %v27761_v28  ;;  %23319 = vmatpush3.bf16.msra.mxu0 %v27411_v47  ;;  %23392 = vmatprep.subr.bf16.mxu1 %v29556_v36  ;;  %v8998_v24 = vadd.f32 %v27761_v28, %v29715_v22  ;;  %v9617_v51 = vadd.f32 %v27761_v28, %v29678_v34  ;;  %v21027_v16 = vpop.f32.mrb[43].mxu0 }
 0x341   :  { %v27777_v47 = vadd.f32 %v27761_v28, %v29716_v21  ;;  %v27779_v56 = vpop.f32.mrb[42].mxu1  ;;  %21627 = vmatmul.mubr.f32.gmra.mrb[64].mxu0 %v24742_v5  ;;  %23356 = vmatprep.subr.bf16.mxu0 %v29556_v36 }
 0x342   :  { %29718 = vst [vmem:[#allocation28_spill] sm:$0xff] %v27779_v56  ;;  %v9611_v22 = vadd.f32 %v27779_v56, %v29719_v50  ;;  %v27790_v41 = vadd.f32 %v27779_v56, %v29713_v35  ;;  %v27794_v49 = vadd.f32 %v27779_v56, %v29721_v7  ;;  %v21129_v16 = vpop.f32.mrb[43].mxu1  ;;  %21729 = vmatmul.mubr.f32.gmra.mrb[64].mxu1 %v24742_v5  ;;  %v9001_v59 = vmul.f32 0.10218499, %v8998_v24  ;;  %v29727_v56 = vld [vmem:[#allocation19_spill] sm:$0xff]  ;;  %v29731_v7 = vld [vmem:[#allocation12_spill] sm:$0xff] }
 0x343   :  { %29717 = vst [vmem:[#allocation18_spill] sm:$0xff] %v27777_v47  ;;  %21637 = vmatprep.mubr.msk.f32.mxu0 %vm24602_vm0, %v29550_v18  ;;  %v9620_v52 = vmul.f32 0.13967033, %v9617_v51  ;;  %21739 = vmatprep.mubr.msk.f32.mxu1 %vm24602_vm0, %v29550_v18  ;;  %v27805_v50 = vsub.f32 %v27715_v10, %v29459_v29  ;;  %v29724_v16 = vand.u32 4294901760, %v27717_v8  ;;  %v27817_v24 = vsub.f32 %v27725_v20, %v29725_v1  ;;  %v29726_v51 = vld [vmem:[#allocation22_spill] sm:$0xff] }
 0x344   :  { %29720 = vst [vmem:[#allocation37_spill] sm:$0xff] %v27790_v41  ;;  %29722 = vst [vmem:[#allocation20_spill] sm:$0xff] %v27794_v49  ;;  %v9614_v58 = vmul.f32 0.10218499, %v9611_v22  ;;  %v27807_v49 = vpack.c.bf16 %v14055_v60, %v14048_v39  ;;  %v9016_v41 = vmul.f32 0.16847457, %v29726_v51  ;;  %v9010_v28 = vadd.f32 %v9007_v46, %v9001_v59 }
 0x345   :  { %v27812_v47 = vsub.f32 %v27717_v8, %v29724_v16  ;;  %v9629_v35 = vmul.f32 0.16847457, %v29727_v56  ;;  %v27821_v29 = vpop.f32.mrb[44].mxu0  ;;  %v27823_v22 = vpop.f32.mrb[44].mxu1  ;;  %21638 = vmatmul.mubr.f32.vlgmr.msra.gmra.mrb[60].mxu0 %v24678_v31  ;;  %v27826_v39 = vpack.c.bf16 %v13442_v4, %v13435_v33  ;;  %v29730_v16 = vld [vmem:[#allocation26_spill] sm:$0xff]  ;;  %v29734_v33 = vld [vmem:[#allocation29_spill] sm:$0xff] }
 0x346   :  { %29728 = vst [vmem:[#allocation11_spill] sm:$0xff] %v27821_v29  ;;  %29729 = vst [vmem:[#allocation24_spill] sm:$0xff] %v27823_v22  ;;  %v9623_v60 = vadd.f32 %v9620_v52, %v9614_v58  ;;  %v8999_v34 = vadd.f32 %v27821_v29, %v29730_v16  ;;  %v9618_v1 = vadd.f32 %v27821_v29, %v29731_v7  ;;  %v21030_v59 = vpop.f32.mrb[45].mxu0  ;;  %v21132_v46 = vpop.f32.mrb[45].mxu1  ;;  %21740 = vmatmul.mubr.f32.vlgmr.msra.gmra.mrb[60].mxu1 %v24678_v31  ;;  %v29736_v4 = vld [vmem:[#allocation34_spill] sm:$0xff] }
 0x347   :  { %v27834_v51 = vadd.f32 %v27821_v29, %v29732_v27  ;;  %v9635_v56 = vmul.f32 0.17934024, %v29716_v21  ;;  %v9019_v13 = vadd.f32 %v9016_v41, %v9010_v28  ;;  %v9612_v58 = vadd.f32 %v27823_v22, %v29734_v33  ;;  %23394 = vmatpush3.bf16.msra.mxu1 %v27748_v48  ;;  %21640 = vmatprep.mubr.msk.f32.mxu0 %vm24602_vm0, %v29550_v18 }
 0x348   :  { %v27842_v52 = vadd.f32 %v27823_v22, %v29699_v40  ;;  %v9008_v16 = vmul.f32 0.13967033, %v29736_v4  ;;  %v9632_v59 = vadd.f32 %v9629_v35, %v9623_v60  ;;  %v9002_v46 = vmul.f32 0.10218499, %v8999_v34  ;;  %21742 = vmatprep.mubr.msk.f32.mxu1 %vm24602_vm0, %v29550_v18  ;;  %23358 = vmatpush3.bf16.msra.mxu0 %v27750_v11  ;;  %v27857_v29 = vpop.f32.mrb[46].mxu0  ;;  %v29739_v34 = vld [vmem:[#allocation25_spill] sm:$0xff] }
 0x349   :  { %29733 = vst [vmem:[#allocation31_spill] sm:$0xff] %v27834_v51  ;;  %v9621_v51 = vmul.f32 0.13967033, %v9618_v1  ;;  %v9636_v41 = vmul.f32 0.17934024, %v29732_v27  ;;  %v9025_v28 = vadd.f32 %v27735_v17, %v9019_v13  ;;  %v27859_v4 = vpop.f32.mrb[46].mxu1  ;;  %21641 = vmatmul.mubr.f32.gmra.mrb[62].mxu0 %v24705_v44  ;;  %23395 = vmatprep.subr.bf16.mxu1 %v29556_v36  ;;  %v9000_v13 = vadd.f32 %v27857_v29, %v26814_v15 }
 0x34a   :  { %29735 = vst [vmem:[#allocation33_spill] sm:$0xff] %v27842_v52  ;;  %v9615_v33 = vmul.f32 0.10218499, %v9612_v58  ;;  %v29737_v52 = vld [vmem:[#allocation35_spill] sm:$0xff]  ;;  %v9017_v35 = vmul.f32 0.16847457, %v29739_v34  ;;  %v9638_v60 = vadd.f32 %v9635_v56, %v9632_v59  ;;  %v9011_v1 = vadd.f32 %v9008_v16, %v9002_v46  ;;  %21743 = vmatmul.mubr.f32.gmra.mrb[62].mxu1 %v24705_v44  ;;  %21643 = vmatprep.mubr.msk.f32.mxu0 %vm24602_vm0, %v29550_v18 }
 0x34b   :  { %v27855_v40 = vadd.f32 %v27823_v22, %v29737_v52  ;;  %v21033_v17 = vpop.f32.mrb[47].mxu0  ;;  %v21135_v58 = vpop.f32.mrb[47].mxu1  ;;  %9029 = vst [vmem:[#allocation7 + $0xc0] sm:$0xff] %v9025_v28  ;;  %v9619_v7 = vadd.f32 %v27857_v29, %v27165_v53  ;;  %v27874_v56 = vadd.f32 %v27857_v29, %v27511_v25  ;;  %21745 = vmatprep.mubr.msk.f32.mxu1 %vm24602_vm0, %v29550_v18  ;;  %v9009_v15 = vmul.f32 0.13967033, %v27541_v42 }
 0x34c   :  { %v9624_v27 = vadd.f32 %v9621_v51, %v9615_v33  ;;  %23397 = vmatpush3.bf16.msra.mxu1 %v27752_v54  ;;  %9642 = vst [vmem:[#allocation7 + $0xd8] sm:$0xff] %v9638_v60  ;;  %v9020_v16 = vadd.f32 %v9017_v35, %v9011_v1  ;;  %v9003_v59 = vmul.f32 0.10218499, %v9000_v13  ;;  %23359 = vmatprep.subr.bf16.mxu0 %v29556_v36  ;;  %v9018_v51 = vmul.f32 0.16847457, %v27528_v14 }
 0x34d   :  { %29738 = vst [vmem:[#allocation27_spill] sm:$0xff] %v27855_v40  ;;  %v29740_v40 = vld [vmem:[#allocation32_spill] sm:$0xff]  ;;  %23398 = vmatprep.subr.bf16.mxu1 %v29556_v36  ;;  %v9622_v28 = vmul.f32 0.13967033, %v9619_v7  ;;  %v27887_v33 = vadd.f32 %v27859_v4, %v27167_v63  ;;  %21644 = vmatmul.mubr.f32.gmra.mrb[64].mxu0 %v24742_v5  ;;  %v14069_v7 = vand.u32 4294901760, %v27805_v50  ;;  %v29741_v58 = vand.u32 4294901760, %v27683_v38 }
 0x34e   :  { %v9630_v22 = vmul.f32 0.16847457, %v29740_v40  ;;  %v9613_v40 = vadd.f32 %v27859_v4, %v26816_v6  ;;  %v9026_v42 = vadd.f32 %v27743_v45, %v9020_v16  ;;  %v9012_v34 = vadd.f32 %v9009_v15, %v9003_v59  ;;  %21746 = vmatmul.mubr.f32.gmra.mrb[64].mxu1 %v24742_v5  ;;  %23361 = vmatpush3.bf16.msra.mxu0 %v27757_v61 }
 0x34f   :  { %v27893_v6 = vadd.f32 %v27859_v4, %v27513_v43  ;;  %21756 = vmatprep.mubr.msk.f32.mxu0 %vm24602_vm0, %v29550_v18  ;;  %21858 = vmatprep.mubr.msk.f32.mxu1 %vm24602_vm0, %v29550_v18  ;;  %v13449_v45 = vand.u32 4294901760, %v27812_v47  ;;  %v9637_v13 = vmul.f32 0.17934024, %v27511_v25  ;;  %v29742_v15 = vand.u32 4294901760, %v27687_v30 }
 0x350   :  { %v9633_v46 = vadd.f32 %v9630_v22, %v9624_v27  ;;  %v9616_v35 = vmul.f32 0.10218499, %v9613_v40  ;;  %v14062_v27 = vand.u32 4294901760, %v27768_v26  ;;  %v9631_v22 = vmul.f32 0.16847457, %v27547_v19  ;;  %9030 = vst [vmem:[#allocation7 + $0xc8] sm:$0xff] %v9026_v42  ;;  %23362 = vmatprep.subr.bf16.mxu0 %v29556_v36 }
 0x351   :  { %v9021_v60 = vadd.f32 %v9018_v51, %v9012_v34  ;;  %21757 = vmatmul.mubr.f32.vlgmr.msra.gmra.mrb[66].mxu0 %v24733_v62  ;;  %v23417_v16 = vpack.c.bf16 %v29742_v15, %v29741_v58  ;;  %v29743_v59 = vand.u32 4294901760, %v27690_v32  ;;  %v29744_v40 = vand.u32 4294901760, %v27694_v0 }
 0x352   :  { %v9639_v14 = vadd.f32 %v9636_v41, %v9633_v46  ;;  %v9625_v1 = vadd.f32 %v9622_v28, %v9616_v35  ;;  %v13456_v41 = vand.u32 4294901760, %v27817_v24  ;;  %21859 = vmatmul.mubr.f32.vlgmr.msra.gmra.mrb[66].mxu1 %v24733_v62  ;;  %21759 = vmatprep.mubr.msk.f32.mxu0 %vm24602_vm0, %v29550_v18  ;;  %v23402_v19 = vpack.c.bf16 %v14069_v7, %v14062_v27  ;;  %v28001_v46 = vld [vmem:[#allocation5 + $0x300] sm:$0xff]  ;;  %v29749_v27 = vld [vmem:[#allocation13_spill] sm:$0xff] }
 0x353   :  { %v9027_v26 = vadd.f32 %v27784_v2, %v9021_v60  ;;  %23400 = vmatpush3.bf16.msra.mxu1 %v27807_v49  ;;  %23364 = vmatpush3.bf16.msra.mxu0 %v27826_v39  ;;  %v23405_v49 = vpack.c.bf16 %v27687_v30, %v27683_v38  ;;  %v23369_v2 = vpack.c.bf16 %v27694_v0, %v27690_v32  ;;  %v29745_v38 = vand.u32 4294901760, %v27704_v12  ;;  %v28007_v32 = vld [vmem:[#allocation5 + $0x308] sm:$0xff]  ;;  %v28009_v0 = vld [vmem:[#allocation5 + $0x2e0] sm:$0xff] }
 0x354   :  { %9643 = vst [vmem:[#allocation7 + $0xe0] sm:$0xff] %v9639_v14  ;;  %v9634_v17 = vadd.f32 %v9631_v22, %v9625_v1  ;;  %21861 = vmatprep.mubr.msk.f32.mxu1 %vm24602_vm0, %v29550_v18  ;;  %23401 = vmatprep.subr.bf16.mxu1 %v29556_v36  ;;  %v23366_v50 = vpack.c.bf16 %v13456_v41, %v13449_v45  ;;  %v29746_v30 = vand.u32 4294901760, %v27715_v10  ;;  %v29747_v42 = vand.u32 4294901760, %v27717_v8  ;;  %v14551_v14 = vld [vmem:[#allocation5 + $0x2e8] sm:$0xff]  ;;  %v15165_v45 = vld [vmem:[#allocation5 + $0x310] sm:$0xff] }
 0x355   :  { %9031 = vst [vmem:[#allocation7 + $0xd0] sm:$0xff] %v9027_v26  ;;  %21760 = vmatmul.mubr.f32.gmra.mrb[68].mxu0 %v24753_v9  ;;  %23365 = vmatprep.subr.bf16.mxu0 %v29556_v36  ;;  %v23408_v24 = vpack.c.bf16 %v27715_v10, %v27704_v12  ;;  %v23372_v39 = vpack.c.bf16 %v27725_v20, %v27717_v8  ;;  %v29748_v34 = vand.u32 4294901760, %v27725_v20  ;;  %v15171_v12 = vand.u32 4294901760, %v28001_v46  ;;  %v15166_v22 = vld [vmem:[#allocation5 + $0x318] sm:$0xf] }
 0x356   :  { %v9640_v47 = vadd.f32 %v9637_v13, %v9634_v17  ;;  %21862 = vmatmul.mubr.f32.gmra.mrb[68].mxu1 %v24753_v9  ;;  %21762 = vmatprep.mubr.msk.f32.mxu0 %vm24602_vm0, %v29550_v18  ;;  %v23381_v51 = vpack.c.bf16 %v29744_v40, %v29743_v59  ;;  %v23420_v28 = vpack.c.bf16 %v29746_v30, %v29745_v38  ;;  %v15174_v10 = vand.u32 4294901760, %v28007_v32  ;;  %v14553_v41 = vld [vmem:[#allocation5 + $0x2f8] sm:$0xf]  ;;  %v29750_v13 = vld [vmem:[#allocation15_spill] sm:$0xff] }
 0x357   :  { %21864 = vmatprep.mubr.msk.f32.mxu1 %vm24602_vm0, %v29550_v18  ;;  %23403 = vmatpush3.bf16.msra.mxu1 %v23402_v19  ;;  %v23384_v35 = vpack.c.bf16 %v29748_v34, %v29747_v42  ;;  %v14558_v7 = vand.u32 4294901760, %v28009_v0  ;;  %v28029_v8 = vsub.f32 %v28001_v46, %v15171_v12  ;;  %v14561_v20 = vand.u32 4294901760, %v14551_v14 }
 0x358   :  { %9644 = vst [vmem:[#allocation7 + $0xe8] sm:$0xff] %v9640_v47  ;;  %23367 = vmatpush3.bf16.msra.mxu0 %v23366_v50  ;;  %23404 = vmatprep.subr.bf16.mxu1 %v29556_v36  ;;  %v28033_v60 = vsub.f32 %v28007_v32, %v15174_v10  ;;  %v15168_v17 = vsel %vm62_vm1, %v15166_v22, 0  ;;  %v15177_v19 = vand.u32 4294901760, %v15165_v45  ;;  %v14552_v47 = vld [vmem:[#allocation5 + $0x2f0] sm:$0xff]  ;;  %v14555_v50 = vsel %vm62_vm1, %v14553_v41, 0 }
 0x359   :  { %21763 = vmatmul.mubr.f32.gmra.mrb[70].mxu0 %v24779_v23  ;;  %23368 = vmatprep.subr.bf16.mxu0 %v29556_v36  ;;  %v28036_v1 = vsub.f32 %v28009_v0, %v14558_v7  ;;  %v28040_v26 = vsub.f32 %v14551_v14, %v14561_v20  ;;  %v15180_v58 = vand.u32 4294901760, %v15168_v17  ;;  %v14564_v15 = vand.u32 4294901760, %v14552_v47 }
 0x35a   :  { %21865 = vmatmul.mubr.f32.gmra.mrb[70].mxu1 %v24779_v23  ;;  %21773 = vmatprep.mubr.msk.f32.mxu0 %vm24602_vm0, %v29550_v18  ;;  %v14567_v59 = vand.u32 4294901760, %v14555_v50  ;;  %v28089_v42 = vmul.f32 0.17934024, %v29737_v52  ;;  %v28094_v34 = vpack.c.bf16 %v15174_v10, %v15171_v12 }
 0x35b   :  { %21875 = vmatprep.mubr.msk.f32.mxu1 %vm24602_vm0, %v29550_v18  ;;  %v28061_v40 = vsub.f32 %v15168_v17, %v15180_v58  ;;  %v28098_v14 = vpack.c.bf16 %v15180_v58, %v15177_v19  ;;  %v29754_v58 = vld [vmem:[#allocation21_spill] sm:$0xff] }
 0x35c   :  { %v28071_v38 = vsub.f32 %v14555_v50, %v14567_v59 }
 0x35d   :  { %21774 = vmatmul.mubr.f32.vlgmr.msra.gmra.mrb[66].mxu0 %v24678_v31  ;;  %v29479_v41 = vand.u32 4294901760, %v28061_v40 }
 0x35e   :  { %21876 = vmatmul.mubr.f32.vlgmr.msra.gmra.mrb[66].mxu1 %v24678_v31  ;;  %21776 = vmatprep.mubr.msk.f32.mxu0 %vm24602_vm0, %v29550_v18 }
 0x35f   :  { %23406 = vmatpush3.bf16.msra.mxu1 %v23405_v49  ;;  %23370 = vmatpush3.bf16.msra.mxu0 %v23369_v2  ;;  %v29473_v49 = vand.u32 4294901760, %v28029_v8  ;;  %v28050_v2 = vsub.f32 %v15165_v45, %v15177_v19  ;;  %v28103_v45 = vpack.c.bf16 %v14567_v59, %v14564_v15 }
 0x360   :  { %21878 = vmatprep.mubr.msk.f32.mxu1 %vm24602_vm0, %v29550_v18  ;;  %23407 = vmatprep.subr.bf16.mxu1 %v29556_v36 }
 0x361   :  { %21777 = vmatmul.mubr.f32.gmra.mrb[68].mxu0 %v24705_v44  ;;  %23371 = vmatprep.subr.bf16.mxu0 %v29556_v36  ;;  %v15273_v46 = vsub.f32 %v28029_v8, %v29473_v49  ;;  %v29469_v30 = vand.u32 4294901760, %v28050_v2 }
 0x362   :  { %21879 = vmatmul.mubr.f32.gmra.mrb[68].mxu1 %v24705_v44  ;;  %21779 = vmatprep.mubr.msk.f32.mxu0 %vm24602_vm0, %v29550_v18 }
 0x363   :  { %21881 = vmatprep.mubr.msk.f32.mxu1 %vm24602_vm0, %v29550_v18  ;;  %23409 = vmatpush3.bf16.msra.mxu1 %v23408_v24  ;;  %v29472_v24 = vand.u32 4294901760, %v28033_v60  ;;  %v15274_v22 = vand.u32 4294901760, %v15273_v46 }
 0x364   :  { %23373 = vmatpush3.bf16.msra.mxu0 %v23372_v39  ;;  %23410 = vmatprep.subr.bf16.mxu1 %v29556_v36  ;;  %v29471_v39 = vand.u32 4294901760, %v28036_v1 }
 0x365   :  { %21780 = vmatmul.mubr.f32.gmra.mrb[70].mxu0 %v24742_v5  ;;  %23374 = vmatprep.subr.bf16.mxu0 %v29556_v36 }
 0x366   :  { %21882 = vmatmul.mubr.f32.gmra.mrb[70].mxu1 %v24742_v5  ;;  %21790 = vmatprep.mubr.msk.f32.mxu0 %vm24602_vm0, %v29550_v18 }
 0x367   :  { %21892 = vmatprep.mubr.msk.f32.mxu1 %vm24602_vm0, %v29550_v18 }
 0x369   :  { %21791 = vmatmul.mubr.f32.vlgmr.msra.gmra.mrb[66].mxu0 %v24689_v37 }
 0x36a   :  { %21893 = vmatmul.mubr.f32.vlgmr.msra.gmra.mrb[66].mxu1 %v24689_v37  ;;  %21793 = vmatprep.mubr.msk.f32.mxu0 %vm24602_vm0, %v29550_v18 }
 0x36b   :  { %23412 = vmatpush3.bf16.msra.mxu1 %v27748_v48  ;;  %23376 = vmatpush3.bf16.msra.mxu0 %v27750_v11 }
 0x36c   :  { %21895 = vmatprep.mubr.msk.f32.mxu1 %vm24602_vm0, %v29550_v18  ;;  %23413 = vmatprep.subr.bf16.mxu1 %v29556_v36 }
 0x36d   :  { %21794 = vmatmul.mubr.f32.gmra.mrb[68].mxu0 %v29625_v57  ;;  %23377 = vmatprep.subr.bf16.mxu0 %v29556_v36 }
 0x36e   :  { %21896 = vmatmul.mubr.f32.gmra.mrb[68].mxu1 %v29625_v57  ;;  %21796 = vmatprep.mubr.msk.f32.mxu0 %vm24602_vm0, %v29550_v18 }
 0x36f   :  { %21898 = vmatprep.mubr.msk.f32.mxu1 %vm24602_vm0, %v29550_v18  ;;  %23415 = vmatpush3.bf16.msra.mxu1 %v27752_v54 }
 0x370   :  { %23379 = vmatpush3.bf16.msra.mxu0 %v27757_v61  ;;  %23416 = vmatprep.subr.bf16.mxu1 %v29556_v36 }
 0x371   :  { %21797 = vmatmul.mubr.f32.gmra.mrb[70].mxu0 %v29626_v3  ;;  %23380 = vmatprep.subr.bf16.mxu0 %v29556_v36 }
 0x372   :  { %21899 = vmatmul.mubr.f32.gmra.mrb[70].mxu1 %v29626_v3  ;;  %21807 = vmatprep.mubr.msk.f32.mxu0 %vm24602_vm0, %v29550_v18 }
 0x373   :  { %21909 = vmatprep.mubr.msk.f32.mxu1 %vm24602_vm0, %v29550_v18 }
 0x375   :  { %21808 = vmatmul.mubr.f32.vlgmr.msra.gmra.mrb[66].mxu0 %v29631_v55 }
 0x376   :  { %21910 = vmatmul.mubr.f32.vlgmr.msra.gmra.mrb[66].mxu1 %v29631_v55  ;;  %21810 = vmatprep.mubr.msk.f32.mxu0 %vm24602_vm0, %v29550_v18 }
 0x377   :  { %23418 = vmatpush3.bf16.msra.mxu1 %v23417_v16  ;;  %23382 = vmatpush3.bf16.msra.mxu0 %v23381_v51  ;;  %v29470_v16 = vand.u32 4294901760, %v28040_v26  ;;  %v28063_v51 = vsub.f32 %v14552_v47, %v14564_v15 }
 0x378   :  { %21912 = vmatprep.mubr.msk.f32.mxu1 %vm24602_vm0, %v29550_v18  ;;  %23419 = vmatprep.subr.bf16.mxu1 %v29556_v36 }
 0x379   :  { %21811 = vmatmul.mubr.f32.gmra.mrb[68].mxu0 %v29749_v27  ;;  %23383 = vmatprep.subr.bf16.mxu0 %v29556_v36  ;;  %v14667_v0 = vsub.f32 %v28040_v26, %v29470_v16  ;;  %v29759_v16 = vld [vmem:[#allocation28_spill] sm:$0xff] }
 0x37a   :  { %21913 = vmatmul.mubr.f32.gmra.mrb[68].mxu1 %v29749_v27  ;;  %21813 = vmatprep.mubr.msk.f32.mxu0 %vm24602_vm0, %v29550_v18 }
 0x37b   :  { %21915 = vmatprep.mubr.msk.f32.mxu1 %vm24602_vm0, %v29550_v18  ;;  %23421 = vmatpush3.bf16.msra.mxu1 %v23420_v28  ;;  %v29751_v28 = vld [vmem:[#allocation23_spill] sm:$0xff]  ;;  %v14668_v46 = vand.u32 4294901760, %v14667_v0  ;;  %v29761_v0 = vld [vmem:[#allocation37_spill] sm:$0xff] }
 0x37c   :  { %23385 = vmatpush3.bf16.msra.mxu0 %v23384_v35  ;;  %23422 = vmatprep.subr.bf16.mxu1 %v29556_v36  ;;  %v28081_v32 = vmul.f32 0.17934024, %v29751_v28  ;;  %v28096_v35 = vpack.c.bf16 %v14561_v20, %v14558_v7  ;;  %v28114_v7 = vsub.f32 %v28050_v2, %v29469_v30  ;;  %v29753_v20 = vld [vmem:[#allocation36_spill] sm:$0xff] }
 0x37d   :  { %21814 = vmatmul.mubr.f32.gmra.mrb[70].mxu0 %v29750_v13  ;;  %23386 = vmatprep.subr.bf16.mxu0 %v29556_v36 }
 0x37e   :  { %21916 = vmatmul.mubr.f32.gmra.mrb[70].mxu1 %v29750_v13  ;;  %21824 = vmatprep.mubr.msk.f32.mxu0 %vm24602_vm0, %v29550_v18  ;;  %v29770_v13 = vld [vmem:[#allocation11_spill] sm:$0xff] }
 0x37f   :  { %21926 = vmatprep.mubr.msk.f32.mxu1 %vm24602_vm0, %v29550_v18 }
 0x381   :  { %21825 = vmatmul.mubr.f32.vlgmr.msra.gmra.mrb[66].mxu0 %v24678_v31 }
 0x382   :  { %21927 = vmatmul.mubr.f32.vlgmr.msra.gmra.mrb[66].mxu1 %v24678_v31  ;;  %21827 = vmatprep.mubr.msk.f32.mxu0 %vm24602_vm0, %v29550_v18 }
 0x383   :  { %23424 = vmatpush3.bf16.msra.mxu1 %v27748_v48  ;;  %23388 = vmatpush3.bf16.msra.mxu0 %v27750_v11  ;;  %v15280_v48 = vsub.f32 %v28033_v60, %v29472_v24  ;;  %v14660_v11 = vsub.f32 %v28036_v1, %v29471_v39  ;;  %v10233_v24 = vmul.f32 0.13967033, %v29761_v0  ;;  %v29763_v0 = vand.u32 4294901760, %v28071_v38 }
 0x384   :  { %21929 = vmatprep.mubr.msk.f32.mxu1 %vm24602_vm0, %v29550_v18  ;;  %23425 = vmatprep.subr.bf16.mxu1 %v29556_v36 }
 0x385   :  { %21828 = vmatmul.mubr.f32.gmra.mrb[68].mxu0 %v24705_v44  ;;  %23389 = vmatprep.subr.bf16.mxu0 %v29556_v36  ;;  %v15281_v12 = vand.u32 4294901760, %v15280_v48  ;;  %v14661_v10 = vand.u32 4294901760, %v14660_v11  ;;  %v28130_v48 = vmul.f32 0.17934024, %v27513_v43  ;;  %v29757_v11 = vld [vmem:[#allocation17_spill] sm:$0xff] }
 0x386   :  { %21930 = vmatmul.mubr.f32.gmra.mrb[68].mxu1 %v24705_v44  ;;  %21830 = vmatprep.mubr.msk.f32.mxu0 %vm24602_vm0, %v29550_v18 }
 0x387   :  { %21932 = vmatprep.mubr.msk.f32.mxu1 %vm24602_vm0, %v29550_v18  ;;  %23427 = vmatpush3.bf16.msra.mxu1 %v27752_v54 }
 0x388   :  { %v28107_v47 = vpop.f32.mrb[48].mxu0  ;;  %23391 = vmatpush3.bf16.msra.mxu0 %v27757_v61  ;;  %23464 = vmatprep.subr.bf16.mxu1 %v29556_v36 }
 0x389   :  { %29752 = vst [vmem:[#allocation22_spill] sm:$0xff] %v28107_v47  ;;  %v10224_v19 = vadd.f32 %v28107_v47, %v29753_v20  ;;  %v10843_v50 = vadd.f32 %v28107_v47, %v29716_v21  ;;  %v28123_v61 = vadd.f32 %v28107_v47, %v29754_v58  ;;  %v28125_v15 = vpop.f32.mrb[48].mxu1  ;;  %v21231_v59 = vpop.f32.mrb[49].mxu0  ;;  %21831 = vmatmul.mubr.f32.gmra.mrb[70].mxu0 %v24742_v5 }
 0x38a   :  { %29756 = vst [vmem:[#allocation26_spill] sm:$0xff] %v28125_v15  ;;  %23428 = vmatprep.subr.bf16.mxu0 %v29556_v36  ;;  %v10837_v20 = vadd.f32 %v28125_v15, %v29757_v11  ;;  %v28136_v30 = vadd.f32 %v28125_v15, %v29751_v28  ;;  %v28140_v39 = vadd.f32 %v28125_v15, %v29759_v16  ;;  %v21333_v59 = vpop.f32.mrb[49].mxu1  ;;  %v29765_v15 = vld [vmem:[#allocation20_spill] sm:$0xff] }
 0x38b   :  { %29755 = vst [vmem:[#allocation19_spill] sm:$0xff] %v28123_v61  ;;  %21933 = vmatmul.mubr.f32.gmra.mrb[70].mxu1 %v24742_v5  ;;  %21841 = vmatprep.mubr.msk.f32.mxu0 %vm24602_vm0, %v29550_v18  ;;  %v10227_v49 = vmul.f32 0.10218499, %v10224_v19  ;;  %v10846_v54 = vmul.f32 0.13967033, %v10843_v50  ;;  %v28151_v11 = vsub.f32 %v28061_v40, %v29479_v41  ;;  %v29762_v59 = vand.u32 4294901760, %v28063_v51 }
 0x38c   :  { %29758 = vst [vmem:[#allocation29_spill] sm:$0xff] %v28136_v30  ;;  %29760 = vst [vmem:[#allocation34_spill] sm:$0xff] %v28140_v39  ;;  %21943 = vmatprep.mubr.msk.f32.mxu1 %vm24602_vm0, %v29550_v18  ;;  %v10840_v17 = vmul.f32 0.10218499, %v10837_v20  ;;  %v28153_v39 = vpack.c.bf16 %v15281_v12, %v15274_v22  ;;  %v28163_v19 = vsub.f32 %v28071_v38, %v29763_v0  ;;  %v29764_v50 = vld [vmem:[#allocation18_spill] sm:$0xff]  ;;  %v28167_v41 = vpop.f32.mrb[50].mxu0 }
 0x38d   :  { %v28158_v61 = vsub.f32 %v28063_v51, %v29762_v59  ;;  %v10242_v30 = vmul.f32 0.16847457, %v29764_v50  ;;  %v10855_v28 = vmul.f32 0.16847457, %v29765_v15  ;;  %v10236_v47 = vadd.f32 %v10233_v24, %v10227_v49  ;;  %29766 = vst [vmem:[#allocation25_spill] sm:$0xff] %v28167_v41  ;;  %v28169_v20 = vpop.f32.mrb[50].mxu1  ;;  %21842 = vmatmul.mubr.f32.vlgmr.msra.gmra.mrb[66].mxu0 %v24678_v31 }
 0x38e   :  { %29767 = vst [vmem:[#allocation32_spill] sm:$0xff] %v28169_v20  ;;  %v28172_v22 = vpack.c.bf16 %v14668_v46, %v14661_v10  ;;  %v10849_v12 = vadd.f32 %v10846_v54, %v10840_v17  ;;  %v29768_v59 = vld [vmem:[#allocation12_spill] sm:$0xff]  ;;  %v28180_v50 = vadd.f32 %v28167_v41, %v29770_v13  ;;  %v21234_v49 = vpop.f32.mrb[51].mxu0  ;;  %v21336_v24 = vpop.f32.mrb[51].mxu1  ;;  %v10861_v15 = vmul.f32 0.17934024, %v29754_v58  ;;  %21844 = vmatprep.mubr.msk.f32.mxu0 %vm24602_vm0, %v29550_v18 }
 0x38f   :  { %v10225_v21 = vadd.f32 %v28167_v41, %v29768_v59  ;;  %v29769_v16 = vld [vmem:[#allocation16_spill] sm:$0xff]  ;;  %21944 = vmatmul.mubr.f32.vlgmr.msra.gmra.mrb[66].mxu1 %v24678_v31  ;;  %v10245_v27 = vadd.f32 %v10242_v30, %v10236_v47  ;;  %v29772_v10 = vld [vmem:[#allocation14_spill] sm:$0xff]  ;;  %v28188_v54 = vadd.f32 %v28169_v20, %v29737_v52  ;;  %v29774_v46 = vld [vmem:[#allocation33_spill] sm:$0xff]  ;;  %23430 = vmatpush3.bf16.msra.mxu0 %v28096_v35  ;;  %v10862_v30 = vmul.f32 0.17934024, %v29770_v13 }
 0x390   :  { %v10844_v0 = vadd.f32 %v28167_v41, %v29769_v16  ;;  %29771 = vst [vmem:[#allocation36_spill] sm:$0xff] %v28180_v50  ;;  %v10838_v17 = vadd.f32 %v28169_v20, %v29772_v10  ;;  %23466 = vmatpush3.bf16.msra.mxu1 %v28094_v34  ;;  %v10234_v59 = vmul.f32 0.13967033, %v29774_v46  ;;  %v10858_v49 = vadd.f32 %v10855_v28, %v10849_v12  ;;  %v28203_v41 = vpop.f32.mrb[52].mxu0 }
 0x391   :  { %29773 = vst [vmem:[#allocation17_spill] sm:$0xff] %v28188_v54  ;;  %v10228_v24 = vmul.f32 0.10218499, %v10225_v21  ;;  %21946 = vmatprep.mubr.msk.f32.mxu1 %vm24602_vm0, %v29550_v18  ;;  %v10251_v47 = vadd.f32 %v28081_v32, %v10245_v27  ;;  %v29775_v54 = vld [vmem:[#allocation24_spill] sm:$0xff]  ;;  %v28205_v46 = vpop.f32.mrb[52].mxu1  ;;  %21845 = vmatmul.mubr.f32.gmra.mrb[68].mxu0 %v24705_v44  ;;  %v29777_v21 = vld [vmem:[#allocation31_spill] sm:$0xff]  ;;  %v10226_v27 = vadd.f32 %v28203_v41, %v27165_v53 }
 0x392   :  { %v10847_v50 = vmul.f32 0.13967033, %v10844_v0  ;;  %v10841_v10 = vmul.f32 0.10218499, %v10838_v17  ;;  %v28201_v52 = vadd.f32 %v28169_v20, %v29775_v54  ;;  %23467 = vmatprep.subr.bf16.mxu1 %v29556_v36  ;;  %v10243_v28 = vmul.f32 0.16847457, %v29777_v21  ;;  %21847 = vmatprep.mubr.msk.f32.mxu0 %vm24602_vm0, %v29550_v18 }
 0x393   :  { %v10864_v12 = vadd.f32 %v10861_v15, %v10858_v49  ;;  %v10237_v0 = vadd.f32 %v10234_v59, %v10228_v24  ;;  %v21237_v32 = vpop.f32.mrb[53].mxu0  ;;  %v21339_v17 = vpop.f32.mrb[53].mxu1  ;;  %21947 = vmatmul.mubr.f32.gmra.mrb[68].mxu1 %v24705_v44  ;;  %10255 = vst [vmem:[#allocation7 + $0xf0] sm:$0xff] %v10251_v47  ;;  %v10845_v16 = vadd.f32 %v28203_v41, %v27511_v25  ;;  %v10235_v53 = vmul.f32 0.13967033, %v27887_v33 }
 0x394   :  { %29776 = vst [vmem:[#allocation37_spill] sm:$0xff] %v28201_v52  ;;  %v29778_v52 = vld [vmem:[#allocation27_spill] sm:$0xff]  ;;  %v10850_v13 = vadd.f32 %v10847_v50, %v10841_v10  ;;  %v28220_v15 = vadd.f32 %v28203_v41, %v27857_v29  ;;  %21949 = vmatprep.mubr.msk.f32.mxu1 %vm24602_vm0, %v29550_v18  ;;  %23469 = vmatpush3.bf16.msra.mxu1 %v28098_v14  ;;  %v10229_v49 = vmul.f32 0.10218499, %v10226_v27  ;;  %v10244_v50 = vmul.f32 0.16847457, %v27874_v56 }
 0x395   :  { %v10856_v20 = vmul.f32 0.16847457, %v29778_v52  ;;  %10868 = vst [vmem:[#allocation7 + $0x108] sm:$0xff] %v10864_v12  ;;  %v10246_v59 = vadd.f32 %v10243_v28, %v10237_v0  ;;  %v10839_v52 = vadd.f32 %v28205_v46, %v27167_v63  ;;  %23431 = vmatprep.subr.bf16.mxu0 %v29556_v36  ;;  %23470 = vmatprep.subr.bf16.mxu1 %v29556_v36  ;;  %v10848_v47 = vmul.f32 0.13967033, %v10845_v16 }
 0x396   :  { %v28233_v10 = vadd.f32 %v28205_v46, %v27513_v43  ;;  %21848 = vmatmul.mubr.f32.gmra.mrb[70].mxu0 %v24742_v5  ;;  %v10238_v21 = vadd.f32 %v10235_v53, %v10229_v49  ;;  %v28239_v63 = vadd.f32 %v28205_v46, %v27859_v4  ;;  %v15295_v16 = vand.u32 4294901760, %v28151_v11 }
 0x397   :  { %v10859_v24 = vadd.f32 %v10856_v20, %v10850_v13  ;;  %v10252_v33 = vadd.f32 %v28089_v42, %v10246_v59  ;;  %v10842_v28 = vmul.f32 0.10218499, %v10839_v52  ;;  %21950 = vmatmul.mubr.f32.gmra.mrb[70].mxu1 %v24742_v5  ;;  %23433 = vmatpush3.bf16.msra.mxu0 %v28103_v45  ;;  %v15288_v13 = vand.u32 4294901760, %v28114_v7 }
 0x398   :  { %21960 = vmatprep.mubr.msk.f32.mxu0 %vm24602_vm0, %v29550_v18  ;;  %22062 = vmatprep.mubr.msk.f32.mxu1 %vm24602_vm0, %v29550_v18  ;;  %v14675_v42 = vand.u32 4294901760, %v28158_v61  ;;  %v10857_v20 = vmul.f32 0.16847457, %v27893_v6  ;;  %v10247_v12 = vadd.f32 %v10244_v50, %v10238_v21  ;;  %v10863_v27 = vmul.f32 0.17934024, %v27857_v29 }
 0x399   :  { %v10865_v56 = vadd.f32 %v10862_v30, %v10859_v24  ;;  %10256 = vst [vmem:[#allocation7 + $0xf8] sm:$0xff] %v10252_v33  ;;  %v10851_v0 = vadd.f32 %v10848_v47, %v10842_v28  ;;  %23434 = vmatprep.subr.bf16.mxu0 %v29556_v36  ;;  %v14682_v30 = vand.u32 4294901760, %v28163_v19  ;;  %v23474_v6 = vpack.c.bf16 %v15295_v16, %v15288_v13  ;;  %v28347_v24 = vld [vmem:[#allocation5 + $0x340] sm:$0xff]  ;;  %v29787_v13 = vld [vmem:[#allocation13_spill] sm:$0xff] }
 0x39a   :  { %21961 = vmatmul.mubr.f32.vlgmr.msra.gmra.mrb[72].mxu0 %v24733_v62  ;;  %v10253_v7 = vadd.f32 %v28130_v48, %v10247_v12  ;;  %v23441_v48 = vpack.c.bf16 %v28040_v26, %v28036_v1  ;;  %v23480_v19 = vpack.c.bf16 %v28061_v40, %v28050_v2  ;;  %v29779_v17 = vand.u32 4294901760, %v28029_v8 }
 0x39b   :  { %10869 = vst [vmem:[#allocation7 + $0x110] sm:$0xff] %v10865_v56  ;;  %v10860_v32 = vadd.f32 %v10857_v20, %v10851_v0  ;;  %22063 = vmatmul.mubr.f32.vlgmr.msra.gmra.mrb[72].mxu1 %v24733_v62  ;;  %21963 = vmatprep.mubr.msk.f32.mxu0 %vm24602_vm0, %v29550_v18  ;;  %v23438_v11 = vpack.c.bf16 %v14682_v30, %v14675_v42  ;;  %v29780_v53 = vand.u32 4294901760, %v28033_v60  ;;  %v29781_v49 = vand.u32 4294901760, %v28036_v1  ;;  %v28353_v1 = vld [vmem:[#allocation5 + $0x348] sm:$0xff]  ;;  %v16391_v42 = vld [vmem:[#allocation5 + $0x350] sm:$0xff] }
 0x39c   :  { %23472 = vmatpush3.bf16.msra.mxu1 %v28153_v39  ;;  %23436 = vmatpush3.bf16.msra.mxu0 %v28172_v22  ;;  %10257 = vst [vmem:[#allocation7 + $0x100] sm:$0xff] %v10253_v7  ;;  %v23477_v39 = vpack.c.bf16 %v28033_v60, %v28029_v8  ;;  %v23444_v22 = vpack.c.bf16 %v28071_v38, %v28063_v51  ;;  %v29782_v52 = vand.u32 4294901760, %v28040_v26  ;;  %v29783_v8 = vand.u32 4294901760, %v28050_v2  ;;  %v28355_v26 = vld [vmem:[#allocation5 + $0x320] sm:$0xff]  ;;  %v15777_v56 = vld [vmem:[#allocation5 + $0x328] sm:$0xff] }
 0x39d   :  { %v10866_v61 = vadd.f32 %v10863_v27, %v10860_v32  ;;  %22065 = vmatprep.mubr.msk.f32.mxu1 %vm24602_vm0, %v29550_v18  ;;  %23473 = vmatprep.subr.bf16.mxu1 %v29556_v36  ;;  %v23489_v59 = vpack.c.bf16 %v29780_v53, %v29779_v17  ;;  %v29784_v60 = vand.u32 4294901760, %v28061_v40  ;;  %v29785_v33 = vand.u32 4294901760, %v28063_v51  ;;  %v16392_v20 = vld [vmem:[#allocation5 + $0x358] sm:$0xf]  ;;  %v29788_v27 = vld [vmem:[#allocation15_spill] sm:$0xff] }
 0x39e   :  { %21964 = vmatmul.mubr.f32.gmra.mrb[74].mxu0 %v24753_v9  ;;  %23437 = vmatprep.subr.bf16.mxu0 %v29556_v36  ;;  %v23453_v50 = vpack.c.bf16 %v29782_v52, %v29781_v49  ;;  %v29786_v21 = vand.u32 4294901760, %v28071_v38  ;;  %v16397_v2 = vand.u32 4294901760, %v28347_v24  ;;  %v16400_v40 = vand.u32 4294901760, %v28353_v1  ;;  %v15779_v30 = vld [vmem:[#allocation5 + $0x338] sm:$0xf] }
 0x39f   :  { %10870 = vst [vmem:[#allocation7 + $0x118] sm:$0xff] %v10866_v61  ;;  %22066 = vmatmul.mubr.f32.gmra.mrb[74].mxu1 %v24753_v9  ;;  %21966 = vmatprep.mubr.msk.f32.mxu0 %vm24602_vm0, %v29550_v18  ;;  %v23492_v47 = vpack.c.bf16 %v29784_v60, %v29783_v8  ;;  %v15784_v16 = vand.u32 4294901760, %v28355_v26  ;;  %v15787_v38 = vand.u32 4294901760, %v15777_v56  ;;  %v16394_v32 = vsel %vm62_vm1, %v16392_v20, 0  ;;  %v15778_v61 = vld [vmem:[#allocation5 + $0x330] sm:$0xff] }
 0x3a0   :  { %22068 = vmatprep.mubr.msk.f32.mxu1 %vm24602_vm0, %v29550_v18  ;;  %23475 = vmatpush3.bf16.msra.mxu1 %v23474_v6  ;;  %v23456_v28 = vpack.c.bf16 %v29786_v21, %v29785_v33  ;;  %v28375_v51 = vsub.f32 %v28347_v24, %v16397_v2  ;;  %v28379_v12 = vsub.f32 %v28353_v1, %v16400_v40  ;;  %v28392_v6 = vand.u32 4294901760, %v16391_v42 }
 0x3a1   :  { %23439 = vmatpush3.bf16.msra.mxu0 %v23438_v11  ;;  %23476 = vmatprep.subr.bf16.mxu1 %v29556_v36  ;;  %v28382_v0 = vsub.f32 %v28355_v26, %v15784_v16  ;;  %v28386_v7 = vsub.f32 %v15777_v56, %v15787_v38  ;;  %v15781_v11 = vsel %vm62_vm1, %v15779_v30, 0  ;;  %v16406_v17 = vand.u32 4294901760, %v16394_v32 }
 0x3a2   :  { %21967 = vmatmul.mubr.f32.gmra.mrb[76].mxu0 %v24779_v23  ;;  %23440 = vmatprep.subr.bf16.mxu0 %v29556_v36  ;;  %29789 = vst [vmem:[#allocation18_spill] sm:$0xff] %v28392_v6  ;;  %v15790_v53 = vand.u32 4294901760, %v15778_v61  ;;  %v15793_v49 = vand.u32 4294901760, %v15781_v11  ;;  %v28440_v33 = vmul.f32 0.17934024, %v29775_v54  ;;  %v28445_v21 = vpack.c.bf16 %v16400_v40, %v16397_v2 }
 0x3a3   :  { %22069 = vmatmul.mubr.f32.gmra.mrb[76].mxu1 %v24779_v23  ;;  %21977 = vmatprep.mubr.msk.f32.mxu0 %vm24602_vm0, %v29550_v18  ;;  %v28410_v52 = vsub.f32 %v16394_v32, %v16406_v17  ;;  %v28450_v56 = vpack.c.bf16 %v16406_v17, %v28392_v6 }
 0x3a4   :  { %22079 = vmatprep.mubr.msk.f32.mxu1 %vm24602_vm0, %v29550_v18  ;;  %v28420_v8 = vsub.f32 %v15781_v11, %v15793_v49 }
 0x3a5   :  { %v29499_v30 = vand.u32 4294901760, %v28410_v52 }
 0x3a6   :  { %21978 = vmatmul.mubr.f32.vlgmr.msra.gmra.mrb[72].mxu0 %v24678_v31 }
 0x3a7   :  { %22080 = vmatmul.mubr.f32.vlgmr.msra.gmra.mrb[72].mxu1 %v24678_v31  ;;  %21980 = vmatprep.mubr.msk.f32.mxu0 %vm24602_vm0, %v29550_v18 }
 0x3a8   :  { %23478 = vmatpush3.bf16.msra.mxu1 %v23477_v39  ;;  %23442 = vmatpush3.bf16.msra.mxu0 %v23441_v48  ;;  %v29492_v39 = vand.u32 4294901760, %v28375_v51  ;;  %v28399_v48 = vsub.f32 %v16391_v42, %v28392_v6  ;;  %v28455_v42 = vpack.c.bf16 %v15793_v49, %v15790_v53 }
 0x3a9   :  { %22082 = vmatprep.mubr.msk.f32.mxu1 %vm24602_vm0, %v29550_v18  ;;  %23479 = vmatprep.subr.bf16.mxu1 %v29556_v36 }
 0x3aa   :  { %21981 = vmatmul.mubr.f32.gmra.mrb[74].mxu0 %v24705_v44  ;;  %23443 = vmatprep.subr.bf16.mxu0 %v29556_v36  ;;  %v16499_v24 = vsub.f32 %v28375_v51, %v29492_v39  ;;  %v28429_v60 = vand.u32 4294901760, %v28399_v48 }
 0x3ab   :  { %22083 = vmatmul.mubr.f32.gmra.mrb[74].mxu1 %v24705_v44  ;;  %21983 = vmatprep.mubr.msk.f32.mxu0 %vm24602_vm0, %v29550_v18 }
 0x3ac   :  { %22085 = vmatprep.mubr.msk.f32.mxu1 %vm24602_vm0, %v29550_v18  ;;  %23481 = vmatpush3.bf16.msra.mxu1 %v23480_v19  ;;  %v29491_v19 = vand.u32 4294901760, %v28379_v12  ;;  %29790 = vst [vmem:[#allocation20_spill] sm:$0xff] %v28429_v60  ;;  %v16500_v20 = vand.u32 4294901760, %v16499_v24 }
 0x3ad   :  { %23445 = vmatpush3.bf16.msra.mxu0 %v23444_v22  ;;  %23482 = vmatprep.subr.bf16.mxu1 %v29556_v36  ;;  %v29490_v22 = vand.u32 4294901760, %v28382_v0 }
 0x3ae   :  { %21984 = vmatmul.mubr.f32.gmra.mrb[76].mxu0 %v24742_v5  ;;  %23446 = vmatprep.subr.bf16.mxu0 %v29556_v36 }
 0x3af   :  { %22086 = vmatmul.mubr.f32.gmra.mrb[76].mxu1 %v24742_v5  ;;  %21994 = vmatprep.mubr.msk.f32.mxu0 %vm24602_vm0, %v29550_v18 }
 0x3b0   :  { %22096 = vmatprep.mubr.msk.f32.mxu1 %vm24602_vm0, %v29550_v18 }
 0x3b2   :  { %21995 = vmatmul.mubr.f32.vlgmr.msra.gmra.mrb[72].mxu0 %v24689_v37 }
 0x3b3   :  { %22097 = vmatmul.mubr.f32.vlgmr.msra.gmra.mrb[72].mxu1 %v24689_v37  ;;  %21997 = vmatprep.mubr.msk.f32.mxu0 %vm24602_vm0, %v29550_v18 }
 0x3b4   :  { %23484 = vmatpush3.bf16.msra.mxu1 %v28094_v34  ;;  %23448 = vmatpush3.bf16.msra.mxu0 %v28096_v35 }
 0x3b5   :  { %22099 = vmatprep.mubr.msk.f32.mxu1 %vm24602_vm0, %v29550_v18  ;;  %23485 = vmatprep.subr.bf16.mxu1 %v29556_v36 }
 0x3b6   :  { %21998 = vmatmul.mubr.f32.gmra.mrb[74].mxu0 %v29625_v57  ;;  %23449 = vmatprep.subr.bf16.mxu0 %v29556_v36 }
 0x3b7   :  { %22100 = vmatmul.mubr.f32.gmra.mrb[74].mxu1 %v29625_v57  ;;  %22000 = vmatprep.mubr.msk.f32.mxu0 %vm24602_vm0, %v29550_v18 }
 0x3b8   :  { %22102 = vmatprep.mubr.msk.f32.mxu1 %vm24602_vm0, %v29550_v18  ;;  %23487 = vmatpush3.bf16.msra.mxu1 %v28098_v14 }
 0x3b9   :  { %23451 = vmatpush3.bf16.msra.mxu0 %v28103_v45  ;;  %23488 = vmatprep.subr.bf16.mxu1 %v29556_v36 }
 0x3ba   :  { %22001 = vmatmul.mubr.f32.gmra.mrb[76].mxu0 %v29626_v3  ;;  %23452 = vmatprep.subr.bf16.mxu0 %v29556_v36 }
 0x3bb   :  { %22103 = vmatmul.mubr.f32.gmra.mrb[76].mxu1 %v29626_v3  ;;  %22011 = vmatprep.mubr.msk.f32.mxu0 %vm24602_vm0, %v29550_v18 }
 0x3bc   :  { %22113 = vmatprep.mubr.msk.f32.mxu1 %vm24602_vm0, %v29550_v18 }
 0x3be   :  { %22012 = vmatmul.mubr.f32.vlgmr.msra.gmra.mrb[72].mxu0 %v29631_v55 }
 0x3bf   :  { %22114 = vmatmul.mubr.f32.vlgmr.msra.gmra.mrb[72].mxu1 %v29631_v55  ;;  %22014 = vmatprep.mubr.msk.f32.mxu0 %vm24602_vm0, %v29550_v18 }
 0x3c0   :  { %23490 = vmatpush3.bf16.msra.mxu1 %v23489_v59  ;;  %23454 = vmatpush3.bf16.msra.mxu0 %v23453_v50  ;;  %v29489_v59 = vand.u32 4294901760, %v28386_v7  ;;  %v28412_v50 = vsub.f32 %v15778_v61, %v15790_v53  ;;  %v29794_v53 = vld [vmem:[#allocation22_spill] sm:$0xff] }
 0x3c1   :  { %22116 = vmatprep.mubr.msk.f32.mxu1 %vm24602_vm0, %v29550_v18  ;;  %23491 = vmatprep.subr.bf16.mxu1 %v29556_v36 }
 0x3c2   :  { %22015 = vmatmul.mubr.f32.gmra.mrb[74].mxu0 %v29787_v13  ;;  %23455 = vmatprep.subr.bf16.mxu0 %v29556_v36  ;;  %v15893_v26 = vsub.f32 %v28386_v7, %v29489_v59  ;;  %v29797_v59 = vld [vmem:[#allocation23_spill] sm:$0xff] }
 0x3c3   :  { %22117 = vmatmul.mubr.f32.gmra.mrb[74].mxu1 %v29787_v13  ;;  %22017 = vmatprep.mubr.msk.f32.mxu0 %vm24602_vm0, %v29550_v18 }
 0x3c4   :  { %22119 = vmatprep.mubr.msk.f32.mxu1 %vm24602_vm0, %v29550_v18  ;;  %23493 = vmatpush3.bf16.msra.mxu1 %v23492_v47  ;;  %v29791_v47 = vld [vmem:[#allocation28_spill] sm:$0xff] }
 0x3c5   :  { %23457 = vmatpush3.bf16.msra.mxu0 %v23456_v28  ;;  %23494 = vmatprep.subr.bf16.mxu1 %v29556_v36  ;;  %v28432_v1 = vmul.f32 0.17934024, %v29791_v47  ;;  %v28447_v28 = vpack.c.bf16 %v15787_v38, %v15784_v16  ;;  %v29793_v38 = vld [vmem:[#allocation30_spill] sm:$0xff] }
 0x3c6   :  { %22018 = vmatmul.mubr.f32.gmra.mrb[76].mxu0 %v29788_v27  ;;  %23458 = vmatprep.subr.bf16.mxu0 %v29556_v36 }
 0x3c7   :  { %22120 = vmatmul.mubr.f32.gmra.mrb[76].mxu1 %v29788_v27  ;;  %22028 = vmatprep.mubr.msk.f32.mxu0 %vm24602_vm0, %v29550_v18  ;;  %v29810_v27 = vld [vmem:[#allocation25_spill] sm:$0xff] }
 0x3c8   :  { %22130 = vmatprep.mubr.msk.f32.mxu1 %vm24602_vm0, %v29550_v18 }
 0x3ca   :  { %22029 = vmatmul.mubr.f32.vlgmr.msra.gmra.mrb[72].mxu0 %v24678_v31 }
 0x3cb   :  { %22131 = vmatmul.mubr.f32.vlgmr.msra.gmra.mrb[72].mxu1 %v24678_v31  ;;  %22031 = vmatprep.mubr.msk.f32.mxu0 %vm24602_vm0, %v29550_v18 }
 0x3cc   :  { %23496 = vmatpush3.bf16.msra.mxu1 %v28094_v34  ;;  %23460 = vmatpush3.bf16.msra.mxu0 %v28096_v35  ;;  %v16506_v34 = vsub.f32 %v28379_v12, %v29491_v19  ;;  %v15886_v35 = vsub.f32 %v28382_v0, %v29490_v22  ;;  %v29799_v19 = vld [vmem:[#allocation26_spill] sm:$0xff] }
 0x3cd   :  { %22133 = vmatprep.mubr.msk.f32.mxu1 %vm24602_vm0, %v29550_v18  ;;  %23497 = vmatprep.subr.bf16.mxu1 %v29556_v36 }
 0x3ce   :  { %22032 = vmatmul.mubr.f32.gmra.mrb[74].mxu0 %v24705_v44  ;;  %23461 = vmatprep.subr.bf16.mxu0 %v29556_v36  ;;  %v16507_v2 = vand.u32 4294901760, %v16506_v34  ;;  %v15887_v40 = vand.u32 4294901760, %v15886_v35  ;;  %v15894_v34 = vand.u32 4294901760, %v15893_v26  ;;  %v28479_v35 = vmul.f32 0.17934024, %v27859_v4  ;;  %v29801_v26 = vld [vmem:[#allocation29_spill] sm:$0xff] }
 0x3cf   :  { %22134 = vmatmul.mubr.f32.gmra.mrb[74].mxu1 %v24705_v44  ;;  %22034 = vmatprep.mubr.msk.f32.mxu0 %vm24602_vm0, %v29550_v18  ;;  %v11459_v16 = vmul.f32 0.13967033, %v29801_v26  ;;  %v29803_v26 = vand.u32 4294901760, %v28420_v8 }
 0x3d0   :  { %22136 = vmatprep.mubr.msk.f32.mxu1 %vm24602_vm0, %v29550_v18  ;;  %23499 = vmatpush3.bf16.msra.mxu1 %v28098_v14  ;;  %v28459_v61 = vpop.f32.mrb[54].mxu0 }
 0x3d1   :  { %29792 = vst [vmem:[#allocation12_spill] sm:$0xff] %v28459_v61  ;;  %23463 = vmatpush3.bf16.msra.mxu0 %v28103_v45  ;;  %23536 = vmatprep.subr.bf16.mxu1 %v29556_v36  ;;  %v11450_v11 = vadd.f32 %v28459_v61, %v29793_v38  ;;  %v12069_v17 = vadd.f32 %v28459_v61, %v29754_v58  ;;  %v28474_v45 = vpop.f32.mrb[54].mxu1  ;;  %v21435_v24 = vpop.f32.mrb[55].mxu0 }
 0x3d2   :  { %v28472_v49 = vadd.f32 %v28459_v61, %v29794_v53  ;;  %29796 = vst [vmem:[#allocation33_spill] sm:$0xff] %v28474_v45  ;;  %22035 = vmatmul.mubr.f32.gmra.mrb[76].mxu0 %v24742_v5  ;;  %23500 = vmatprep.subr.bf16.mxu0 %v29556_v36  ;;  %v12063_v38 = vadd.f32 %v28474_v45, %v29797_v59  ;;  %v21537_v24 = vpop.f32.mrb[55].mxu1 }
 0x3d3   :  { %v28485_v22 = vadd.f32 %v28474_v45, %v29791_v47  ;;  %v28489_v39 = vadd.f32 %v28474_v45, %v29799_v19  ;;  %22137 = vmatmul.mubr.f32.gmra.mrb[76].mxu1 %v24742_v5  ;;  %22045 = vmatprep.mubr.msk.f32.mxu0 %vm24602_vm0, %v29550_v18  ;;  %v11453_v14 = vmul.f32 0.10218499, %v11450_v11  ;;  %v12072_v32 = vmul.f32 0.13967033, %v12069_v17  ;;  %v29804_v17 = vld [vmem:[#allocation19_spill] sm:$0xff]  ;;  %v29805_v47 = vld [vmem:[#allocation34_spill] sm:$0xff] }
 0x3d4   :  { %29795 = vst [vmem:[#allocation14_spill] sm:$0xff] %v28472_v49  ;;  %22147 = vmatprep.mubr.msk.f32.mxu1 %vm24602_vm0, %v29550_v18  ;;  %v28500_v59 = vsub.f32 %v28410_v52, %v29499_v30  ;;  %v12066_v49 = vmul.f32 0.10218499, %v12063_v38  ;;  %v29802_v24 = vand.u32 4294901760, %v28412_v50  ;;  %v28512_v11 = vsub.f32 %v28420_v8, %v29803_v26  ;;  %v28516_v30 = vpop.f32.mrb[56].mxu0  ;;  %v29809_v19 = vld [vmem:[#allocation11_spill] sm:$0xff] }
 0x3d5   :  { %29798 = vst [vmem:[#allocation31_spill] sm:$0xff] %v28485_v22  ;;  %29800 = vst [vmem:[#allocation27_spill] sm:$0xff] %v28489_v39  ;;  %v28502_v39 = vpack.c.bf16 %v16507_v2, %v16500_v20  ;;  %v11468_v45 = vmul.f32 0.16847457, %v29804_v17  ;;  %v12081_v61 = vmul.f32 0.16847457, %v29805_v47  ;;  %v11462_v58 = vadd.f32 %v11459_v16, %v11453_v14 }
 0x3d6   :  { %v28507_v22 = vsub.f32 %v28412_v50, %v29802_v24  ;;  %29806 = vst [vmem:[#allocation30_spill] sm:$0xff] %v28516_v30  ;;  %v28518_v38 = vpop.f32.mrb[56].mxu1  ;;  %22046 = vmatmul.mubr.f32.vlgmr.msra.gmra.mrb[72].mxu0 %v24678_v31  ;;  %v28521_v20 = vpack.c.bf16 %v15894_v34, %v15887_v40  ;;  %v12075_v2 = vadd.f32 %v12072_v32, %v12066_v49  ;;  %v29808_v24 = vld [vmem:[#allocation16_spill] sm:$0xff]  ;;  %v21438_v47 = vpop.f32.mrb[57].mxu0  ;;  %v12087_v14 = vmul.f32 0.17934024, %v29794_v53 }
 0x3d7   :  { %29807 = vst [vmem:[#allocation23_spill] sm:$0xff] %v28518_v38  ;;  %v11451_v6 = vadd.f32 %v28516_v30, %v29808_v24  ;;  %v12070_v26 = vadd.f32 %v28516_v30, %v29809_v19  ;;  %v28529_v17 = vadd.f32 %v28516_v30, %v29810_v27  ;;  %v21540_v16 = vpop.f32.mrb[57].mxu1  ;;  %22148 = vmatmul.mubr.f32.vlgmr.msra.gmra.mrb[72].mxu1 %v24678_v31  ;;  %v29812_v40 = vld [vmem:[#allocation35_spill] sm:$0xff]  ;;  %v29814_v34 = vld [vmem:[#allocation17_spill] sm:$0xff] }
 0x3d8   :  { %v11471_v13 = vadd.f32 %v11468_v45, %v11462_v58  ;;  %v12064_v32 = vadd.f32 %v28518_v38, %v29812_v40  ;;  %v28537_v49 = vadd.f32 %v28518_v38, %v29775_v54  ;;  %23538 = vmatpush3.bf16.msra.mxu1 %v28445_v21  ;;  %22048 = vmatprep.mubr.msk.f32.mxu0 %vm24602_vm0, %v29550_v18  ;;  %v11460_v24 = vmul.f32 0.13967033, %v29814_v34  ;;  %v28552_v30 = vpop.f32.mrb[58].mxu0 }
 0x3d9   :  { %29811 = vst [vmem:[#allocation29_spill] sm:$0xff] %v28529_v17  ;;  %v12084_v47 = vadd.f32 %v12081_v61, %v12075_v2  ;;  %v11454_v16 = vmul.f32 0.10218499, %v11451_v6  ;;  %v12073_v17 = vmul.f32 0.13967033, %v12070_v26  ;;  %22150 = vmatprep.mubr.msk.f32.mxu1 %vm24602_vm0, %v29550_v18  ;;  %23502 = vmatpush3.bf16.msra.mxu0 %v28447_v28  ;;  %v28554_v34 = vpop.f32.mrb[58].mxu1  ;;  %v12071_v19 = vadd.f32 %v28552_v30, %v27857_v29 }
 0x3da   :  { %29813 = vst [vmem:[#allocation19_spill] sm:$0xff] %v28537_v49  ;;  %v12088_v58 = vmul.f32 0.17934024, %v29810_v27  ;;  %v11477_v45 = vadd.f32 %v28432_v1, %v11471_v13  ;;  %v12067_v40 = vmul.f32 0.10218499, %v12064_v32  ;;  %v29815_v49 = vld [vmem:[#allocation32_spill] sm:$0xff]  ;;  %22049 = vmatmul.mubr.f32.gmra.mrb[74].mxu0 %v24705_v44  ;;  %23539 = vmatprep.subr.bf16.mxu1 %v29556_v36  ;;  %v11452_v13 = vadd.f32 %v28552_v30, %v27511_v25 }
 0x3db   :  { %v28550_v54 = vadd.f32 %v28518_v38, %v29815_v49  ;;  %v29817_v6 = vld [vmem:[#allocation36_spill] sm:$0xff]  ;;  %v12090_v2 = vadd.f32 %v12087_v14, %v12084_v47  ;;  %v11463_v26 = vadd.f32 %v11460_v24, %v11454_v16  ;;  %v21441_v1 = vpop.f32.mrb[59].mxu0  ;;  %v21543_v32 = vpop.f32.mrb[59].mxu1  ;;  %22151 = vmatmul.mubr.f32.gmra.mrb[74].mxu1 %v24705_v44  ;;  %22051 = vmatprep.mubr.msk.f32.mxu0 %vm24602_vm0, %v29550_v18  ;;  %v11461_v25 = vmul.f32 0.13967033, %v28233_v10 }
 0x3dc   :  { %v11469_v61 = vmul.f32 0.16847457, %v29817_v6  ;;  %11481 = vst [vmem:[#allocation7 + $0x120] sm:$0xff] %v11477_v45  ;;  %v12076_v27 = vadd.f32 %v12073_v17, %v12067_v40  ;;  %v28569_v14 = vadd.f32 %v28552_v30, %v28203_v41  ;;  %22153 = vmatprep.mubr.msk.f32.mxu1 %vm24602_vm0, %v29550_v18  ;;  %23541 = vmatpush3.bf16.msra.mxu1 %v28450_v56  ;;  %v11455_v47 = vmul.f32 0.10218499, %v11452_v13 }
 0x3dd   :  { %29816 = vst [vmem:[#allocation34_spill] sm:$0xff] %v28550_v54  ;;  %v29818_v54 = vld [vmem:[#allocation37_spill] sm:$0xff]  ;;  %12094 = vst [vmem:[#allocation7 + $0x138] sm:$0xff] %v12090_v2  ;;  %23503 = vmatprep.subr.bf16.mxu0 %v29556_v36  ;;  %23542 = vmatprep.subr.bf16.mxu1 %v29556_v36  ;;  %v11470_v17 = vmul.f32 0.16847457, %v28220_v15  ;;  %v28582_v40 = vadd.f32 %v28554_v34, %v27859_v4  ;;  %v15908_v13 = vand.u32 4294901760, %v28512_v11 }
 0x3de   :  { %v12082_v38 = vmul.f32 0.16847457, %v29818_v54  ;;  %v11472_v24 = vadd.f32 %v11469_v61, %v11463_v26  ;;  %v12065_v54 = vadd.f32 %v28554_v34, %v27513_v43  ;;  %v12074_v45 = vmul.f32 0.13967033, %v12071_v19  ;;  %22052 = vmatmul.mubr.f32.gmra.mrb[76].mxu0 %v24742_v5 }
 0x3df   :  { %v11464_v6 = vadd.f32 %v11461_v25, %v11455_v47  ;;  %v28588_v43 = vadd.f32 %v28554_v34, %v28205_v46  ;;  %22154 = vmatmul.mubr.f32.gmra.mrb[76].mxu1 %v24742_v5  ;;  %23505 = vmatpush3.bf16.msra.mxu0 %v28455_v42  ;;  %v12083_v2 = vmul.f32 0.16847457, %v28239_v63  ;;  %v12089_v1 = vmul.f32 0.17934024, %v28203_v41 }
 0x3e0   :  { %v12085_v16 = vadd.f32 %v12082_v38, %v12076_v27  ;;  %v11478_v10 = vadd.f32 %v28440_v33, %v11472_v24  ;;  %v12068_v61 = vmul.f32 0.10218499, %v12065_v54  ;;  %22164 = vmatprep.mubr.msk.f32.mxu0 %vm24602_vm0, %v29550_v18  ;;  %22266 = vmatprep.mubr.msk.f32.mxu1 %vm24602_vm0, %v29550_v18  ;;  %v29819_v27 = vsub.f32 %v28399_v48, %v28429_v60 }
 0x3e1   :  { %v16521_v33 = vand.u32 4294901760, %v28500_v59  ;;  %v15901_v38 = vand.u32 4294901760, %v28507_v22  ;;  %v11473_v26 = vadd.f32 %v11470_v17, %v11464_v6  ;;  %23506 = vmatprep.subr.bf16.mxu0 %v29556_v36  ;;  %v28635_v59 = vpack.c.bf16 %v28379_v12, %v28375_v51 }
 0x3e2   :  { %v12091_v15 = vadd.f32 %v12088_v58, %v12085_v16  ;;  %v28599_v19 = vand.u32 4294901760, %v29819_v27  ;;  %11482 = vst [vmem:[#allocation7 + $0x128] sm:$0xff] %v11478_v10  ;;  %v12077_v58 = vadd.f32 %v12074_v45, %v12068_v61  ;;  %22165 = vmatmul.mubr.f32.vlgmr.msra.gmra.mrb[78].mxu0 %v24733_v62  ;;  %v23513_v11 = vpack.c.bf16 %v28386_v7, %v28382_v0  ;;  %v29827_v61 = vld [vmem:[#allocation13_spill] sm:$0xff]  ;;  %v29828_v27 = vld [vmem:[#allocation15_spill] sm:$0xff] }
 0x3e3   :  { %v11479_v32 = vadd.f32 %v28479_v35, %v11473_v26  ;;  %22267 = vmatmul.mubr.f32.vlgmr.msra.gmra.mrb[78].mxu1 %v24733_v62  ;;  %22167 = vmatprep.mubr.msk.f32.mxu0 %vm24602_vm0, %v29550_v18  ;;  %v23510_v35 = vpack.c.bf16 %v15908_v13, %v15901_v38  ;;  %v23516_v24 = vpack.c.bf16 %v28420_v8, %v28412_v50  ;;  %v29820_v47 = vand.u32 4294901760, %v28375_v51 }
 0x3e4   :  { %12095 = vst [vmem:[#allocation7 + $0x140] sm:$0xff] %v12091_v15  ;;  %v12086_v25 = vadd.f32 %v12083_v2, %v12077_v58  ;;  %23544 = vmatpush3.bf16.msra.mxu1 %v28502_v39  ;;  %23508 = vmatpush3.bf16.msra.mxu0 %v28521_v20  ;;  %v23546_v63 = vpack.c.bf16 %v16521_v33, %v28599_v19  ;;  %v29821_v54 = vand.u32 4294901760, %v28379_v12  ;;  %v29822_v16 = vand.u32 4294901760, %v28382_v0  ;;  %v17002_v15 = vld [vmem:[#allocation5 + $0x360] sm:$0xff]  ;;  %v17005_v33 = vld [vmem:[#allocation5 + $0x378] sm:$0xf] }
 0x3e5   :  { %11483 = vst [vmem:[#allocation7 + $0x130] sm:$0xff] %v11479_v32  ;;  %22269 = vmatprep.mubr.msk.f32.mxu1 %vm24602_vm0, %v29550_v18  ;;  %23545 = vmatprep.subr.bf16.mxu1 %v29556_v36  ;;  %v23552_v20 = vpack.c.bf16 %v28410_v52, %v28399_v48  ;;  %v29823_v45 = vand.u32 4294901760, %v28386_v7  ;;  %v29824_v51 = vand.u32 4294901760, %v28410_v52  ;;  %v29825_v0 = vand.u32 4294901760, %v28412_v50  ;;  %v17003_v52 = vld [vmem:[#allocation5 + $0x368] sm:$0xff]  ;;  %v17004_v58 = vld [vmem:[#allocation5 + $0x370] sm:$0xff] }
 0x3e6   :  { %v12092_v22 = vadd.f32 %v12089_v1, %v12086_v25  ;;  %22168 = vmatmul.mubr.f32.gmra.mrb[80].mxu0 %v24753_v9  ;;  %23509 = vmatprep.subr.bf16.mxu0 %v29556_v36  ;;  %v28696_v17 = vpack.c.bf16 %v29821_v54, %v29820_v47  ;;  %v29826_v7 = vand.u32 4294901760, %v28420_v8  ;;  %v17010_v50 = vand.u32 4294901760, %v17002_v15  ;;  %v17617_v8 = vld [vmem:[#allocation5 + $0x358] sm:$0xf] }
 0x3e7   :  { %22270 = vmatmul.mubr.f32.gmra.mrb[80].mxu1 %v24753_v9  ;;  %22170 = vmatprep.mubr.msk.f32.mxu0 %vm24602_vm0, %v29550_v18  ;;  %v23525_v10 = vpack.c.bf16 %v29823_v45, %v29822_v16  ;;  %v23564_v12 = vpack.c.bf16 %v29824_v51, %v28429_v60  ;;  %v17013_v38 = vand.u32 4294901760, %v17003_v52  ;;  %v17619_v26 = vsel %vm62_vm1, %v17617_v8, 0  ;;  %v29829_v47 = vld [vmem:[#allocation26_spill] sm:$0xff] }
 0x3e8   :  { %12096 = vst [vmem:[#allocation7 + $0x148] sm:$0xff] %v12092_v22  ;;  %22272 = vmatprep.mubr.msk.f32.mxu1 %vm24602_vm0, %v29550_v18  ;;  %23547 = vmatpush3.bf16.msra.mxu1 %v23546_v63  ;;  %v23528_v6 = vpack.c.bf16 %v29826_v7, %v29825_v0  ;;  %v28730_v2 = vsub.f32 %v17002_v15, %v17010_v50  ;;  %v17007_v1 = vsel %vm62_vm1, %v17005_v33, 0  ;;  %v17631_v32 = vand.u32 4294901760, %v17619_v26  ;;  %v29832_v15 = vld [vmem:[#allocation21_spill] sm:$0xff] }
 0x3e9   :  { %23511 = vmatpush3.bf16.msra.mxu0 %v23510_v35  ;;  %23548 = vmatprep.subr.bf16.mxu1 %v29556_v36  ;;  %v28735_v13 = vsub.f32 %v17003_v52, %v17013_v38  ;;  %v17016_v25 = vand.u32 4294901760, %v17004_v58  ;;  %v17019_v22 = vand.u32 4294901760, %v17007_v1  ;;  %v28766_v54 = vmul.f32 0.17934024, %v29829_v47 }
 0x3ea   :  { %22171 = vmatmul.mubr.f32.gmra.mrb[82].mxu0 %v24779_v23  ;;  %23512 = vmatprep.subr.bf16.mxu0 %v29556_v36  ;;  %v29510_v63 = vand.u32 4294901760, %v28730_v2  ;;  %v28748_v35 = vsub.f32 %v17619_v26, %v17631_v32  ;;  %v28769_v16 = vmul.f32 0.17934024, %v29815_v49  ;;  %v28772_v45 = vmul.f32 0.17934024, %v28205_v46 }
 0x3eb   :  { %22273 = vmatmul.mubr.f32.gmra.mrb[82].mxu1 %v24779_v23  ;;  %22181 = vmatprep.mubr.msk.f32.mxu0 %vm24602_vm0, %v29550_v18 }
 0x3ec   :  { %22283 = vmatprep.mubr.msk.f32.mxu1 %vm24602_vm0, %v29550_v18 }
 0x3ee   :  { %22182 = vmatmul.mubr.f32.vlgmr.msra.gmra.mrb[78].mxu0 %v24678_v31 }
 0x3ef   :  { %22284 = vmatmul.mubr.f32.vlgmr.msra.gmra.mrb[78].mxu1 %v24678_v31  ;;  %22184 = vmatprep.mubr.msk.f32.mxu0 %vm24602_vm0, %v29550_v18 }
 0x3f0   :  { %23550 = vmatpush3.bf16.msra.mxu1 %v28635_v59  ;;  %23514 = vmatpush3.bf16.msra.mxu0 %v23513_v11  ;;  %v28750_v11 = vsub.f32 %v17004_v58, %v17016_v25  ;;  %v29836_v58 = vld [vmem:[#allocation28_spill] sm:$0xff] }
 0x3f1   :  { %22286 = vmatprep.mubr.msk.f32.mxu1 %vm24602_vm0, %v29550_v18  ;;  %23551 = vmatprep.subr.bf16.mxu1 %v29556_v36 }
 0x3f2   :  { %22185 = vmatmul.mubr.f32.gmra.mrb[80].mxu0 %v24705_v44  ;;  %23515 = vmatprep.subr.bf16.mxu0 %v29556_v36 }
 0x3f3   :  { %22287 = vmatmul.mubr.f32.gmra.mrb[80].mxu1 %v24705_v44  ;;  %22187 = vmatprep.mubr.msk.f32.mxu0 %vm24602_vm0, %v29550_v18 }
 0x3f4   :  { %22289 = vmatprep.mubr.msk.f32.mxu1 %vm24602_vm0, %v29550_v18  ;;  %23553 = vmatpush3.bf16.msra.mxu1 %v23552_v20  ;;  %v29509_v20 = vand.u32 4294901760, %v28735_v13 }
 0x3f5   :  { %23517 = vmatpush3.bf16.msra.mxu0 %v23516_v24  ;;  %23554 = vmatprep.subr.bf16.mxu1 %v29556_v36  ;;  %v28755_v24 = vsub.f32 %v17007_v1, %v17019_v22 }
 0x3f6   :  { %22188 = vmatmul.mubr.f32.gmra.mrb[82].mxu0 %v24742_v5  ;;  %23518 = vmatprep.subr.bf16.mxu0 %v29556_v36  ;;  %v28789_v7 = vsub.f32 %v28735_v13, %v29509_v20 }
 0x3f7   :  { %22290 = vmatmul.mubr.f32.gmra.mrb[82].mxu1 %v24742_v5  ;;  %22198 = vmatprep.mubr.msk.f32.mxu0 %vm24602_vm0, %v29550_v18 }
 0x3f8   :  { %22300 = vmatprep.mubr.msk.f32.mxu1 %vm24602_vm0, %v29550_v18 }
 0x3fa   :  { %22199 = vmatmul.mubr.f32.vlgmr.msra.gmra.mrb[78].mxu0 %v24689_v37 }
 0x3fb   :  { %22301 = vmatmul.mubr.f32.vlgmr.msra.gmra.mrb[78].mxu1 %v24689_v37  ;;  %22201 = vmatprep.mubr.msk.f32.mxu0 %vm24602_vm0, %v29550_v18 }
 0x3fc   :  { %23556 = vmatpush3.bf16.msra.mxu1 %v28445_v21  ;;  %23520 = vmatpush3.bf16.msra.mxu0 %v28447_v28 }
 0x3fd   :  { %22303 = vmatprep.mubr.msk.f32.mxu1 %vm24602_vm0, %v29550_v18  ;;  %23557 = vmatprep.subr.bf16.mxu1 %v29556_v36 }
 0x3fe   :  { %22202 = vmatmul.mubr.f32.gmra.mrb[80].mxu0 %v29625_v57  ;;  %23521 = vmatprep.subr.bf16.mxu0 %v29556_v36 }
 0x3ff   :  { %22304 = vmatmul.mubr.f32.gmra.mrb[80].mxu1 %v29625_v57  ;;  %22204 = vmatprep.mubr.msk.f32.mxu0 %vm24602_vm0, %v29550_v18 }
 0x400   :  { %22306 = vmatprep.mubr.msk.f32.mxu1 %vm24602_vm0, %v29550_v18  ;;  %23559 = vmatpush3.bf16.msra.mxu1 %v28450_v56 }
 0x401   :  { %23523 = vmatpush3.bf16.msra.mxu0 %v28455_v42  ;;  %23560 = vmatprep.subr.bf16.mxu1 %v29556_v36 }
 0x402   :  { %22205 = vmatmul.mubr.f32.gmra.mrb[82].mxu0 %v29626_v3  ;;  %23524 = vmatprep.subr.bf16.mxu0 %v29556_v36 }
 0x403   :  { %22307 = vmatmul.mubr.f32.gmra.mrb[82].mxu1 %v29626_v3  ;;  %22215 = vmatprep.mubr.msk.f32.mxu0 %vm24602_vm0, %v29550_v18 }
 0x404   :  { %22317 = vmatprep.mubr.msk.f32.mxu1 %vm24602_vm0, %v29550_v18 }
 0x406   :  { %22216 = vmatmul.mubr.f32.vlgmr.msra.gmra.mrb[78].mxu0 %v29631_v55 }
 0x407   :  { %22318 = vmatmul.mubr.f32.vlgmr.msra.gmra.mrb[78].mxu1 %v29631_v55  ;;  %22218 = vmatprep.mubr.msk.f32.mxu0 %vm24602_vm0, %v29550_v18 }
 0x408   :  { %23562 = vmatpush3.bf16.msra.mxu1 %v28696_v17  ;;  %23526 = vmatpush3.bf16.msra.mxu0 %v23525_v10  ;;  %v28777_v10 = vpack.c.bf16 %v17013_v38, %v17010_v50  ;;  %v29833_v50 = vld [vmem:[#allocation12_spill] sm:$0xff] }
 0x409   :  { %22320 = vmatprep.mubr.msk.f32.mxu1 %vm24602_vm0, %v29550_v18  ;;  %23563 = vmatprep.subr.bf16.mxu1 %v29556_v36 }
 0x40a   :  { %22219 = vmatmul.mubr.f32.gmra.mrb[80].mxu0 %v29827_v61  ;;  %23527 = vmatprep.subr.bf16.mxu0 %v29556_v36 }
 0x40b   :  { %22321 = vmatmul.mubr.f32.gmra.mrb[80].mxu1 %v29827_v61  ;;  %22221 = vmatprep.mubr.msk.f32.mxu0 %vm24602_vm0, %v29550_v18  ;;  %v13313_v61 = vmul.f32 0.17934024, %v29833_v50 }
 0x40c   :  { %22323 = vmatprep.mubr.msk.f32.mxu1 %vm24602_vm0, %v29550_v18  ;;  %23565 = vmatpush3.bf16.msra.mxu1 %v23564_v12  ;;  %v29831_v12 = vld [vmem:[#allocation18_spill] sm:$0xff] }
 0x40d   :  { %23529 = vmatpush3.bf16.msra.mxu0 %v23528_v6  ;;  %23566 = vmatprep.subr.bf16.mxu1 %v29556_v36  ;;  %v28784_v0 = vpack.c.bf16 %v17631_v32, %v29831_v12  ;;  %v29838_v12 = vld [vmem:[#allocation33_spill] sm:$0xff]  ;;  %v28823_v6 = vpack.c.bf16 %v17019_v22, %v17016_v25 }
 0x40e   :  { %22222 = vmatmul.mubr.f32.gmra.mrb[82].mxu0 %v29828_v27  ;;  %23530 = vmatprep.subr.bf16.mxu0 %v29556_v36 }
 0x40f   :  { %22324 = vmatmul.mubr.f32.gmra.mrb[82].mxu1 %v29828_v27  ;;  %22232 = vmatprep.mubr.msk.f32.mxu0 %vm24602_vm0, %v29550_v18 }
 0x410   :  { %22334 = vmatprep.mubr.msk.f32.mxu1 %vm24602_vm0, %v29550_v18 }
 0x412   :  { %22233 = vmatmul.mubr.f32.vlgmr.msra.gmra.mrb[78].mxu0 %v24678_v31 }
 0x413   :  { %22335 = vmatmul.mubr.f32.vlgmr.msra.gmra.mrb[78].mxu1 %v24678_v31  ;;  %22235 = vmatprep.mubr.msk.f32.mxu0 %vm24602_vm0, %v29550_v18 }
 0x414   :  { %23568 = vmatpush3.bf16.msra.mxu1 %v28445_v21  ;;  %23532 = vmatpush3.bf16.msra.mxu0 %v28447_v28  ;;  %v28763_v28 = vsub.f32 %v28730_v2, %v29510_v63  ;;  %v29840_v63 = vld [vmem:[#allocation31_spill] sm:$0xff] }
 0x415   :  { %22337 = vmatprep.mubr.msk.f32.mxu1 %vm24602_vm0, %v29550_v18  ;;  %23569 = vmatprep.subr.bf16.mxu1 %v29556_v36  ;;  %v12685_v26 = vmul.f32 0.13967033, %v29840_v63  ;;  %v29843_v63 = vld [vmem:[#allocation14_spill] sm:$0xff] }
 0x416   :  { %22236 = vmatmul.mubr.f32.gmra.mrb[80].mxu0 %v24705_v44  ;;  %23533 = vmatprep.subr.bf16.mxu0 %v29556_v36 }
 0x417   :  { %22338 = vmatmul.mubr.f32.gmra.mrb[80].mxu1 %v24705_v44  ;;  %22238 = vmatprep.mubr.msk.f32.mxu0 %vm24602_vm0, %v29550_v18 }
 0x418   :  { %22340 = vmatprep.mubr.msk.f32.mxu1 %vm24602_vm0, %v29550_v18  ;;  %23571 = vmatpush3.bf16.msra.mxu1 %v28450_v56  ;;  %v28779_v51 = vpop.f32.mrb[60].mxu0 }
 0x419   :  { %29830 = vst [vmem:[#allocation16_spill] sm:$0xff] %v28779_v51  ;;  %23535 = vmatpush3.bf16.msra.mxu0 %v28455_v42  ;;  %23608 = vmatprep.subr.bf16.mxu1 %v29556_v36  ;;  %v12676_v52 = vadd.f32 %v28779_v51, %v29832_v15  ;;  %v13295_v42 = vadd.f32 %v28779_v51, %v29794_v53  ;;  %v28801_v33 = vpop.f32.mrb[60].mxu1  ;;  %v21639_v38 = vpop.f32.mrb[61].mxu0 }
 0x41a   :  { %v28799_v8 = vadd.f32 %v28779_v51, %v29833_v50  ;;  %29835 = vst [vmem:[#allocation17_spill] sm:$0xff] %v28801_v33  ;;  %22239 = vmatmul.mubr.f32.gmra.mrb[82].mxu0 %v24742_v5  ;;  %23572 = vmatprep.subr.bf16.mxu0 %v29556_v36  ;;  %v13289_v1 = vadd.f32 %v28801_v33, %v29836_v58  ;;  %v21741_v20 = vpop.f32.mrb[61].mxu1  ;;  %v29848_v51 = vld [vmem:[#allocation11_spill] sm:$0xff] }
 0x41b   :  { %v28810_v32 = vadd.f32 %v28801_v33, %v29829_v47  ;;  %v28814_v15 = vadd.f32 %v28801_v33, %v29838_v12  ;;  %22341 = vmatmul.mubr.f32.gmra.mrb[82].mxu1 %v24742_v5  ;;  %22249 = vmatprep.mubr.msk.f32.mxu0 %vm24602_vm0, %v29550_v18  ;;  %v12679_v56 = vmul.f32 0.10218499, %v12676_v52  ;;  %v13298_v58 = vmul.f32 0.13967033, %v13295_v42  ;;  %v29844_v42 = vld [vmem:[#allocation27_spill] sm:$0xff]  ;;  %v29849_v12 = vld [vmem:[#allocation25_spill] sm:$0xff] }
 0x41c   :  { %29834 = vst [vmem:[#allocation35_spill] sm:$0xff] %v28799_v8  ;;  %22351 = vmatprep.mubr.msk.f32.mxu1 %vm24602_vm0, %v29550_v18  ;;  %v29841_v20 = vand.u32 4294901760, %v28748_v35  ;;  %v29842_v47 = vand.u32 4294901760, %v28750_v11  ;;  %v12694_v52 = vmul.f32 0.16847457, %v29843_v63  ;;  %v28838_v25 = vpop.f32.mrb[62].mxu0 }
 0x41d   :  { %29837 = vst [vmem:[#allocation36_spill] sm:$0xff] %v28810_v32  ;;  %29839 = vst [vmem:[#allocation37_spill] sm:$0xff] %v28814_v15  ;;  %v13292_v32 = vmul.f32 0.10218499, %v13289_v1  ;;  %v13307_v8 = vmul.f32 0.16847457, %v29844_v42  ;;  %v12688_v53 = vadd.f32 %v12685_v26, %v12679_v56  ;;  %v13296_v63 = vadd.f32 %v28838_v25, %v29849_v12 }
 0x41e   :  { %v28829_v33 = vsub.f32 %v28748_v35, %v29841_v20  ;;  %v28834_v38 = vsub.f32 %v28750_v11, %v29842_v47  ;;  %29845 = vst [vmem:[#allocation18_spill] sm:$0xff] %v28838_v25  ;;  %v28840_v22 = vpop.f32.mrb[62].mxu1  ;;  %22250 = vmatmul.mubr.f32.vlgmr.msra.gmra.mrb[78].mxu0 %v24678_v31  ;;  %v29847_v1 = vand.u32 4294901760, %v28755_v24  ;;  %v12677_v47 = vadd.f32 %v28838_v25, %v29848_v51  ;;  %v29850_v42 = vld [vmem:[#allocation30_spill] sm:$0xff]  ;;  %v21642_v26 = vpop.f32.mrb[63].mxu0 }
 0x41f   :  { %29846 = vst [vmem:[#allocation21_spill] sm:$0xff] %v28840_v22  ;;  %v13301_v15 = vadd.f32 %v13298_v58, %v13292_v32  ;;  %v28854_v56 = vadd.f32 %v28838_v25, %v29850_v42  ;;  %v21744_v27 = vpop.f32.mrb[63].mxu1  ;;  %22352 = vmatmul.mubr.f32.vlgmr.msra.gmra.mrb[78].mxu1 %v24678_v31  ;;  %v12697_v60 = vadd.f32 %v12694_v52, %v12688_v53  ;;  %v29854_v58 = vld [vmem:[#allocation19_spill] sm:$0xff]  ;;  %v13299_v25 = vmul.f32 0.13967033, %v13296_v63 }
 0x420   :  { %v28846_v20 = vsub.f32 %v28755_v24, %v29847_v1  ;;  %v29852_v1 = vld [vmem:[#allocation24_spill] sm:$0xff]  ;;  %v28862_v51 = vadd.f32 %v28840_v22, %v29815_v49  ;;  %23610 = vmatpush3.bf16.msra.mxu1 %v28445_v21  ;;  %22252 = vmatprep.mubr.msk.f32.mxu0 %vm24602_vm0, %v29550_v18  ;;  %v12686_v26 = vmul.f32 0.13967033, %v29854_v58  ;;  %v13314_v53 = vmul.f32 0.17934024, %v29850_v42  ;;  %v28877_v12 = vpop.f32.mrb[64].mxu0 }
 0x421   :  { %29851 = vst [vmem:[#allocation28_spill] sm:$0xff] %v28854_v56  ;;  %v13290_v32 = vadd.f32 %v28840_v22, %v29852_v1  ;;  %v13310_v27 = vadd.f32 %v13307_v8, %v13301_v15  ;;  %v12680_v56 = vmul.f32 0.10218499, %v12677_v47  ;;  %22354 = vmatprep.mubr.msk.f32.mxu1 %vm24602_vm0, %v29550_v18  ;;  %23574 = vmatpush3.bf16.msra.mxu0 %v28777_v10  ;;  %v28879_v58 = vpop.f32.mrb[64].mxu1  ;;  %v29857_v8 = vld [vmem:[#allocation29_spill] sm:$0xff] }
 0x422   :  { %29853 = vst [vmem:[#allocation31_spill] sm:$0xff] %v28862_v51  ;;  %v12703_v52 = vadd.f32 %v28766_v54, %v12697_v60  ;;  %v29855_v51 = vld [vmem:[#allocation23_spill] sm:$0xff]  ;;  %22253 = vmatmul.mubr.f32.gmra.mrb[80].mxu0 %v24705_v44  ;;  %23611 = vmatprep.subr.bf16.mxu1 %v29556_v36  ;;  %v12695_v15 = vmul.f32 0.16847457, %v29857_v8  ;;  %v12678_v60 = vadd.f32 %v28877_v12, %v27857_v29  ;;  %v21645_v54 = vpop.f32.mrb[65].mxu0 }
 0x423   :  { %v13293_v1 = vmul.f32 0.10218499, %v13290_v32  ;;  %v28875_v49 = vadd.f32 %v28840_v22, %v29855_v51  ;;  %v13316_v47 = vadd.f32 %v13313_v61, %v13310_v27  ;;  %v12689_v63 = vadd.f32 %v12686_v26, %v12680_v56  ;;  %v21747_v32 = vpop.f32.mrb[65].mxu1  ;;  %22355 = vmatmul.mubr.f32.gmra.mrb[80].mxu1 %v24705_v44  ;;  %22255 = vmatprep.mubr.msk.f32.mxu0 %vm24602_vm0, %v29550_v18  ;;  %v29858_v22 = vld [vmem:[#allocation34_spill] sm:$0xff] }
 0x424   :  { %12707 = vst [vmem:[#allocation7 + $0x150] sm:$0xff] %v12703_v52  ;;  %v13297_v50 = vadd.f32 %v28877_v12, %v28203_v41  ;;  %v28894_v61 = vadd.f32 %v28877_v12, %v28552_v30  ;;  %22357 = vmatprep.mubr.msk.f32.mxu1 %vm24602_vm0, %v29550_v18  ;;  %23613 = vmatpush3.bf16.msra.mxu1 %v28784_v0  ;;  %v12687_v29 = vmul.f32 0.13967033, %v28582_v40  ;;  %v12681_v26 = vmul.f32 0.10218499, %v12678_v60 }
 0x425   :  { %29856 = vst [vmem:[#allocation14_spill] sm:$0xff] %v28875_v49  ;;  %v13308_v49 = vmul.f32 0.16847457, %v29858_v22  ;;  %v13302_v42 = vadd.f32 %v13299_v25, %v13293_v1  ;;  %13320 = vst [vmem:[#allocation7 + $0x168] sm:$0xff] %v13316_v47  ;;  %v12698_v56 = vadd.f32 %v12695_v15, %v12689_v63  ;;  %v13291_v25 = vadd.f32 %v28879_v58, %v27859_v4 }
 0x426   :  { %23575 = vmatprep.subr.bf16.mxu0 %v29556_v36  ;;  %23614 = vmatprep.subr.bf16.mxu1 %v29556_v36  ;;  %v12696_v22 = vmul.f32 0.16847457, %v28569_v14  ;;  %v13300_v52 = vmul.f32 0.13967033, %v13297_v50  ;;  %v28907_v1 = vadd.f32 %v28879_v58, %v28205_v46  ;;  %v12690_v8 = vadd.f32 %v12687_v29, %v12681_v26  ;;  %v29872_v29 = vld [vmem:[#allocation12_spill] sm:$0xff] }
 0x427   :  { %v13311_v27 = vadd.f32 %v13308_v49, %v13302_v42  ;;  %22256 = vmatmul.mubr.f32.gmra.mrb[82].mxu0 %v24742_v5  ;;  %v12704_v40 = vadd.f32 %v28769_v16, %v12698_v56  ;;  %v13294_v15 = vmul.f32 0.10218499, %v13291_v25  ;;  %v28913_v4 = vadd.f32 %v28879_v58, %v28554_v34  ;;  %22358 = vmatmul.mubr.f32.gmra.mrb[82].mxu1 %v24742_v5 }
 0x428   :  { %23577 = vmatpush3.bf16.msra.mxu0 %v28823_v6  ;;  %22368 = vmatprep.mubr.msk.f32.mxu0 %vm24602_vm0, %v29550_v18  ;;  %v29859_v14 = vand.u32 4294901760, %v28763_v28  ;;  %v29860_v16 = vand.u32 4294901760, %v28789_v7  ;;  %v17746_v42 = vand.u32 4294901760, %v28829_v33  ;;  %v17127_v47 = vand.u32 4294901760, %v28834_v38 }
 0x429   :  { %v13317_v49 = vadd.f32 %v13314_v53, %v13311_v27  ;;  %22470 = vmatprep.mubr.msk.f32.mxu1 %vm24602_vm0, %v29550_v18  ;;  %v13309_v63 = vmul.f32 0.16847457, %v28588_v43  ;;  %12708 = vst [vmem:[#allocation7 + $0x158] sm:$0xff] %v12704_v40  ;;  %v12699_v60 = vadd.f32 %v12696_v22, %v12690_v8  ;;  %v13303_v53 = vadd.f32 %v13300_v52, %v13294_v15  ;;  %v29873_v22 = vld [vmem:[#allocation35_spill] sm:$0xff]  ;;  %v29875_v15 = vld [vmem:[#allocation17_spill] sm:$0xff] }
 0x42a   :  { %v23579_v50 = vpack.c.bf16 %v29860_v16, %v29859_v14  ;;  %23578 = vmatprep.subr.bf16.mxu0 %v29556_v36  ;;  %v17134_v54 = vand.u32 4294901760, %v28846_v20  ;;  %v13315_v28 = vmul.f32 0.17934024, %v28552_v30  ;;  %v23618_v43 = vpack.c.bf16 %v17746_v42, %v28599_v19  ;;  %v29876_v14 = vld [vmem:[#allocation36_spill] sm:$0xff] }
 0x42b   :  { %13321 = vst [vmem:[#allocation7 + $0x170] sm:$0xff] %v13317_v49  ;;  %22369 = vmatmul.mubr.f32.vlgmr.msra.gmra.mrb[84].mxu0 %v24733_v62  ;;  %v12705_v7 = vadd.f32 %v28772_v45, %v12699_v60  ;;  %v13312_v32 = vadd.f32 %v13309_v63, %v13303_v53  ;;  %22471 = vmatmul.mubr.f32.vlgmr.msra.gmra.mrb[84].mxu1 %v24733_v62  ;;  %v13920_v27 = vmul.f32 0.16847457, %v29873_v22  ;;  %v13911_v16 = vmul.f32 0.13967033, %v29876_v14 }
 0x42c   :  { %22371 = vmatprep.mubr.msk.f32.mxu0 %vm24602_vm0, %v29550_v18  ;;  %23616 = vmatpush3.bf16.msra.mxu1 %v28502_v39  ;;  %v23582_v38 = vpack.c.bf16 %v17134_v54, %v17127_v47  ;;  %v23585_v62 = vpack.c.bf16 %v28735_v13, %v28730_v2  ;;  %v29877_v47 = vld [vmem:[#allocation37_spill] sm:$0xff] }
 0x42d   :  { %23580 = vmatpush3.bf16.msra.mxu0 %v23579_v50  ;;  %12709 = vst [vmem:[#allocation7 + $0x160] sm:$0xff] %v12705_v7  ;;  %v13318_v33 = vadd.f32 %v13315_v28, %v13312_v32  ;;  %22473 = vmatprep.mubr.msk.f32.mxu1 %vm24602_vm0, %v29550_v18  ;;  %v14533_v63 = vmul.f32 0.16847457, %v29877_v47  ;;  %v29878_v28 = vld [vmem:[#allocation25_spill] sm:$0xff]  ;;  %v29879_v32 = vld [vmem:[#allocation30_spill] sm:$0xff] }
 0x42e   :  { %23617 = vmatprep.subr.bf16.mxu1 %v29556_v36  ;;  %23581 = vmatprep.subr.bf16.mxu0 %v29556_v36 }
 0x42f   :  { %22372 = vmatmul.mubr.f32.gmra.mrb[86].mxu0 %v24753_v9  ;;  %13322 = vst [vmem:[#allocation7 + $0x178] sm:$0xff] %v13318_v33  ;;  %22474 = vmatmul.mubr.f32.gmra.mrb[86].mxu1 %v24753_v9  ;;  %v23624_v9 = vpack.c.bf16 %v28748_v35, %v28399_v48  ;;  %v29864_v48 = vand.u32 4294901760, %v28748_v35  ;;  %v29880_v33 = vld [vmem:[#allocation18_spill] sm:$0xff] }
 0x430   :  { %22374 = vmatprep.mubr.msk.f32.mxu0 %vm24602_vm0, %v29550_v18  ;;  %22476 = vmatprep.mubr.msk.f32.mxu1 %vm24602_vm0, %v29550_v18 }
 0x431   :  { %23619 = vmatpush3.bf16.msra.mxu1 %v23618_v43  ;;  %23583 = vmatpush3.bf16.msra.mxu0 %v23582_v38 }
 0x432   :  { %23620 = vmatprep.subr.bf16.mxu1 %v29556_v36  ;;  %23584 = vmatprep.subr.bf16.mxu0 %v29556_v36 }
 0x433   :  { %22375 = vmatmul.mubr.f32.gmra.mrb[88].mxu0 %v24779_v23  ;;  %22477 = vmatmul.mubr.f32.gmra.mrb[88].mxu1 %v24779_v23  ;;  %v23588_v23 = vpack.c.bf16 %v28755_v24, %v28750_v11 }
 0x434   :  { %22385 = vmatprep.mubr.msk.f32.mxu0 %vm24602_vm0, %v29550_v18  ;;  %22487 = vmatprep.mubr.msk.f32.mxu1 %vm24602_vm0, %v29550_v18 }
 0x437   :  { %22386 = vmatmul.mubr.f32.vlgmr.msra.gmra.mrb[84].mxu0 %v24678_v31  ;;  %22488 = vmatmul.mubr.f32.vlgmr.msra.gmra.mrb[90].mxu1 %v24678_v31 }
 0x438   :  { %22388 = vmatprep.mubr.msk.f32.mxu0 %vm24602_vm0, %v29550_v18  ;;  %23622 = vmatpush3.bf16.msra.mxu1 %v28635_v59  ;;  %v29865_v59 = vand.u32 4294901760, %v28750_v11  ;;  %v29064_v11 = vmul.f32 0.17934024, %v29855_v51 }
 0x439   :  { %23586 = vmatpush3.bf16.msra.mxu0 %v23585_v62  ;;  %22490 = vmatprep.mubr.msk.f32.mxu1 %vm24602_vm0, %v29550_v18 }
 0x43a   :  { %23623 = vmatprep.subr.bf16.mxu1 %v29556_v36  ;;  %23587 = vmatprep.subr.bf16.mxu0 %v29556_v36 }
 0x43b   :  { %22389 = vmatmul.mubr.f32.gmra.mrb[86].mxu0 %v24705_v44  ;;  %22491 = vmatmul.mubr.f32.gmra.mrb[92].mxu1 %v24705_v44 }
 0x43c   :  { %22391 = vmatprep.mubr.msk.f32.mxu0 %vm24602_vm0, %v29550_v18  ;;  %22493 = vmatprep.mubr.msk.f32.mxu1 %vm24602_vm0, %v29550_v18 }
 0x43d   :  { %23625 = vmatpush3.bf16.msra.mxu1 %v23624_v9  ;;  %23589 = vmatpush3.bf16.msra.mxu0 %v23588_v23  ;;  %v29881_v23 = vld [vmem:[#allocation28_spill] sm:$0xff] }
 0x43e   :  { %23626 = vmatprep.subr.bf16.mxu1 %v29556_v36  ;;  %23590 = vmatprep.subr.bf16.mxu0 %v29556_v36 }
 0x43f   :  { %22392 = vmatmul.mubr.f32.gmra.mrb[88].mxu0 %v24742_v5  ;;  %22494 = vmatmul.mubr.f32.gmra.mrb[94].mxu1 %v24742_v5 }
 0x440   :  { %22402 = vmatprep.mubr.msk.f32.mxu0 %vm24602_vm0, %v29550_v18  ;;  %22504 = vmatprep.mubr.msk.f32.mxu1 %vm24602_vm0, %v29550_v18 }
 0x443   :  { %22403 = vmatmul.mubr.f32.vlgmr.msra.gmra.mrb[84].mxu0 %v24689_v37  ;;  %22505 = vmatmul.mubr.f32.vlgmr.msra.gmra.mrb[96].mxu1 %v24689_v37  ;;  %v29861_v37 = vand.u32 4294901760, %v28730_v2  ;;  %v29866_v2 = vand.u32 4294901760, %v28755_v24 }
 0x444   :  { %22405 = vmatprep.mubr.msk.f32.mxu0 %vm24602_vm0, %v29550_v18  ;;  %23628 = vmatpush3.bf16.msra.mxu1 %v28445_v21 }
 0x445   :  { %23592 = vmatpush3.bf16.msra.mxu0 %v28777_v10  ;;  %22507 = vmatprep.mubr.msk.f32.mxu1 %vm24602_vm0, %v29550_v18 }
 0x446   :  { %23629 = vmatprep.subr.bf16.mxu1 %v29556_v36  ;;  %23593 = vmatprep.subr.bf16.mxu0 %v29556_v36 }
 0x447   :  { %22406 = vmatmul.mubr.f32.gmra.mrb[86].mxu0 %v29625_v57  ;;  %22508 = vmatmul.mubr.f32.gmra.mrb[98].mxu1 %v29625_v57  ;;  %v29862_v57 = vand.u32 4294901760, %v28735_v13  ;;  %v29867_v13 = vld [vmem:[#allocation13_spill] sm:$0xff] }
 0x448   :  { %22408 = vmatprep.mubr.msk.f32.mxu0 %vm24602_vm0, %v29550_v18  ;;  %22510 = vmatprep.mubr.msk.f32.mxu1 %vm24602_vm0, %v29550_v18 }
 0x449   :  { %23631 = vmatpush3.bf16.msra.mxu1 %v28784_v0  ;;  %23595 = vmatpush3.bf16.msra.mxu0 %v28823_v6  ;;  %v23597_v39 = vpack.c.bf16 %v29862_v57, %v29861_v37  ;;  %v13921_v37 = vmul.f32 0.16847457, %v29881_v23 }
 0x44a   :  { %23632 = vmatprep.subr.bf16.mxu1 %v29556_v36  ;;  %23596 = vmatprep.subr.bf16.mxu0 %v29556_v36 }
 0x44b   :  { %22409 = vmatmul.mubr.f32.gmra.mrb[88].mxu0 %v29626_v3  ;;  %22511 = vmatmul.mubr.f32.gmra.mrb[100].mxu1 %v29626_v3  ;;  %v29863_v3 = vld [vmem:[#allocation20_spill] sm:$0xff] }
 0x44c   :  { %22419 = vmatprep.mubr.msk.f32.mxu0 %vm24602_vm0, %v29550_v18  ;;  %22521 = vmatprep.mubr.msk.f32.mxu1 %vm24602_vm0, %v29550_v18  ;;  %v23636_v19 = vpack.c.bf16 %v29864_v48, %v29863_v3 }
 0x44f   :  { %22420 = vmatmul.mubr.f32.vlgmr.msra.gmra.mrb[84].mxu0 %v29631_v55  ;;  %22522 = vmatmul.mubr.f32.vlgmr.msra.gmra.mrb[102].mxu1 %v29631_v55  ;;  %v23600_v55 = vpack.c.bf16 %v29866_v2, %v29865_v59  ;;  %v29883_v59 = vld [vmem:[#allocation31_spill] sm:$0xff] }
 0x450   :  { %22422 = vmatprep.mubr.msk.f32.mxu0 %vm24602_vm0, %v29550_v18  ;;  %23634 = vmatpush3.bf16.msra.mxu1 %v28696_v17  ;;  %v29868_v17 = vld [vmem:[#allocation15_spill] sm:$0xff]  ;;  %v13912_v2 = vmul.f32 0.13967033, %v29883_v59 }
 0x451   :  { %23598 = vmatpush3.bf16.msra.mxu0 %v23597_v39  ;;  %22524 = vmatprep.mubr.msk.f32.mxu1 %vm24602_vm0, %v29550_v18  ;;  %v29882_v39 = vld [vmem:[#allocation32_spill] sm:$0xff] }
 0x452   :  { %23635 = vmatprep.subr.bf16.mxu1 %v29556_v36  ;;  %23599 = vmatprep.subr.bf16.mxu0 %v29556_v36 }
 0x453   :  { %22423 = vmatmul.mubr.f32.gmra.mrb[86].mxu0 %v29867_v13  ;;  %22525 = vmatmul.mubr.f32.gmra.mrb[104].mxu1 %v29867_v13 }
 0x454   :  { %22425 = vmatprep.mubr.msk.f32.mxu0 %vm24602_vm0, %v29550_v18  ;;  %22527 = vmatprep.mubr.msk.f32.mxu1 %vm24602_vm0, %v29550_v18 }
 0x455   :  { %23637 = vmatpush3.bf16.msra.mxu1 %v23636_v19  ;;  %23601 = vmatpush3.bf16.msra.mxu0 %v23600_v55 }
 0x456   :  { %23638 = vmatprep.subr.bf16.mxu1 %v29556_v36  ;;  %23602 = vmatprep.subr.bf16.mxu0 %v29556_v36 }
 0x457   :  { %22426 = vmatmul.mubr.f32.gmra.mrb[88].mxu0 %v29868_v17  ;;  %22528 = vmatmul.mubr.f32.gmra.mrb[106].mxu1 %v29868_v17 }
 0x458   :  { %22436 = vmatprep.mubr.msk.f32.mxu0 %vm24602_vm0, %v29550_v18  ;;  %22538 = vmatprep.mubr.msk.f32.mxu1 %vm24602_vm0, %v29550_v18 }
 0x45b   :  { %22437 = vmatmul.mubr.f32.vlgmr.msra.gmra.mrb[84].mxu0 %v24678_v31  ;;  %22539 = vmatmul.mubr.f32.vlgmr.msra.gmra.mrb[108].mxu1 %v24678_v31 }
 0x45c   :  { %22439 = vmatprep.mubr.msk.f32.mxu0 %vm24602_vm0, %v29550_v18  ;;  %23640 = vmatpush3.bf16.msra.mxu1 %v28445_v21  ;;  %v29869_v21 = vld [vmem:[#allocation33_spill] sm:$0xff] }
 0x45d   :  { %23604 = vmatpush3.bf16.msra.mxu0 %v28777_v10  ;;  %22541 = vmatprep.mubr.msk.f32.mxu1 %vm24602_vm0, %v29550_v18  ;;  %v13926_v35 = vmul.f32 0.17934024, %v29869_v21  ;;  %v29871_v10 = vld [vmem:[#allocation22_spill] sm:$0xff] }
 0x45e   :  { %23641 = vmatprep.subr.bf16.mxu1 %v29556_v36  ;;  %23605 = vmatprep.subr.bf16.mxu0 %v29556_v36  ;;  %v29870_v36 = vld [vmem:[#allocation16_spill] sm:$0xff] }
 0x45f   :  { %22440 = vmatmul.mubr.f32.gmra.mrb[86].mxu0 %v24705_v44  ;;  %22542 = vmatmul.mubr.f32.gmra.mrb[110].mxu1 %v24705_v44  ;;  %v14539_v45 = vmul.f32 0.17934024, %v29870_v36 }
 0x460   :  { %22442 = vmatprep.mubr.msk.f32.mxu0 %vm24602_vm0, %v29550_v18  ;;  %22544 = vmatprep.mubr.msk.f32.mxu1 %vm24602_vm0, %v29550_v18  ;;  %v29066_v24 = vpop.f32.mrb[66].mxu0 }
 0x461   :  { %23643 = vmatpush3.bf16.msra.mxu1 %v28784_v0  ;;  %23607 = vmatpush3.bf16.msra.mxu0 %v28823_v6  ;;  %v13902_v20 = vadd.f32 %v29066_v24, %v29871_v10  ;;  %v14521_v56 = vadd.f32 %v29066_v24, %v29872_v29  ;;  %v29076_v0 = vadd.f32 %v29066_v24, %v29870_v36  ;;  %v21843_v25 = vpop.f32.mrb[67].mxu0  ;;  %v29874_v6 = vld [vmem:[#allocation26_spill] sm:$0xff] }
 0x462   :  { %v29078_v26 = vpop.f32.mrb[66].mxu1  ;;  %v29884_v10 = vld [vmem:[#allocation14_spill] sm:$0xff] }
 0x463   :  { %22443 = vmatmul.mubr.f32.gmra.mrb[88].mxu0 %v24742_v5  ;;  %v14515_v52 = vadd.f32 %v29078_v26, %v29874_v6  ;;  %v29086_v40 = vadd.f32 %v29078_v26, %v29869_v21  ;;  %v21945_v8 = vpop.f32.mrb[67].mxu1  ;;  %22545 = vmatmul.mubr.f32.gmra.mrb[112].mxu1 %v24742_v5  ;;  %v29093_v49 = vadd.f32 %v29078_v26, %v29875_v15  ;;  %v13905_v50 = vmul.f32 0.10218499, %v13902_v20  ;;  %v29885_v6 = vld [vmem:[#allocation21_spill] sm:$0xff] }
 0x464   :  { %22453 = vmatprep.mubr.msk.f32.mxu0 %vm24602_vm0, %v29550_v18  ;;  %v14524_v42 = vmul.f32 0.13967033, %v14521_v56  ;;  %22555 = vmatprep.mubr.msk.f32.mxu1 %vm24602_vm0, %v29550_v18  ;;  %v29099_v53 = vpop.f32.mrb[68].mxu0  ;;  %v14534_v20 = vmul.f32 0.16847457, %v29884_v10 }
 0x465   :  { %v14518_v60 = vmul.f32 0.10218499, %v14515_v52  ;;  %v13914_v54 = vadd.f32 %v13911_v16, %v13905_v50  ;;  %v13903_v7 = vadd.f32 %v29099_v53, %v29878_v28  ;;  %v14522_v43 = vadd.f32 %v29099_v53, %v29879_v32  ;;  %v21846_v9 = vpop.f32.mrb[69].mxu0 }
 0x466   :  { %v29107_v38 = vadd.f32 %v29099_v53, %v29880_v33  ;;  %v29109_v62 = vpop.f32.mrb[68].mxu1 }
 0x467   :  { %22454 = vmatmul.mubr.f32.vlgmr.msra.gmra.mrb[84].mxu0 %v24678_v31  ;;  %v14527_v57 = vadd.f32 %v14524_v42, %v14518_v60  ;;  %v14516_v3 = vadd.f32 %v29109_v62, %v29882_v39  ;;  %v29117_v48 = vadd.f32 %v29109_v62, %v29855_v51  ;;  %v21948_v19 = vpop.f32.mrb[69].mxu1  ;;  %22556 = vmatmul.mubr.f32.vlgmr.msra.gmra.mrb[114].mxu1 %v24678_v31  ;;  %v13906_v13 = vmul.f32 0.10218499, %v13903_v7 }
 0x468   :  { %22456 = vmatprep.mubr.msk.f32.mxu0 %vm24602_vm0, %v29550_v18  ;;  %v13923_v55 = vadd.f32 %v13920_v27, %v13914_v54  ;;  %v14525_v17 = vmul.f32 0.13967033, %v14522_v43  ;;  %22558 = vmatprep.mubr.msk.f32.mxu1 %vm24602_vm0, %v29550_v18  ;;  %v29130_v31 = vadd.f32 %v29109_v62, %v29885_v6  ;;  %v13913_v42 = vmul.f32 0.13967033, %v28907_v1 }
 0x469   :  { %v14536_v56 = vadd.f32 %v14533_v63, %v14527_v57  ;;  %v14519_v25 = vmul.f32 0.10218499, %v14516_v3  ;;  %v29126_v22 = vpop.f32.mrb[70].mxu0  ;;  %v13915_v8 = vadd.f32 %v13912_v2, %v13906_v13  ;;  %v14540_v1 = vmul.f32 0.17934024, %v29880_v33 }
 0x46a   :  { %v13929_v52 = vadd.f32 %v13926_v35, %v13923_v55  ;;  %v13904_v27 = vadd.f32 %v29126_v22, %v28203_v41  ;;  %v14523_v14 = vadd.f32 %v29126_v22, %v28552_v30  ;;  %v29136_v16 = vpop.f32.mrb[70].mxu1  ;;  %v21849_v50 = vpop.f32.mrb[71].mxu0  ;;  %v29142_v60 = vadd.f32 %v29126_v22, %v28877_v12 }
 0x46b   :  { %22457 = vmatmul.mubr.f32.gmra.mrb[86].mxu0 %v24705_v44  ;;  %v14542_v47 = vadd.f32 %v14539_v45, %v14536_v56  ;;  %v14528_v63 = vadd.f32 %v14525_v17, %v14519_v25  ;;  %v21951_v35 = vpop.f32.mrb[71].mxu1  ;;  %22559 = vmatmul.mubr.f32.gmra.mrb[116].mxu1 %v24705_v44  ;;  %v13924_v41 = vadd.f32 %v13921_v37, %v13915_v8  ;;  %v13922_v43 = vmul.f32 0.16847457, %v28894_v61 }
 0x46c   :  { %22459 = vmatprep.mubr.msk.f32.mxu0 %vm24602_vm0, %v29550_v18  ;;  %13933 = vst [vmem:[#allocation7 + $0x180] sm:$0xff] %v13929_v52  ;;  %v13907_v54 = vmul.f32 0.10218499, %v13904_v27  ;;  %v14526_v28 = vmul.f32 0.13967033, %v14523_v14  ;;  %v14517_v7 = vadd.f32 %v29136_v16, %v28205_v46  ;;  %22561 = vmatprep.mubr.msk.f32.mxu1 %vm24602_vm0, %v29550_v18  ;;  %v29154_v44 = vadd.f32 %v29136_v16, %v28554_v34 }
 0x46d   :  { %14546 = vst [vmem:[#allocation7 + $0x198] sm:$0xff] %v14542_v47  ;;  %v14537_v45 = vadd.f32 %v14534_v20, %v14528_v63  ;;  %v13930_v9 = vadd.f32 %v29064_v11, %v13924_v41  ;;  %v29162_v18 = vadd.f32 %v29136_v16, %v28879_v58  ;;  %v13928_v57 = vmul.f32 0.17934024, %v28554_v34 }
 0x46e   :  { %v13916_v23 = vadd.f32 %v13913_v42, %v13907_v54  ;;  %v14520_v37 = vmul.f32 0.10218499, %v14517_v7  ;;  %v14535_v39 = vmul.f32 0.16847457, %v28913_v4  ;;  %v14541_v11 = vmul.f32 0.17934024, %v28877_v12 }
 0x46f   :  { %22460 = vmatmul.mubr.f32.gmra.mrb[88].mxu0 %v24742_v5  ;;  %v14543_v46 = vadd.f32 %v14540_v1, %v14537_v45  ;;  %22562 = vmatmul.mubr.f32.gmra.mrb[118].mxu1 %v24742_v5  ;;  %13934 = vst [vmem:[#allocation7 + $0x188] sm:$0xff] %v13930_v9  ;;  %v15137_v52 = vmul.f32 0.13967033, %v29086_v40  ;;  %v15152_v14 = vmul.f32 0.17934024, %v29875_v15 }
 0x470   :  { %v13925_v3 = vadd.f32 %v13922_v43, %v13916_v23  ;;  %v14529_v61 = vadd.f32 %v14526_v28, %v14520_v37  ;;  %v15765_v50 = vmul.f32 0.17934024, %v29066_v24  ;;  %v15759_v63 = vmul.f32 0.16847457, %v29093_v49 }
 0x471   :  { %14547 = vst [vmem:[#allocation7 + $0x1a0] sm:$0xff] %v14543_v46  ;;  %v15138_v45 = vmul.f32 0.13967033, %v29117_v48  ;;  %v15147_v48 = vmul.f32 0.16847457, %v29107_v38 }
 0x472   :  { %v13931_v19 = vadd.f32 %v13928_v57, %v13925_v3  ;;  %v14538_v59 = vadd.f32 %v14535_v39, %v14529_v61  ;;  %v15153_v39 = vmul.f32 0.17934024, %v29885_v6 }
 0x474   :  { %13935 = vst [vmem:[#allocation7 + $0x190] sm:$0xff] %v13931_v19  ;;  %v14544_v2 = vadd.f32 %v14541_v11, %v14538_v59  ;;  %v15760_v19 = vmul.f32 0.16847457, %v29130_v31 }
 0x476   :  { %14548 = vst [vmem:[#allocation7 + $0x1a8] sm:$0xff] %v14544_v2 }
 0x4a9   :  { %v29167_v5 = vpop.f32.mrb[72].mxu0 }
 0x4aa   :  { %v15128_v55 = vadd.f32 %v29167_v5, %v29872_v29  ;;  %v15747_v13 = vadd.f32 %v29167_v5, %v29870_v36  ;;  %v29175_v4 = vadd.f32 %v29167_v5, %v29066_v24  ;;  %v29177_v17 = vpop.f32.mrb[72].mxu1  ;;  %v22047_v10 = vpop.f32.mrb[73].mxu0 }
 0x4ab   :  { %v15741_v20 = vadd.f32 %v29177_v17, %v29869_v21  ;;  %v29183_v56 = vadd.f32 %v29177_v17, %v29875_v15  ;;  %v29187_v29 = vadd.f32 %v29177_v17, %v29078_v26  ;;  %v22149_v25 = vpop.f32.mrb[73].mxu1  ;;  %v15146_v21 = vmul.f32 0.16847457, %v29076_v0 }
 0x4ac   :  { %v15131_v8 = vmul.f32 0.10218499, %v15128_v55  ;;  %v15750_v27 = vmul.f32 0.13967033, %v15747_v13  ;;  %v15139_v13 = vmul.f32 0.13967033, %v29154_v44 }
 0x4ad   :  { %v15744_v42 = vmul.f32 0.10218499, %v15741_v20  ;;  %v29194_v35 = vpop.f32.mrb[74].mxu0  ;;  %v15766_v44 = vmul.f32 0.17934024, %v29099_v53 }
 0x4ae   :  { %v15140_v47 = vadd.f32 %v15137_v52, %v15131_v8  ;;  %v29196_v41 = vpop.f32.mrb[74].mxu1  ;;  %v15129_v40 = vadd.f32 %v29194_v35, %v29879_v32  ;;  %v15748_v28 = vadd.f32 %v29194_v35, %v29880_v33  ;;  %v29204_v7 = vadd.f32 %v29194_v35, %v29099_v53  ;;  %v22050_v1 = vpop.f32.mrb[75].mxu0 }
 0x4af   :  { %v15753_v54 = vadd.f32 %v15750_v27, %v15744_v42  ;;  %v22152_v0 = vpop.f32.mrb[75].mxu1  ;;  %v15742_v43 = vadd.f32 %v29196_v41, %v29855_v51  ;;  %v29211_v9 = vadd.f32 %v29196_v41, %v29885_v6  ;;  %v29215_v46 = vadd.f32 %v29196_v41, %v29109_v62 }
 0x4b0   :  { %v15149_v49 = vadd.f32 %v15146_v21, %v15140_v47  ;;  %v15132_v23 = vmul.f32 0.10218499, %v15129_v40  ;;  %v15751_v37 = vmul.f32 0.13967033, %v15748_v28  ;;  %v15148_v42 = vmul.f32 0.16847457, %v29142_v60 }
 0x4b1   :  { %v15762_v32 = vadd.f32 %v15759_v63, %v15753_v54  ;;  %v29217_v57 = vpop.f32.mrb[76].mxu0  ;;  %v15745_v61 = vmul.f32 0.10218499, %v15742_v43  ;;  %v15761_v1 = vmul.f32 0.16847457, %v29162_v18 }
 0x4b2   :  { %v15155_v3 = vadd.f32 %v15152_v14, %v15149_v49  ;;  %v15141_v11 = vadd.f32 %v15138_v45, %v15132_v23  ;;  %v15130_v59 = vadd.f32 %v29217_v57, %v28552_v30  ;;  %v29224_v2 = vpop.f32.mrb[76].mxu1  ;;  %v22053_v55 = vpop.f32.mrb[77].mxu0  ;;  %v15749_v20 = vadd.f32 %v29217_v57, %v28877_v12 }
 0x4b3   :  { %v15768_v51 = vadd.f32 %v15765_v50, %v15762_v32  ;;  %v15754_v10 = vadd.f32 %v15751_v37, %v15745_v61  ;;  %v29231_v38 = vadd.f32 %v29217_v57, %v29126_v22  ;;  %v22155_v25 = vpop.f32.mrb[77].mxu1  ;;  %v15743_v30 = vadd.f32 %v29224_v2, %v28554_v34 }
 0x4b4   :  { %15159 = vst [vmem:[#allocation7 + $0x1b0] sm:$0xff] %v15155_v3  ;;  %v15150_v31 = vadd.f32 %v15147_v48, %v15141_v11  ;;  %v15133_v52 = vmul.f32 0.10218499, %v15130_v59  ;;  %v29237_v8 = vadd.f32 %v29224_v2, %v28879_v58  ;;  %v15752_v14 = vmul.f32 0.13967033, %v15749_v20 }
 0x4b5   :  { %15772 = vst [vmem:[#allocation7 + $0x1c8] sm:$0xff] %v15768_v51  ;;  %v15763_v27 = vadd.f32 %v15760_v19, %v15754_v10  ;;  %v29242_v50 = vadd.f32 %v29224_v2, %v29136_v16  ;;  %v15746_v63 = vmul.f32 0.10218499, %v15743_v30  ;;  %v15154_v34 = vmul.f32 0.17934024, %v28879_v58 }
 0x4b6   :  { %v15156_v21 = vadd.f32 %v15153_v39, %v15150_v31  ;;  %v15142_v47 = vadd.f32 %v15139_v13, %v15133_v52  ;;  %v15767_v0 = vmul.f32 0.17934024, %v29126_v22  ;;  %v16378_v59 = vmul.f32 0.17934024, %v29078_v26 }
 0x4b7   :  { %v15769_v54 = vadd.f32 %v15766_v44, %v15763_v27  ;;  %v15755_v28 = vadd.f32 %v15752_v14, %v15746_v63  ;;  %v16379_v13 = vmul.f32 0.17934024, %v29109_v62  ;;  %v16985_v10 = vmul.f32 0.16847457, %v29187_v29 }
 0x4b8   :  { %15160 = vst [vmem:[#allocation7 + $0x1b8] sm:$0xff] %v15156_v21  ;;  %v15151_v40 = vadd.f32 %v15148_v42, %v15142_v47  ;;  %v16991_v29 = vmul.f32 0.17934024, %v29167_v5  ;;  %v16364_v47 = vmul.f32 0.13967033, %v29211_v9 }
 0x4b9   :  { %15773 = vst [vmem:[#allocation7 + $0x1d0] sm:$0xff] %v15769_v54  ;;  %v15764_v49 = vadd.f32 %v15761_v1, %v15755_v28 }
 0x4ba   :  { %v15157_v45 = vadd.f32 %v15154_v34, %v15151_v40  ;;  %v16373_v40 = vmul.f32 0.16847457, %v29204_v7  ;;  %v16365_v7 = vmul.f32 0.13967033, %v29237_v8 }
 0x4bb   :  { %v15770_v43 = vadd.f32 %v15767_v0, %v15764_v49 }
 0x4bc   :  { %15161 = vst [vmem:[#allocation7 + $0x1c0] sm:$0xff] %v15157_v45 }
 0x4bd   :  { %15774 = vst [vmem:[#allocation7 + $0x1d8] sm:$0xff] %v15770_v43 }
 0x4f1   :  { %v29248_v60 = vpop.f32.mrb[78].mxu0 }
 0x4f2   :  { %v16354_v32 = vadd.f32 %v29248_v60, %v29870_v36  ;;  %v16973_v23 = vadd.f32 %v29248_v60, %v29066_v24  ;;  %v29256_v37 = vadd.f32 %v29248_v60, %v29167_v5  ;;  %v16951_v18 = vpop.f32.mrb[78].mxu1  ;;  %v22251_v39 = vpop.f32.mrb[79].mxu0  ;;  %v16363_v36 = vmul.f32 0.13967033, %v29183_v56 }
 0x4f3   :  { %v16967_v48 = vadd.f32 %v16951_v18, %v29875_v15  ;;  %v29260_v3 = vadd.f32 %v16951_v18, %v29078_v26  ;;  %v29263_v61 = vadd.f32 %v16951_v18, %v29177_v17  ;;  %v22353_v51 = vpop.f32.mrb[79].mxu1  ;;  %v16372_v15 = vmul.f32 0.16847457, %v29175_v4 }
 0x4f4   :  { %v16357_v11 = vmul.f32 0.10218499, %v16354_v32  ;;  %v16976_v19 = vmul.f32 0.13967033, %v16973_v23  ;;  %v16986_v18 = vmul.f32 0.16847457, %v29215_v46 }
 0x4f5   :  { %v16970_v55 = vmul.f32 0.10218499, %v16967_v48  ;;  %v29270_v25 = vpop.f32.mrb[80].mxu0 }
 0x4f6   :  { %v16366_v20 = vadd.f32 %v16363_v36, %v16357_v11  ;;  %v16957_v31 = vpop.f32.mrb[80].mxu1  ;;  %v16355_v30 = vadd.f32 %v29270_v25, %v29880_v33  ;;  %v16974_v56 = vadd.f32 %v29270_v25, %v29099_v53  ;;  %v29278_v44 = vadd.f32 %v29270_v25, %v29194_v35  ;;  %v22254_v27 = vpop.f32.mrb[81].mxu0 }
 0x4f7   :  { %v16979_v52 = vadd.f32 %v16976_v19, %v16970_v55  ;;  %v22356_v14 = vpop.f32.mrb[81].mxu1  ;;  %v16968_v4 = vadd.f32 %v16957_v31, %v29885_v6  ;;  %v29283_v21 = vadd.f32 %v16957_v31, %v29109_v62  ;;  %v29288_v1 = vadd.f32 %v16957_v31, %v29196_v41 }
 0x4f8   :  { %v16375_v42 = vadd.f32 %v16372_v15, %v16366_v20  ;;  %v16358_v63 = vmul.f32 0.10218499, %v16355_v30  ;;  %v16977_v54 = vmul.f32 0.13967033, %v16974_v56  ;;  %v16992_v19 = vmul.f32 0.17934024, %v29194_v35 }
 0x4f9   :  { %v16988_v33 = vadd.f32 %v16985_v10, %v16979_v52  ;;  %v16971_v28 = vmul.f32 0.10218499, %v16968_v4  ;;  %v16374_v15 = vmul.f32 0.16847457, %v29231_v38  ;;  %v16987_v56 = vmul.f32 0.16847457, %v29242_v50 }
 0x4fa   :  { %v16381_v34 = vadd.f32 %v16378_v59, %v16375_v42  ;;  %v29290_v0 = vpop.f32.mrb[82].mxu0  ;;  %v16963_v45 = vpop.f32.mrb[82].mxu1  ;;  %v16367_v6 = vadd.f32 %v16364_v47, %v16358_v63  ;;  %v16380_v27 = vmul.f32 0.17934024, %v29136_v16  ;;  %v16993_v42 = vmul.f32 0.17934024, %v29217_v57 }
 0x4fb   :  { %v16994_v49 = vadd.f32 %v16991_v29, %v16988_v33  ;;  %v16356_v43 = vadd.f32 %v29290_v0, %v28877_v12  ;;  %v16975_v9 = vadd.f32 %v29290_v0, %v29126_v22  ;;  %v22257_v32 = vpop.f32.mrb[83].mxu0  ;;  %v22359_v23 = vpop.f32.mrb[83].mxu1  ;;  %v16980_v39 = vadd.f32 %v16977_v54, %v16971_v28 }
 0x4fc   :  { %16385 = vst [vmem:[#allocation7 + $0x1e0] sm:$0xff] %v16381_v34  ;;  %v29300_v48 = vadd.f32 %v29290_v0, %v29217_v57  ;;  %v16376_v51 = vadd.f32 %v16373_v40, %v16367_v6  ;;  %v16969_v12 = vadd.f32 %v16963_v45, %v28879_v58  ;;  %v29305_v55 = vadd.f32 %v16963_v45, %v29136_v16 }
 0x4fd   :  { %16998 = vst [vmem:[#allocation7 + $0x1f8] sm:$0xff] %v16994_v49  ;;  %v16359_v36 = vmul.f32 0.10218499, %v16356_v43  ;;  %v16978_v11 = vmul.f32 0.13967033, %v16975_v9  ;;  %v16989_v59 = vadd.f32 %v16986_v18, %v16980_v39  ;;  %v29308_v46 = vadd.f32 %v16963_v45, %v29224_v2 }
 0x4fe   :  { %v17696_v8 = vpop.f32.mrb[84].mxu1  ;;  %v16382_v10 = vadd.f32 %v16379_v13, %v16376_v51  ;;  %v16972_v31 = vmul.f32 0.10218499, %v16969_v12 }
 0x4ff   :  { %v16368_v20 = vadd.f32 %v16365_v7, %v16359_v36  ;;  %v22472_v52 = vpop.f32.mrb[85].mxu1  ;;  %v16995_v30 = vadd.f32 %v16992_v19, %v16989_v59 }
 0x500   :  { %16386 = vst [vmem:[#allocation7 + $0x1e8] sm:$0xff] %v16382_v10  ;;  %v16981_v14 = vadd.f32 %v16978_v11, %v16972_v31 }
 0x501   :  { %v16377_v58 = vadd.f32 %v16374_v15, %v16368_v20  ;;  %16999 = vst [vmem:[#allocation7 + $0x200] sm:$0xff] %v16995_v30 }
 0x502   :  { %v17706_v29 = vpop.f32.mrb[86].mxu1  ;;  %v16990_v47 = vadd.f32 %v16987_v56, %v16981_v14 }
 0x503   :  { %v16383_v4 = vadd.f32 %v16380_v27, %v16377_v58  ;;  %v22475_v13 = vpop.f32.mrb[87].mxu1 }
 0x504   :  { %v16996_v33 = vadd.f32 %v16993_v42, %v16990_v47 }
 0x505   :  { %16387 = vst [vmem:[#allocation7 + $0x1f0] sm:$0xff] %v16383_v4 }
 0x506   :  { %v17716_v38 = vpop.f32.mrb[88].mxu1  ;;  %17000 = vst [vmem:[#allocation7 + $0x208] sm:$0xff] %v16996_v33 }
 0x507   :  { %v22478_v63 = vpop.f32.mrb[89].mxu1 }
 0x50a   :  { %v17807_v54 = vpop.f32.mrb[90].mxu1 }
 0x50b   :  { %v17808_v34 = vadd.f32 %v17807_v54, %v17696_v8  ;;  %v22489_v50 = vpop.f32.mrb[91].mxu1 }
 0x50e   :  { %v17813_v40 = vpop.f32.mrb[92].mxu1 }
 0x50f   :  { %v17814_v28 = vadd.f32 %v17813_v40, %v17706_v29  ;;  %v22492_v45 = vpop.f32.mrb[93].mxu1  ;;  %v17589_v40 = vmul.f32 0.13967033, %v29260_v3  ;;  %v18216_v3 = vmul.f32 0.17934024, %v29248_v60 }
 0x510   :  { %v17604_v45 = vmul.f32 0.17934024, %v29177_v17  ;;  %v17590_v17 = vmul.f32 0.13967033, %v29283_v21 }
 0x512   :  { %v17819_v49 = vpop.f32.mrb[94].mxu1 }
 0x513   :  { %v17820_v6 = vadd.f32 %v17819_v49, %v17716_v38  ;;  %v22495_v43 = vpop.f32.mrb[95].mxu1 }
 0x514   :  { %v17598_v43 = vmul.f32 0.16847457, %v29256_v37  ;;  %v17599_v37 = vmul.f32 0.16847457, %v29278_v44  ;;  %v17591_v44 = vmul.f32 0.13967033, %v29305_v55 }
 0x515   :  { %v17606_v55 = vmul.f32 0.17934024, %v29224_v2 }
 0x516   :  { %v17899_v9 = vpop.f32.mrb[96].mxu1 }
 0x517   :  { %v17900_v32 = vadd.f32 %v17899_v9, %v17808_v34  ;;  %v22506_v23 = vpop.f32.mrb[97].mxu1 }
 0x51a   :  { %v17906_v18 = vpop.f32.mrb[98].mxu1 }
 0x51b   :  { %v17907_v7 = vadd.f32 %v17906_v18, %v17814_v28  ;;  %v22509_v39 = vpop.f32.mrb[99].mxu1 }
 0x51e   :  { %v17913_v51 = vpop.f32.mrb[100].mxu1 }
 0x51f   :  { %v17914_v36 = vadd.f32 %v17913_v51, %v17820_v6  ;;  %v22512_v11 = vpop.f32.mrb[101].mxu1 }
 0x520   :  { %v18210_v11 = vmul.f32 0.16847457, %v29263_v61  ;;  %v17605_v61 = vmul.f32 0.17934024, %v29196_v41 }
 0x522   :  { %v17990_v12 = vpop.f32.mrb[102].mxu1 }
 0x523   :  { %v17991_v19 = vadd.f32 %v17990_v12, %v17900_v32  ;;  %v22523_v59 = vpop.f32.mrb[103].mxu1 }
 0x526   :  { %v17998_v8 = vpop.f32.mrb[104].mxu1 }
 0x527   :  { %v17999_v10 = vadd.f32 %v17998_v8, %v17907_v7  ;;  %v22526_v20 = vpop.f32.mrb[105].mxu1 }
 0x52a   :  { %v18006_v15 = vpop.f32.mrb[106].mxu1 }
 0x52b   :  { %v18007_v31 = vadd.f32 %v18006_v15, %v17914_v36  ;;  %v22529_v52 = vpop.f32.mrb[107].mxu1 }
 0x52e   :  { %v18089_v30 = vpop.f32.mrb[108].mxu1 }
 0x52f   :  { %v18090_v56 = vadd.f32 %v18089_v30, %v17991_v19  ;;  %v22540_v58 = vpop.f32.mrb[109].mxu1 }
 0x530   :  { %v18211_v58 = vmul.f32 0.16847457, %v29288_v1  ;;  %v18212_v1 = vmul.f32 0.16847457, %v29308_v46 }
 0x532   :  { %v18095_v27 = vpop.f32.mrb[110].mxu1 }
 0x533   :  { %v18096_v14 = vadd.f32 %v18095_v27, %v17999_v10  ;;  %v22543_v29 = vpop.f32.mrb[111].mxu1 }
 0x536   :  { %v18101_v42 = vpop.f32.mrb[112].mxu1 }
 0x537   :  { %v18102_v4 = vadd.f32 %v18101_v42, %v18007_v31  ;;  %v22546_v47 = vpop.f32.mrb[113].mxu1 }
 0x53a   :  { %v17564_v13 = vpop.f32.mrb[84].mxu0  ;;  %v18176_v63 = vpop.f32.mrb[114].mxu1 }
 0x53b   :  { %v17580_v33 = vadd.f32 %v17564_v13, %v29066_v24  ;;  %v18198_v38 = vadd.f32 %v17564_v13, %v29167_v5  ;;  %v22455_v54 = vpop.f32.mrb[85].mxu0  ;;  %v18177_v34 = vadd.f32 %v18176_v63, %v18090_v56  ;;  %v22557_v50 = vpop.f32.mrb[115].mxu1 }
 0x53d   :  { %v17583_v28 = vmul.f32 0.10218499, %v17580_v33  ;;  %v18192_v49 = vadd.f32 %v18177_v34, %v29078_v26  ;;  %v18201_v18 = vmul.f32 0.13967033, %v18198_v38 }
 0x53e   :  { %v17570_v6 = vpop.f32.mrb[86].mxu0  ;;  %v18182_v5 = vpop.f32.mrb[116].mxu1 }
 0x53f   :  { %v17592_v9 = vadd.f32 %v17589_v40, %v17583_v28  ;;  %v17581_v32 = vadd.f32 %v17570_v6, %v29099_v53  ;;  %v18199_v24 = vadd.f32 %v17570_v6, %v29194_v35  ;;  %v22458_v23 = vpop.f32.mrb[87].mxu0  ;;  %v18195_v7 = vmul.f32 0.10218499, %v18192_v49  ;;  %v22560_v51 = vpop.f32.mrb[117].mxu1 }
 0x540   :  { %v18183_v39 = vadd.f32 %v18182_v5, %v18096_v14  ;;  %v17600_v14 = vmul.f32 0.16847457, %v29300_v48 }
 0x541   :  { %v17601_v36 = vadd.f32 %v17598_v43, %v17592_v9  ;;  %v17584_v26 = vmul.f32 0.10218499, %v17581_v32  ;;  %v18204_v12 = vadd.f32 %v18201_v18, %v18195_v7  ;;  %v18202_v21 = vmul.f32 0.13967033, %v18199_v24 }
 0x542   :  { %v18193_v53 = vadd.f32 %v18183_v39, %v29109_v62  ;;  %v17576_v35 = vpop.f32.mrb[88].mxu0  ;;  %v18188_v20 = vpop.f32.mrb[118].mxu1 }
 0x543   :  { %v17607_v19 = vadd.f32 %v17604_v45, %v17601_v36  ;;  %v17593_v59 = vadd.f32 %v17590_v17, %v17584_v26  ;;  %v17582_v8 = vadd.f32 %v17576_v35, %v29126_v22  ;;  %v18200_v10 = vadd.f32 %v17576_v35, %v29217_v57  ;;  %v22461_v60 = vpop.f32.mrb[89].mxu0  ;;  %v22563_v30 = vpop.f32.mrb[119].mxu1 }
 0x544   :  { %v18213_v15 = vadd.f32 %v18210_v11, %v18204_v12  ;;  %v18196_v31 = vmul.f32 0.10218499, %v18193_v53  ;;  %v18189_v52 = vadd.f32 %v18188_v20, %v18102_v4  ;;  %v18217_v4 = vmul.f32 0.17934024, %v29270_v25 }
 0x545   :  { %17611 = vst [vmem:[#allocation7 + $0x210] sm:$0xff] %v17607_v19  ;;  %v17602_v62 = vadd.f32 %v17599_v37, %v17593_v59  ;;  %v17585_v56 = vmul.f32 0.10218499, %v17582_v8  ;;  %v18203_v41 = vmul.f32 0.13967033, %v18200_v10 }
 0x546   :  { %v18219_v27 = vadd.f32 %v18216_v3, %v18213_v15  ;;  %v18205_v22 = vadd.f32 %v18202_v21, %v18196_v31  ;;  %v18194_v57 = vadd.f32 %v18189_v52, %v29136_v16  ;;  %v18218_v16 = vmul.f32 0.17934024, %v29290_v0 }
 0x547   :  { %v17608_v29 = vadd.f32 %v17605_v61, %v17602_v62  ;;  %v17594_v42 = vadd.f32 %v17591_v44, %v17585_v56 }
 0x548   :  { %18223 = vst [vmem:[#allocation7 + $0x228] sm:$0xff] %v18219_v27  ;;  %v18214_v47 = vadd.f32 %v18211_v58, %v18205_v22  ;;  %v18197_v13 = vmul.f32 0.10218499, %v18194_v57 }
 0x549   :  { %17612 = vst [vmem:[#allocation7 + $0x218] sm:$0xff] %v17608_v29  ;;  %v17603_v33 = vadd.f32 %v17600_v14, %v17594_v42 }
 0x54a   :  { %v18220_v38 = vadd.f32 %v18217_v4, %v18214_v47  ;;  %v18206_v63 = vadd.f32 %v18203_v41, %v18197_v13 }
 0x54b   :  { %v17609_v54 = vadd.f32 %v17606_v55, %v17603_v33 }
 0x54c   :  { %18224 = vst [vmem:[#allocation7 + $0x230] sm:$0xff] %v18220_v38  ;;  %v18215_v48 = vadd.f32 %v18212_v1, %v18206_v63 }
 0x54d   :  { %17613 = vst [vmem:[#allocation7 + $0x220] sm:$0xff] %v17609_v54 }
 0x54e   :  { %v18221_v25 = vadd.f32 %v18218_v16, %v18215_v48 }
 0x550   :  { %18225 = vst [vmem:[#allocation7 + $0x238] sm:$0xff] %v18221_v25 }
 0x551   :  { %24580 = shalt.err (!%p24577_p6)
}
 0x552   :  { %s24581_s10 = scalar_lea.hbm %s29355_s2, 9216 }
 0x553   :  { %p24582_p7 = scmp.ne.s32.totalorder %s29355_s2, %s24581_s10  ;;  %p24585_p8 = scmp.lt.u32.totalorder %s24581_s10, %s29355_s2 }
 0x555   :  { %p24587_p9 = pnand %p24585_p8, %p24582_p7 }
 0x557   :  { %24590 = shalt.err (!%p24587_p9)
}
 0x558   :  { %18237 = dma.vmem_to_hbm [thread:$0]  %s18232_s6, 9216, %s29355_s2, [#allocation4], %s24598_s19, %s24598_s19, %s24599_s20  }
 0x559   :  { %24595 = dma.done.wait [#allocation4], 9216  }
 0x55a   :  { %24596 = vsyncadd [#allocation4], 4294958080 }
 0x55b   :  { %18241 = vsyncpa [#allocation3], 1 }
 0x55c   :  { %18242 = vsyncpa [#allocation6], 1 }
 0x55d   :  { %18243 = vsyncpa [#allocation4], 1 }

</bundles_post_ra>
